<compile_context>
chip_gen: v5e
topology: v5e:2x2
jax: 0.10.0
libtpu: 0.0.40
codegen_flags: <defaults>
</compile_context>

<pallas_src>
import jax
import jax.numpy as jnp
import numpy as np
from jax.experimental import pallas as pl
from jax.experimental.pallas import tpu as pltpu

EPS = 1e-5


def _down_kernel(x_ref, w1_ref, g1_ref, be1_ref, w2_ref, g2_ref, be2_ref, o_ref):
    # x_ref: (N, Hh, 2, Wh, 2, Cin)  -- H and W pre-split into 2x2 pool windows
    N, Hh, _, Wh, _, Cin = x_ref.shape
    Cout = o_ref.shape[0]
    rows = N * Hh * Wh

    # ---- MaxPool2d(2, stride=2) ----
    x = x_ref[...]
    pooled = jnp.max(jnp.max(x, axis=4), axis=2)          # (N, Hh, Wh, Cin)

    def shift(t, d, axis):
        """s[..., i, ...] = t[..., i+d, ...]; zero where i+d is out of range."""
        if d == 0:
            return t
        size = t.shape[axis]
        zshape = list(t.shape)
        zshape[axis] = 1
        z = jnp.zeros(zshape, t.dtype)
        idx = [slice(None)] * t.ndim
        if d > 0:
            idx[axis] = slice(1, size)
            return jnp.concatenate([t[tuple(idx)], z], axis=axis)
        idx[axis] = slice(0, size - 1)
        return jnp.concatenate([z, t[tuple(idx)]], axis=axis)

    def conv3x3_bn_relu(h, c_in, w_ref, g_ref, be_ref):
        # im2col patch (rows, 9*c_in): SAME padding realized as shift + zero
        # fill of the value (no padded VMEM scratch, no full-buffer memset).
        cols = []
        for dy in (-1, 0, 1):            # ky = dy + 1
            hy = shift(h, dy, axis=1)
            for dx in (-1, 0, 1):        # kx = dx + 1
                cols.append(shift(hy, dx, axis=2))
        patch = jnp.concatenate(cols, axis=-1).reshape(rows, 9 * c_in)

        # Single MXU matmul per conv: bf16 inputs, f32 accumulation.
        acc = jnp.dot(patch.astype(jnp.bfloat16), w_ref[...],
                      preferred_element_type=jnp.float32)      # (rows, Cout)

        # Train-mode BatchNorm2d: batch stats over N*H*W per channel (biased
        # variance, eps=1e-5). The conv bias is omitted on purpose — it is
        # cancelled exactly by the batch-mean subtraction.
        mean = jnp.mean(acc, axis=0, keepdims=True)
        var = jnp.mean((acc - mean) ** 2, axis=0, keepdims=True)
        y = (acc - mean) * jax.lax.rsqrt(var + EPS) * g_ref[...] + be_ref[...]
        return jnp.maximum(y, 0.0)                              # ReLU

    y1 = conv3x3_bn_relu(pooled, Cin, w1_ref, g1_ref, be1_ref)       # (rows, Cout)
    y2 = conv3x3_bn_relu(y1.reshape(N, Hh, Wh, Cout), Cout,
                         w2_ref, g2_ref, be2_ref)                    # (rows, Cout)

    # Lane-dense store: (Cout, rows) puts the long axis on the 128-lane dim,
    # so the output store / DMA is unmasked and contiguous.
    o_ref[...] = jnp.transpose(y2)


def down_forward(x_nchw, params):
    """x_nchw: (N, Cin, H, W) float32.  Returns (N, Cout, H//2, W//2) float32."""
    w1, b1, g1, be1, w2, b2, g2, be2 = params   # w*: HWIO, b/g/be: (1, C)
    del b1, b2  # conv bias cancels exactly under train-mode BatchNorm
    N, Cin, H, W = x_nchw.shape
    Cout = w1.shape[-1]
    Hh, Wh = H // 2, W // 2
    rows = N * Hh * Wh

    # layout plumbing (wrapper side): NCHW -> NHWC, pre-split 2x2 pool windows
    x_nhwc = jnp.transpose(x_nchw, (0, 2, 3, 1))
    x6 = x_nhwc.reshape(N, Hh, 2, Wh, 2, Cin)

    # weights reshaped for the fused im2col matmul, pre-cast to bf16 (MXU path)
    w1_k = w1.reshape(9 * Cin, Cout).astype(jnp.bfloat16)
    w2_k = w2.reshape(9 * Cout, Cout).astype(jnp.bfloat16)

    def full(shape):
        return pl.BlockSpec(shape, lambda i, _s=shape: (0,) * len(_s))

    out_t = pl.pallas_call(
        _down_kernel,
        out_shape=jax.ShapeDtypeStruct((Cout, rows), jnp.float32),
        grid=(1,),
        in_specs=[
            full(x6.shape),
            full(w1_k.shape), full(g1.shape), full(be1.shape),
            full(w2_k.shape), full(g2.shape), full(be2.shape),
        ],
        out_specs=full((Cout, rows)),
        compiler_params=pltpu.CompilerParams(
            dimension_semantics=("arbitrary",)),
    )(x6, w1_k, g1, be1, w2_k, g2, be2)

    # (Cout, N*Hh*Wh) -> (N, Cout, Hh, Wh)
    return jnp.transpose(out_t.reshape(Cout, N, Hh, Wh), (1, 0, 2, 3))


def ref_forward(x_nchw, params, conv_dtype=jnp.float32):
    """Pure-JAX reference. conv_dtype=bfloat16 mirrors the kernel's MXU inputs."""
    w1, b1, g1, be1, w2, b2, g2, be2 = params
    x = jnp.transpose(x_nchw, (0, 2, 3, 1))
    p = jax.lax.reduce_window(x, -jnp.inf, jax.lax.max,
                              (1, 2, 2, 1), (1, 2, 2, 1), 'VALID')

    def block(h, w, b, g, be):
        y = jax.lax.conv_general_dilated(
            h.astype(conv_dtype), w.astype(conv_dtype), (1, 1), 'SAME',
            dimension_numbers=('NHWC', 'HWIO', 'NHWC'),
            preferred_element_type=jnp.float32) + b.reshape(-1)
        mean = jnp.mean(y, axis=(0, 1, 2))
        var = jnp.mean((y - mean) ** 2, axis=(0, 1, 2))
        y = (y - mean) * jax.lax.rsqrt(var + EPS) * g.reshape(-1) + be.reshape(-1)
        return jnp.maximum(y, 0.0)

    h = block(p, w1, b1, g1, be1)
    h = block(h, w2, b2, g2, be2)
    return jnp.transpose(h, (0, 3, 1, 2))


if __name__ == "__main__":
    key = jax.random.PRNGKey(0)
    N, Cin, Cout, H, W = 2, 4, 8, 16, 16
    ks = jax.random.split(key, 9)

    x = jax.random.normal(ks[0], (N, Cin, H, W), jnp.float32)
    # Deterministic synthetic parameters (shapes from Conv2d / BatchNorm2d).
    w1 = jax.random.normal(ks[1], (3, 3, Cin, Cout), jnp.float32) * 0.1   # HWIO
    b1 = jax.random.normal(ks[2], (1, Cout), jnp.float32) * 0.05
    g1 = 1.0 + jax.random.normal(ks[3], (1, Cout), jnp.float32) * 0.05
    be1 = jax.random.normal(ks[4], (1, Cout), jnp.float32) * 0.05
    w2 = jax.random.normal(ks[5], (3, 3, Cout, Cout), jnp.float32) * 0.1
    b2 = jax.random.normal(ks[6], (1, Cout), jnp.float32) * 0.05
    g2 = 1.0 + jax.random.normal(ks[7], (1, Cout), jnp.float32) * 0.05
    be2 = jax.random.normal(ks[8], (1, Cout), jnp.float32) * 0.05
    params = (w1, b1, g1, be1, w2, b2, g2, be2)

    out = jax.block_until_ready(down_forward(x, params))
    assert out.shape == (N, Cout, H // 2, W // 2), out.shape

    # Tight check vs a reference with matching bf16 conv inputs (kernel math).
    ref_bf16 = jax.block_until_ready(ref_forward(x, params, jnp.bfloat16))
    np.testing.assert_allclose(np.asarray(out), np.asarray(ref_bf16),
                               rtol=1e-2, atol=1e-2)
    # Looser check vs the exact f32 module semantics (tolerance sized for the
    # bf16 MXU-input rounding accumulated through two conv+BN layers).
    ref_f32 = jax.block_until_ready(ref_forward(x, params))
    np.testing.assert_allclose(np.asarray(out), np.asarray(ref_f32),
                               rtol=5e-2, atol=5e-2)
    print("KERNEL_OK")
</pallas_src>

<mosaic_0001>
module attributes {stable_mosaic.version = 11 : i64} {
  func.func @_down_kernel(%arg0: i32, %arg1: memref<2x8x2x8x2x4xf32, #tpu.memory_space<vmem>>, %arg2: memref<36x8xbf16, #tpu.memory_space<vmem>>, %arg3: memref<1x8xf32, #tpu.memory_space<vmem>>, %arg4: memref<1x8xf32, #tpu.memory_space<vmem>>, %arg5: memref<72x8xbf16, #tpu.memory_space<vmem>>, %arg6: memref<1x8xf32, #tpu.memory_space<vmem>>, %arg7: memref<1x8xf32, #tpu.memory_space<vmem>>, %arg8: memref<8x128xf32, #tpu.memory_space<vmem>>) attributes {dimension_semantics = [#tpu.dimension_semantics<arbitrary>], iteration_bounds = array<i64: 1>, scalar_prefetch = 0 : i64, scratch_operands = 0 : i64, tpu.core_type = #tpu.core_type<tc>, window_params = [{pipeline_mode = #tpu.pipeline_mode<synchronous>, transform_indices = @transform_0, window_bounds = array<i64: 2, 8, 2, 8, 2, 4>}, {pipeline_mode = #tpu.pipeline_mode<synchronous>, transform_indices = @transform_1, window_bounds = array<i64: 36, 8>}, {pipeline_mode = #tpu.pipeline_mode<synchronous>, transform_indices = @transform_2, window_bounds = array<i64: 1, 8>}, {pipeline_mode = #tpu.pipeline_mode<synchronous>, transform_indices = @transform_3, window_bounds = array<i64: 1, 8>}, {pipeline_mode = #tpu.pipeline_mode<synchronous>, transform_indices = @transform_4, window_bounds = array<i64: 72, 8>}, {pipeline_mode = #tpu.pipeline_mode<synchronous>, transform_indices = @transform_5, window_bounds = array<i64: 1, 8>}, {pipeline_mode = #tpu.pipeline_mode<synchronous>, transform_indices = @transform_6, window_bounds = array<i64: 1, 8>}, {pipeline_mode = #tpu.pipeline_mode<synchronous>, transform_indices = @transform_7, window_bounds = array<i64: 8, 128>}]} {
    %c0 = arith.constant 0 : index
    %c0_0 = arith.constant 0 : index
    %c0_1 = arith.constant 0 : index
    %c0_2 = arith.constant 0 : index
    %c0_3 = arith.constant 0 : index
    %c0_4 = arith.constant 0 : index
    %0 = vector.load %arg1[%c0, %c0_0, %c0_1, %c0_2, %c0_3, %c0_4] : memref<2x8x2x8x2x4xf32, #tpu.memory_space<vmem>>, vector<2x8x2x8x2x4xf32>
    %cst = arith.constant dense<0xFF800000> : vector<2x8x2x8x4xf32>
    %1 = vector.multi_reduction <maximumf>, %0, %cst [4] : vector<2x8x2x8x2x4xf32> to vector<2x8x2x8x4xf32>
    %cst_5 = arith.constant dense<0xFF800000> : vector<2x8x8x4xf32>
    %2 = vector.multi_reduction <maximumf>, %1, %cst_5 [2] : vector<2x8x2x8x4xf32> to vector<2x8x8x4xf32>
    %cst_6 = arith.constant 0.000000e+00 : f32
    %3 = vector.broadcast %cst_6 : f32 to vector<2x1x8x4xf32>
    %4 = vector.extract_strided_slice %2 {offsets = [0, 0, 0, 0], sizes = [2, 7, 8, 4], strides = [1, 1, 1, 1]} : vector<2x8x8x4xf32> to vector<2x7x8x4xf32>
    %5 = tpu.concatenate %3, %4 in 1 : vector<2x1x8x4xf32>, vector<2x7x8x4xf32> -> vector<2x8x8x4xf32>
    %cst_7 = arith.constant 0.000000e+00 : f32
    %6 = vector.broadcast %cst_7 : f32 to vector<2x8x1x4xf32>
    %7 = vector.extract_strided_slice %5 {offsets = [0, 0, 0, 0], sizes = [2, 8, 7, 4], strides = [1, 1, 1, 1]} : vector<2x8x8x4xf32> to vector<2x8x7x4xf32>
    %8 = tpu.concatenate %6, %7 in 2 : vector<2x8x1x4xf32>, vector<2x8x7x4xf32> -> vector<2x8x8x4xf32>
    %cst_8 = arith.constant 0.000000e+00 : f32
    %9 = vector.broadcast %cst_8 : f32 to vector<2x8x1x4xf32>
    %10 = vector.extract_strided_slice %5 {offsets = [0, 0, 1, 0], sizes = [2, 8, 7, 4], strides = [1, 1, 1, 1]} : vector<2x8x8x4xf32> to vector<2x8x7x4xf32>
    %11 = tpu.concatenate %10, %9 in 2 : vector<2x8x7x4xf32>, vector<2x8x1x4xf32> -> vector<2x8x8x4xf32>
    %cst_9 = arith.constant 0.000000e+00 : f32
    %12 = vector.broadcast %cst_9 : f32 to vector<2x8x1x4xf32>
    %13 = vector.extract_strided_slice %2 {offsets = [0, 0, 0, 0], sizes = [2, 8, 7, 4], strides = [1, 1, 1, 1]} : vector<2x8x8x4xf32> to vector<2x8x7x4xf32>
    %14 = tpu.concatenate %12, %13 in 2 : vector<2x8x1x4xf32>, vector<2x8x7x4xf32> -> vector<2x8x8x4xf32>
    %cst_10 = arith.constant 0.000000e+00 : f32
    %15 = vector.broadcast %cst_10 : f32 to vector<2x8x1x4xf32>
    %16 = vector.extract_strided_slice %2 {offsets = [0, 0, 1, 0], sizes = [2, 8, 7, 4], strides = [1, 1, 1, 1]} : vector<2x8x8x4xf32> to vector<2x8x7x4xf32>
    %17 = tpu.concatenate %16, %15 in 2 : vector<2x8x7x4xf32>, vector<2x8x1x4xf32> -> vector<2x8x8x4xf32>
    %cst_11 = arith.constant 0.000000e+00 : f32
    %18 = vector.broadcast %cst_11 : f32 to vector<2x1x8x4xf32>
    %19 = vector.extract_strided_slice %2 {offsets = [0, 1, 0, 0], sizes = [2, 7, 8, 4], strides = [1, 1, 1, 1]} : vector<2x8x8x4xf32> to vector<2x7x8x4xf32>
    %20 = tpu.concatenate %19, %18 in 1 : vector<2x7x8x4xf32>, vector<2x1x8x4xf32> -> vector<2x8x8x4xf32>
    %cst_12 = arith.constant 0.000000e+00 : f32
    %21 = vector.broadcast %cst_12 : f32 to vector<2x8x1x4xf32>
    %22 = vector.extract_strided_slice %20 {offsets = [0, 0, 0, 0], sizes = [2, 8, 7, 4], strides = [1, 1, 1, 1]} : vector<2x8x8x4xf32> to vector<2x8x7x4xf32>
    %23 = tpu.concatenate %21, %22 in 2 : vector<2x8x1x4xf32>, vector<2x8x7x4xf32> -> vector<2x8x8x4xf32>
    %cst_13 = arith.constant 0.000000e+00 : f32
    %24 = vector.broadcast %cst_13 : f32 to vector<2x8x1x4xf32>
    %25 = vector.extract_strided_slice %20 {offsets = [0, 0, 1, 0], sizes = [2, 8, 7, 4], strides = [1, 1, 1, 1]} : vector<2x8x8x4xf32> to vector<2x8x7x4xf32>
    %26 = tpu.concatenate %25, %24 in 2 : vector<2x8x7x4xf32>, vector<2x8x1x4xf32> -> vector<2x8x8x4xf32>
    %27 = tpu.concatenate %8, %5, %11, %14, %2, %17, %23, %20, %26 in 3 : vector<2x8x8x4xf32>, vector<2x8x8x4xf32>, vector<2x8x8x4xf32>, vector<2x8x8x4xf32>, vector<2x8x8x4xf32>, vector<2x8x8x4xf32>, vector<2x8x8x4xf32>, vector<2x8x8x4xf32>, vector<2x8x8x4xf32> -> vector<2x8x8x36xf32>
    %28 = vector.shape_cast %27 : vector<2x8x8x36xf32> to vector<128x36xf32>
    %29 = arith.truncf %28 : vector<128x36xf32> to vector<128x36xbf16>
    %c0_14 = arith.constant 0 : index
    %c0_15 = arith.constant 0 : index
    %30 = vector.load %arg2[%c0_14, %c0_15] : memref<36x8xbf16, #tpu.memory_space<vmem>>, vector<36x8xbf16>
    %cst_16 = arith.constant dense<0.000000e+00> : vector<128x8xf32>
    %31 = tpu.matmul %29, %30, %cst_16 {dimension_numbers = #tpu.dot_dimension_numbers<[1], [0], [0], [1], [0, 0, 1, 1], [], []>} : vector<128x36xbf16>, vector<36x8xbf16>, vector<128x8xf32> -> vector<128x8xf32>
    %cst_17 = arith.constant dense<0.000000e+00> : vector<8xf32>
    %32 = vector.multi_reduction <add>, %31, %cst_17 [0] : vector<128x8xf32> to vector<8xf32>
    %33 = vector.shape_cast %32 : vector<8xf32> to vector<1x8xf32>
    %cst_18 = arith.constant 1.280000e+02 : f32
    %34 = vector.broadcast %cst_18 : f32 to vector<1x8xf32>
    %35 = arith.divf %33, %34 : vector<1x8xf32>
    %36 = vector.broadcast %35 : vector<1x8xf32> to vector<128x8xf32>
    %37 = arith.subf %31, %36 : vector<128x8xf32>
    %38 = arith.mulf %37, %37 : vector<128x8xf32>
    %cst_19 = arith.constant dense<0.000000e+00> : vector<8xf32>
    %39 = vector.multi_reduction <add>, %38, %cst_19 [0] : vector<128x8xf32> to vector<8xf32>
    %40 = vector.shape_cast %39 : vector<8xf32> to vector<1x8xf32>
    %cst_20 = arith.constant 1.280000e+02 : f32
    %41 = vector.broadcast %cst_20 : f32 to vector<1x8xf32>
    %42 = arith.divf %40, %41 : vector<1x8xf32>
    %43 = vector.broadcast %35 : vector<1x8xf32> to vector<128x8xf32>
    %44 = arith.subf %31, %43 : vector<128x8xf32>
    %cst_21 = arith.constant 9.99999974E-6 : f32
    %45 = vector.broadcast %cst_21 : f32 to vector<1x8xf32>
    %46 = arith.addf %42, %45 : vector<1x8xf32>
    %47 = math.rsqrt %46 : vector<1x8xf32>
    %48 = vector.broadcast %47 : vector<1x8xf32> to vector<128x8xf32>
    %49 = arith.mulf %44, %48 : vector<128x8xf32>
    %c0_22 = arith.constant 0 : index
    %c0_23 = arith.constant 0 : index
    %50 = vector.load %arg3[%c0_22, %c0_23] : memref<1x8xf32, #tpu.memory_space<vmem>>, vector<1x8xf32>
    %51 = vector.broadcast %50 : vector<1x8xf32> to vector<128x8xf32>
    %52 = arith.mulf %49, %51 : vector<128x8xf32>
    %c0_24 = arith.constant 0 : index
    %c0_25 = arith.constant 0 : index
    %53 = vector.load %arg4[%c0_24, %c0_25] : memref<1x8xf32, #tpu.memory_space<vmem>>, vector<1x8xf32>
    %54 = vector.broadcast %53 : vector<1x8xf32> to vector<128x8xf32>
    %55 = arith.addf %52, %54 : vector<128x8xf32>
    %cst_26 = arith.constant 0.000000e+00 : f32
    %56 = vector.broadcast %cst_26 : f32 to vector<128x8xf32>
    %57 = arith.maximumf %55, %56 : vector<128x8xf32>
    %58 = vector.shape_cast %57 : vector<128x8xf32> to vector<2x8x8x8xf32>
    %cst_27 = arith.constant 0.000000e+00 : f32
    %59 = vector.broadcast %cst_27 : f32 to vector<2x1x8x8xf32>
    %60 = vector.extract_strided_slice %58 {offsets = [0, 0, 0, 0], sizes = [2, 7, 8, 8], strides = [1, 1, 1, 1]} : vector<2x8x8x8xf32> to vector<2x7x8x8xf32>
    %61 = tpu.concatenate %59, %60 in 1 : vector<2x1x8x8xf32>, vector<2x7x8x8xf32> -> vector<2x8x8x8xf32>
    %cst_28 = arith.constant 0.000000e+00 : f32
    %62 = vector.broadcast %cst_28 : f32 to vector<2x8x1x8xf32>
    %63 = vector.extract_strided_slice %61 {offsets = [0, 0, 0, 0], sizes = [2, 8, 7, 8], strides = [1, 1, 1, 1]} : vector<2x8x8x8xf32> to vector<2x8x7x8xf32>
    %64 = tpu.concatenate %62, %63 in 2 : vector<2x8x1x8xf32>, vector<2x8x7x8xf32> -> vector<2x8x8x8xf32>
    %cst_29 = arith.constant 0.000000e+00 : f32
    %65 = vector.broadcast %cst_29 : f32 to vector<2x8x1x8xf32>
    %66 = vector.extract_strided_slice %61 {offsets = [0, 0, 1, 0], sizes = [2, 8, 7, 8], strides = [1, 1, 1, 1]} : vector<2x8x8x8xf32> to vector<2x8x7x8xf32>
    %67 = tpu.concatenate %66, %65 in 2 : vector<2x8x7x8xf32>, vector<2x8x1x8xf32> -> vector<2x8x8x8xf32>
    %cst_30 = arith.constant 0.000000e+00 : f32
    %68 = vector.broadcast %cst_30 : f32 to vector<2x8x1x8xf32>
    %69 = vector.extract_strided_slice %58 {offsets = [0, 0, 0, 0], sizes = [2, 8, 7, 8], strides = [1, 1, 1, 1]} : vector<2x8x8x8xf32> to vector<2x8x7x8xf32>
    %70 = tpu.concatenate %68, %69 in 2 : vector<2x8x1x8xf32>, vector<2x8x7x8xf32> -> vector<2x8x8x8xf32>
    %cst_31 = arith.constant 0.000000e+00 : f32
    %71 = vector.broadcast %cst_31 : f32 to vector<2x8x1x8xf32>
    %72 = vector.extract_strided_slice %58 {offsets = [0, 0, 1, 0], sizes = [2, 8, 7, 8], strides = [1, 1, 1, 1]} : vector<2x8x8x8xf32> to vector<2x8x7x8xf32>
    %73 = tpu.concatenate %72, %71 in 2 : vector<2x8x7x8xf32>, vector<2x8x1x8xf32> -> vector<2x8x8x8xf32>
    %cst_32 = arith.constant 0.000000e+00 : f32
    %74 = vector.broadcast %cst_32 : f32 to vector<2x1x8x8xf32>
    %75 = vector.extract_strided_slice %58 {offsets = [0, 1, 0, 0], sizes = [2, 7, 8, 8], strides = [1, 1, 1, 1]} : vector<2x8x8x8xf32> to vector<2x7x8x8xf32>
    %76 = tpu.concatenate %75, %74 in 1 : vector<2x7x8x8xf32>, vector<2x1x8x8xf32> -> vector<2x8x8x8xf32>
    %cst_33 = arith.constant 0.000000e+00 : f32
    %77 = vector.broadcast %cst_33 : f32 to vector<2x8x1x8xf32>
    %78 = vector.extract_strided_slice %76 {offsets = [0, 0, 0, 0], sizes = [2, 8, 7, 8], strides = [1, 1, 1, 1]} : vector<2x8x8x8xf32> to vector<2x8x7x8xf32>
    %79 = tpu.concatenate %77, %78 in 2 : vector<2x8x1x8xf32>, vector<2x8x7x8xf32> -> vector<2x8x8x8xf32>
    %cst_34 = arith.constant 0.000000e+00 : f32
    %80 = vector.broadcast %cst_34 : f32 to vector<2x8x1x8xf32>
    %81 = vector.extract_strided_slice %76 {offsets = [0, 0, 1, 0], sizes = [2, 8, 7, 8], strides = [1, 1, 1, 1]} : vector<2x8x8x8xf32> to vector<2x8x7x8xf32>
    %82 = tpu.concatenate %81, %80 in 2 : vector<2x8x7x8xf32>, vector<2x8x1x8xf32> -> vector<2x8x8x8xf32>
    %83 = tpu.concatenate %64, %61, %67, %70, %58, %73, %79, %76, %82 in 3 : vector<2x8x8x8xf32>, vector<2x8x8x8xf32>, vector<2x8x8x8xf32>, vector<2x8x8x8xf32>, vector<2x8x8x8xf32>, vector<2x8x8x8xf32>, vector<2x8x8x8xf32>, vector<2x8x8x8xf32>, vector<2x8x8x8xf32> -> vector<2x8x8x72xf32>
    %84 = vector.shape_cast %83 : vector<2x8x8x72xf32> to vector<128x72xf32>
    %85 = arith.truncf %84 : vector<128x72xf32> to vector<128x72xbf16>
    %c0_35 = arith.constant 0 : index
    %c0_36 = arith.constant 0 : index
    %86 = vector.load %arg5[%c0_35, %c0_36] : memref<72x8xbf16, #tpu.memory_space<vmem>>, vector<72x8xbf16>
    %cst_37 = arith.constant dense<0.000000e+00> : vector<128x8xf32>
    %87 = tpu.matmul %85, %86, %cst_37 {dimension_numbers = #tpu.dot_dimension_numbers<[1], [0], [0], [1], [0, 0, 1, 1], [], []>} : vector<128x72xbf16>, vector<72x8xbf16>, vector<128x8xf32> -> vector<128x8xf32>
    %cst_38 = arith.constant dense<0.000000e+00> : vector<8xf32>
    %88 = vector.multi_reduction <add>, %87, %cst_38 [0] : vector<128x8xf32> to vector<8xf32>
    %89 = vector.shape_cast %88 : vector<8xf32> to vector<1x8xf32>
    %cst_39 = arith.constant 1.280000e+02 : f32
    %90 = vector.broadcast %cst_39 : f32 to vector<1x8xf32>
    %91 = arith.divf %89, %90 : vector<1x8xf32>
    %92 = vector.broadcast %91 : vector<1x8xf32> to vector<128x8xf32>
    %93 = arith.subf %87, %92 : vector<128x8xf32>
    %94 = arith.mulf %93, %93 : vector<128x8xf32>
    %cst_40 = arith.constant dense<0.000000e+00> : vector<8xf32>
    %95 = vector.multi_reduction <add>, %94, %cst_40 [0] : vector<128x8xf32> to vector<8xf32>
    %96 = vector.shape_cast %95 : vector<8xf32> to vector<1x8xf32>
    %cst_41 = arith.constant 1.280000e+02 : f32
    %97 = vector.broadcast %cst_41 : f32 to vector<1x8xf32>
    %98 = arith.divf %96, %97 : vector<1x8xf32>
    %99 = vector.broadcast %91 : vector<1x8xf32> to vector<128x8xf32>
    %100 = arith.subf %87, %99 : vector<128x8xf32>
    %cst_42 = arith.constant 9.99999974E-6 : f32
    %101 = vector.broadcast %cst_42 : f32 to vector<1x8xf32>
    %102 = arith.addf %98, %101 : vector<1x8xf32>
    %103 = math.rsqrt %102 : vector<1x8xf32>
    %104 = vector.broadcast %103 : vector<1x8xf32> to vector<128x8xf32>
    %105 = arith.mulf %100, %104 : vector<128x8xf32>
    %c0_43 = arith.constant 0 : index
    %c0_44 = arith.constant 0 : index
    %106 = vector.load %arg6[%c0_43, %c0_44] : memref<1x8xf32, #tpu.memory_space<vmem>>, vector<1x8xf32>
    %107 = vector.broadcast %106 : vector<1x8xf32> to vector<128x8xf32>
    %108 = arith.mulf %105, %107 : vector<128x8xf32>
    %c0_45 = arith.constant 0 : index
    %c0_46 = arith.constant 0 : index
    %109 = vector.load %arg7[%c0_45, %c0_46] : memref<1x8xf32, #tpu.memory_space<vmem>>, vector<1x8xf32>
    %110 = vector.broadcast %109 : vector<1x8xf32> to vector<128x8xf32>
    %111 = arith.addf %108, %110 : vector<128x8xf32>
    %cst_47 = arith.constant 0.000000e+00 : f32
    %112 = vector.broadcast %cst_47 : f32 to vector<128x8xf32>
    %113 = arith.maximumf %111, %112 : vector<128x8xf32>
    %114 = tpu.transpose %113, [1, 0] : vector<128x8xf32> -> vector<8x128xf32>
    %c0_48 = arith.constant 0 : index
    %c0_49 = arith.constant 0 : index
    %115 = vector.load %arg8[%c0_48, %c0_49] : memref<8x128xf32, #tpu.memory_space<vmem>>, vector<8x128xf32>
    tpu.vector_store %arg8[%c0_48, %c0_49], %114 {strides = array<i32>} : memref<8x128xf32, #tpu.memory_space<vmem>>, vector<8x128xf32>,
    return
  }
  func.func @transform_0(%arg0: i32) -> (i32, i32, i32, i32, i32, i32) {
    %c0_i32 = arith.constant 0 : i32
    %c0_i32_0 = arith.constant 0 : i32
    %c0_i32_1 = arith.constant 0 : i32
    %c0_i32_2 = arith.constant 0 : i32
    %c0_i32_3 = arith.constant 0 : i32
    %c0_i32_4 = arith.constant 0 : i32
    %c0_i32_5 = arith.constant 0 : i32
    return %c0_i32, %c0_i32_0, %c0_i32_1, %c0_i32_2, %c0_i32_3, %c0_i32_4 : i32, i32, i32, i32, i32, i32
  }
  func.func @transform_1(%arg0: i32) -> (i32, i32) {
    %c0_i32 = arith.constant 0 : i32
    %c0_i32_0 = arith.constant 0 : i32
    %c0_i32_1 = arith.constant 0 : i32
    return %c0_i32, %c0_i32_0 : i32, i32
  }
  func.func @transform_2(%arg0: i32) -> (i32, i32) {
    %c0_i32 = arith.constant 0 : i32
    %c0_i32_0 = arith.constant 0 : i32
    %c0_i32_1 = arith.constant 0 : i32
    return %c0_i32, %c0_i32_0 : i32, i32
  }
  func.func @transform_3(%arg0: i32) -> (i32, i32) {
    %c0_i32 = arith.constant 0 : i32
    %c0_i32_0 = arith.constant 0 : i32
    %c0_i32_1 = arith.constant 0 : i32
    return %c0_i32, %c0_i32_0 : i32, i32
  }
  func.func @transform_4(%arg0: i32) -> (i32, i32) {
    %c0_i32 = arith.constant 0 : i32
    %c0_i32_0 = arith.constant 0 : i32
    %c0_i32_1 = arith.constant 0 : i32
    return %c0_i32, %c0_i32_0 : i32, i32
  }
  func.func @transform_5(%arg0: i32) -> (i32, i32) {
    %c0_i32 = arith.constant 0 : i32
    %c0_i32_0 = arith.constant 0 : i32
    %c0_i32_1 = arith.constant 0 : i32
    return %c0_i32, %c0_i32_0 : i32, i32
  }
  func.func @transform_6(%arg0: i32) -> (i32, i32) {
    %c0_i32 = arith.constant 0 : i32
    %c0_i32_0 = arith.constant 0 : i32
    %c0_i32_1 = arith.constant 0 : i32
    return %c0_i32, %c0_i32_0 : i32, i32
  }
  func.func @transform_7(%arg0: i32) -> (i32, i32) {
    %c0_i32 = arith.constant 0 : i32
    %c0_i32_0 = arith.constant 0 : i32
    %c0_i32_1 = arith.constant 0 : i32
    return %c0_i32, %c0_i32_0 : i32, i32
  }
}

</mosaic_0001>

<bundles_post_ra>
// kernel: tpu_custom_call.1
= control target key start
LH: loop header
LB: loop body
LE: loop exit
PB: predicated region body
PF: predicated region fallthrough
CT: control target
= control target key end

     0   :  { %vm284_vm0 = vcmask 25600   ;;  %s11292_s0 = inlined_call_operand.vmem [shape: f32[2,8,2,8,2,4], index: 0, kind: input, shape index: {}]   ;;  %s11293_s1 = inlined_call_operand.vmem [shape: bf16[36,8], index: 1, kind: input, shape index: {}]   ;;  %s11294_s2 = inlined_call_operand.vmem [shape: f32[1,8], index: 2, kind: input, shape index: {}]   ;;  %s11295_s3 = inlined_call_operand.vmem [shape: f32[1,8], index: 3, kind: input, shape index: {}]   ;;  %s11296_s4 = inlined_call_operand.vmem [shape: bf16[72,8], index: 4, kind: input, shape index: {}]   ;;  %s11297_s5 = inlined_call_operand.vmem [shape: f32[1,8], index: 5, kind: input, shape index: {}]   ;;  %s11298_s6 = inlined_call_operand.vmem [shape: f32[1,8], index: 6, kind: input, shape index: {}]   ;;  %s11299_s7 = inlined_call_operand.hbm [shape: f32[8,128], index: 7, kind: output, shape index: {}]  }
   0x1   :  { %v156_v0 = vld [vmem:[%s11292_s0 + $0x100] sm:$0x3]  ;;  %v157_v1 = vld [vmem:[%s11292_s0 + $0x102] sm:$0x3]  ;;  %v158_v2 = vld [vmem:[%s11292_s0 + $0x104] sm:$0x3] }
   0x2   :  { %v159_v3 = vld [vmem:[%s11292_s0 + $0x106] sm:$0x3]  ;;  %v160_v4 = vld [vmem:[%s11292_s0 + $0x108] sm:$0x3]  ;;  %v161_v5 = vld [vmem:[%s11292_s0 + $0x10a] sm:$0x3] }
   0x3   :  { %v162_v6 = vld [vmem:[%s11292_s0 + $0x10c] sm:$0x3]  ;;  %v163_v7 = vld [vmem:[%s11292_s0 + $0x10e] sm:$0x3]  ;;  %v1181_v8 = vsel %vm284_vm0, %v156_v0, -inf  ;;  %v1188_v9 = vsel %vm284_vm0, %v157_v1, -inf }
   0x4   :  { %v1195_v10 = vsel %vm284_vm0, %v158_v2, -inf  ;;  %v1202_v11 = vsel %vm284_vm0, %v159_v3, -inf  ;;  %v1182_v12 = vrot.slane %v1181_v8, 4  ;;  %v1189_v13 = vrot.slane %v1188_v9, 4 }
   0x5   :  { %v1196_v14 = vrot.slane %v1195_v10, 4  ;;  %v1203_v15 = vrot.slane %v1202_v11, 4  ;;  %v1209_v16 = vsel %vm284_vm0, %v160_v4, -inf  ;;  %v1216_v17 = vsel %vm284_vm0, %v161_v5, -inf }
   0x6   :  { %v1223_v18 = vsel %vm284_vm0, %v162_v6, -inf  ;;  %v1230_v19 = vsel %vm284_vm0, %v163_v7, -inf  ;;  %v1183_v20 = vmax.f32 %v1181_v8, %v1182_v12  ;;  %v1190_v21 = vmax.f32 %v1188_v9, %v1189_v13 }
   0x7   :  { %v1197_v22 = vmax.f32 %v1195_v10, %v1196_v14  ;;  %v1204_v23 = vmax.f32 %v1202_v11, %v1203_v15 }
   0x8   :  { %12 = vsyncpa [#allocation3], 0  ;;  %v1210_v24 = vrot.slane %v1209_v16, 4  ;;  %v1217_v25 = vrot.slane %v1216_v17, 4  ;;  %v1224_v26 = vrot.slane %v1223_v18, 4  ;;  %v1231_v27 = vrot.slane %v1230_v19, 4 }
   0x9   :  { %v1184_v28 = vrot.slane %v1183_v20, 2  ;;  %v1191_v29 = vrot.slane %v1190_v21, 2  ;;  %v1198_v30 = vrot.slane %v1197_v22, 2  ;;  %v1205_v31 = vrot.slane %v1204_v23, 2  ;;  %v164_v44 = vld [vmem:[%s11292_s0 + $0x110] sm:$0x3] }
   0xa   :  { %v1211_v32 = vmax.f32 %v1209_v16, %v1210_v24  ;;  %v1218_v33 = vmax.f32 %v1216_v17, %v1217_v25  ;;  %v1225_v34 = vmax.f32 %v1223_v18, %v1224_v26  ;;  %v1232_v35 = vmax.f32 %v1230_v19, %v1231_v27  ;;  %v165_v49 = vld [vmem:[%s11292_s0 + $0x112] sm:$0x3]  ;;  %v166_v50 = vld [vmem:[%s11292_s0 + $0x114] sm:$0x3]  ;;  %v167_v51 = vld [vmem:[%s11292_s0 + $0x116] sm:$0x3] }
   0xb   :  { %v1185_v36 = vmax.f32 %v1183_v20, %v1184_v28  ;;  %v1192_v37 = vmax.f32 %v1190_v21, %v1191_v29  ;;  %v1199_v38 = vmax.f32 %v1197_v22, %v1198_v30  ;;  %v1206_v39 = vmax.f32 %v1204_v23, %v1205_v31  ;;  %v168_v56 = vld [vmem:[%s11292_s0 + $0x118] sm:$0x3]  ;;  %v169_v58 = vld [vmem:[%s11292_s0 + $0x11a] sm:$0x3]  ;;  %v170_v59 = vld [vmem:[%s11292_s0 + $0x11c] sm:$0x3] }
   0xc   :  { %v1212_v40 = vrot.slane %v1211_v32, 2  ;;  %v1219_v41 = vrot.slane %v1218_v33, 2  ;;  %v1226_v42 = vrot.slane %v1225_v34, 2  ;;  %v1233_v43 = vrot.slane %v1232_v35, 2  ;;  %v171_v0 = vld [vmem:[%s11292_s0 + $0x11e] sm:$0x3] }
   0xd   :  { %v1186_v45 = vrot.slane %v1185_v36, 1  ;;  %v1193_v46 = vrot.slane %v1192_v37, 1  ;;  %v1200_v47 = vrot.slane %v1199_v38, 1  ;;  %v1207_v48 = vrot.slane %v1206_v39, 1  ;;  %s6271_s12 = smov 4   ;;  %s6273_s29 = smov 20  }
   0xe   :  { %v1213_v52 = vmax.f32 %v1211_v32, %v1212_v40  ;;  %v6370_v53 = vmax.f32 %v1218_v33, %v1219_v41  ;;  %v6372_v54 = vmax.f32 %v1225_v34, %v1226_v42  ;;  %v6374_v55 = vmax.f32 %v1232_v35, %v1233_v43  ;;  %v172_v41 = vld [vmem:[%s11292_s0 + $0x120] sm:$0x3]  ;;  %s6274_s16 = smov 12   ;;  %s6275_s25 = smov 8  }
   0xf   :  { %v6379_v57 = vmax.f32 %v1185_v36, %v1186_v45  ;;  %v6387_v60 = vmax.f32 %v1192_v37, %v1193_v46  ;;  %v6389_v61 = vmax.f32 %v1199_v38, %v1200_v47  ;;  %v6391_v62 = vmax.f32 %v1206_v39, %v1207_v48  ;;  %v173_v46 = vld [vmem:[%s11292_s0 + $0x122] sm:$0x3]  ;;  %v174_v47 = vld [vmem:[%s11292_s0 + $0x124] sm:$0x3]  ;;  %v175_v48 = vld [vmem:[%s11292_s0 + $0x126] sm:$0x3] }
  0x10   :  { %v1214_v63 = vrot.slane %v1213_v52, 1  ;;  %v1237_v1 = vsel %vm284_vm0, %v164_v44, -inf  ;;  %v1244_v2 = vsel %vm284_vm0, %v165_v49, -inf  ;;  %v1251_v3 = vsel %vm284_vm0, %v166_v50, -inf  ;;  %s6276_s26 = smov 24   ;;  %s6277_s27 = smov 16  }
  0x11   :  { %v1258_v4 = vsel %vm284_vm0, %v167_v51, -inf  ;;  %v1221_v6 = vrot.slane %v6370_v53, 1  ;;  %v1228_v7 = vrot.slane %v6372_v54, 1  ;;  %v1235_v8 = vrot.slane %v6374_v55, 1  ;;  %s6278_s28 = smov 28   ;;  %s6279_s30 = smov 32  }
  0x12   :  { %v6400_v5 = vmax.f32 %v1213_v52, %v1214_v63  ;;  %v1238_v9 = vrot.slane %v1237_v1, 4  ;;  %v1245_v10 = vrot.slane %v1244_v2, 4  ;;  %v1252_v11 = vrot.slane %v1251_v3, 4  ;;  %s6283_s18 = smov 64   ;;  %s6284_s19 = smov 40  }
  0x13   :  { %v1259_v12 = vrot.slane %v1258_v4, 4  ;;  %v1265_v13 = vsel %vm284_vm0, %v168_v56, -inf  ;;  %v1272_v14 = vsel %vm284_vm0, %v169_v58, -inf  ;;  %v1279_v15 = vsel %vm284_vm0, %v170_v59, -inf  ;;  %v176_v56 = vld [vmem:[%s11292_s0 + $0x128] sm:$0x3] }
  0x14   :  { %v1286_v16 = vsel %vm284_vm0, %v171_v0, -inf  ;;  %v1239_v17 = vmax.f32 %v1237_v1, %v1238_v9  ;;  %v1246_v18 = vmax.f32 %v1244_v2, %v1245_v10  ;;  %v1253_v19 = vmax.f32 %v1251_v3, %v1252_v11  ;;  %v177_v1 = vld [vmem:[%s11292_s0 + $0x12a] sm:$0x3]  ;;  %v178_v2 = vld [vmem:[%s11292_s0 + $0x12c] sm:$0x3]  ;;  %s5562_s13 = sshll.u32 %s11299_s7, 4  ;;  %s5563_s13 = int_to_ptr.hbm [resolvable:$true] %s5562_s13 }
  0x15   :  { %v1260_v20 = vmax.f32 %v1258_v4, %v1259_v12  ;;  %v1266_v21 = vrot.slane %v1265_v13, 4  ;;  %v1273_v22 = vrot.slane %v1272_v14, 4  ;;  %v1280_v23 = vrot.slane %v1279_v15, 4 }
  0x16   :  { %v1287_v24 = vrot.slane %v1286_v16, 4  ;;  %v1240_v25 = vrot.slane %v1239_v17, 2  ;;  %v1247_v26 = vrot.slane %v1246_v18, 2  ;;  %v1254_v27 = vrot.slane %v1253_v19, 2 }
  0x17   :  { %v1261_v28 = vrot.slane %v1260_v20, 2  ;;  %v1267_v29 = vmax.f32 %v1265_v13, %v1266_v21  ;;  %v1274_v30 = vmax.f32 %v1272_v14, %v1273_v22  ;;  %v1281_v31 = vmax.f32 %v1279_v15, %v1280_v23 }
  0x18   :  { %v1288_v32 = vmax.f32 %v1286_v16, %v1287_v24  ;;  %v1241_v33 = vmax.f32 %v1239_v17, %v1240_v25  ;;  %v1248_v34 = vmax.f32 %v1246_v18, %v1247_v26  ;;  %v1255_v35 = vmax.f32 %v1253_v19, %v1254_v27 }
  0x19   :  { %v1262_v36 = vmax.f32 %v1260_v20, %v1261_v28  ;;  %v1268_v37 = vrot.slane %v1267_v29, 2  ;;  %v1275_v38 = vrot.slane %v1274_v30, 2  ;;  %v1282_v39 = vrot.slane %v1281_v31, 2 }
  0x1a   :  { %v1289_v40 = vrot.slane %v1288_v32, 2  ;;  %v1242_v42 = vrot.slane %v1241_v33, 1  ;;  %v1249_v43 = vrot.slane %v1248_v34, 1  ;;  %v1256_v44 = vrot.slane %v1255_v35, 1 }
  0x1b   :  { %v1263_v45 = vrot.slane %v1262_v36, 1  ;;  %v1269_v49 = vmax.f32 %v1267_v29, %v1268_v37  ;;  %v6421_v50 = vmax.f32 %v1274_v30, %v1275_v38  ;;  %v6423_v51 = vmax.f32 %v1281_v31, %v1282_v39 }
  0x1c   :  { %v6425_v52 = vmax.f32 %v1288_v32, %v1289_v40  ;;  %v6431_v58 = vmax.f32 %v6370_v53, %v1221_v6  ;;  %v6434_v59 = vmax.f32 %v6372_v54, %v1228_v7  ;;  %v6437_v63 = vmax.f32 %v6374_v55, %v1235_v8  ;;  %v179_v55 = vld [vmem:[%s11292_s0 + $0x12e] sm:$0x3] }
  0x1d   :  { %v6439_v0 = vmax.f32 %v1241_v33, %v1242_v42  ;;  %v6447_v3 = vmax.f32 %v1248_v34, %v1249_v43  ;;  %v6449_v53 = vmax.f32 %v1255_v35, %v1256_v44  ;;  %v6451_v4 = vmax.f32 %v1262_v36, %v1263_v45 }
  0x1e   :  { %v1270_v54 = vrot.slane %v1269_v49, 1  ;;  %v1293_v6 = vsel %vm284_vm0, %v172_v41, -inf  ;;  %v1300_v7 = vsel %vm284_vm0, %v173_v46, -inf  ;;  %v1307_v8 = vsel %vm284_vm0, %v174_v47, -inf  ;;  %v180_v46 = vld [vmem:[%s11292_s0 + $0x130] sm:$0x3] }
  0x1f   :  { %v1314_v9 = vsel %vm284_vm0, %v175_v48, -inf  ;;  %v1277_v11 = vrot.slane %v6421_v50, 1  ;;  %v1284_v12 = vrot.slane %v6423_v51, 1  ;;  %v1291_v13 = vrot.slane %v6425_v52, 1 }
  0x20   :  { %v6460_v10 = vmax.f32 %v1269_v49, %v1270_v54  ;;  %v1294_v14 = vrot.slane %v1293_v6, 4  ;;  %v1301_v15 = vrot.slane %v1300_v7, 4  ;;  %v1308_v16 = vrot.slane %v1307_v8, 4  ;;  %v183_v54 = vld [vmem:[%s11292_s0 + $0x136] sm:$0x3] }
  0x21   :  { %v1315_v17 = vrot.slane %v1314_v9, 4  ;;  %v1321_v18 = vsel %vm284_vm0, %v176_v56, -inf  ;;  %v1328_v19 = vsel %vm284_vm0, %v177_v1, -inf  ;;  %v1335_v20 = vsel %vm284_vm0, %v178_v2, -inf  ;;  %v181_v1 = vld [vmem:[%s11292_s0 + $0x132] sm:$0x3] }
  0x22   :  { %v1342_v21 = vsel %vm284_vm0, %v179_v55, -inf  ;;  %v1295_v22 = vmax.f32 %v1293_v6, %v1294_v14  ;;  %v1302_v23 = vmax.f32 %v1300_v7, %v1301_v15  ;;  %v1309_v24 = vmax.f32 %v1307_v8, %v1308_v16  ;;  %v182_v2 = vld [vmem:[%s11292_s0 + $0x134] sm:$0x3] }
  0x23   :  { %v1316_v25 = vmax.f32 %v1314_v9, %v1315_v17  ;;  %v1322_v26 = vrot.slane %v1321_v18, 4  ;;  %v1329_v27 = vrot.slane %v1328_v19, 4  ;;  %v1336_v28 = vrot.slane %v1335_v20, 4  ;;  %v184_v9 = vld [vmem:[%s11292_s0 + $0x138] sm:$0x3] }
  0x24   :  { %v1343_v29 = vrot.slane %v1342_v21, 4  ;;  %v1296_v30 = vrot.slane %v1295_v22, 2  ;;  %v1303_v31 = vrot.slane %v1302_v23, 2  ;;  %v1310_v32 = vrot.slane %v1309_v24, 2 }
  0x25   :  { %v1317_v33 = vrot.slane %v1316_v25, 2  ;;  %v1323_v34 = vmax.f32 %v1321_v18, %v1322_v26  ;;  %v1330_v35 = vmax.f32 %v1328_v19, %v1329_v27  ;;  %v1337_v36 = vmax.f32 %v1335_v20, %v1336_v28  ;;  %v185_v18 = vld [vmem:[%s11292_s0 + $0x13a] sm:$0x3]  ;;  %v186_v19 = vld [vmem:[%s11292_s0 + $0x13c] sm:$0x3] }
  0x26   :  { %v1344_v37 = vmax.f32 %v1342_v21, %v1343_v29  ;;  %v1297_v38 = vmax.f32 %v1295_v22, %v1296_v30  ;;  %v1304_v39 = vmax.f32 %v1302_v23, %v1303_v31  ;;  %v1311_v40 = vmax.f32 %v1309_v24, %v1310_v32 }
  0x27   :  { %v1318_v41 = vmax.f32 %v1316_v25, %v1317_v33  ;;  %v1324_v42 = vrot.slane %v1323_v34, 2  ;;  %v1331_v43 = vrot.slane %v1330_v35, 2  ;;  %v1338_v44 = vrot.slane %v1337_v36, 2 }
  0x28   :  { %v1345_v45 = vrot.slane %v1344_v37, 2  ;;  %v1298_v47 = vrot.slane %v1297_v38, 1  ;;  %v1305_v48 = vrot.slane %v1304_v39, 1  ;;  %v1312_v49 = vrot.slane %v1311_v40, 1 }
  0x29   :  { %v1319_v56 = vrot.slane %v1318_v41, 1  ;;  %v1325_v55 = vmax.f32 %v1323_v34, %v1324_v42  ;;  %v6481_v6 = vmax.f32 %v1330_v35, %v1331_v43  ;;  %v6483_v7 = vmax.f32 %v1337_v36, %v1338_v44 }
  0x2a   :  { %v6485_v8 = vmax.f32 %v1344_v37, %v1345_v45  ;;  %v6491_v14 = vmax.f32 %v6421_v50, %v1277_v11  ;;  %v6494_v15 = vmax.f32 %v6423_v51, %v1284_v12  ;;  %v6497_v16 = vmax.f32 %v6425_v52, %v1291_v13  ;;  %v187_v52 = vld [vmem:[%s11292_s0 + $0x13e] sm:$0x3] }
  0x2b   :  { %v6499_v17 = vmax.f32 %v1297_v38, %v1298_v47  ;;  %v6507_v20 = vmax.f32 %v1304_v39, %v1305_v48  ;;  %v6509_v50 = vmax.f32 %v1311_v40, %v1312_v49  ;;  %v6511_v11 = vmax.f32 %v1318_v41, %v1319_v56 }
  0x2c   :  { %v1326_v51 = vrot.slane %v1325_v55, 1  ;;  %v1349_v12 = vsel %vm284_vm0, %v180_v46, -inf  ;;  %v1356_v13 = vsel %vm284_vm0, %v181_v1, -inf  ;;  %v1363_v21 = vsel %vm284_vm0, %v182_v2, -inf }
  0x2d   :  { %v1370_v22 = vsel %vm284_vm0, %v183_v54, -inf  ;;  %v1333_v24 = vrot.slane %v6481_v6, 1  ;;  %v1340_v25 = vrot.slane %v6483_v7, 1  ;;  %v1347_v26 = vrot.slane %v6485_v8, 1 }
  0x2e   :  { %v6520_v23 = vmax.f32 %v1325_v55, %v1326_v51  ;;  %v1350_v27 = vrot.slane %v1349_v12, 4  ;;  %v1357_v28 = vrot.slane %v1356_v13, 4  ;;  %v1364_v29 = vrot.slane %v1363_v21, 4 }
  0x2f   :  { %v1371_v30 = vrot.slane %v1370_v22, 4  ;;  %v1377_v31 = vsel %vm284_vm0, %v184_v9, -inf  ;;  %v1384_v32 = vsel %vm284_vm0, %v185_v18, -inf  ;;  %v1391_v33 = vsel %vm284_vm0, %v186_v19, -inf }
  0x30   :  { %v1398_v34 = vsel %vm284_vm0, %v187_v52, -inf  ;;  %v1351_v35 = vmax.f32 %v1349_v12, %v1350_v27  ;;  %v1358_v36 = vmax.f32 %v1356_v13, %v1357_v28  ;;  %v1365_v37 = vmax.f32 %v1363_v21, %v1364_v29 }
  0x31   :  { %v1372_v38 = vmax.f32 %v1370_v22, %v1371_v30  ;;  %v1378_v39 = vrot.slane %v1377_v31, 4  ;;  %v1385_v40 = vrot.slane %v1384_v32, 4  ;;  %v1392_v41 = vrot.slane %v1391_v33, 4 }
  0x32   :  { %v1399_v42 = vrot.slane %v1398_v34, 4  ;;  %v1352_v43 = vrot.slane %v1351_v35, 2  ;;  %v1359_v44 = vrot.slane %v1358_v36, 2  ;;  %v1366_v45 = vrot.slane %v1365_v37, 2 }
  0x33   :  { %v1373_v46 = vrot.slane %v1372_v38, 2  ;;  %v1379_v47 = vmax.f32 %v1377_v31, %v1378_v39  ;;  %v1386_v48 = vmax.f32 %v1384_v32, %v1385_v40  ;;  %v1393_v49 = vmax.f32 %v1391_v33, %v1392_v41 }
  0x34   :  { %v1400_v56 = vmax.f32 %v1398_v34, %v1399_v42  ;;  %v1353_v1 = vmax.f32 %v1351_v35, %v1352_v43  ;;  %v1360_v2 = vmax.f32 %v1358_v36, %v1359_v44  ;;  %v1367_v54 = vmax.f32 %v1365_v37, %v1366_v45 }
  0x35   :  { %v1374_v55 = vmax.f32 %v1372_v38, %v1373_v46  ;;  %v1380_v9 = vrot.slane %v1379_v47, 2  ;;  %v1387_v18 = vrot.slane %v1386_v48, 2  ;;  %v1394_v19 = vrot.slane %v1393_v49, 2 }
  0x36   :  { %v1401_v51 = vrot.slane %v1400_v56, 2  ;;  %v1354_v52 = vrot.slane %v1353_v1, 1  ;;  %v1361_v12 = vrot.slane %v1360_v2, 1  ;;  %v1368_v13 = vrot.slane %v1367_v54, 1 }
  0x37   :  { %v1375_v21 = vrot.slane %v1374_v55, 1  ;;  %v1381_v22 = vmax.f32 %v1379_v47, %v1380_v9  ;;  %v1388_v27 = vmax.f32 %v1386_v48, %v1387_v18  ;;  %v1395_v28 = vmax.f32 %v1393_v49, %v1394_v19 }
  0x38   :  { %v1402_v29 = vmax.f32 %v1400_v56, %v1401_v51  ;;  %v1334_v30 = vmax.f32 %v6481_v6, %v1333_v24  ;;  %v1341_v31 = vmax.f32 %v6483_v7, %v1340_v25  ;;  %v6532_v32 = vmax.f32 %v6485_v8, %v1347_v26 }
  0x39   :  { %v1355_v33 = vmax.f32 %v1353_v1, %v1354_v52  ;;  %v1382_v34 = vrot.slane %v1381_v22, 1  ;;  %v1389_v35 = vrot.slane %v1388_v27, 1  ;;  %v1396_v36 = vrot.slane %v1395_v28, 1 }
  0x3a   :  { %v1403_v37 = vrot.slane %v1402_v29, 1  ;;  %v1362_v38 = vmax.f32 %v1360_v2, %v1361_v12  ;;  %v1369_v39 = vmax.f32 %v1367_v54, %v1368_v13  ;;  %v1376_v40 = vmax.f32 %v1374_v55, %v1375_v21 }
  0x3b   :  { %vm11499_vm1 = vcmask 31744   ;;  %v1383_v41 = vmax.f32 %v1381_v22, %v1382_v34  ;;  %v1390_v42 = vmax.f32 %v1388_v27, %v1389_v35  ;;  %v1397_v43 = vmax.f32 %v1395_v28, %v1396_v36  ;;  %v77_v22 = vld [vmem:[%s11292_s0 + $0x62] sm:$0x3] }
  0x3c   :  { %v1404_v44 = vmax.f32 %v1402_v29, %v1403_v37  ;;  %v2270_v6 = vsel %vm11499_vm1, %v6379_v57, -inf  ;;  %v2271_v7 = vsel %vm11499_vm1, %v6439_v0, -inf  ;;  %v2273_v8 = vsel %vm11499_vm1, %v6387_v60, -inf }
  0x3d   :  { %v2274_v24 = vsel %vm11499_vm1, %v6447_v3, -inf  ;;  %v6542_v25 = vmax.f32 %v2270_v6, %v2271_v7  ;;  %v2276_v45 = vsel %vm11499_vm1, %v6389_v61, -inf  ;;  %v2277_v46 = vsel %vm11499_vm1, %v6449_v53, -inf }
  0x3e   :  { %v6544_v26 = vmax.f32 %v2273_v8, %v2274_v24  ;;  %v6550_v57 = vmax.f32 %v2276_v45, %v2277_v46  ;;  %v2279_v0 = vsel %vm11499_vm1, %v6391_v62, -inf  ;;  %v2280_v60 = vsel %vm11499_vm1, %v6451_v4, -inf }
  0x3f   :  { %11503 = vst [vmem:[#allocation5_spill] sm:$0xff] %v6542_v25  ;;  %v2282_v3 = vsel %vm11499_vm1, %v6400_v5, -inf  ;;  %vm2574_vm2 = vcmask 1041409   ;;  %v6558_v47 = vmax.f32 %v2279_v0, %v2280_v60  ;;  %v2283_v61 = vsel %vm11499_vm1, %v6460_v10, -inf }
  0x40   :  { %11504 = vst [vmem:[#allocation6_spill] sm:$0xff] %v6544_v26  ;;  %v2285_v53 = vsel %vm11499_vm1, %v6431_v58, -inf  ;;  %v2286_v48 = vsel %vm11499_vm1, %v6491_v14, -inf  ;;  %vm2576_vm3 = vcmask 1042434   ;;  %v6566_v62 = vmax.f32 %v2282_v3, %v2283_v61 }
  0x41   :  { %11505 = vst [vmem:[#allocation7_spill] sm:$0xff] %v6550_v57  ;;  %v6568_v49 = vmax.f32 %v2285_v53, %v2286_v48  ;;  %v2288_v5 = vsel %vm11499_vm1, %v6434_v59, -inf  ;;  %v2289_v4 = vsel %vm11499_vm1, %v6494_v15, -inf  ;;  %vm2578_vm4 = vcmask 1043459   ;;  %v80_v53 = vld [vmem:[%s11292_s0 + $0x68] sm:$0x3] }
  0x42   :  { %11506 = vst [vmem:[#allocation8_spill] sm:$0xff] %v6558_v47  ;;  %v6574_v56 = vmax.f32 %v2288_v5, %v2289_v4  ;;  %v2291_v58 = vsel %vm11499_vm1, %v6437_v63, -inf  ;;  %v2292_v10 = vsel %vm11499_vm1, %v6497_v16, -inf  ;;  %v2294_v14 = vsel %vm11499_vm1, %v6499_v17, -inf }
  0x43   :  { %11507 = vst [vmem:[#allocation9_spill] sm:$0xff] %v6566_v62  ;;  %v6582_v1 = vmax.f32 %v2291_v58, %v2292_v10  ;;  %v2295_v2 = vsel %vm11499_vm1, %v1355_v33, -inf  ;;  %v2297_v59 = vsel %vm11499_vm1, %v6507_v20, -inf  ;;  %v2298_v15 = vsel %vm11499_vm1, %v1362_v38, -inf  ;;  %v79_v33 = vld [vmem:[%s11292_s0 + $0x66] sm:$0x3] }
  0x44   :  { %11508 = vst [vmem:[#allocation10_spill] sm:$0xff] %v6568_v49  ;;  %v6588_v54 = vmax.f32 %v2294_v14, %v2295_v2  ;;  %v6590_v55 = vmax.f32 %v2297_v59, %v2298_v15  ;;  %v2300_v63 = vsel %vm11499_vm1, %v6509_v50, -inf  ;;  %v2301_v16 = vsel %vm11499_vm1, %v1369_v39, -inf  ;;  %v81_v10 = vld [vmem:[%s11292_s0 + $0x6a] sm:$0x3] }
  0x45   :  { %11509 = vst [vmem:[#allocation11_spill] sm:$0xff] %v6574_v56  ;;  %v6595_v9 = vmax.f32 %v2300_v63, %v2301_v16  ;;  %v2303_v17 = vsel %vm11499_vm1, %v6511_v11, -inf  ;;  %v2304_v18 = vsel %vm11499_vm1, %v1376_v40, -inf  ;;  %v2306_v20 = vsel %vm11499_vm1, %v6520_v23, -inf  ;;  %v76_v23 = vld [vmem:[%s11292_s0 + $0x60] sm:$0x3] }
  0x46   :  { %11510 = vst [vmem:[#allocation12_spill] sm:$0xff] %v6582_v1  ;;  %v6602_v19 = vmax.f32 %v2303_v17, %v2304_v18  ;;  %v2307_v51 = vsel %vm11499_vm1, %v1383_v41, -inf  ;;  %v2309_v52 = vsel %vm11499_vm1, %v1334_v30, -inf  ;;  %v2310_v50 = vsel %vm11499_vm1, %v1390_v42, -inf  ;;  %v78_v30 = vld [vmem:[%s11292_s0 + $0x64] sm:$0x3] }
  0x47   :  { %11511 = vst [vmem:[#allocation13_spill] sm:$0xff] %v6588_v54  ;;  %v6607_v12 = vmax.f32 %v2306_v20, %v2307_v51  ;;  %v6609_v13 = vmax.f32 %v2309_v52, %v2310_v50  ;;  %v2312_v21 = vsel %vm11499_vm1, %v1341_v31, -inf  ;;  %v2313_v11 = vsel %vm11499_vm1, %v1397_v43, -inf  ;;  %v82_v14 = vld [vmem:[%s11292_s0 + $0x6c] sm:$0x3] }
  0x48   :  { %11512 = vst [vmem:[#allocation14_spill] sm:$0xff] %v6590_v55  ;;  %v6619_v27 = vmax.f32 %v2312_v21, %v2313_v11  ;;  %v2315_v28 = vsel %vm11499_vm1, %v6532_v32, -inf  ;;  %v2316_v29 = vsel %vm11499_vm1, %v1404_v44, -inf  ;;  %vm2580_vm5 = vcmask 1044484   ;;  %v83_v16 = vld [vmem:[%s11292_s0 + $0x6e] sm:$0x3] }
  0x49   :  { %11513 = vst [vmem:[#allocation15_spill] sm:$0xff] %v6595_v9  ;;  %v6627_v31 = vmax.f32 %v2315_v28, %v2316_v29  ;;  %vm2582_vm6 = vcmask 1045509   ;;  %vm2584_vm7 = vcmask 1046534   ;;  %vm2586_vm8 = vcmask 1047559  }
  0x4a   :  { %11514 = vst [vmem:[#allocation16_spill] sm:$0xff] %v6602_v19  ;;  %v2630_v32 = vsel %vm2574_vm2, %v6544_v26, %v6542_v25  ;;  %v2637_v34 = vsel %vm2574_vm2, %v6590_v55, %v6588_v54  ;;  %v621_v35 = vsel %vm284_vm0, %v76_v23, -inf  ;;  %v628_v36 = vsel %vm284_vm0, %v77_v22, -inf  ;;  %v84_v23 = vld [vmem:[%s11292_s0 + $0x70] sm:$0x3] }
  0x4b   :  { %11515 = vst [vmem:[#allocation17_spill] sm:$0xff] %v6607_v12  ;;  %v2631_v37 = vsel %vm2576_vm3, %v6550_v57, %v2630_v32  ;;  %v2638_v38 = vsel %vm2576_vm3, %v6595_v9, %v2637_v34  ;;  %v622_v39 = vrot.slane %v621_v35, 4  ;;  %v629_v40 = vrot.slane %v628_v36, 4 }
  0x4c   :  { %11516 = vst [vmem:[#allocation18_spill] sm:$0xff] %v6609_v13  ;;  %v2632_v41 = vsel %vm2578_vm4, %v6558_v47, %v2631_v37  ;;  %v2639_v42 = vsel %vm2578_vm4, %v6602_v19, %v2638_v38  ;;  %v635_v43 = vsel %vm284_vm0, %v78_v30, -inf  ;;  %v642_v44 = vsel %vm284_vm0, %v79_v33, -inf }
  0x4d   :  { %11517 = vst [vmem:[#allocation19_spill] sm:$0xff] %v6619_v27  ;;  %v2633_v6 = vsel %vm2580_vm5, %v6566_v62, %v2632_v41  ;;  %v2640_v7 = vsel %vm2580_vm5, %v6607_v12, %v2639_v42  ;;  %v623_v8 = vmax.f32 %v621_v35, %v622_v39  ;;  %v630_v24 = vmax.f32 %v628_v36, %v629_v40  ;;  %v85_v36 = vld [vmem:[%s11292_s0 + $0x72] sm:$0x3]  ;;  %v86_v41 = vld [vmem:[%s11292_s0 + $0x74] sm:$0x3] }
  0x4e   :  { %11518 = vst [vmem:[#allocation20_spill] sm:$0xff] %v6627_v31  ;;  %v2634_v45 = vsel %vm2582_vm6, %v6568_v49, %v2633_v6  ;;  %v2641_v46 = vsel %vm2582_vm6, %v6609_v13, %v2640_v7  ;;  %v636_v0 = vrot.slane %v635_v43, 4  ;;  %v643_v60 = vrot.slane %v642_v44, 4 }
  0x4f   :  { %v2635_v3 = vsel %vm2584_vm7, %v6574_v56, %v2634_v45  ;;  %v2642_v61 = vsel %vm2584_vm7, %v6619_v27, %v2641_v46  ;;  %v624_v48 = vrot.slane %v623_v8, 2  ;;  %v631_v5 = vrot.slane %v630_v24, 2  ;;  %v87_v46 = vld [vmem:[%s11292_s0 + $0x76] sm:$0x3] }
  0x50   :  { %v6667_v4 = vsel %vm2586_vm8, %v6582_v1, %v2635_v3  ;;  %v6671_v58 = vsel %vm2586_vm8, %v6627_v31, %v2642_v61  ;;  %v637_v2 = vmax.f32 %v635_v43, %v636_v0  ;;  %v644_v59 = vmax.f32 %v642_v44, %v643_v60 }
  0x51   :  { %11519 = vst [vmem:[#allocation21_spill] sm:$0xff] %v6667_v4  ;;  %v6681_v15 = vpack.i.bf16 %v6671_v58, %v6667_v4  ;;  %v625_v63 = vmax.f32 %v623_v8, %v624_v48  ;;  %v632_v17 = vmax.f32 %v630_v24, %v631_v5  ;;  %v649_v51 = vsel %vm284_vm0, %v80_v53, -inf }
  0x52   :  { %11520 = vst [vmem:[#allocation22_spill] sm:$0xff] %v6671_v58  ;;  %v638_v18 = vrot.slane %v637_v2, 2  ;;  %v645_v20 = vrot.slane %v644_v59, 2  ;;  %v650_v50 = vrot.slane %v649_v51, 4  ;;  %v656_v21 = vsel %vm284_vm0, %v81_v10, -inf }
  0x53   :  { %11521 = vst [vmem:[#allocation23_spill] sm:$0xff] %v6681_v15  ;;  %5661 = vrot.lane.b32.xlu2 %v6681_v15, %s6271_s12  ;;  %v626_v52 = vrot.slane %v625_v63, 1  ;;  %v663_v11 = vsel %vm284_vm0, %v82_v14, -inf  ;;  %v633_v22 = vrot.slane %v632_v17, 1  ;;  %v657_v30 = vrot.slane %v656_v21, 4 }
  0x54   :  { %v639_v28 = vmax.f32 %v637_v2, %v638_v18  ;;  %v646_v29 = vmax.f32 %v644_v59, %v645_v20  ;;  %v651_v32 = vmax.f32 %v649_v51, %v650_v50  ;;  %v664_v34 = vrot.slane %v663_v11, 4 }
  0x55   :  { %v6694_v33 = vmax.f32 %v625_v63, %v626_v52  ;;  %v670_v35 = vsel %vm284_vm0, %v83_v16, -inf  ;;  %v6700_v37 = vmax.f32 %v632_v17, %v633_v22  ;;  %v658_v40 = vmax.f32 %v656_v21, %v657_v30  ;;  %v88_v16 = vld [vmem:[%s11292_s0 + $0x78] sm:$0x3]  ;;  %v90_v22 = vld [vmem:[%s11292_s0 + $0x7c] sm:$0x3] }
  0x56   :  { %v640_v38 = vrot.slane %v639_v28, 1  ;;  %v647_v39 = vrot.slane %v646_v29, 1  ;;  %v652_v42 = vrot.slane %v651_v32, 2  ;;  %v665_v43 = vmax.f32 %v663_v11, %v664_v34 }
  0x57   :  { %v671_v44 = vrot.slane %v670_v35, 4  ;;  %v677_v6 = vsel %vm284_vm0, %v84_v23, -inf  ;;  %v659_v24 = vrot.slane %v658_v40, 2  ;;  %v684_v61 = vsel %vm284_vm0, %v85_v36, -inf  ;;  %v89_v23 = vld [vmem:[%s11292_s0 + $0x7a] sm:$0x3] }
  0x58   :  { %v6706_v7 = vmax.f32 %v639_v28, %v640_v38  ;;  %v6708_v8 = vmax.f32 %v646_v29, %v647_v39  ;;  %v678_v45 = vrot.slane %v677_v6, 4  ;;  %v653_v0 = vmax.f32 %v651_v32, %v652_v42  ;;  %v91_v39 = vld [vmem:[%s11292_s0 + $0x7e] sm:$0x3] }
  0x59   :  { %v666_v60 = vrot.slane %v665_v43, 2  ;;  %v672_v3 = vmax.f32 %v670_v35, %v671_v44  ;;  %v660_v53 = vmax.f32 %v658_v40, %v659_v24  ;;  %v685_v5 = vrot.slane %v684_v61, 4 }
  0x5a   :  { %v679_v48 = vmax.f32 %v677_v6, %v678_v45  ;;  %v691_v10 = vsel %vm284_vm0, %v86_v41, -inf  ;;  %v654_v14 = vrot.slane %v653_v0, 1  ;;  %v698_v51 = vsel %vm284_vm0, %v87_v46, -inf  ;;  %v92_v46 = vld [vmem:[%s11292_s0 + $0x80] sm:$0x3] }
  0x5b   :  { %v667_v2 = vmax.f32 %v665_v43, %v666_v60  ;;  %v673_v59 = vrot.slane %v672_v3, 2  ;;  %v692_v63 = vrot.slane %v691_v10, 4  ;;  %v661_v17 = vrot.slane %v660_v53, 1 }
  0x5c   :  { %v680_v18 = vrot.slane %v679_v48, 2  ;;  %v686_v20 = vmax.f32 %v684_v61, %v685_v5  ;;  %v6719_v52 = vmax.f32 %v653_v0, %v654_v14  ;;  %v699_v32 = vrot.slane %v698_v51, 4  ;;  %v93_v14 = vld [vmem:[%s11292_s0 + $0x82] sm:$0x3] }
  0x5d   :  { %v668_v50 = vrot.slane %v667_v2, 1  ;;  %v674_v21 = vmax.f32 %v672_v3, %v673_v59  ;;  %v693_v11 = vmax.f32 %v691_v10, %v692_v63  ;;  %v6727_v28 = vmax.f32 %v660_v53, %v661_v17 }
  0x5e   :  { %v681_v29 = vmax.f32 %v679_v48, %v680_v18  ;;  %v687_v30 = vrot.slane %v686_v20, 2  ;;  %v705_v38 = vsel %vm284_vm0, %v88_v16, -inf  ;;  %v700_v42 = vmax.f32 %v698_v51, %v699_v32 }
  0x5f   :  { %v6729_v34 = vmax.f32 %v667_v2, %v668_v50  ;;  %v675_v35 = vrot.slane %v674_v21, 1  ;;  %v694_v36 = vrot.slane %v693_v11, 2  ;;  %v706_v43 = vrot.slane %v705_v38, 4  ;;  %v94_v2 = vld [vmem:[%s11292_s0 + $0x84] sm:$0x3] }
  0x60   :  { %v682_v40 = vrot.slane %v681_v29, 1  ;;  %v688_v41 = vmax.f32 %v686_v20, %v687_v30  ;;  %v712_v24 = vsel %vm284_vm0, %v89_v23, -inf  ;;  %v719_v45 = vsel %vm284_vm0, %v90_v22, -inf }
  0x61   :  { %v6735_v44 = vmax.f32 %v674_v21, %v675_v35  ;;  %v695_v6 = vmax.f32 %v693_v11, %v694_v36  ;;  %v701_v3 = vrot.slane %v700_v42, 2  ;;  %v707_v61 = vmax.f32 %v705_v38, %v706_v43 }
  0x62   :  { %v6742_v0 = vmax.f32 %v681_v29, %v682_v40  ;;  %v689_v60 = vrot.slane %v688_v41, 1  ;;  %v713_v48 = vrot.slane %v712_v24, 4  ;;  %v720_v5 = vrot.slane %v719_v45, 4  ;;  %v95_v29 = vld [vmem:[%s11292_s0 + $0x86] sm:$0x3] }
  0x63   :  { %v696_v53 = vrot.slane %v695_v6, 1  ;;  %v726_v10 = vsel %vm284_vm0, %v91_v39, -inf  ;;  %v702_v63 = vmax.f32 %v700_v42, %v701_v3  ;;  %v708_v16 = vrot.slane %v707_v61, 2  ;;  %v96_v42 = vld [vmem:[%s11292_s0 + $0x88] sm:$0x3] }
  0x64   :  { %v6751_v59 = vmax.f32 %v688_v41, %v689_v60  ;;  %v727_v17 = vrot.slane %v726_v10, 4  ;;  %v714_v20 = vmax.f32 %v712_v24, %v713_v48  ;;  %v721_v51 = vmax.f32 %v719_v45, %v720_v5 }
  0x65   :  { %v6753_v18 = vmax.f32 %v695_v6, %v696_v53  ;;  %v733_v50 = vsel %vm284_vm0, %v92_v46, -inf  ;;  %v703_v21 = vrot.slane %v702_v63, 1  ;;  %v709_v11 = vmax.f32 %v707_v61, %v708_v16  ;;  %v97_v53 = vld [vmem:[%s11292_s0 + $0x8a] sm:$0x3] }
  0x66   :  { %v728_v23 = vmax.f32 %v726_v10, %v727_v17  ;;  %v734_v22 = vrot.slane %v733_v50, 4  ;;  %v715_v30 = vrot.slane %v714_v20, 2  ;;  %v722_v32 = vrot.slane %v721_v51, 2 }
  0x67   :  { %v740_v35 = vsel %vm284_vm0, %v93_v14, -inf  ;;  %v747_v36 = vsel %vm284_vm0, %v94_v2, -inf  ;;  %v6761_v38 = vmax.f32 %v702_v63, %v703_v21  ;;  %v710_v39 = vrot.slane %v709_v11, 1  ;;  %v98_v2 = vld [vmem:[%s11292_s0 + $0x8c] sm:$0x3] }
  0x68   :  { %v729_v40 = vrot.slane %v728_v23, 2  ;;  %v735_v41 = vmax.f32 %v733_v50, %v734_v22  ;;  %v716_v43 = vmax.f32 %v714_v20, %v715_v30  ;;  %v723_v6 = vmax.f32 %v721_v51, %v722_v32 }
  0x69   :  { %v741_v24 = vrot.slane %v740_v35, 4  ;;  %v748_v45 = vrot.slane %v747_v36, 4  ;;  %v6766_v46 = vmax.f32 %v709_v11, %v710_v39  ;;  %v754_v61 = vsel %vm284_vm0, %v95_v29, -inf }
  0x6a   :  { %v730_v60 = vmax.f32 %v728_v23, %v729_v40  ;;  %v736_v3 = vrot.slane %v735_v41, 2  ;;  %v717_v48 = vrot.slane %v716_v43, 1  ;;  %v724_v5 = vrot.slane %v723_v6, 1  ;;  %v99_v23 = vld [vmem:[%s11292_s0 + $0x8e] sm:$0x3] }
  0x6b   :  { %v742_v10 = vmax.f32 %v740_v35, %v741_v24  ;;  %v749_v14 = vmax.f32 %v747_v36, %v748_v45  ;;  %v755_v17 = vrot.slane %v754_v61, 4  ;;  %v761_v20 = vsel %vm284_vm0, %v96_v42, -inf }
  0x6c   :  { %v731_v63 = vrot.slane %v730_v60, 1  ;;  %v737_v16 = vmax.f32 %v735_v41, %v736_v3  ;;  %v6776_v51 = vmax.f32 %v716_v43, %v717_v48  ;;  %v6778_v50 = vmax.f32 %v723_v6, %v724_v5  ;;  %v100_v41 = vld [vmem:[%s11292_s0 + $0x90] sm:$0x3]  ;;  %v102_v48 = vld [vmem:[%s11292_s0 + $0x94] sm:$0x3] }
  0x6d   :  { %v743_v21 = vrot.slane %v742_v10, 2  ;;  %v750_v11 = vrot.slane %v749_v14, 2  ;;  %v756_v30 = vmax.f32 %v754_v61, %v755_v17  ;;  %v762_v32 = vrot.slane %v761_v20, 4 }
  0x6e   :  { %v6783_v22 = vmax.f32 %v730_v60, %v731_v63  ;;  %v738_v29 = vrot.slane %v737_v16, 1  ;;  %v768_v39 = vsel %vm284_vm0, %v97_v53, -inf  ;;  %v775_v40 = vsel %vm284_vm0, %v98_v2, -inf  ;;  %v101_v53 = vld [vmem:[%s11292_s0 + $0x92] sm:$0x3] }
  0x6f   :  { %v744_v35 = vmax.f32 %v742_v10, %v743_v21  ;;  %v751_v36 = vmax.f32 %v749_v14, %v750_v11  ;;  %v757_v43 = vrot.slane %v756_v30, 2  ;;  %v763_v6 = vmax.f32 %v761_v20, %v762_v32  ;;  %v103_v32 = vld [vmem:[%s11292_s0 + $0x96] sm:$0x3] }
  0x70   :  { %v6790_v42 = vmax.f32 %v737_v16, %v738_v29  ;;  %v769_v24 = vrot.slane %v768_v39, 4  ;;  %v776_v3 = vrot.slane %v775_v40, 4  ;;  %v782_v61 = vsel %vm284_vm0, %v99_v23, -inf }
  0x71   :  { %v745_v45 = vrot.slane %v744_v35, 1  ;;  %v752_v60 = vrot.slane %v751_v36, 1  ;;  %v758_v5 = vmax.f32 %v756_v30, %v757_v43  ;;  %v764_v10 = vrot.slane %v763_v6, 2 }
  0x72   :  { %v770_v14 = vmax.f32 %v768_v39, %v769_v24  ;;  %v783_v2 = vrot.slane %v782_v61, 4  ;;  %v777_v17 = vmax.f32 %v775_v40, %v776_v3  ;;  %v789_v20 = vsel %vm284_vm0, %v100_v41, -inf  ;;  %v104_v41 = vld [vmem:[%s11292_s0 + $0x98] sm:$0x3] }
  0x73   :  { %v6799_v63 = vmax.f32 %v744_v35, %v745_v45  ;;  %v6801_v16 = vmax.f32 %v751_v36, %v752_v60  ;;  %v759_v21 = vrot.slane %v758_v5, 1  ;;  %v765_v11 = vmax.f32 %v763_v6, %v764_v10 }
  0x74   :  { %v771_v23 = vrot.slane %v770_v14, 2  ;;  %v784_v29 = vmax.f32 %v782_v61, %v783_v2  ;;  %v778_v15 = vrot.slane %v777_v17, 2  ;;  %v790_v30 = vrot.slane %v789_v20, 4 }
  0x75   :  { %v796_v39 = vsel %vm284_vm0, %v101_v53, -inf  ;;  %v803_v35 = vsel %vm284_vm0, %v102_v48, -inf  ;;  %v6809_v43 = vmax.f32 %v758_v5, %v759_v21  ;;  %v766_v36 = vrot.slane %v765_v11, 1  ;;  %v105_v48 = vld [vmem:[%s11292_s0 + $0x9a] sm:$0x3] }
  0x76   :  { %v772_v40 = vmax.f32 %v770_v14, %v771_v23  ;;  %v785_v24 = vrot.slane %v784_v29, 2  ;;  %v779_v6 = vmax.f32 %v777_v17, %v778_v15  ;;  %v791_v45 = vmax.f32 %v789_v20, %v790_v30 }
  0x77   :  { %v797_v60 = vrot.slane %v796_v39, 4  ;;  %v804_v3 = vrot.slane %v803_v35, 4  ;;  %v6814_v61 = vmax.f32 %v765_v11, %v766_v36  ;;  %v810_v53 = vsel %vm284_vm0, %v103_v32, -inf  ;;  %v106_v11 = vld [vmem:[%s11292_s0 + $0x9c] sm:$0x3] }
  0x78   :  { %v773_v10 = vrot.slane %v772_v40, 1  ;;  %v786_v2 = vmax.f32 %v784_v29, %v785_v24  ;;  %v780_v5 = vrot.slane %v779_v6, 1  ;;  %v792_v14 = vrot.slane %v791_v45, 2  ;;  %v107_v29 = vld [vmem:[%s11292_s0 + $0x9e] sm:$0x3] }
  0x79   :  { %v798_v21 = vmax.f32 %v796_v39, %v797_v60  ;;  %v805_v23 = vmax.f32 %v803_v35, %v804_v3  ;;  %v811_v17 = vrot.slane %v810_v53, 4  ;;  %v817_v20 = vsel %vm284_vm0, %v104_v41, -inf }
  0x7a   :  { %v6820_v31 = vmax.f32 %v772_v40, %v773_v10  ;;  %v787_v15 = vrot.slane %v786_v2, 1  ;;  %v6829_v32 = vmax.f32 %v779_v6, %v780_v5  ;;  %v793_v30 = vmax.f32 %v791_v45, %v792_v14 }
  0x7b   :  { %v799_v36 = vrot.slane %v798_v21, 2  ;;  %v806_v39 = vrot.slane %v805_v23, 2  ;;  %v812_v40 = vmax.f32 %v810_v53, %v811_v17  ;;  %v818_v24 = vrot.slane %v817_v20, 4 }
  0x7c   :  { %v6831_v35 = vmax.f32 %v786_v2, %v787_v15  ;;  %v824_v60 = vsel %vm284_vm0, %v105_v48, -inf  ;;  %v794_v41 = vrot.slane %v793_v30, 1  ;;  %v831_v13 = vsel %vm284_vm0, %v106_v11, -inf }
  0x7d   :  { %v800_v3 = vmax.f32 %v798_v21, %v799_v36  ;;  %v807_v10 = vmax.f32 %v805_v23, %v806_v39  ;;  %v825_v1 = vrot.slane %v824_v60, 4  ;;  %v813_v4 = vrot.slane %v812_v40, 2 }
  0x7e   :  { %v819_v27 = vmax.f32 %v817_v20, %v818_v24  ;;  %v838_v6 = vsel %vm284_vm0, %v107_v29, -inf  ;;  %v795_v5 = vmax.f32 %v793_v30, %v794_v41  ;;  %v832_v53 = vrot.slane %v831_v13, 4 }
  0x7f   :  { %v801_v45 = vrot.slane %v800_v3, 1  ;;  %v808_v14 = vrot.slane %v807_v10, 1  ;;  %v826_v12 = vmax.f32 %v824_v60, %v825_v1  ;;  %v814_v2 = vmax.f32 %v812_v40, %v813_v4 }
  0x80   :  { %v820_v15 = vrot.slane %v819_v27, 2  ;;  %v839_v17 = vrot.slane %v838_v6, 4  ;;  %v2150_v21 = vsel %vm11499_vm1, %v6694_v33, -inf  ;;  %v833_v36 = vmax.f32 %v831_v13, %v832_v53 }
  0x81   :  { %v802_v56 = vmax.f32 %v800_v3, %v801_v45  ;;  %v809_v48 = vmax.f32 %v807_v10, %v808_v14  ;;  %v827_v19 = vrot.slane %v826_v12, 2  ;;  %v815_v23 = vrot.slane %v814_v2, 1 }
  0x82   :  { %v821_v20 = vmax.f32 %v819_v27, %v820_v15  ;;  %v840_v11 = vmax.f32 %v838_v6, %v839_v17  ;;  %v2151_v29 = vsel %vm11499_vm1, %v6742_v0, -inf  ;;  %v2153_v1 = vsel %vm11499_vm1, %v6700_v37, -inf }
  0x83   :  { %v828_v39 = vmax.f32 %v826_v12, %v827_v19  ;;  %v2154_v4 = vsel %vm11499_vm1, %v6751_v59, -inf  ;;  %v816_v30 = vmax.f32 %v814_v2, %v815_v23  ;;  %v834_v24 = vrot.slane %v833_v36, 2 }
  0x84   :  { %v822_v40 = vrot.slane %v821_v20, 1  ;;  %v841_v60 = vrot.slane %v840_v11, 2  ;;  %v6844_v33 = vmax.f32 %v2150_v21, %v2151_v29  ;;  %v6846_v27 = vmax.f32 %v2153_v1, %v2154_v4 }
  0x85   :  { %v829_v41 = vrot.slane %v828_v39, 1  ;;  %v2156_v19 = vsel %vm11499_vm1, %v6706_v7, -inf  ;;  %v835_v13 = vmax.f32 %v833_v36, %v834_v24  ;;  %v2157_v37 = vsel %vm11499_vm1, %v6753_v18, -inf }
  0x86   :  { %11522 = vst [vmem:[#allocation24_spill] sm:$0xff] %v6844_v33  ;;  %v823_v12 = vmax.f32 %v821_v20, %v822_v40  ;;  %v842_v0 = vmax.f32 %v840_v11, %v841_v60  ;;  %v6852_v59 = vmax.f32 %v2156_v19, %v2157_v37  ;;  %v2159_v10 = vsel %vm11499_vm1, %v6708_v8, -inf }
  0x87   :  { %11523 = vst [vmem:[#allocation25_spill] sm:$0xff] %v6846_v27  ;;  %v830_v3 = vmax.f32 %v828_v39, %v829_v41  ;;  %v2160_v6 = vsel %vm11499_vm1, %v6761_v38, -inf  ;;  %v836_v45 = vrot.slane %v835_v13, 1  ;;  %v2162_v7 = vsel %vm11499_vm1, %v6719_v52, -inf }
  0x88   :  { %11524 = vst [vmem:[#allocation26_spill] sm:$0xff] %v6852_v59  ;;  %v843_v14 = vrot.slane %v842_v0, 1  ;;  %v6858_v2 = vmax.f32 %v2159_v10, %v2160_v6  ;;  %v2163_v15 = vsel %vm11499_vm1, %v6766_v46, -inf  ;;  %v2165_v18 = vsel %vm11499_vm1, %v6727_v28, -inf  ;;  %v31_v10 = vld [vmem:[%s11292_s0 + $0x6] sm:$0x3] }
  0x89   :  { %v2166_v53 = vsel %vm11499_vm1, %v6776_v51, -inf  ;;  %v2168_v8 = vsel %vm11499_vm1, %v6729_v34, -inf  ;;  %v837_v38 = vmax.f32 %v835_v13, %v836_v45  ;;  %v6870_v21 = vmax.f32 %v2162_v7, %v2163_v15 }
  0x8a   :  { %11525 = vst [vmem:[#allocation27_spill] sm:$0xff] %v6858_v2  ;;  %v844_v17 = vmax.f32 %v842_v0, %v843_v14  ;;  %v6872_v23 = vmax.f32 %v2165_v18, %v2166_v53  ;;  %v2169_v52 = vsel %vm11499_vm1, %v6778_v50, -inf  ;;  %v2171_v46 = vsel %vm11499_vm1, %v6735_v44, -inf }
  0x8b   :  { %11526 = vst [vmem:[#allocation28_spill] sm:$0xff] %v6870_v21  ;;  %v2172_v28 = vsel %vm11499_vm1, %v6783_v22, -inf  ;;  %v2174_v51 = vsel %vm11499_vm1, %v6790_v42, -inf  ;;  %v6882_v20 = vmax.f32 %v2168_v8, %v2169_v52  ;;  %v2175_v36 = vsel %vm11499_vm1, %v795_v5, -inf }
  0x8c   :  { %11527 = vst [vmem:[#allocation29_spill] sm:$0xff] %v6872_v23  ;;  %v6884_v34 = vmax.f32 %v2171_v46, %v2172_v28  ;;  %v2177_v11 = vsel %vm11499_vm1, %v6799_v63, -inf  ;;  %v6889_v39 = vmax.f32 %v2174_v51, %v2175_v36  ;;  %v2178_v50 = vsel %vm11499_vm1, %v802_v56, -inf }
  0x8d   :  { %11528 = vst [vmem:[#allocation30_spill] sm:$0xff] %v6882_v20  ;;  %v2180_v44 = vsel %vm11499_vm1, %v6801_v16, -inf  ;;  %v2181_v22 = vsel %vm11499_vm1, %v809_v48, -inf  ;;  %v6895_v29 = vmax.f32 %v2177_v11, %v2178_v50  ;;  %v2183_v1 = vsel %vm11499_vm1, %v6809_v43, -inf  ;;  %v28_v48 = vld [vmem:[%s11292_s0] sm:$0x3] }
  0x8e   :  { %11529 = vst [vmem:[#allocation31_spill] sm:$0xff] %v6884_v34  ;;  %v6897_v42 = vmax.f32 %v2180_v44, %v2181_v22  ;;  %v2184_v5 = vsel %vm11499_vm1, %v816_v30, -inf  ;;  %v2186_v63 = vsel %vm11499_vm1, %v6814_v61, -inf  ;;  %v2187_v56 = vsel %vm11499_vm1, %v823_v12, -inf  ;;  %v29_v61 = vld [vmem:[%s11292_s0 + $0x2] sm:$0x3] }
  0x8f   :  { %11530 = vst [vmem:[#allocation32_spill] sm:$0xff] %v6889_v39  ;;  %v6902_v4 = vmax.f32 %v2183_v1, %v2184_v5  ;;  %v2189_v16 = vsel %vm11499_vm1, %v6820_v31, -inf  ;;  %v6912_v40 = vmax.f32 %v2186_v63, %v2187_v56  ;;  %v2190_v43 = vsel %vm11499_vm1, %v830_v3, -inf  ;;  %v30_v12 = vld [vmem:[%s11292_s0 + $0x4] sm:$0x3] }
  0x90   :  { %11531 = vst [vmem:[#allocation33_spill] sm:$0xff] %v6895_v29  ;;  %v2192_v30 = vsel %vm11499_vm1, %v6829_v32, -inf  ;;  %v2193_v24 = vsel %vm11499_vm1, %v837_v38, -inf  ;;  %v6921_v60 = vmax.f32 %v2189_v16, %v2190_v43  ;;  %v2195_v41 = vsel %vm11499_vm1, %v6831_v35, -inf  ;;  %v32_v50 = vld [vmem:[%s11292_s0 + $0x8] sm:$0x3] }
  0x91   :  { %11532 = vst [vmem:[#allocation34_spill] sm:$0xff] %v6897_v42  ;;  %v6923_v31 = vmax.f32 %v2192_v30, %v2193_v24  ;;  %v2196_v19 = vsel %vm11499_vm1, %v844_v17, -inf  ;;  %v2602_v13 = vsel %vm2574_vm2, %v6846_v27, %v6844_v33  ;;  %v2609_v0 = vsel %vm2574_vm2, %v6895_v29, %v6889_v39  ;;  %v33_v63 = vld [vmem:[%s11292_s0 + $0xa] sm:$0x3]  ;;  %v34_v56 = vld [vmem:[%s11292_s0 + $0xc] sm:$0x3] }
  0x92   :  { %11533 = vst [vmem:[#allocation35_spill] sm:$0xff] %v6902_v4  ;;  %v6931_v32 = vmax.f32 %v2195_v41, %v2196_v19  ;;  %v285_v37 = vsel %vm284_vm0, %v28_v48, -inf  ;;  %v2603_v35 = vsel %vm2576_vm3, %v6852_v59, %v2602_v13  ;;  %v2610_v3 = vsel %vm2576_vm3, %v6897_v42, %v2609_v0  ;;  %v35_v24 = vld [vmem:[%s11292_s0 + $0xe] sm:$0x3] }
  0x93   :  { %11534 = vst [vmem:[#allocation36_spill] sm:$0xff] %v6912_v40  ;;  %v286_v6 = vrot.slane %v285_v37, 4  ;;  %v292_v45 = vsel %vm284_vm0, %v29_v61, -inf  ;;  %v2604_v14 = vsel %vm2578_vm4, %v6858_v2, %v2603_v35  ;;  %v2611_v7 = vsel %vm2578_vm4, %v6902_v4, %v2610_v3  ;;  %v36_v3 = vld [vmem:[%s11292_s0 + $0x10] sm:$0x3] }
  0x94   :  { %11535 = vst [vmem:[#allocation37_spill] sm:$0xff] %v6921_v60  ;;  %v293_v15 = vrot.slane %v292_v45, 4  ;;  %v299_v18 = vsel %vm284_vm0, %v30_v12, -inf  ;;  %v2605_v53 = vsel %vm2580_vm5, %v6870_v21, %v2604_v14  ;;  %v2612_v8 = vsel %vm2580_vm5, %v6912_v40, %v2611_v7 }
  0x95   :  { %11536 = vst [vmem:[#allocation38_spill] sm:$0xff] %v6923_v31  ;;  %v287_v38 = vmax.f32 %v285_v37, %v286_v6  ;;  %v300_v17 = vrot.slane %v299_v18, 4  ;;  %v2606_v52 = vsel %vm2582_vm6, %v6872_v23, %v2605_v53  ;;  %v2613_v46 = vsel %vm2582_vm6, %v6921_v60, %v2612_v8  ;;  %v37_v8 = vld [vmem:[%s11292_s0 + $0x12] sm:$0x3] }
  0x96   :  { %11537 = vst [vmem:[#allocation39_spill] sm:$0xff] %v6931_v32  ;;  %v294_v28 = vmax.f32 %v292_v45, %v293_v15  ;;  %v306_v51 = vsel %vm284_vm0, %v31_v10, -inf  ;;  %v2607_v36 = vsel %vm2584_vm7, %v6882_v20, %v2606_v52  ;;  %v2614_v11 = vsel %vm2584_vm7, %v6923_v31, %v2613_v46 }
  0x97   :  { %v288_v44 = vrot.slane %v287_v38, 2  ;;  %v301_v22 = vmax.f32 %v299_v18, %v300_v17  ;;  %v6971_v1 = vsel %vm2586_vm8, %v6884_v34, %v2607_v36  ;;  %v6975_v5 = vsel %vm2586_vm8, %v6931_v32, %v2614_v11 }
  0x98   :  { %11538 = vst [vmem:[#allocation40_spill] sm:$0xff] %v6971_v1  ;;  %v295_v16 = vrot.slane %v294_v28, 2  ;;  %v307_v48 = vrot.slane %v306_v51, 4  ;;  %v5650_v43 = vpack.i.bf16 %v6975_v5, %v6971_v1  ;;  %v313_v12 = vsel %vm284_vm0, %v32_v50, -inf  ;;  %v38_v50 = vld [vmem:[%s11292_s0 + $0x14] sm:$0x3] }
  0x99   :  { %11539 = vst [vmem:[#allocation41_spill] sm:$0xff] %v6975_v5  ;;  %v289_v30 = vmax.f32 %v287_v38, %v288_v44  ;;  %v302_v41 = vrot.slane %v301_v22, 2  ;;  %v314_v0 = vrot.slane %v313_v12, 4  ;;  %v320_v37 = vsel %vm284_vm0, %v33_v63, -inf }
  0x9a   :  { %v296_v61 = vmax.f32 %v294_v28, %v295_v16  ;;  %v308_v19 = vmax.f32 %v306_v51, %v307_v48  ;;  %5651 = vrot.lane.b32.xlu1 %v5650_v43, %s6271_s12  ;;  %v327_v35 = vsel %vm284_vm0, %v34_v56, -inf  ;;  %v321_v14 = vrot.slane %v320_v37, 4 }
  0x9b   :  { %v290_v13 = vrot.slane %v289_v30, 1  ;;  %v303_v6 = vmax.f32 %v301_v22, %v302_v41  ;;  %v315_v15 = vmax.f32 %v313_v12, %v314_v0  ;;  %v328_v18 = vrot.slane %v327_v35, 4 }
  0x9c   :  { %v297_v10 = vrot.slane %v296_v61, 1  ;;  %v309_v45 = vrot.slane %v308_v19, 2  ;;  %v334_v53 = vsel %vm284_vm0, %v35_v24, -inf  ;;  %v322_v46 = vmax.f32 %v320_v37, %v321_v14  ;;  %v39_v24 = vld [vmem:[%s11292_s0 + $0x16] sm:$0x3] }
  0x9d   :  { %v6995_v7 = vmax.f32 %v289_v30, %v290_v13  ;;  %v304_v17 = vrot.slane %v303_v6, 1  ;;  %v316_v28 = vrot.slane %v315_v15, 2  ;;  %v329_v51 = vmax.f32 %v327_v35, %v328_v18 }
  0x9e   :  { %v7001_v38 = vmax.f32 %v296_v61, %v297_v10  ;;  %v310_v52 = vmax.f32 %v308_v19, %v309_v45  ;;  %v335_v36 = vrot.slane %v334_v53, 4  ;;  %v341_v11 = vsel %vm284_vm0, %v36_v3, -inf  ;;  %v40_v3 = vld [vmem:[%s11292_s0 + $0x18] sm:$0x3] }
  0x9f   :  { %v7007_v44 = vmax.f32 %v303_v6, %v304_v17  ;;  %v323_v63 = vrot.slane %v322_v46, 2  ;;  %v342_v56 = vrot.slane %v341_v11, 4  ;;  %v317_v16 = vmax.f32 %v315_v15, %v316_v28  ;;  %v41_v17 = vld [vmem:[%s11292_s0 + $0x1a] sm:$0x3] }
  0xa0   :  { %v311_v22 = vrot.slane %v310_v52, 1  ;;  %v330_v48 = vrot.slane %v329_v51, 2  ;;  %v336_v43 = vmax.f32 %v334_v53, %v335_v36  ;;  %v348_v30 = vsel %vm284_vm0, %v37_v8, -inf }
  0xa1   :  { %v324_v41 = vmax.f32 %v322_v46, %v323_v63  ;;  %v343_v19 = vmax.f32 %v341_v11, %v342_v56  ;;  %v349_v12 = vrot.slane %v348_v30, 4  ;;  %v318_v13 = vrot.slane %v317_v16, 1  ;;  %v43_v56 = vld [vmem:[%s11292_s0 + $0x1e] sm:$0x3] }
  0xa2   :  { %v7013_v61 = vmax.f32 %v310_v52, %v311_v22  ;;  %v331_v0 = vmax.f32 %v329_v51, %v330_v48  ;;  %v337_v37 = vrot.slane %v336_v43, 2  ;;  %v355_v35 = vsel %vm284_vm0, %v38_v50, -inf  ;;  %v42_v52 = vld [vmem:[%s11292_s0 + $0x1c] sm:$0x3] }
  0xa3   :  { %v325_v10 = vrot.slane %v324_v41, 1  ;;  %v344_v6 = vrot.slane %v343_v19, 2  ;;  %v350_v45 = vmax.f32 %v348_v30, %v349_v12  ;;  %v356_v14 = vrot.slane %v355_v35, 4 }
  0xa4   :  { %v7019_v15 = vmax.f32 %v317_v16, %v318_v13  ;;  %v332_v18 = vrot.slane %v331_v0, 1  ;;  %v338_v53 = vmax.f32 %v336_v43, %v337_v37  ;;  %v362_v8 = vsel %vm284_vm0, %v39_v24, -inf }
  0xa5   :  { %v7028_v46 = vmax.f32 %v324_v41, %v325_v10  ;;  %v345_v28 = vmax.f32 %v343_v19, %v344_v6  ;;  %v351_v51 = vrot.slane %v350_v45, 2  ;;  %v357_v36 = vmax.f32 %v355_v35, %v356_v14 }
  0xa6   :  { %v7030_v11 = vmax.f32 %v331_v0, %v332_v18  ;;  %v339_v50 = vrot.slane %v338_v53, 1  ;;  %v363_v22 = vrot.slane %v362_v8, 4  ;;  %v369_v63 = vsel %vm284_vm0, %v40_v3, -inf }
  0xa7   :  { %v346_v16 = vrot.slane %v345_v28, 1  ;;  %v352_v48 = vmax.f32 %v350_v45, %v351_v51  ;;  %v358_v43 = vrot.slane %v357_v36, 2  ;;  %v370_v30 = vrot.slane %v369_v63, 4 }
  0xa8   :  { %v340_v24 = vmax.f32 %v338_v53, %v339_v50  ;;  %v364_v41 = vmax.f32 %v362_v8, %v363_v22  ;;  %v376_v19 = vsel %vm284_vm0, %v41_v17, -inf  ;;  %v383_v12 = vsel %vm284_vm0, %v42_v52, -inf }
  0xa9   :  { %v347_v13 = vmax.f32 %v345_v28, %v346_v16  ;;  %v353_v0 = vrot.slane %v352_v48, 1  ;;  %v359_v37 = vmax.f32 %v357_v36, %v358_v43  ;;  %v371_v35 = vmax.f32 %v369_v63, %v370_v30 }
  0xaa   :  { %v365_v10 = vrot.slane %v364_v41, 2  ;;  %v377_v3 = vrot.slane %v376_v19, 4  ;;  %v384_v6 = vrot.slane %v383_v12, 4  ;;  %v390_v14 = vsel %vm284_vm0, %v43_v56, -inf }
  0xab   :  { %v354_v18 = vmax.f32 %v352_v48, %v353_v0  ;;  %v360_v49 = vrot.slane %v359_v37, 1  ;;  %v372_v45 = vrot.slane %v371_v35, 2  ;;  %v391_v51 = vrot.slane %v390_v14, 4 }
  0xac   :  { %v366_v9 = vmax.f32 %v364_v41, %v365_v10  ;;  %v378_v53 = vmax.f32 %v376_v19, %v377_v3  ;;  %v385_v8 = vmax.f32 %v383_v12, %v384_v6  ;;  %v2078_v17 = vsel %vm11499_vm1, %v6995_v7, -inf }
  0xad   :  { %v361_v52 = vmax.f32 %v359_v37, %v360_v49  ;;  %v373_v28 = vmax.f32 %v371_v35, %v372_v45  ;;  %v392_v50 = vmax.f32 %v390_v14, %v391_v51  ;;  %v2079_v36 = vsel %vm11499_vm1, %v347_v13, -inf }
  0xae   :  { %v367_v22 = vrot.slane %v366_v9, 1  ;;  %v379_v63 = vrot.slane %v378_v53, 2  ;;  %v386_v16 = vrot.slane %v385_v8, 2  ;;  %v7042_v43 = vmax.f32 %v2078_v17, %v2079_v36  ;;  %v188_v17 = vld [vmem:[%s11292_s0 + $0x140] sm:$0x3] }
  0xaf   :  { %v374_v56 = vrot.slane %v373_v28, 1  ;;  %v393_v48 = vrot.slane %v392_v50, 2  ;;  %v2081_v30 = vsel %vm11499_vm1, %v7001_v38, -inf  ;;  %v2082_v41 = vsel %vm11499_vm1, %v354_v18, -inf }
  0xb0   :  { %v368_v19 = vmax.f32 %v366_v9, %v367_v22  ;;  %v380_v12 = vmax.f32 %v378_v53, %v379_v63  ;;  %v387_v7 = vmax.f32 %v385_v8, %v386_v16  ;;  %v7047_v49 = vmax.f32 %v2081_v30, %v2082_v41  ;;  %v192_v30 = vld [vmem:[%s11292_s0 + $0x148] sm:$0x3] }
  0xb1   :  { %v375_v0 = vmax.f32 %v373_v28, %v374_v56  ;;  %v394_v37 = vmax.f32 %v392_v50, %v393_v48  ;;  %v2084_v13 = vsel %vm11499_vm1, %v7007_v44, -inf  ;;  %v2085_v35 = vsel %vm11499_vm1, %v361_v52, -inf  ;;  %v189_v50 = vld [vmem:[%s11292_s0 + $0x142] sm:$0x3]  ;;  %v191_v48 = vld [vmem:[%s11292_s0 + $0x146] sm:$0x3] }
  0xb2   :  { %v381_v10 = vrot.slane %v380_v12, 1  ;;  %v388_v3 = vrot.slane %v387_v7, 1  ;;  %v7052_v6 = vmax.f32 %v2084_v13, %v2085_v35  ;;  %v2087_v38 = vsel %vm11499_vm1, %v7013_v61, -inf }
  0xb3   :  { %v395_v14 = vrot.slane %v394_v37, 1  ;;  %v2088_v9 = vsel %vm11499_vm1, %v368_v19, -inf  ;;  %v2090_v18 = vsel %vm11499_vm1, %v7019_v15, -inf  ;;  %v2091_v45 = vsel %vm11499_vm1, %v375_v0, -inf }
  0xb4   :  { %v382_v51 = vmax.f32 %v380_v12, %v381_v10  ;;  %v389_v53 = vmax.f32 %v387_v7, %v388_v3  ;;  %v7060_v44 = vmax.f32 %v2087_v38, %v2088_v9  ;;  %v7062_v8 = vmax.f32 %v2090_v18, %v2091_v45 }
  0xb5   :  { %v396_v52 = vmax.f32 %v394_v37, %v395_v14  ;;  %v2093_v61 = vsel %vm11499_vm1, %v7028_v46, -inf  ;;  %v2096_v28 = vsel %vm11499_vm1, %v7030_v11, -inf  ;;  %v2099_v15 = vsel %vm11499_vm1, %v340_v24, -inf  ;;  %v190_v46 = vld [vmem:[%s11292_s0 + $0x144] sm:$0x3] }
  0xb6   :  { %v2094_v36 = vsel %vm11499_vm1, %v382_v51, -inf  ;;  %v2097_v22 = vsel %vm11499_vm1, %v389_v53, -inf  ;;  %v2575_v63 = vsel %vm2574_vm2, %v7047_v49, %v7042_v43  ;;  %v1405_v12 = vsel %vm284_vm0, %v188_v17, -inf  ;;  %v193_v37 = vld [vmem:[%s11292_s0 + $0x14a] sm:$0x3] }
  0xb7   :  { %v7083_v16 = vmax.f32 %v2093_v61, %v2094_v36  ;;  %v7085_v11 = vmax.f32 %v2096_v28, %v2097_v22  ;;  %v2100_v24 = vsel %vm11499_vm1, %v396_v52, -inf  ;;  %v2577_v56 = vsel %vm2576_vm3, %v7052_v6, %v2575_v63  ;;  %v194_v52 = vld [vmem:[%s11292_s0 + $0x14c] sm:$0x3]  ;;  %v195_v61 = vld [vmem:[%s11292_s0 + $0x14e] sm:$0x3] }
  0xb8   :  { %v7096_v41 = vmax.f32 %v2099_v15, %v2100_v24  ;;  %v2579_v19 = vsel %vm2578_vm4, %v7060_v44, %v2577_v56  ;;  %v1412_v7 = vsel %vm284_vm0, %v189_v50, -inf  ;;  %v1406_v13 = vrot.slane %v1405_v12, 4 }
  0xb9   :  { %v2581_v0 = vsel %vm2580_vm5, %v7062_v8, %v2579_v19  ;;  %v1413_v35 = vrot.slane %v1412_v7, 4  ;;  %v1419_v10 = vsel %vm284_vm0, %v190_v46, -inf  ;;  %v1426_v14 = vsel %vm284_vm0, %v191_v48, -inf }
  0xba   :  { %v2583_v3 = vsel %vm2582_vm6, %v7083_v16, %v2581_v0  ;;  %v1420_v38 = vrot.slane %v1419_v10, 4  ;;  %v1433_v9 = vsel %vm284_vm0, %v192_v30, -inf  ;;  %v1407_v45 = vmax.f32 %v1405_v12, %v1406_v13 }
  0xbb   :  { %v2585_v18 = vsel %vm2584_vm7, %v7085_v11, %v2583_v3  ;;  %v1414_v51 = vmax.f32 %v1412_v7, %v1413_v35  ;;  %v1427_v53 = vrot.slane %v1426_v14, 4  ;;  %v1434_v15 = vrot.slane %v1433_v9, 4 }
  0xbc   :  { %v7116_v17 = vsel %vm2586_vm8, %v7096_v41, %v2585_v18  ;;  %v1421_v28 = vmax.f32 %v1419_v10, %v1420_v38  ;;  %v1440_v50 = vsel %vm284_vm0, %v193_v37, -inf  ;;  %v11320_v36 = vmov 0.0  }
  0xbd   :  { %11540 = vst [vmem:[#allocation42_spill] sm:$0xff] %v7116_v17  ;;  %v5640_v22 = vpack.i.bf16 %v7116_v17, %v11320_v36  ;;  %v1408_v63 = vrot.slane %v1407_v45, 2  ;;  %v1415_v46 = vrot.slane %v1414_v51, 2  ;;  %v1428_v56 = vmax.f32 %v1426_v14, %v1427_v53  ;;  %v196_v14 = vld [vmem:[%s11292_s0 + $0x150] sm:$0x3] }
  0xbe   :  { %v1422_v24 = vrot.slane %v1421_v28, 2  ;;  %v1435_v48 = vmax.f32 %v1433_v9, %v1434_v15  ;;  %v1441_v30 = vrot.slane %v1440_v50, 4  ;;  %v1447_v7 = vsel %vm284_vm0, %v194_v52, -inf  ;;  %v197_v9 = vld [vmem:[%s11292_s0 + $0x152] sm:$0x3] }
  0xbf   :  { %5641 = vrot.lane.b32.xlu0 %v5640_v22, %s6271_s12  ;;  %v1409_v19 = vmax.f32 %v1407_v45, %v1408_v63  ;;  %v1416_v12 = vmax.f32 %v1414_v51, %v1415_v46  ;;  %v1454_v0 = vsel %vm284_vm0, %v195_v61, -inf  ;;  %v1429_v37 = vrot.slane %v1428_v56, 2  ;;  %v198_v22 = vld [vmem:[%s11292_s0 + $0x154] sm:$0x3] }
  0xc0   :  { %v1423_v13 = vmax.f32 %v1421_v28, %v1422_v24  ;;  %v1436_v35 = vrot.slane %v1435_v48, 2  ;;  %v1442_v10 = vmax.f32 %v1440_v50, %v1441_v30  ;;  %v1448_v18 = vrot.slane %v1447_v7, 4 }
  0xc1   :  { %v1410_v3 = vrot.slane %v1409_v19, 1  ;;  %v1417_v38 = vrot.slane %v1416_v12, 1  ;;  %v1455_v36 = vrot.slane %v1454_v0, 4  ;;  %v1430_v51 = vmax.f32 %v1428_v56, %v1429_v37  ;;  %v199_v56 = vld [vmem:[%s11292_s0 + $0x156] sm:$0x3] }
  0xc2   :  { %v1424_v45 = vrot.slane %v1423_v13, 1  ;;  %v1437_v53 = vmax.f32 %v1435_v48, %v1436_v35  ;;  %v1443_v52 = vrot.slane %v1442_v10, 2  ;;  %v1449_v15 = vmax.f32 %v1447_v7, %v1448_v18  ;;  %v200_v35 = vld [vmem:[%s11292_s0 + $0x158] sm:$0x3] }
  0xc3   :  { %v7136_v61 = vmax.f32 %v1409_v19, %v1410_v3  ;;  %v7138_v28 = vmax.f32 %v1416_v12, %v1417_v38  ;;  %v1456_v50 = vmax.f32 %v1454_v0, %v1455_v36  ;;  %v1431_v46 = vrot.slane %v1430_v51, 1 }
  0xc4   :  { %v7143_v63 = vmax.f32 %v1423_v13, %v1424_v45  ;;  %v1438_v24 = vrot.slane %v1437_v53, 1  ;;  %v1444_v30 = vmax.f32 %v1442_v10, %v1443_v52  ;;  %v1450_v48 = vrot.slane %v1449_v15, 2  ;;  %v201_v10 = vld [vmem:[%s11292_s0 + $0x15a] sm:$0x3]  ;;  %v202_v52 = vld [vmem:[%s11292_s0 + $0x15c] sm:$0x3] }
  0xc5   :  { %v1457_v19 = vrot.slane %v1456_v50, 2  ;;  %v1461_v12 = vsel %vm284_vm0, %v196_v14, -inf  ;;  %v1468_v7 = vsel %vm284_vm0, %v197_v9, -inf  ;;  %v7150_v36 = vmax.f32 %v1430_v51, %v1431_v46 }
  0xc6   :  { %v7152_v0 = vmax.f32 %v1437_v53, %v1438_v24  ;;  %v1445_v37 = vrot.slane %v1444_v30, 1  ;;  %v1462_v13 = vrot.slane %v1461_v12, 4  ;;  %v1451_v3 = vmax.f32 %v1449_v15, %v1450_v48  ;;  %v203_v15 = vld [vmem:[%s11292_s0 + $0x15e] sm:$0x3] }
  0xc7   :  { %v1458_v38 = vmax.f32 %v1456_v50, %v1457_v19  ;;  %v1469_v18 = vrot.slane %v1468_v7, 4  ;;  %v1475_v14 = vsel %vm284_vm0, %v198_v22, -inf  ;;  %v1482_v53 = vsel %vm284_vm0, %v199_v56, -inf }
  0xc8   :  { %v7161_v9 = vmax.f32 %v1444_v30, %v1445_v37  ;;  %v1463_v45 = vmax.f32 %v1461_v12, %v1462_v13  ;;  %v1476_v51 = vrot.slane %v1475_v14, 4  ;;  %v1452_v46 = vrot.slane %v1451_v3, 1 }
  0xc9   :  { %v1459_v24 = vrot.slane %v1458_v38, 1  ;;  %v1470_v62 = vmax.f32 %v1468_v7, %v1469_v18  ;;  %v1483_v55 = vrot.slane %v1482_v53, 4  ;;  %v1489_v30 = vsel %vm284_vm0, %v200_v35, -inf }
  0xca   :  { %v1464_v50 = vrot.slane %v1463_v45, 2  ;;  %v1477_v22 = vmax.f32 %v1475_v14, %v1476_v51  ;;  %v1496_v48 = vsel %vm284_vm0, %v201_v10, -inf  ;;  %v7172_v19 = vmax.f32 %v1451_v3, %v1452_v46  ;;  %v204_v3 = vld [vmem:[%s11292_s0 + $0x160] sm:$0x3] }
  0xcb   :  { %v7174_v56 = vmax.f32 %v1458_v38, %v1459_v24  ;;  %v1471_v12 = vrot.slane %v1470_v62, 2  ;;  %v1484_v37 = vmax.f32 %v1482_v53, %v1483_v55  ;;  %v1490_v7 = vrot.slane %v1489_v30, 4 }
  0xcc   :  { %v1465_v13 = vmax.f32 %v1463_v45, %v1464_v50  ;;  %v1478_v54 = vrot.slane %v1477_v22, 2  ;;  %v1497_v18 = vrot.slane %v1496_v48, 4  ;;  %v1503_v26 = vsel %vm284_vm0, %v202_v52, -inf  ;;  %v205_v52 = vld [vmem:[%s11292_s0 + $0x162] sm:$0x3] }
  0xcd   :  { %v1472_v47 = vmax.f32 %v1470_v62, %v1471_v12  ;;  %v1485_v57 = vrot.slane %v1484_v37, 2  ;;  %v1510_v14 = vsel %vm284_vm0, %v203_v15, -inf  ;;  %v1491_v25 = vmax.f32 %v1489_v30, %v1490_v7  ;;  %v207_v7 = vld [vmem:[%s11292_s0 + $0x166] sm:$0x3] }
  0xce   :  { %v1466_v51 = vrot.slane %v1465_v13, 1  ;;  %v1479_v35 = vmax.f32 %v1477_v22, %v1478_v54  ;;  %v1498_v10 = vmax.f32 %v1496_v48, %v1497_v18  ;;  %v1504_v45 = vrot.slane %v1503_v26, 4  ;;  %v206_v54 = vld [vmem:[%s11292_s0 + $0x164] sm:$0x3] }
  0xcf   :  { %v1473_v38 = vrot.slane %v1472_v47, 1  ;;  %v1486_v55 = vmax.f32 %v1484_v37, %v1485_v57  ;;  %v1511_v53 = vrot.slane %v1510_v14, 4  ;;  %v1492_v24 = vrot.slane %v1491_v25, 2 }
  0xd0   :  { %v7181_v46 = vmax.f32 %v1465_v13, %v1466_v51  ;;  %v1480_v62 = vrot.slane %v1479_v35, 1  ;;  %v1499_v50 = vrot.slane %v1498_v10, 2  ;;  %v1505_v30 = vmax.f32 %v1503_v26, %v1504_v45 }
  0xd1   :  { %v7189_v15 = vmax.f32 %v1472_v47, %v1473_v38  ;;  %v1487_v22 = vrot.slane %v1486_v55, 1  ;;  %v1512_v57 = vmax.f32 %v1510_v14, %v1511_v53  ;;  %v1493_v12 = vmax.f32 %v1491_v25, %v1492_v24  ;;  %v208_v25 = vld [vmem:[%s11292_s0 + $0x168] sm:$0x3] }
  0xd2   :  { %v7191_v48 = vmax.f32 %v1479_v35, %v1480_v62  ;;  %v1500_v37 = vmax.f32 %v1498_v10, %v1499_v50  ;;  %v1517_v13 = vsel %vm284_vm0, %v204_v3, -inf  ;;  %v1506_v51 = vrot.slane %v1505_v30, 2  ;;  %v209_v35 = vld [vmem:[%s11292_s0 + $0x16a] sm:$0x3] }
  0xd3   :  { %v7197_v18 = vmax.f32 %v1486_v55, %v1487_v22  ;;  %v1513_v58 = vrot.slane %v1512_v57, 2  ;;  %v1518_v5 = vrot.slane %v1517_v13, 4  ;;  %v1494_v47 = vrot.slane %v1493_v12, 1 }
  0xd4   :  { %v1501_v38 = vrot.slane %v1500_v37, 1  ;;  %v1524_v26 = vsel %vm284_vm0, %v205_v52, -inf  ;;  %v1531_v14 = vsel %vm284_vm0, %v206_v54, -inf  ;;  %v1507_v10 = vmax.f32 %v1505_v30, %v1506_v51  ;;  %v210_v52 = vld [vmem:[%s11292_s0 + $0x16c] sm:$0x3] }
  0xd5   :  { %v1514_v3 = vmax.f32 %v1512_v57, %v1513_v58  ;;  %v1519_v55 = vmax.f32 %v1517_v13, %v1518_v5  ;;  %v1525_v45 = vrot.slane %v1524_v26, 4  ;;  %v7207_v53 = vmax.f32 %v1493_v12, %v1494_v47  ;;  %v211_v58 = vld [vmem:[%s11292_s0 + $0x16e] sm:$0x3] }
  0xd6   :  { %v7209_v62 = vmax.f32 %v1500_v37, %v1501_v38  ;;  %v1532_v24 = vrot.slane %v1531_v14, 4  ;;  %v1538_v50 = vsel %vm284_vm0, %v207_v7, -inf  ;;  %v1508_v54 = vrot.slane %v1507_v10, 1 }
  0xd7   :  { %v1515_v22 = vrot.slane %v1514_v3, 1  ;;  %v1520_v39 = vrot.slane %v1519_v55, 2  ;;  %v1526_v32 = vmax.f32 %v1524_v26, %v1525_v45  ;;  %v1539_v30 = vrot.slane %v1538_v50, 4 }
  0xd8   :  { %v1533_v5 = vmax.f32 %v1531_v14, %v1532_v24  ;;  %v1545_v57 = vsel %vm284_vm0, %v208_v25, -inf  ;;  %v1552_v12 = vsel %vm284_vm0, %v209_v35, -inf  ;;  %v7220_v37 = vmax.f32 %v1507_v10, %v1508_v54  ;;  %v212_v25 = vld [vmem:[%s11292_s0 + $0x170] sm:$0x3] }
  0xd9   :  { %v7222_v13 = vmax.f32 %v1514_v3, %v1515_v22  ;;  %v1521_v7 = vmax.f32 %v1519_v55, %v1520_v39  ;;  %v1527_v51 = vrot.slane %v1526_v32, 2  ;;  %v1540_v38 = vmax.f32 %v1538_v50, %v1539_v30 }
  0xda   :  { %v1534_v47 = vrot.slane %v1533_v5, 2  ;;  %v1546_v31 = vrot.slane %v1545_v57, 4  ;;  %v1553_v26 = vrot.slane %v1552_v12, 4  ;;  %v1559_v29 = vsel %vm284_vm0, %v210_v52, -inf }
  0xdb   :  { %v1522_v45 = vrot.slane %v1521_v7, 1  ;;  %v1528_v60 = vmax.f32 %v1526_v32, %v1527_v51  ;;  %v1566_v14 = vsel %vm284_vm0, %v211_v58, -inf  ;;  %v1541_v10 = vrot.slane %v1540_v38, 2  ;;  %v213_v32 = vld [vmem:[%s11292_s0 + $0x172] sm:$0x3] }
  0xdc   :  { %v1535_v35 = vmax.f32 %v1533_v5, %v1534_v47  ;;  %v1547_v3 = vmax.f32 %v1545_v57, %v1546_v31  ;;  %v1554_v24 = vmax.f32 %v1552_v12, %v1553_v26  ;;  %v1560_v50 = vrot.slane %v1559_v29, 4  ;;  %v214_v57 = vld [vmem:[%s11292_s0 + $0x174] sm:$0x3] }
  0xdd   :  { %v7229_v39 = vmax.f32 %v1521_v7, %v1522_v45  ;;  %v1529_v55 = vrot.slane %v1528_v60, 1  ;;  %v1567_v54 = vrot.slane %v1566_v14, 4  ;;  %v1542_v22 = vmax.f32 %v1540_v38, %v1541_v10 }
  0xde   :  { %v1536_v52 = vrot.slane %v1535_v35, 1  ;;  %v1548_v58 = vrot.slane %v1547_v3, 2  ;;  %v1555_v30 = vrot.slane %v1554_v24, 2  ;;  %v1561_v40 = vmax.f32 %v1559_v29, %v1560_v50  ;;  %v215_v29 = vld [vmem:[%s11292_s0 + $0x176] sm:$0x3] }
  0xdf   :  { %v7234_v51 = vmax.f32 %v1528_v60, %v1529_v55  ;;  %v1568_v5 = vmax.f32 %v1566_v14, %v1567_v54  ;;  %v1573_v31 = vsel %vm284_vm0, %v212_v25, -inf  ;;  %v1543_v7 = vrot.slane %v1542_v22, 1 }
  0xe0   :  { %v7240_v12 = vmax.f32 %v1535_v35, %v1536_v52  ;;  %v1549_v47 = vmax.f32 %v1547_v3, %v1548_v58  ;;  %v1556_v26 = vmax.f32 %v1554_v24, %v1555_v30  ;;  %v1562_v45 = vrot.slane %v1561_v40, 2  ;;  %v216_v35 = vld [vmem:[%s11292_s0 + $0x178] sm:$0x3] }
  0xe1   :  { %v1569_v4 = vrot.slane %v1568_v5, 2  ;;  %v1574_v38 = vrot.slane %v1573_v31, 4  ;;  %v1580_v10 = vsel %vm284_vm0, %v213_v32, -inf  ;;  %v7246_v60 = vmax.f32 %v1542_v22, %v1543_v7  ;;  %v217_v22 = vld [vmem:[%s11292_s0 + $0x17a] sm:$0x3] }
  0xe2   :  { %v1550_v14 = vrot.slane %v1549_v47, 1  ;;  %v1557_v25 = vrot.slane %v1556_v26, 1  ;;  %v1581_v55 = vrot.slane %v1580_v10, 4  ;;  %v1563_v3 = vmax.f32 %v1561_v40, %v1562_v45 }
  0xe3   :  { %v1570_v24 = vmax.f32 %v1568_v5, %v1569_v4  ;;  %v1575_v50 = vmax.f32 %v1573_v31, %v1574_v38  ;;  %v1587_v54 = vsel %vm284_vm0, %v214_v57, -inf  ;;  %v1594_v33 = vsel %vm284_vm0, %v215_v29, -inf  ;;  %v218_v4 = vld [vmem:[%s11292_s0 + $0x17c] sm:$0x3] }
  0xe4   :  { %v7252_v52 = vmax.f32 %v1549_v47, %v1550_v14  ;;  %v7254_v32 = vmax.f32 %v1556_v26, %v1557_v25  ;;  %v1582_v58 = vmax.f32 %v1580_v10, %v1581_v55  ;;  %v1588_v30 = vrot.slane %v1587_v54, 4  ;;  %v219_v10 = vld [vmem:[%s11292_s0 + $0x17e] sm:$0x3] }
  0xe5   :  { %v1564_v7 = vrot.slane %v1563_v3, 1  ;;  %v1571_v42 = vrot.slane %v1570_v24, 1  ;;  %v1576_v1 = vrot.slane %v1575_v50, 2  ;;  %v1595_v31 = vrot.slane %v1594_v33, 4 }
  0xe6   :  { %v1583_v40 = vrot.slane %v1582_v58, 2  ;;  %v1589_v5 = vmax.f32 %v1587_v54, %v1588_v30  ;;  %v1601_v57 = vsel %vm284_vm0, %v216_v35, -inf  ;;  %v1608_v55 = vsel %vm284_vm0, %v217_v22, -inf }
  0xe7   :  { %v7264_v47 = vmax.f32 %v1563_v3, %v1564_v7  ;;  %v7266_v26 = vmax.f32 %v1570_v24, %v1571_v42  ;;  %v1577_v45 = vmax.f32 %v1575_v50, %v1576_v1  ;;  %v1602_v38 = vrot.slane %v1601_v57, 4 }
  0xe8   :  { %v1584_v29 = vmax.f32 %v1582_v58, %v1583_v40  ;;  %v1590_v14 = vrot.slane %v1589_v5, 2  ;;  %v1596_v25 = vmax.f32 %v1594_v33, %v1595_v31  ;;  %v1609_v30 = vrot.slane %v1608_v55, 4 }
  0xe9   :  { %v1578_v34 = vrot.slane %v1577_v45, 1  ;;  %v1603_v54 = vmax.f32 %v1601_v57, %v1602_v38  ;;  %v1615_v35 = vsel %vm284_vm0, %v218_v4, -inf  ;;  %v1622_v23 = vsel %vm284_vm0, %v219_v10, -inf }
  0xea   :  { %v1585_v3 = vrot.slane %v1584_v29, 1  ;;  %v1591_v7 = vmax.f32 %v1589_v5, %v1590_v14  ;;  %v1597_v42 = vrot.slane %v1596_v25, 2  ;;  %v1616_v24 = vrot.slane %v1615_v35, 4 }
  0xeb   :  { %v1579_v1 = vmax.f32 %v1577_v45, %v1578_v34  ;;  %v1604_v50 = vrot.slane %v1603_v54, 2  ;;  %v1610_v20 = vmax.f32 %v1608_v55, %v1609_v30  ;;  %v1623_v2 = vrot.slane %v1622_v23, 4 }
  0xec   :  { %v1586_v21 = vmax.f32 %v1584_v29, %v1585_v3  ;;  %v1592_v58 = vrot.slane %v1591_v7, 1  ;;  %v1598_v40 = vmax.f32 %v1596_v25, %v1597_v42  ;;  %v1617_v33 = vmax.f32 %v1615_v35, %v1616_v24 }
  0xed   :  { %v1605_v31 = vmax.f32 %v1603_v54, %v1604_v50  ;;  %v1611_v22 = vrot.slane %v1610_v20, 2  ;;  %v2318_v57 = vsel %vm11499_vm1, %v7136_v61, -inf  ;;  %v2319_v34 = vsel %vm11499_vm1, %v7181_v46, -inf }
  0xee   :  { %v1593_v4 = vmax.f32 %v1591_v7, %v1592_v58  ;;  %v1599_v38 = vrot.slane %v1598_v40, 1  ;;  %v1618_v5 = vrot.slane %v1617_v33, 2  ;;  %v1624_v55 = vmax.f32 %v1622_v23, %v1623_v2 }
  0xef   :  { %v1606_v45 = vrot.slane %v1605_v31, 1  ;;  %v1612_v14 = vmax.f32 %v1610_v20, %v1611_v22  ;;  %v7278_v10 = vmax.f32 %v2318_v57, %v2319_v34  ;;  %v2321_v54 = vsel %vm11499_vm1, %v7138_v28, -inf }
  0xf0   :  { %v1600_v29 = vmax.f32 %v1598_v40, %v1599_v38  ;;  %v1619_v25 = vmax.f32 %v1617_v33, %v1618_v5  ;;  %v2322_v30 = vsel %vm11499_vm1, %v7189_v15, -inf  ;;  %v1625_v3 = vrot.slane %v1624_v55, 2 }
  0xf1   :  { %11541 = vst [vmem:[#allocation43_spill] sm:$0xff] %v7278_v10  ;;  %v1607_v61 = vmax.f32 %v1605_v31, %v1606_v45  ;;  %v1613_v35 = vrot.slane %v1612_v14, 1  ;;  %v7284_v7 = vmax.f32 %v2321_v54, %v2322_v30  ;;  %v2324_v20 = vsel %vm11499_vm1, %v7143_v63, -inf }
  0xf2   :  { %v1620_v42 = vrot.slane %v1619_v25, 1  ;;  %v2325_v2 = vsel %vm11499_vm1, %v7191_v48, -inf  ;;  %v2327_v23 = vsel %vm11499_vm1, %v7150_v36, -inf  ;;  %v1626_v28 = vmax.f32 %v1624_v55, %v1625_v3 }
  0xf3   :  { %11542 = vst [vmem:[#allocation44_spill] sm:$0xff] %v7284_v7  ;;  %v1614_v46 = vmax.f32 %v1612_v14, %v1613_v35  ;;  %v7292_v24 = vmax.f32 %v2324_v20, %v2325_v2  ;;  %v2328_v15 = vsel %vm11499_vm1, %v7197_v18, -inf  ;;  %v2330_v40 = vsel %vm11499_vm1, %v7152_v0, -inf }
  0xf4   :  { %v1621_v50 = vmax.f32 %v1619_v25, %v1620_v42  ;;  %v7296_v58 = vmax.f32 %v2327_v23, %v2328_v15  ;;  %v2331_v63 = vsel %vm11499_vm1, %v7207_v53, -inf  ;;  %v1627_v48 = vrot.slane %v1626_v28, 1  ;;  %v111_v15 = vld [vmem:[%s11292_s0 + $0xa6] sm:$0x3] }
  0xf5   :  { %11543 = vst [vmem:[#allocation45_spill] sm:$0xff] %v7292_v24  ;;  %v7302_v33 = vmax.f32 %v2330_v40, %v2331_v63  ;;  %v2333_v36 = vsel %vm11499_vm1, %v7161_v9, -inf  ;;  %v2334_v31 = vsel %vm11499_vm1, %v7209_v62, -inf  ;;  %v2336_v18 = vsel %vm11499_vm1, %v7172_v19, -inf }
  0xf6   :  { %11544 = vst [vmem:[#allocation46_spill] sm:$0xff] %v7296_v58  ;;  %v7308_v22 = vmax.f32 %v2333_v36, %v2334_v31  ;;  %v2337_v0 = vsel %vm11499_vm1, %v7220_v37, -inf  ;;  %v2339_v53 = vsel %vm11499_vm1, %v7174_v56, -inf  ;;  %v1628_v57 = vmax.f32 %v1626_v28, %v1627_v48 }
  0xf7   :  { %11545 = vst [vmem:[#allocation47_spill] sm:$0xff] %v7302_v33  ;;  %v7316_v38 = vmax.f32 %v2336_v18, %v2337_v0  ;;  %v2340_v9 = vsel %vm11499_vm1, %v7222_v13, -inf  ;;  %v2342_v62 = vsel %vm11499_vm1, %v7229_v39, -inf  ;;  %v2343_v34 = vsel %vm11499_vm1, %v1579_v1, -inf }
  0xf8   :  { %11546 = vst [vmem:[#allocation48_spill] sm:$0xff] %v7308_v22  ;;  %v7322_v5 = vmax.f32 %v2339_v53, %v2340_v9  ;;  %v2345_v19 = vsel %vm11499_vm1, %v7234_v51, -inf  ;;  %v2346_v37 = vsel %vm11499_vm1, %v1586_v21, -inf  ;;  %v7328_v45 = vmax.f32 %v2342_v62, %v2343_v34  ;;  %v112_v53 = vld [vmem:[%s11292_s0 + $0xa8] sm:$0x3] }
  0xf9   :  { %11547 = vst [vmem:[#allocation49_spill] sm:$0xff] %v7316_v38  ;;  %v7330_v56 = vmax.f32 %v2345_v19, %v2346_v37  ;;  %v2348_v14 = vsel %vm11499_vm1, %v7240_v12, -inf  ;;  %v2349_v13 = vsel %vm11499_vm1, %v1593_v4, -inf  ;;  %v2351_v39 = vsel %vm11499_vm1, %v7246_v60, -inf  ;;  %v108_v4 = vld [vmem:[%s11292_s0 + $0xa0] sm:$0x3] }
  0xfa   :  { %11548 = vst [vmem:[#allocation50_spill] sm:$0xff] %v7322_v5  ;;  %v7335_v55 = vmax.f32 %v2348_v14, %v2349_v13  ;;  %v2352_v1 = vsel %vm11499_vm1, %v1600_v29, -inf  ;;  %v2354_v51 = vsel %vm11499_vm1, %v7252_v52, -inf  ;;  %v2355_v25 = vsel %vm11499_vm1, %v1607_v61, -inf  ;;  %v109_v61 = vld [vmem:[%s11292_s0 + $0xa2] sm:$0x3] }
  0xfb   :  { %11549 = vst [vmem:[#allocation51_spill] sm:$0xff] %v7328_v45  ;;  %v7342_v21 = vmax.f32 %v2351_v39, %v2352_v1  ;;  %v2357_v54 = vsel %vm11499_vm1, %v7254_v32, -inf  ;;  %v2358_v12 = vsel %vm11499_vm1, %v1614_v46, -inf  ;;  %v7351_v30 = vmax.f32 %v2354_v51, %v2355_v25  ;;  %v113_v39 = vld [vmem:[%s11292_s0 + $0xaa] sm:$0x3] }
  0xfc   :  { %11550 = vst [vmem:[#allocation52_spill] sm:$0xff] %v7330_v56  ;;  %v7353_v60 = vmax.f32 %v2357_v54, %v2358_v12  ;;  %v2360_v52 = vsel %vm11499_vm1, %v7264_v47, -inf  ;;  %v2361_v29 = vsel %vm11499_vm1, %v1621_v50, -inf  ;;  %v2363_v35 = vsel %vm11499_vm1, %v7266_v26, -inf  ;;  %v110_v47 = vld [vmem:[%s11292_s0 + $0xa4] sm:$0x3] }
  0xfd   :  { %11551 = vst [vmem:[#allocation53_spill] sm:$0xff] %v7335_v55  ;;  %v7361_v32 = vmax.f32 %v2360_v52, %v2361_v29  ;;  %v2364_v3 = vsel %vm11499_vm1, %v1628_v57, -inf  ;;  %v2644_v42 = vsel %vm2574_vm2, %v7284_v7, %v7278_v10  ;;  %v2651_v23 = vsel %vm2574_vm2, %v7330_v56, %v7328_v45  ;;  %v114_v1 = vld [vmem:[%s11292_s0 + $0xac] sm:$0x3] }
  0xfe   :  { %11552 = vst [vmem:[#allocation54_spill] sm:$0xff] %v7342_v21  ;;  %v7372_v20 = vmax.f32 %v2363_v35, %v2364_v3  ;;  %v2645_v2 = vsel %vm2576_vm3, %v7292_v24, %v2644_v42  ;;  %v845_v26 = vsel %vm284_vm0, %v108_v4, -inf  ;;  %v2652_v28 = vsel %vm2576_vm3, %v7335_v55, %v2651_v23 }
  0xff   :  { %11553 = vst [vmem:[#allocation55_spill] sm:$0xff] %v7351_v30  ;;  %v2646_v46 = vsel %vm2578_vm4, %v7296_v58, %v2645_v2  ;;  %v846_v50 = vrot.slane %v845_v26, 4  ;;  %v852_v40 = vsel %vm284_vm0, %v109_v61, -inf  ;;  %v2653_v48 = vsel %vm2578_vm4, %v7342_v21, %v2652_v28  ;;  %v115_v61 = vld [vmem:[%s11292_s0 + $0xae] sm:$0x3] }
 0x100   :  { %11554 = vst [vmem:[#allocation56_spill] sm:$0xff] %v7353_v60  ;;  %v2647_v63 = vsel %vm2580_vm5, %v7302_v33, %v2646_v46  ;;  %v853_v36 = vrot.slane %v852_v40, 4  ;;  %v859_v31 = vsel %vm284_vm0, %v110_v47, -inf  ;;  %v2654_v0 = vsel %vm2580_vm5, %v7351_v30, %v2653_v48 }
 0x101   :  { %11555 = vst [vmem:[#allocation57_spill] sm:$0xff] %v7361_v32  ;;  %v2648_v18 = vsel %vm2582_vm6, %v7308_v22, %v2647_v63  ;;  %v847_v57 = vmax.f32 %v845_v26, %v846_v50  ;;  %v860_v9 = vrot.slane %v859_v31, 4  ;;  %v2655_v34 = vsel %vm2582_vm6, %v7353_v60, %v2654_v0 }
 0x102   :  { %11556 = vst [vmem:[#allocation58_spill] sm:$0xff] %v7372_v20  ;;  %v2649_v62 = vsel %vm2584_vm7, %v7316_v38, %v2648_v18  ;;  %v854_v19 = vmax.f32 %v852_v40, %v853_v36  ;;  %v866_v37 = vsel %vm284_vm0, %v111_v15, -inf  ;;  %v2656_v13 = vsel %vm2584_vm7, %v7361_v32, %v2655_v34  ;;  %v116_v40 = vld [vmem:[%s11292_s0 + $0xb0] sm:$0x3] }
 0x103   :  { %v7407_v14 = vsel %vm2586_vm8, %v7322_v5, %v2649_v62  ;;  %v848_v51 = vrot.slane %v847_v57, 2  ;;  %v861_v25 = vmax.f32 %v859_v31, %v860_v9  ;;  %v7419_v54 = vsel %vm2586_vm8, %v7372_v20, %v2656_v13  ;;  %v117_v9 = vld [vmem:[%s11292_s0 + $0xb2] sm:$0x3]  ;;  %v118_v62 = vld [vmem:[%s11292_s0 + $0xb4] sm:$0x3] }
 0x104   :  { %11557 = vst [vmem:[#allocation59_spill] sm:$0xff] %v7407_v14  ;;  %v855_v12 = vrot.slane %v854_v19, 2  ;;  %v867_v4 = vrot.slane %v866_v37, 4  ;;  %v873_v52 = vsel %vm284_vm0, %v112_v53, -inf  ;;  %v7424_v29 = vpack.i.bf16 %v7419_v54, %v7407_v14 }
 0x105   :  { %11558 = vst [vmem:[#allocation60_spill] sm:$0xff] %v7419_v54  ;;  %v849_v35 = vmax.f32 %v847_v57, %v848_v51  ;;  %v862_v3 = vrot.slane %v861_v25, 2  ;;  %v874_v42 = vrot.slane %v873_v52, 4  ;;  %v880_v23 = vsel %vm284_vm0, %v113_v39, -inf }
 0x106   :  { %11559 = vst [vmem:[#allocation61_spill] sm:$0xff] %v7424_v29  ;;  %v856_v47 = vmax.f32 %v854_v19, %v855_v12  ;;  %v868_v2 = vmax.f32 %v866_v37, %v867_v4  ;;  %v887_v26 = vsel %vm284_vm0, %v114_v1, -inf  ;;  %5666 = vrot.lane.b32.xlu2 %v7424_v29, %s6271_s12  ;;  %v881_v50 = vrot.slane %v880_v23, 4 }
 0x107   :  { %v850_v46 = vrot.slane %v849_v35, 1  ;;  %v863_v28 = vmax.f32 %v861_v25, %v862_v3  ;;  %v875_v15 = vmax.f32 %v873_v52, %v874_v42  ;;  %v888_v36 = vrot.slane %v887_v26, 4 }
 0x108   :  { %v857_v63 = vrot.slane %v856_v47, 1  ;;  %v869_v48 = vrot.slane %v868_v2, 2  ;;  %v894_v31 = vsel %vm284_vm0, %v115_v61, -inf  ;;  %v882_v57 = vmax.f32 %v880_v23, %v881_v50 }
 0x109   :  { %v7437_v18 = vmax.f32 %v849_v35, %v850_v46  ;;  %v864_v0 = vrot.slane %v863_v28, 1  ;;  %v876_v53 = vrot.slane %v875_v15, 2  ;;  %v889_v37 = vmax.f32 %v887_v26, %v888_v36  ;;  %v119_v35 = vld [vmem:[%s11292_s0 + $0xb6] sm:$0x3] }
 0x10a   :  { %v7445_v34 = vmax.f32 %v856_v47, %v857_v63  ;;  %v870_v19 = vmax.f32 %v868_v2, %v869_v48  ;;  %v895_v13 = vrot.slane %v894_v31, 4  ;;  %v883_v51 = vrot.slane %v882_v57, 2 }
 0x10b   :  { %v7447_v39 = vmax.f32 %v863_v28, %v864_v0  ;;  %v877_v1 = vmax.f32 %v875_v15, %v876_v53  ;;  %v901_v25 = vsel %vm284_vm0, %v116_v40, -inf  ;;  %v890_v4 = vrot.slane %v889_v37, 2  ;;  %v120_v15 = vld [vmem:[%s11292_s0 + $0xb8] sm:$0x3] }
 0x10c   :  { %v871_v12 = vrot.slane %v870_v19, 1  ;;  %v896_v52 = vmax.f32 %v894_v31, %v895_v13  ;;  %v902_v61 = vrot.slane %v901_v25, 4  ;;  %v884_v42 = vmax.f32 %v882_v57, %v883_v51  ;;  %v121_v57 = vld [vmem:[%s11292_s0 + $0xba] sm:$0x3] }
 0x10d   :  { %v878_v3 = vrot.slane %v877_v1, 1  ;;  %v908_v47 = vsel %vm284_vm0, %v117_v9, -inf  ;;  %v915_v2 = vsel %vm284_vm0, %v118_v62, -inf  ;;  %v891_v26 = vmax.f32 %v889_v37, %v890_v4  ;;  %v122_v9 = vld [vmem:[%s11292_s0 + $0xbc] sm:$0x3] }
 0x10e   :  { %v7455_v23 = vmax.f32 %v870_v19, %v871_v12  ;;  %v897_v46 = vrot.slane %v896_v52, 2  ;;  %v903_v28 = vmax.f32 %v901_v25, %v902_v61  ;;  %v885_v40 = vrot.slane %v884_v42, 1  ;;  %v123_v4 = vld [vmem:[%s11292_s0 + $0xbe] sm:$0x3] }
 0x10f   :  { %v7460_v50 = vmax.f32 %v877_v1, %v878_v3  ;;  %v909_v63 = vrot.slane %v908_v47, 4  ;;  %v916_v48 = vrot.slane %v915_v2, 4  ;;  %v892_v36 = vrot.slane %v891_v26, 1 }
 0x110   :  { %v898_v31 = vmax.f32 %v896_v52, %v897_v46  ;;  %v904_v0 = vrot.slane %v903_v28, 2  ;;  %v922_v53 = vsel %vm284_vm0, %v119_v35, -inf  ;;  %v7469_v62 = vmax.f32 %v884_v42, %v885_v40 }
 0x111   :  { %v910_v19 = vmax.f32 %v908_v47, %v909_v63  ;;  %v917_v37 = vmax.f32 %v915_v2, %v916_v48  ;;  %v923_v13 = vrot.slane %v922_v53, 4  ;;  %v7471_v1 = vmax.f32 %v891_v26, %v892_v36  ;;  %v124_v26 = vld [vmem:[%s11292_s0 + $0xc0] sm:$0x3] }
 0x112   :  { %v899_v51 = vrot.slane %v898_v31, 1  ;;  %v905_v25 = vmax.f32 %v903_v28, %v904_v0  ;;  %v929_v12 = vsel %vm284_vm0, %v120_v15, -inf  ;;  %v936_v47 = vsel %vm284_vm0, %v121_v57, -inf }
 0x113   :  { %v911_v52 = vrot.slane %v910_v19, 2  ;;  %v918_v61 = vrot.slane %v917_v37, 2  ;;  %v924_v35 = vmax.f32 %v922_v53, %v923_v13  ;;  %v930_v3 = vrot.slane %v929_v12, 4 }
 0x114   :  { %v7477_v46 = vmax.f32 %v898_v31, %v899_v51  ;;  %v906_v42 = vrot.slane %v905_v25, 1  ;;  %v943_v2 = vsel %vm284_vm0, %v122_v9, -inf  ;;  %v937_v36 = vrot.slane %v936_v47, 4  ;;  %v125_v9 = vld [vmem:[%s11292_s0 + $0xc2] sm:$0x3] }
 0x115   :  { %v912_v28 = vmax.f32 %v910_v19, %v911_v52  ;;  %v919_v15 = vmax.f32 %v917_v37, %v918_v61  ;;  %v925_v40 = vrot.slane %v924_v35, 2  ;;  %v931_v63 = vmax.f32 %v929_v12, %v930_v3  ;;  %v126_v19 = vld [vmem:[%s11292_s0 + $0xc4] sm:$0x3] }
 0x116   :  { %v7484_v48 = vmax.f32 %v905_v25, %v906_v42  ;;  %v944_v0 = vrot.slane %v943_v2, 4  ;;  %v950_v31 = vsel %vm284_vm0, %v123_v4, -inf  ;;  %v938_v37 = vmax.f32 %v936_v47, %v937_v36  ;;  %v127_v42 = vld [vmem:[%s11292_s0 + $0xc6] sm:$0x3] }
 0x117   :  { %v913_v53 = vrot.slane %v912_v28, 1  ;;  %v920_v13 = vrot.slane %v919_v15, 1  ;;  %v926_v51 = vmax.f32 %v924_v35, %v925_v40  ;;  %v932_v57 = vrot.slane %v931_v63, 2 }
 0x118   :  { %v945_v12 = vmax.f32 %v943_v2, %v944_v0  ;;  %v951_v25 = vrot.slane %v950_v31, 4  ;;  %v957_v52 = vsel %vm284_vm0, %v124_v26, -inf  ;;  %v939_v40 = vrot.slane %v938_v37, 2 }
 0x119   :  { %v7494_v61 = vmax.f32 %v912_v28, %v913_v53  ;;  %v7496_v4 = vmax.f32 %v919_v15, %v920_v13  ;;  %v927_v3 = vrot.slane %v926_v51, 1  ;;  %v933_v35 = vmax.f32 %v931_v63, %v932_v57  ;;  %v128_v28 = vld [vmem:[%s11292_s0 + $0xc8] sm:$0x3] }
 0x11a   :  { %v946_v54 = vrot.slane %v945_v12, 2  ;;  %v952_v20 = vmax.f32 %v950_v31, %v951_v25  ;;  %v958_v5 = vrot.slane %v957_v52, 4  ;;  %v964_v2 = vsel %vm284_vm0, %v125_v9, -inf }
 0x11b   :  { %v7501_v29 = vmax.f32 %v926_v51, %v927_v3  ;;  %v934_v47 = vrot.slane %v933_v35, 1  ;;  %v971_v26 = vsel %vm284_vm0, %v126_v19, -inf  ;;  %v940_v15 = vmax.f32 %v938_v37, %v939_v40  ;;  %v129_v19 = vld [vmem:[%s11292_s0 + $0xca] sm:$0x3] }
 0x11c   :  { %v947_v63 = vmax.f32 %v945_v12, %v946_v54  ;;  %v953_v36 = vrot.slane %v952_v20, 2  ;;  %v959_v0 = vmax.f32 %v957_v52, %v958_v5  ;;  %v965_v13 = vrot.slane %v964_v2, 4  ;;  %v130_v54 = vld [vmem:[%s11292_s0 + $0xcc] sm:$0x3] }
 0x11d   :  { %v7508_v53 = vmax.f32 %v933_v35, %v934_v47  ;;  %v972_v31 = vrot.slane %v971_v26, 4  ;;  %v978_v51 = vsel %vm284_vm0, %v127_v42, -inf  ;;  %v941_v57 = vrot.slane %v940_v15, 1  ;;  %v131_v47 = vld [vmem:[%s11292_s0 + $0xce] sm:$0x3] }
 0x11e   :  { %v948_v25 = vrot.slane %v947_v63, 1  ;;  %v954_v3 = vmax.f32 %v952_v20, %v953_v36  ;;  %v960_v9 = vrot.slane %v959_v0, 2  ;;  %v966_v37 = vmax.f32 %v964_v2, %v965_v13 }
 0x11f   :  { %v973_v5 = vmax.f32 %v971_v26, %v972_v31  ;;  %v979_v12 = vrot.slane %v978_v51, 4  ;;  %v985_v52 = vsel %vm284_vm0, %v128_v28, -inf  ;;  %v7518_v35 = vmax.f32 %v940_v15, %v941_v57  ;;  %v132_v15 = vld [vmem:[%s11292_s0 + $0xd0] sm:$0x3] }
 0x120   :  { %v7520_v42 = vmax.f32 %v947_v63, %v948_v25  ;;  %v955_v40 = vrot.slane %v954_v3, 1  ;;  %v961_v20 = vmax.f32 %v959_v0, %v960_v9  ;;  %v967_v36 = vrot.slane %v966_v37, 2 }
 0x121   :  { %v974_v32 = vrot.slane %v973_v5, 2  ;;  %v980_v38 = vmax.f32 %v978_v51, %v979_v12  ;;  %v986_v14 = vrot.slane %v985_v52, 4  ;;  %v992_v26 = vsel %vm284_vm0, %v129_v19, -inf }
 0x122   :  { %v7525_v60 = vmax.f32 %v954_v3, %v955_v40  ;;  %v962_v2 = vrot.slane %v961_v20, 1  ;;  %v999_v28 = vsel %vm284_vm0, %v130_v54, -inf  ;;  %v968_v63 = vmax.f32 %v966_v37, %v967_v36  ;;  %v133_v54 = vld [vmem:[%s11292_s0 + $0xd2] sm:$0x3] }
 0x123   :  { %v975_v0 = vmax.f32 %v973_v5, %v974_v32  ;;  %v981_v13 = vrot.slane %v980_v38, 2  ;;  %v987_v31 = vmax.f32 %v985_v52, %v986_v14  ;;  %v993_v25 = vrot.slane %v992_v26, 4  ;;  %v134_v32 = vld [vmem:[%s11292_s0 + $0xd4] sm:$0x3] }
 0x124   :  { %v7532_v57 = vmax.f32 %v961_v20, %v962_v2  ;;  %v1000_v51 = vrot.slane %v999_v28, 4  ;;  %v1006_v3 = vsel %vm284_vm0, %v131_v47, -inf  ;;  %v969_v9 = vrot.slane %v968_v63, 1  ;;  %v135_v2 = vld [vmem:[%s11292_s0 + $0xd6] sm:$0x3] }
 0x125   :  { %v976_v12 = vrot.slane %v975_v0, 1  ;;  %v982_v40 = vmax.f32 %v980_v38, %v981_v13  ;;  %v988_v19 = vrot.slane %v987_v31, 2  ;;  %v994_v37 = vmax.f32 %v992_v26, %v993_v25 }
 0x126   :  { %v1001_v14 = vmax.f32 %v999_v28, %v1000_v51  ;;  %v1007_v5 = vrot.slane %v1006_v3, 4  ;;  %v1013_v52 = vsel %vm284_vm0, %v132_v15, -inf  ;;  %v7542_v20 = vmax.f32 %v968_v63, %v969_v9  ;;  %v136_v63 = vld [vmem:[%s11292_s0 + $0xd8] sm:$0x3] }
 0x127   :  { %v7544_v47 = vmax.f32 %v975_v0, %v976_v12  ;;  %v983_v36 = vrot.slane %v982_v40, 1  ;;  %v989_v38 = vmax.f32 %v987_v31, %v988_v19  ;;  %v995_v13 = vrot.slane %v994_v37, 2 }
 0x128   :  { %v1002_v22 = vrot.slane %v1001_v14, 2  ;;  %v1008_v30 = vmax.f32 %v1006_v3, %v1007_v5  ;;  %v1014_v33 = vrot.slane %v1013_v52, 4  ;;  %v1020_v28 = vsel %vm284_vm0, %v133_v54, -inf }
 0x129   :  { %v7549_v21 = vmax.f32 %v982_v40, %v983_v36  ;;  %v990_v26 = vrot.slane %v989_v38, 1  ;;  %v1027_v15 = vsel %vm284_vm0, %v134_v32, -inf  ;;  %v996_v0 = vmax.f32 %v994_v37, %v995_v13  ;;  %v137_v32 = vld [vmem:[%s11292_s0 + $0xda] sm:$0x3] }
 0x12a   :  { %v1003_v31 = vmax.f32 %v1001_v14, %v1002_v22  ;;  %v1009_v25 = vrot.slane %v1008_v30, 2  ;;  %v1015_v51 = vmax.f32 %v1013_v52, %v1014_v33  ;;  %v1021_v12 = vrot.slane %v1020_v28, 4  ;;  %v138_v22 = vld [vmem:[%s11292_s0 + $0xdc] sm:$0x3] }
 0x12b   :  { %v7556_v9 = vmax.f32 %v989_v38, %v990_v26  ;;  %v1028_v3 = vrot.slane %v1027_v15, 4  ;;  %v1034_v40 = vsel %vm284_vm0, %v135_v2, -inf  ;;  %v997_v19 = vrot.slane %v996_v0, 1  ;;  %v139_v26 = vld [vmem:[%s11292_s0 + $0xde] sm:$0x3] }
 0x12c   :  { %v1004_v5 = vrot.slane %v1003_v31, 1  ;;  %v1010_v36 = vmax.f32 %v1008_v30, %v1009_v25  ;;  %v1016_v54 = vrot.slane %v1015_v51, 2  ;;  %v1022_v37 = vmax.f32 %v1020_v28, %v1021_v12 }
 0x12d   :  { %v1029_v33 = vmax.f32 %v1027_v15, %v1028_v3  ;;  %v1035_v14 = vrot.slane %v1034_v40, 4  ;;  %v1041_v52 = vsel %vm284_vm0, %v136_v63, -inf  ;;  %v7566_v38 = vmax.f32 %v996_v0, %v997_v19 }
 0x12e   :  { %v7568_v2 = vmax.f32 %v1003_v31, %v1004_v5  ;;  %v1011_v13 = vrot.slane %v1010_v36, 1  ;;  %v1017_v30 = vmax.f32 %v1015_v51, %v1016_v54  ;;  %v1023_v25 = vrot.slane %v1022_v37, 2 }
 0x12f   :  { %v1030_v58 = vrot.slane %v1029_v33, 2  ;;  %v1036_v55 = vmax.f32 %v1034_v40, %v1035_v14  ;;  %v1042_v24 = vrot.slane %v1041_v52, 4  ;;  %v1048_v15 = vsel %vm284_vm0, %v137_v32, -inf }
 0x130   :  { %v7573_v56 = vmax.f32 %v1010_v36, %v1011_v13  ;;  %v1018_v28 = vrot.slane %v1017_v30, 1  ;;  %v1055_v63 = vsel %vm284_vm0, %v138_v22, -inf  ;;  %v1024_v0 = vmax.f32 %v1022_v37, %v1023_v25 }
 0x131   :  { %v1031_v31 = vmax.f32 %v1029_v33, %v1030_v58  ;;  %v1037_v12 = vrot.slane %v1036_v55, 2  ;;  %v1043_v3 = vmax.f32 %v1041_v52, %v1042_v24  ;;  %v1049_v19 = vrot.slane %v1048_v15, 4 }
 0x132   :  { %v1019_v51 = vmax.f32 %v1017_v30, %v1018_v28  ;;  %v1056_v5 = vrot.slane %v1055_v63, 4  ;;  %v1062_v54 = vsel %vm284_vm0, %v139_v26, -inf  ;;  %v1025_v45 = vrot.slane %v1024_v0, 1 }
 0x133   :  { %v1032_v7 = vrot.slane %v1031_v31, 1  ;;  %v1038_v40 = vmax.f32 %v1036_v55, %v1037_v12  ;;  %v1044_v14 = vrot.slane %v1043_v3, 2  ;;  %v1050_v36 = vmax.f32 %v1048_v15, %v1049_v19 }
 0x134   :  { %v1057_v13 = vmax.f32 %v1055_v63, %v1056_v5  ;;  %v1063_v10 = vrot.slane %v1062_v54, 4  ;;  %v2198_v32 = vsel %vm11499_vm1, %v7437_v18, -inf  ;;  %v1026_v22 = vmax.f32 %v1024_v0, %v1025_v45 }
 0x135   :  { %v1033_v37 = vmax.f32 %v1031_v31, %v1032_v7  ;;  %v1039_v58 = vrot.slane %v1038_v40, 1  ;;  %v1045_v33 = vmax.f32 %v1043_v3, %v1044_v14  ;;  %v1051_v24 = vrot.slane %v1050_v36, 2 }
 0x136   :  { %v1058_v52 = vrot.slane %v1057_v13, 2  ;;  %v1064_v30 = vmax.f32 %v1062_v54, %v1063_v10  ;;  %v2199_v26 = vsel %vm11499_vm1, %v7484_v48, -inf  ;;  %v2201_v15 = vsel %vm11499_vm1, %v7445_v34, -inf }
 0x137   :  { %v1040_v25 = vmax.f32 %v1038_v40, %v1039_v58  ;;  %v1046_v28 = vrot.slane %v1045_v33, 1  ;;  %v7582_v55 = vmax.f32 %v2198_v32, %v2199_v26  ;;  %v1052_v63 = vmax.f32 %v1050_v36, %v1051_v24 }
 0x138   :  { %v1059_v12 = vmax.f32 %v1057_v13, %v1058_v52  ;;  %v1065_v18 = vrot.slane %v1064_v30, 2  ;;  %v2202_v7 = vsel %vm11499_vm1, %v7494_v61, -inf  ;;  %v2204_v10 = vsel %vm11499_vm1, %v7447_v39, -inf }
 0x139   :  { %11560 = vst [vmem:[#allocation62_spill] sm:$0xff] %v7582_v55  ;;  %v1047_v45 = vmax.f32 %v1045_v33, %v1046_v28  ;;  %v7588_v0 = vmax.f32 %v2201_v15, %v2202_v7  ;;  %v2205_v48 = vsel %vm11499_vm1, %v7496_v4, -inf  ;;  %v1053_v31 = vrot.slane %v1052_v63, 1 }
 0x13a   :  { %v1060_v3 = vrot.slane %v1059_v12, 1  ;;  %v1066_v19 = vmax.f32 %v1064_v30, %v1065_v18  ;;  %v7594_v5 = vmax.f32 %v2204_v10, %v2205_v48  ;;  %v2207_v34 = vsel %vm11499_vm1, %v7455_v23, -inf }
 0x13b   :  { %11561 = vst [vmem:[#allocation63_spill] sm:$0xff] %v7588_v0  ;;  %v2208_v61 = vsel %vm11499_vm1, %v7501_v29, -inf  ;;  %v2210_v54 = vsel %vm11499_vm1, %v7460_v50, -inf  ;;  %v2211_v39 = vsel %vm11499_vm1, %v7508_v53, -inf  ;;  %v1054_v40 = vmax.f32 %v1052_v63, %v1053_v31 }
 0x13c   :  { %11562 = vst [vmem:[#allocation64_spill] sm:$0xff] %v7594_v5  ;;  %v1061_v14 = vmax.f32 %v1059_v12, %v1060_v3  ;;  %v1067_v4 = vrot.slane %v1066_v19, 1  ;;  %v7604_v36 = vmax.f32 %v2207_v34, %v2208_v61  ;;  %v7606_v13 = vmax.f32 %v2210_v54, %v2211_v39  ;;  %v47_v39 = vld [vmem:[%s11292_s0 + $0x26] sm:$0x3] }
 0x13d   :  { %v2213_v32 = vsel %vm11499_vm1, %v7469_v62, -inf  ;;  %v2214_v23 = vsel %vm11499_vm1, %v7518_v35, -inf  ;;  %v2216_v29 = vsel %vm11499_vm1, %v7471_v1, -inf  ;;  %v2217_v53 = vsel %vm11499_vm1, %v7520_v42, -inf }
 0x13e   :  { %11563 = vst [vmem:[#allocation65_spill] sm:$0xff] %v7604_v36  ;;  %v1068_v50 = vmax.f32 %v1066_v19, %v1067_v4  ;;  %v7614_v58 = vmax.f32 %v2213_v32, %v2214_v23  ;;  %v2219_v33 = vsel %vm11499_vm1, %v7477_v46, -inf  ;;  %v7620_v24 = vmax.f32 %v2216_v29, %v2217_v53 }
 0x13f   :  { %11564 = vst [vmem:[#allocation66_spill] sm:$0xff] %v7606_v13  ;;  %v2220_v62 = vsel %vm11499_vm1, %v7525_v60, -inf  ;;  %v2222_v35 = vsel %vm11499_vm1, %v7532_v57, -inf  ;;  %v2223_v52 = vsel %vm11499_vm1, %v1019_v51, -inf  ;;  %v2225_v42 = vsel %vm11499_vm1, %v7542_v20, -inf }
 0x140   :  { %11565 = vst [vmem:[#allocation67_spill] sm:$0xff] %v7614_v58  ;;  %v7627_v1 = vmax.f32 %v2219_v33, %v2220_v62  ;;  %v7629_v30 = vmax.f32 %v2222_v35, %v2223_v52  ;;  %v2226_v26 = vsel %vm11499_vm1, %v1026_v22, -inf  ;;  %v2228_v28 = vsel %vm11499_vm1, %v7544_v47, -inf  ;;  %v48_v33 = vld [vmem:[%s11292_s0 + $0x28] sm:$0x3] }
 0x141   :  { %11566 = vst [vmem:[#allocation68_spill] sm:$0xff] %v7620_v24  ;;  %v7634_v46 = vmax.f32 %v2225_v42, %v2226_v26  ;;  %v2229_v60 = vsel %vm11499_vm1, %v1033_v37, -inf  ;;  %v2231_v57 = vsel %vm11499_vm1, %v7549_v21, -inf  ;;  %v2232_v15 = vsel %vm11499_vm1, %v1040_v25, -inf  ;;  %v44_v21 = vld [vmem:[%s11292_s0 + $0x20] sm:$0x3] }
 0x142   :  { %11567 = vst [vmem:[#allocation69_spill] sm:$0xff] %v7627_v1  ;;  %v7641_v51 = vmax.f32 %v2228_v28, %v2229_v60  ;;  %v2234_v63 = vsel %vm11499_vm1, %v7556_v9, -inf  ;;  %v2235_v20 = vsel %vm11499_vm1, %v1047_v45, -inf  ;;  %v7647_v22 = vmax.f32 %v2231_v57, %v2232_v15  ;;  %v49_v26 = vld [vmem:[%s11292_s0 + $0x2a] sm:$0x3] }
 0x143   :  { %11568 = vst [vmem:[#allocation70_spill] sm:$0xff] %v7629_v30  ;;  %v7649_v12 = vmax.f32 %v2234_v63, %v2235_v20  ;;  %v2237_v47 = vsel %vm11499_vm1, %v7566_v38, -inf  ;;  %v2238_v37 = vsel %vm11499_vm1, %v1054_v40, -inf  ;;  %v2240_v9 = vsel %vm11499_vm1, %v7568_v2, -inf  ;;  %v45_v38 = vld [vmem:[%s11292_s0 + $0x22] sm:$0x3] }
 0x144   :  { %11569 = vst [vmem:[#allocation71_spill] sm:$0xff] %v7634_v46  ;;  %v7657_v18 = vmax.f32 %v2237_v47, %v2238_v37  ;;  %v2241_v25 = vsel %vm11499_vm1, %v1061_v14, -inf  ;;  %v2243_v7 = vsel %vm11499_vm1, %v7573_v56, -inf  ;;  %v2244_v10 = vsel %vm11499_vm1, %v1068_v50, -inf  ;;  %v46_v56 = vld [vmem:[%s11292_s0 + $0x24] sm:$0x3] }
 0x145   :  { %11570 = vst [vmem:[#allocation72_spill] sm:$0xff] %v7641_v51  ;;  %v7667_v45 = vmax.f32 %v2240_v9, %v2241_v25  ;;  %v2616_v48 = vsel %vm2574_vm2, %v7588_v0, %v7582_v55  ;;  %v2623_v2 = vsel %vm2574_vm2, %v7634_v46, %v7629_v30  ;;  %v7679_v31 = vmax.f32 %v2243_v7, %v2244_v10  ;;  %v50_v63 = vld [vmem:[%s11292_s0 + $0x2c] sm:$0x3]  ;;  %v51_v7 = vld [vmem:[%s11292_s0 + $0x2e] sm:$0x3] }
 0x146   :  { %11571 = vst [vmem:[#allocation73_spill] sm:$0xff] %v7647_v22  ;;  %v2617_v3 = vsel %vm2576_vm3, %v7594_v5, %v2616_v48  ;;  %v2624_v19 = vsel %vm2576_vm3, %v7641_v51, %v2623_v2  ;;  %v397_v34 = vsel %vm284_vm0, %v44_v21, -inf  ;;  %v404_v14 = vsel %vm284_vm0, %v45_v38, -inf }
 0x147   :  { %11572 = vst [vmem:[#allocation74_spill] sm:$0xff] %v7649_v12  ;;  %v2618_v61 = vsel %vm2578_vm4, %v7604_v36, %v2617_v3  ;;  %v2625_v54 = vsel %vm2578_vm4, %v7647_v22, %v2624_v19  ;;  %v398_v40 = vrot.slane %v397_v34, 4  ;;  %v405_v23 = vrot.slane %v404_v14, 4 }
 0x148   :  { %11573 = vst [vmem:[#allocation75_spill] sm:$0xff] %v7657_v18  ;;  %v2619_v4 = vsel %vm2580_vm5, %v7606_v13, %v2618_v61  ;;  %v2626_v32 = vsel %vm2580_vm5, %v7649_v12, %v2625_v54  ;;  %v411_v29 = vsel %vm284_vm0, %v46_v56, -inf  ;;  %v418_v60 = vsel %vm284_vm0, %v47_v39, -inf }
 0x149   :  { %11574 = vst [vmem:[#allocation76_spill] sm:$0xff] %v7667_v45  ;;  %v2620_v50 = vsel %vm2582_vm6, %v7614_v58, %v2619_v4  ;;  %v2627_v53 = vsel %vm2582_vm6, %v7657_v18, %v2626_v32  ;;  %v399_v62 = vmax.f32 %v397_v34, %v398_v40  ;;  %v412_v35 = vrot.slane %v411_v29, 4 }
 0x14a   :  { %11575 = vst [vmem:[#allocation77_spill] sm:$0xff] %v7679_v31  ;;  %v2621_v52 = vsel %vm2584_vm7, %v7620_v24, %v2620_v50  ;;  %v2628_v42 = vsel %vm2584_vm7, %v7667_v45, %v2627_v53  ;;  %v406_v28 = vmax.f32 %v404_v14, %v405_v23  ;;  %v419_v9 = vrot.slane %v418_v60, 4  ;;  %v52_v14 = vld [vmem:[%s11292_s0 + $0x30] sm:$0x3] }
 0x14b   :  { %v7716_v57 = vsel %vm2586_vm8, %v7627_v1, %v2621_v52  ;;  %v7720_v15 = vsel %vm2586_vm8, %v7679_v31, %v2628_v42  ;;  %v400_v20 = vrot.slane %v399_v62, 2  ;;  %v413_v47 = vmax.f32 %v411_v29, %v412_v35  ;;  %v53_v35 = vld [vmem:[%s11292_s0 + $0x32] sm:$0x3]  ;;  %v54_v52 = vld [vmem:[%s11292_s0 + $0x34] sm:$0x3] }
 0x14c   :  { %11576 = vst [vmem:[#allocation78_spill] sm:$0xff] %v7716_v57  ;;  %v5655_v37 = vpack.i.bf16 %v7720_v15, %v7716_v57  ;;  %v407_v21 = vrot.slane %v406_v28, 2  ;;  %v425_v25 = vsel %vm284_vm0, %v48_v33, -inf  ;;  %v432_v2 = vsel %vm284_vm0, %v49_v26, -inf }
 0x14d   :  { %11577 = vst [vmem:[#allocation79_spill] sm:$0xff] %v7720_v15  ;;  %v401_v38 = vmax.f32 %v399_v62, %v400_v20  ;;  %v414_v10 = vrot.slane %v413_v47, 2  ;;  %v426_v48 = vrot.slane %v425_v25, 4  ;;  %v420_v3 = vmax.f32 %v418_v60, %v419_v9 }
 0x14e   :  { %5656 = vrot.lane.b32.xlu1 %v5655_v37, %s6271_s12  ;;  %v408_v56 = vmax.f32 %v406_v28, %v407_v21  ;;  %v433_v19 = vrot.slane %v432_v2, 4  ;;  %v439_v34 = vsel %vm284_vm0, %v50_v63, -inf  ;;  %v446_v29 = vsel %vm284_vm0, %v51_v7, -inf }
 0x14f   :  { %v402_v61 = vrot.slane %v401_v38, 1  ;;  %v415_v54 = vmax.f32 %v413_v47, %v414_v10  ;;  %v427_v39 = vmax.f32 %v425_v25, %v426_v48  ;;  %v440_v40 = vrot.slane %v439_v34, 4 }
 0x150   :  { %v409_v4 = vrot.slane %v408_v56, 1  ;;  %v421_v32 = vrot.slane %v420_v3, 2  ;;  %v434_v23 = vmax.f32 %v432_v2, %v433_v19  ;;  %v447_v60 = vrot.slane %v446_v29, 4 }
 0x151   :  { %v7738_v50 = vmax.f32 %v401_v38, %v402_v61  ;;  %v416_v53 = vrot.slane %v415_v54, 1  ;;  %v428_v33 = vrot.slane %v427_v39, 2  ;;  %v441_v62 = vmax.f32 %v439_v34, %v440_v40  ;;  %v55_v38 = vld [vmem:[%s11292_s0 + $0x36] sm:$0x3] }
 0x152   :  { %v7746_v42 = vmax.f32 %v408_v56, %v409_v4  ;;  %v422_v26 = vmax.f32 %v420_v3, %v421_v32  ;;  %v435_v28 = vrot.slane %v434_v23, 2  ;;  %v453_v37 = vsel %vm284_vm0, %v52_v14, -inf  ;;  %v56_v3 = vld [vmem:[%s11292_s0 + $0x38] sm:$0x3] }
 0x153   :  { %v7748_v63 = vmax.f32 %v415_v54, %v416_v53  ;;  %v429_v20 = vmax.f32 %v427_v39, %v428_v33  ;;  %v442_v47 = vrot.slane %v441_v62, 2  ;;  %v448_v25 = vmax.f32 %v446_v29, %v447_v60  ;;  %v57_v39 = vld [vmem:[%s11292_s0 + $0x3a] sm:$0x3] }
 0x154   :  { %v423_v21 = vrot.slane %v422_v26, 1  ;;  %v436_v9 = vmax.f32 %v434_v23, %v435_v28  ;;  %v454_v7 = vrot.slane %v453_v37, 4  ;;  %v460_v2 = vsel %vm284_vm0, %v53_v35, -inf }
 0x155   :  { %v430_v10 = vrot.slane %v429_v20, 1  ;;  %v443_v48 = vmax.f32 %v441_v62, %v442_v47  ;;  %v467_v56 = vsel %vm284_vm0, %v54_v52, -inf  ;;  %v449_v61 = vrot.slane %v448_v25, 2  ;;  %v58_v62 = vld [vmem:[%s11292_s0 + $0x3c] sm:$0x3] }
 0x156   :  { %v7759_v19 = vmax.f32 %v422_v26, %v423_v21  ;;  %v437_v34 = vrot.slane %v436_v9, 1  ;;  %v455_v54 = vmax.f32 %v453_v37, %v454_v7  ;;  %v461_v4 = vrot.slane %v460_v2, 4  ;;  %v59_v21 = vld [vmem:[%s11292_s0 + $0x3e] sm:$0x3] }
 0x157   :  { %v7764_v40 = vmax.f32 %v429_v20, %v430_v10  ;;  %v444_v14 = vrot.slane %v443_v48, 1  ;;  %v468_v32 = vrot.slane %v467_v56, 4  ;;  %v450_v29 = vmax.f32 %v448_v25, %v449_v61 }
 0x158   :  { %v7766_v23 = vmax.f32 %v436_v9, %v437_v34  ;;  %v456_v53 = vrot.slane %v455_v54, 2  ;;  %v474_v33 = vsel %vm284_vm0, %v55_v38, -inf  ;;  %v462_v52 = vmax.f32 %v460_v2, %v461_v4 }
 0x159   :  { %v7772_v35 = vmax.f32 %v443_v48, %v444_v14  ;;  %v469_v26 = vmax.f32 %v467_v56, %v468_v32  ;;  %v475_v28 = vrot.slane %v474_v33, 4  ;;  %v451_v60 = vrot.slane %v450_v29, 1 }
 0x15a   :  { %v457_v20 = vmax.f32 %v455_v54, %v456_v53  ;;  %v481_v47 = vsel %vm284_vm0, %v56_v3, -inf  ;;  %v488_v37 = vsel %vm284_vm0, %v57_v39, -inf  ;;  %v463_v9 = vrot.slane %v462_v52, 2  ;;  %v60_v3 = vld [vmem:[%s11292_s0 + $0x40] sm:$0x3] }
 0x15b   :  { %v470_v25 = vrot.slane %v469_v26, 2  ;;  %v476_v7 = vmax.f32 %v474_v33, %v475_v28  ;;  %v482_v38 = vrot.slane %v481_v47, 4  ;;  %v7779_v10 = vmax.f32 %v450_v29, %v451_v60  ;;  %v61_v29 = vld [vmem:[%s11292_s0 + $0x42] sm:$0x3] }
 0x15c   :  { %v458_v48 = vrot.slane %v457_v20, 1  ;;  %v489_v2 = vrot.slane %v488_v37, 4  ;;  %v495_v56 = vsel %vm284_vm0, %v58_v62, -inf  ;;  %v464_v34 = vmax.f32 %v462_v52, %v463_v9  ;;  %v62_v52 = vld [vmem:[%s11292_s0 + $0x44] sm:$0x3] }
 0x15d   :  { %v471_v61 = vmax.f32 %v469_v26, %v470_v25  ;;  %v477_v54 = vrot.slane %v476_v7, 2  ;;  %v483_v39 = vmax.f32 %v481_v47, %v482_v38  ;;  %v496_v32 = vrot.slane %v495_v56, 4 }
 0x15e   :  { %v7785_v14 = vmax.f32 %v457_v20, %v458_v48  ;;  %v490_v4 = vmax.f32 %v488_v37, %v489_v2  ;;  %v502_v53 = vsel %vm284_vm0, %v59_v21, -inf  ;;  %v465_v33 = vrot.slane %v464_v34, 1 }
 0x15f   :  { %v472_v62 = vrot.slane %v471_v61, 1  ;;  %v478_v28 = vmax.f32 %v476_v7, %v477_v54  ;;  %v484_v60 = vrot.slane %v483_v39, 2  ;;  %v497_v47 = vmax.f32 %v495_v56, %v496_v32  ;;  %v63_v7 = vld [vmem:[%s11292_s0 + $0x46] sm:$0x3] }
 0x160   :  { %v491_v26 = vrot.slane %v490_v4, 2  ;;  %v503_v20 = vrot.slane %v502_v53, 4  ;;  %v509_v37 = vsel %vm284_vm0, %v60_v3, -inf  ;;  %v7795_v9 = vmax.f32 %v464_v34, %v465_v33  ;;  %v64_v34 = vld [vmem:[%s11292_s0 + $0x48] sm:$0x3] }
 0x161   :  { %v7797_v21 = vmax.f32 %v471_v61, %v472_v62  ;;  %v479_v25 = vrot.slane %v478_v28, 1  ;;  %v485_v38 = vmax.f32 %v483_v39, %v484_v60  ;;  %v498_v2 = vrot.slane %v497_v47, 2 }
 0x162   :  { %v492_v48 = vmax.f32 %v490_v4, %v491_v26  ;;  %v504_v54 = vmax.f32 %v502_v53, %v503_v20  ;;  %v510_v15 = vrot.slane %v509_v37, 4  ;;  %v516_v32 = vsel %vm284_vm0, %v61_v29, -inf  ;;  %v65_v29 = vld [vmem:[%s11292_s0 + $0x4a] sm:$0x3] }
 0x163   :  { %v7802_v31 = vmax.f32 %v478_v28, %v479_v25  ;;  %v486_v56 = vrot.slane %v485_v38, 1  ;;  %v523_v3 = vsel %vm284_vm0, %v62_v52, -inf  ;;  %v499_v39 = vmax.f32 %v497_v47, %v498_v2 }
 0x164   :  { %v493_v61 = vrot.slane %v492_v48, 1  ;;  %v505_v33 = vrot.slane %v504_v54, 2  ;;  %v511_v62 = vmax.f32 %v509_v37, %v510_v15  ;;  %v517_v4 = vrot.slane %v516_v32, 4  ;;  %v66_v37 = vld [vmem:[%s11292_s0 + $0x4c] sm:$0x3] }
 0x165   :  { %v7809_v60 = vmax.f32 %v485_v38, %v486_v56  ;;  %v524_v53 = vrot.slane %v523_v3, 4  ;;  %v530_v28 = vsel %vm284_vm0, %v63_v7, -inf  ;;  %v500_v52 = vrot.slane %v499_v39, 1 }
 0x166   :  { %v7815_v26 = vmax.f32 %v492_v48, %v493_v61  ;;  %v506_v20 = vmax.f32 %v504_v54, %v505_v33  ;;  %v512_v25 = vrot.slane %v511_v62, 2  ;;  %v518_v45 = vmax.f32 %v516_v32, %v517_v4  ;;  %v67_v32 = vld [vmem:[%s11292_s0 + $0x4e] sm:$0x3] }
 0x167   :  { %v525_v18 = vmax.f32 %v523_v3, %v524_v53  ;;  %v531_v47 = vrot.slane %v530_v28, 4  ;;  %v537_v15 = vsel %vm284_vm0, %v64_v34, -inf  ;;  %v7821_v38 = vmax.f32 %v499_v39, %v500_v52 }
 0x168   :  { %v507_v7 = vrot.slane %v506_v20, 1  ;;  %v513_v2 = vmax.f32 %v511_v62, %v512_v25  ;;  %v538_v56 = vrot.slane %v537_v15, 4  ;;  %v519_v30 = vrot.slane %v518_v45, 2 }
 0x169   :  { %v526_v48 = vrot.slane %v525_v18, 2  ;;  %v532_v61 = vmax.f32 %v530_v28, %v531_v47  ;;  %v544_v54 = vsel %vm284_vm0, %v65_v29, -inf  ;;  %v551_v62 = vsel %vm284_vm0, %v66_v37, -inf  ;;  %v68_v28 = vld [vmem:[%s11292_s0 + $0x50] sm:$0x3] }
 0x16a   :  { %v7827_v3 = vmax.f32 %v506_v20, %v507_v7  ;;  %v514_v34 = vrot.slane %v513_v2, 1  ;;  %v539_v33 = vmax.f32 %v537_v15, %v538_v56  ;;  %v545_v4 = vrot.slane %v544_v54, 4 }
 0x16b   :  { %v520_v53 = vmax.f32 %v518_v45, %v519_v30  ;;  %v527_v39 = vmax.f32 %v525_v18, %v526_v48  ;;  %v533_v52 = vrot.slane %v532_v61, 2  ;;  %v552_v12 = vrot.slane %v551_v62, 4  ;;  %v69_v30 = vld [vmem:[%s11292_s0 + $0x52] sm:$0x3]  ;;  %v70_v18 = vld [vmem:[%s11292_s0 + $0x54] sm:$0x3] }
 0x16c   :  { %v7833_v25 = vmax.f32 %v513_v2, %v514_v34  ;;  %v540_v29 = vrot.slane %v539_v33, 2  ;;  %v546_v47 = vmax.f32 %v544_v54, %v545_v4  ;;  %v558_v15 = vsel %vm284_vm0, %v67_v32, -inf  ;;  %v71_v32 = vld [vmem:[%s11292_s0 + $0x56] sm:$0x3] }
 0x16d   :  { %v521_v22 = vrot.slane %v520_v53, 1  ;;  %v528_v20 = vrot.slane %v527_v39, 1  ;;  %v534_v7 = vmax.f32 %v532_v61, %v533_v52  ;;  %v553_v2 = vmax.f32 %v551_v62, %v552_v12 }
 0x16e   :  { %v541_v45 = vmax.f32 %v539_v33, %v540_v29  ;;  %v547_v37 = vrot.slane %v546_v47, 2  ;;  %v559_v56 = vrot.slane %v558_v15, 4  ;;  %v565_v61 = vsel %vm284_vm0, %v68_v28, -inf }
 0x16f   :  { %v7842_v48 = vmax.f32 %v520_v53, %v521_v22  ;;  %v7844_v54 = vmax.f32 %v527_v39, %v528_v20  ;;  %v535_v34 = vrot.slane %v534_v7, 1  ;;  %v554_v51 = vrot.slane %v553_v2, 2  ;;  %v72_v53 = vld [vmem:[%s11292_s0 + $0x58] sm:$0x3] }
 0x170   :  { %v542_v4 = vrot.slane %v541_v45, 1  ;;  %v548_v52 = vmax.f32 %v546_v47, %v547_v37  ;;  %v560_v46 = vmax.f32 %v558_v15, %v559_v56  ;;  %v566_v33 = vrot.slane %v565_v61, 4  ;;  %v73_v15 = vld [vmem:[%s11292_s0 + $0x5a] sm:$0x3] }
 0x171   :  { %v7850_v1 = vmax.f32 %v534_v7, %v535_v34  ;;  %v572_v12 = vsel %vm284_vm0, %v69_v30, -inf  ;;  %v579_v22 = vsel %vm284_vm0, %v70_v18, -inf  ;;  %v555_v28 = vmax.f32 %v553_v2, %v554_v51  ;;  %v74_v2 = vld [vmem:[%s11292_s0 + $0x5c] sm:$0x3] }
 0x172   :  { %v7857_v39 = vmax.f32 %v541_v45, %v542_v4  ;;  %v549_v62 = vrot.slane %v548_v52, 1  ;;  %v561_v29 = vrot.slane %v560_v46, 2  ;;  %v567_v20 = vmax.f32 %v565_v61, %v566_v33 }
 0x173   :  { %v573_v47 = vrot.slane %v572_v12, 4  ;;  %v580_v37 = vrot.slane %v579_v22, 4  ;;  %v586_v7 = vsel %vm284_vm0, %v71_v32, -inf  ;;  %v556_v18 = vrot.slane %v555_v28, 1 }
 0x174   :  { %v7863_v30 = vmax.f32 %v548_v52, %v549_v62  ;;  %v562_v56 = vmax.f32 %v560_v46, %v561_v29  ;;  %v587_v34 = vrot.slane %v586_v7, 4  ;;  %v568_v24 = vrot.slane %v567_v20, 2 }
 0x175   :  { %v574_v45 = vmax.f32 %v572_v12, %v573_v47  ;;  %v581_v4 = vmax.f32 %v579_v22, %v580_v37  ;;  %v593_v51 = vsel %vm284_vm0, %v72_v53, -inf  ;;  %v7869_v61 = vmax.f32 %v555_v28, %v556_v18  ;;  %v75_v12 = vld [vmem:[%s11292_s0 + $0x5e] sm:$0x3] }
 0x176   :  { %v563_v32 = vrot.slane %v562_v56, 1  ;;  %v588_v33 = vmax.f32 %v586_v7, %v587_v34  ;;  %v594_v58 = vrot.slane %v593_v51, 4  ;;  %v569_v13 = vmax.f32 %v567_v20, %v568_v24 }
 0x177   :  { %v575_v52 = vrot.slane %v574_v45, 2  ;;  %v582_v62 = vrot.slane %v581_v4, 2  ;;  %v600_v46 = vsel %vm284_vm0, %v73_v15, -inf  ;;  %v607_v7 = vsel %vm284_vm0, %v74_v2, -inf }
 0x178   :  { %v7875_v22 = vmax.f32 %v562_v56, %v563_v32  ;;  %v589_v53 = vrot.slane %v588_v33, 2  ;;  %v595_v29 = vmax.f32 %v593_v51, %v594_v58  ;;  %v601_v47 = vrot.slane %v600_v46, 4 }
 0x179   :  { %v570_v37 = vrot.slane %v569_v13, 1  ;;  %v576_v28 = vmax.f32 %v574_v45, %v575_v52  ;;  %v583_v18 = vmax.f32 %v581_v4, %v582_v62  ;;  %v608_v36 = vrot.slane %v607_v7, 4 }
 0x17a   :  { %v590_v34 = vmax.f32 %v588_v33, %v589_v53  ;;  %v596_v24 = vrot.slane %v595_v29, 2  ;;  %v602_v20 = vmax.f32 %v600_v46, %v601_v47  ;;  %v614_v55 = vsel %vm284_vm0, %v75_v12, -inf }
 0x17b   :  { %v571_v5 = vmax.f32 %v569_v13, %v570_v37  ;;  %v577_v15 = vrot.slane %v576_v28, 1  ;;  %v584_v0 = vrot.slane %v583_v18, 1  ;;  %v609_v59 = vmax.f32 %v607_v7, %v608_v36 }
 0x17c   :  { %v591_v57 = vrot.slane %v590_v34, 1  ;;  %v597_v56 = vmax.f32 %v595_v29, %v596_v24  ;;  %v603_v32 = vrot.slane %v602_v20, 2  ;;  %v615_v27 = vrot.slane %v614_v55, 4 }
 0x17d   :  { %v578_v58 = vmax.f32 %v576_v28, %v577_v15  ;;  %v585_v51 = vmax.f32 %v583_v18, %v584_v0  ;;  %v2102_v45 = vsel %vm11499_vm1, %v7738_v50, -inf  ;;  %v610_v52 = vrot.slane %v609_v59, 2 }
 0x17e   :  { %v592_v4 = vmax.f32 %v590_v34, %v591_v57  ;;  %v598_v2 = vrot.slane %v597_v56, 1  ;;  %v604_v33 = vmax.f32 %v602_v20, %v603_v32  ;;  %v616_v62 = vmax.f32 %v614_v55, %v615_v27 }
 0x17f   :  { %v2103_v13 = vsel %vm11499_vm1, %v7785_v14, -inf  ;;  %v2105_v46 = vsel %vm11499_vm1, %v7746_v42, -inf  ;;  %v2106_v36 = vsel %vm11499_vm1, %v7795_v9, -inf  ;;  %v611_v53 = vmax.f32 %v609_v59, %v610_v52 }
 0x180   :  { %v599_v12 = vmax.f32 %v597_v56, %v598_v2  ;;  %v605_v0 = vrot.slane %v604_v33, 1  ;;  %v7887_v29 = vmax.f32 %v2102_v45, %v2103_v13  ;;  %v617_v50 = vrot.slane %v616_v62, 2 }
 0x181   :  { %v7889_v57 = vmax.f32 %v2105_v46, %v2106_v36  ;;  %v2108_v27 = vsel %vm11499_vm1, %v7748_v63, -inf  ;;  %v2109_v55 = vsel %vm11499_vm1, %v7797_v21, -inf  ;;  %v612_v47 = vrot.slane %v611_v53, 1 }
 0x182   :  { %v606_v14 = vmax.f32 %v604_v33, %v605_v0  ;;  %v7895_v42 = vmax.f32 %v2108_v27, %v2109_v55  ;;  %v2111_v9 = vsel %vm11499_vm1, %v7759_v19, -inf  ;;  %v618_v37 = vmax.f32 %v616_v62, %v617_v50 }
 0x183   :  { %v2112_v59 = vsel %vm11499_vm1, %v7802_v31, -inf  ;;  %v2114_v28 = vsel %vm11499_vm1, %v7764_v40, -inf  ;;  %v2115_v63 = vsel %vm11499_vm1, %v7809_v60, -inf  ;;  %v613_v18 = vmax.f32 %v611_v53, %v612_v47 }
 0x184   :  { %v7905_v7 = vmax.f32 %v2111_v9, %v2112_v59  ;;  %v7907_v21 = vmax.f32 %v2114_v28, %v2115_v63  ;;  %v2117_v34 = vsel %vm11499_vm1, %v7766_v23, -inf  ;;  %v619_v24 = vrot.slane %v618_v37, 1 }
 0x185   :  { %v2118_v19 = vsel %vm11499_vm1, %v7815_v26, -inf  ;;  %v2120_v31 = vsel %vm11499_vm1, %v7772_v35, -inf  ;;  %v2121_v40 = vsel %vm11499_vm1, %v7821_v38, -inf  ;;  %v2123_v15 = vsel %vm11499_vm1, %v7779_v10, -inf }
 0x186   :  { %v7917_v20 = vmax.f32 %v2117_v34, %v2118_v19  ;;  %v7919_v60 = vmax.f32 %v2120_v31, %v2121_v40  ;;  %v2124_v23 = vsel %vm11499_vm1, %v7827_v3, -inf  ;;  %v620_v56 = vmax.f32 %v618_v37, %v619_v24 }
 0x187   :  { %v7925_v32 = vmax.f32 %v2123_v15, %v2124_v23  ;;  %v2126_v26 = vsel %vm11499_vm1, %v7833_v25, -inf  ;;  %v2127_v35 = vsel %vm11499_vm1, %v571_v5, -inf  ;;  %v2129_v38 = vsel %vm11499_vm1, %v7842_v48, -inf  ;;  %v220_v23 = vld [vmem:[%s11292_s0 + $0x180] sm:$0x3] }
 0x188   :  { %v7930_v45 = vmax.f32 %v2126_v26, %v2127_v35  ;;  %v2130_v2 = vsel %vm11499_vm1, %v578_v58, -inf  ;;  %v2132_v10 = vsel %vm11499_vm1, %v7844_v54, -inf  ;;  %v2133_v3 = vsel %vm11499_vm1, %v585_v51, -inf }
 0x189   :  { %11578 = vst [vmem:[#allocation80_spill] sm:$0xff] %v7925_v32  ;;  %v7937_v33 = vmax.f32 %v2129_v38, %v2130_v2  ;;  %v2135_v52 = vsel %vm11499_vm1, %v7850_v1, -inf  ;;  %v2136_v25 = vsel %vm11499_vm1, %v592_v4, -inf  ;;  %v7943_v5 = vmax.f32 %v2132_v10, %v2133_v3 }
 0x18a   :  { %v7945_v62 = vmax.f32 %v2135_v52, %v2136_v25  ;;  %v2138_v48 = vsel %vm11499_vm1, %v7857_v39, -inf  ;;  %v2139_v58 = vsel %vm11499_vm1, %v599_v12, -inf  ;;  %v2141_v54 = vsel %vm11499_vm1, %v7863_v30, -inf  ;;  %v221_v52 = vld [vmem:[%s11292_s0 + $0x182] sm:$0x3] }
 0x18b   :  { %v7950_v13 = vmax.f32 %v2138_v48, %v2139_v58  ;;  %v2142_v51 = vsel %vm11499_vm1, %v606_v14, -inf  ;;  %v2144_v1 = vsel %vm11499_vm1, %v7869_v61, -inf  ;;  %v2145_v46 = vsel %vm11499_vm1, %v613_v18, -inf }
 0x18c   :  { %v7957_v4 = vmax.f32 %v2141_v54, %v2142_v51  ;;  %v2147_v36 = vsel %vm11499_vm1, %v7875_v22, -inf  ;;  %v2148_v39 = vsel %vm11499_vm1, %v620_v56, -inf  ;;  %v7963_v12 = vmax.f32 %v2144_v1, %v2145_v46 }
 0x18d   :  { %11579 = vst [vmem:[#allocation81_spill] sm:$0xff] %v7950_v13  ;;  %v7965_v0 = vmax.f32 %v2147_v36, %v2148_v39  ;;  %v2588_v30 = vsel %vm2574_vm2, %v7889_v57, %v7887_v29  ;;  %v2595_v61 = vsel %vm2574_vm2, %v7937_v33, %v7930_v45  ;;  %vm2756_vm9 = vcmask 1046528   ;;  %v223_v36 = vld [vmem:[%s11292_s0 + $0x186] sm:$0x3] }
 0x18e   :  { %11580 = vst [vmem:[#allocation82_spill] sm:$0xff] %v7957_v4  ;;  %v2589_v53 = vsel %vm2576_vm3, %v7895_v42, %v2588_v30  ;;  %v2596_v22 = vsel %vm2576_vm3, %v7943_v5, %v2595_v61  ;;  %v2916_v50 = vsel %vm2574_vm2, %v7052_v6, %v7047_v49  ;;  %v2922_v47 = vsel %vm2574_vm2, %v7895_v42, %v7889_v57 }
 0x18f   :  { %11581 = vst [vmem:[#allocation83_spill] sm:$0xff] %v7963_v12  ;;  %v2590_v27 = vsel %vm2578_vm4, %v7905_v7, %v2589_v53  ;;  %v2597_v55 = vsel %vm2578_vm4, %v7945_v62, %v2596_v22  ;;  %v2917_v14 = vsel %vm2576_vm3, %v7060_v44, %v2916_v50  ;;  %v2923_v28 = vsel %vm2576_vm3, %v7905_v7, %v2922_v47 }
 0x190   :  { %11582 = vst [vmem:[#allocation84_spill] sm:$0xff] %v7965_v0  ;;  %v2591_v9 = vsel %vm2580_vm5, %v7907_v21, %v2590_v27  ;;  %v2598_v37 = vsel %vm2580_vm5, %v7950_v13, %v2597_v55  ;;  %v2918_v59 = vsel %vm2578_vm4, %v7062_v8, %v2917_v14  ;;  %v2924_v24 = vsel %vm2578_vm4, %v7907_v21, %v2923_v28  ;;  %v224_v55 = vld [vmem:[%s11292_s0 + $0x188] sm:$0x3] }
 0x191   :  { %v2592_v63 = vsel %vm2582_vm6, %v7917_v20, %v2591_v9  ;;  %v2599_v18 = vsel %vm2582_vm6, %v7957_v4, %v2598_v37  ;;  %v2919_v34 = vsel %vm2580_vm5, %v7083_v16, %v2918_v59  ;;  %v2925_v15 = vsel %vm2580_vm5, %v7917_v20, %v2924_v24 }
 0x192   :  { %v2593_v19 = vsel %vm2584_vm7, %v7919_v60, %v2592_v63  ;;  %v2600_v31 = vsel %vm2584_vm7, %v7963_v12, %v2599_v18  ;;  %v2920_v40 = vsel %vm2582_vm6, %v7085_v11, %v2919_v34  ;;  %v2926_v38 = vsel %vm2582_vm6, %v7919_v60, %v2925_v15  ;;  %v226_v18 = vld [vmem:[%s11292_s0 + $0x18c] sm:$0x3]  ;;  %v227_v15 = vld [vmem:[%s11292_s0 + $0x18e] sm:$0x3] }
 0x193   :  { %v8018_v56 = vsel %vm2586_vm8, %v7925_v32, %v2593_v19  ;;  %v8022_v26 = vsel %vm2586_vm8, %v7965_v0, %v2600_v31  ;;  %v2921_v35 = vsel %vm2584_vm7, %v7096_v41, %v2920_v40  ;;  %v2927_v10 = vsel %vm2584_vm7, %v7925_v32, %v2926_v38  ;;  %v222_v41 = vld [vmem:[%s11292_s0 + $0x184] sm:$0x3] }
 0x194   :  { %11583 = vst [vmem:[#allocation85_spill] sm:$0xff] %v8018_v56  ;;  %v5645_v2 = vpack.i.bf16 %v8022_v26, %v8018_v56  ;;  %v3028_v3 = vsel %vm2756_vm9, %v2921_v35, 0.0  ;;  %vm2710_vm10 = vcmask 1040384   ;;  %v3029_v25 = vsel %vm2756_vm9, %v2927_v10, 0.0 }
 0x195   :  { %11584 = vst [vmem:[#allocation86_spill] sm:$0xff] %v8022_v26  ;;  %v2786_v48 = vsel %vm2576_vm3, %v7047_v49, %v7042_v43  ;;  %v2792_v58 = vsel %vm2576_vm3, %v7889_v57, %v7887_v29  ;;  %v1629_v54 = vsel %vm284_vm0, %v220_v23, -inf  ;;  %v5685_v51 = vpack.i.bf16 %v3029_v25, %v3028_v3  ;;  %v228_v25 = vld [vmem:[%s11292_s0 + $0x190] sm:$0x3] }
 0x196   :  { %5646 = vrot.lane.b32.xlu0 %v5645_v2, %s6271_s12  ;;  %v2787_v1 = vsel %vm2578_vm4, %v7052_v6, %v2786_v48  ;;  %v2793_v46 = vsel %vm2578_vm4, %v7895_v42, %v2792_v58  ;;  %v1630_v43 = vrot.slane %v1629_v54, 4  ;;  %v1636_v30 = vsel %vm284_vm0, %v221_v52, -inf }
 0x197   :  { %v2788_v49 = vsel %vm2580_vm5, %v7060_v44, %v2787_v1  ;;  %v2794_v39 = vsel %vm2580_vm5, %v7905_v7, %v2793_v46  ;;  %v1643_v61 = vsel %vm284_vm0, %v222_v41, -inf  ;;  %5686 = vrot.lane.b32.xlu1 %v5685_v51, %s6273_s29  ;;  %v1637_v50 = vrot.slane %v1636_v30, 4 }
 0x198   :  { %v2789_v6 = vsel %vm2582_vm6, %v7062_v8, %v2788_v49  ;;  %v2795_v53 = vsel %vm2582_vm6, %v7907_v21, %v2794_v39  ;;  %v1631_v22 = vmax.f32 %v1629_v54, %v1630_v43  ;;  %v1644_v14 = vrot.slane %v1643_v61, 4  ;;  %v229_v49 = vld [vmem:[%s11292_s0 + $0x192] sm:$0x3] }
 0x199   :  { %v2790_v44 = vsel %vm2584_vm7, %v7083_v16, %v2789_v6  ;;  %v2796_v27 = vsel %vm2584_vm7, %v7917_v20, %v2795_v53  ;;  %v1650_v47 = vsel %vm284_vm0, %v223_v36, -inf  ;;  %v225_v16 = vld [vmem:[%s11292_s0 + $0x18a] sm:$0x3]  ;;  %v1638_v59 = vmax.f32 %v1636_v30, %v1637_v50 }
 0x19a   :  { %v2791_v8 = vsel %vm2586_vm8, %v7085_v11, %v2790_v44  ;;  %v2797_v9 = vsel %vm2586_vm8, %v7919_v60, %v2796_v27  ;;  %v1632_v37 = vrot.slane %v1631_v22, 2  ;;  %v1645_v34 = vmax.f32 %v1643_v61, %v1644_v14  ;;  %v230_v27 = vld [vmem:[%s11292_s0 + $0x194] sm:$0x3] }
 0x19b   :  { %v2898_v28 = vsel %vm2710_vm10, 0.0, %v2791_v8  ;;  %v2899_v63 = vsel %vm2710_vm10, 0.0, %v2797_v9  ;;  %v1651_v24 = vrot.slane %v1650_v47, 4  ;;  %v1639_v31 = vrot.slane %v1638_v59, 2 }
 0x19c   :  { %v5675_v11 = vpack.i.bf16 %v2899_v63, %v2898_v28  ;;  %v1633_v19 = vmax.f32 %v1631_v22, %v1632_v37  ;;  %v1657_v40 = vsel %vm284_vm0, %v224_v55, -inf  ;;  %v1646_v23 = vrot.slane %v1645_v34, 2  ;;  %v231_v28 = vld [vmem:[%s11292_s0 + $0x196] sm:$0x3] }
 0x19d   :  { %v1652_v35 = vmax.f32 %v1650_v47, %v1651_v24  ;;  %v1658_v38 = vrot.slane %v1657_v40, 4  ;;  %v1664_v2 = vsel %vm284_vm0, %v225_v16, -inf  ;;  %v1640_v3 = vmax.f32 %v1638_v59, %v1639_v31 }
 0x19e   :  { %5676 = vrot.lane.b32.xlu2 %v5675_v11, %s6274_s16  ;;  %v1634_v10 = vrot.slane %v1633_v19, 1  ;;  %v1665_v52 = vrot.slane %v1664_v2, 4  ;;  %v1671_v41 = vsel %vm284_vm0, %v226_v18, -inf  ;;  %v1647_v48 = vmax.f32 %v1645_v34, %v1646_v23  ;;  %v233_v23 = vld [vmem:[%s11292_s0 + $0x19a] sm:$0x3] }
 0x19f   :  { %v1653_v58 = vrot.slane %v1652_v35, 2  ;;  %v1659_v54 = vmax.f32 %v1657_v40, %v1658_v38  ;;  %v1672_v51 = vrot.slane %v1671_v41, 4  ;;  %v1641_v46 = vrot.slane %v1640_v3, 1 }
 0x1a0   :  { %v8096_v1 = vmax.f32 %v1633_v19, %v1634_v10  ;;  %v1666_v36 = vmax.f32 %v1664_v2, %v1665_v52  ;;  %v1678_v43 = vsel %vm284_vm0, %v227_v15, -inf  ;;  %v1648_v39 = vrot.slane %v1647_v48, 1  ;;  %v232_v15 = vld [vmem:[%s11292_s0 + $0x198] sm:$0x3] }
 0x1a1   :  { %v1654_v30 = vmax.f32 %v1652_v35, %v1653_v58  ;;  %v1660_v61 = vrot.slane %v1659_v54, 2  ;;  %v1673_v6 = vmax.f32 %v1671_v41, %v1672_v51  ;;  %v8102_v53 = vmax.f32 %v1640_v3, %v1641_v46 }
 0x1a2   :  { %v1667_v22 = vrot.slane %v1666_v36, 2  ;;  %v1679_v50 = vrot.slane %v1678_v43, 4  ;;  %v1685_v44 = vsel %vm284_vm0, %v228_v25, -inf  ;;  %v8108_v55 = vmax.f32 %v1647_v48, %v1648_v39  ;;  %v234_v48 = vld [vmem:[%s11292_s0 + $0x19c] sm:$0x3] }
 0x1a3   :  { %v1655_v14 = vrot.slane %v1654_v30, 1  ;;  %v1661_v47 = vmax.f32 %v1659_v54, %v1660_v61  ;;  %v1674_v8 = vrot.slane %v1673_v6, 2  ;;  %v1686_v37 = vrot.slane %v1685_v44, 4 }
 0x1a4   :  { %v1668_v9 = vmax.f32 %v1666_v36, %v1667_v22  ;;  %v1680_v16 = vmax.f32 %v1678_v43, %v1679_v50  ;;  %v1692_v59 = vsel %vm284_vm0, %v229_v49, -inf  ;;  %v1699_v40 = vsel %vm284_vm0, %v230_v27, -inf }
 0x1a5   :  { %v8114_v63 = vmax.f32 %v1654_v30, %v1655_v14  ;;  %v1662_v18 = vrot.slane %v1661_v47, 1  ;;  %v1675_v34 = vmax.f32 %v1673_v6, %v1674_v8  ;;  %v1693_v24 = vrot.slane %v1692_v59, 4  ;;  %v235_v30 = vld [vmem:[%s11292_s0 + $0x19e] sm:$0x3]  ;;  %v236_v8 = vld [vmem:[%s11292_s0 + $0x1a0] sm:$0x3] }
 0x1a6   :  { %v1669_v11 = vrot.slane %v1668_v9, 1  ;;  %v1681_v19 = vrot.slane %v1680_v16, 2  ;;  %v1687_v31 = vmax.f32 %v1685_v44, %v1686_v37  ;;  %v1700_v10 = vrot.slane %v1699_v40, 4 }
 0x1a7   :  { %v8123_v35 = vmax.f32 %v1661_v47, %v1662_v18  ;;  %v1676_v38 = vrot.slane %v1675_v34, 1  ;;  %v1694_v2 = vmax.f32 %v1692_v59, %v1693_v24  ;;  %v1706_v25 = vsel %vm284_vm0, %v231_v28, -inf }
 0x1a8   :  { %v8125_v3 = vmax.f32 %v1668_v9, %v1669_v11  ;;  %v1682_v52 = vmax.f32 %v1680_v16, %v1681_v19  ;;  %v1688_v41 = vrot.slane %v1687_v31, 2  ;;  %v1701_v51 = vmax.f32 %v1699_v40, %v1700_v10  ;;  %v237_v11 = vld [vmem:[%s11292_s0 + $0x1a2] sm:$0x3] }
 0x1a9   :  { %v8131_v58 = vmax.f32 %v1675_v34, %v1676_v38  ;;  %v1695_v54 = vrot.slane %v1694_v2, 2  ;;  %v1707_v46 = vrot.slane %v1706_v25, 4  ;;  %v1713_v49 = vsel %vm284_vm0, %v232_v15, -inf }
 0x1aa   :  { %v1683_v36 = vrot.slane %v1682_v52, 1  ;;  %v1689_v43 = vmax.f32 %v1687_v31, %v1688_v41  ;;  %v1720_v39 = vsel %vm284_vm0, %v233_v23, -inf  ;;  %v1702_v6 = vrot.slane %v1701_v51, 2 }
 0x1ab   :  { %v1696_v61 = vmax.f32 %v1694_v2, %v1695_v54  ;;  %v1708_v22 = vmax.f32 %v1706_v25, %v1707_v46  ;;  %v1714_v50 = vrot.slane %v1713_v49, 4  ;;  %v1721_v14 = vrot.slane %v1720_v39, 4 }
 0x1ac   :  { %v8138_v44 = vmax.f32 %v1682_v52, %v1683_v36  ;;  %v1690_v27 = vrot.slane %v1689_v43, 1  ;;  %v1727_v47 = vsel %vm284_vm0, %v234_v48, -inf  ;;  %v1703_v16 = vmax.f32 %v1701_v51, %v1702_v6  ;;  %v238_v52 = vld [vmem:[%s11292_s0 + $0x1a4] sm:$0x3] }
 0x1ad   :  { %v1697_v9 = vrot.slane %v1696_v61, 1  ;;  %v1709_v37 = vrot.slane %v1708_v22, 2  ;;  %v1715_v59 = vmax.f32 %v1713_v49, %v1714_v50  ;;  %v1722_v18 = vmax.f32 %v1720_v39, %v1721_v14  ;;  %v239_v49 = vld [vmem:[%s11292_s0 + $0x1a6] sm:$0x3] }
 0x1ae   :  { %v8144_v28 = vmax.f32 %v1689_v43, %v1690_v27  ;;  %v1728_v34 = vrot.slane %v1727_v47, 4  ;;  %v1734_v24 = vsel %vm284_vm0, %v235_v30, -inf  ;;  %v1704_v31 = vrot.slane %v1703_v16, 1 }
 0x1af   :  { %v8150_v19 = vmax.f32 %v1696_v61, %v1697_v9  ;;  %v1710_v40 = vmax.f32 %v1708_v22, %v1709_v37  ;;  %v1716_v15 = vrot.slane %v1715_v59, 2  ;;  %v1723_v23 = vrot.slane %v1722_v18, 2 }
 0x1b0   :  { %v1729_v38 = vmax.f32 %v1727_v47, %v1728_v34  ;;  %v1735_v2 = vrot.slane %v1734_v24, 4  ;;  %v1741_v10 = vsel %vm284_vm0, %v236_v8, -inf  ;;  %v8156_v41 = vmax.f32 %v1703_v16, %v1704_v31  ;;  %v240_v47 = vld [vmem:[%s11292_s0 + $0x1a8] sm:$0x3]  ;;  %v241_v8 = vld [vmem:[%s11292_s0 + $0x1aa] sm:$0x3] }
 0x1b1   :  { %v1711_v25 = vrot.slane %v1710_v40, 1  ;;  %v1717_v48 = vmax.f32 %v1715_v59, %v1716_v15  ;;  %v1742_v54 = vrot.slane %v1741_v10, 4  ;;  %v1724_v51 = vmax.f32 %v1722_v18, %v1723_v23  ;;  %v242_v31 = vld [vmem:[%s11292_s0 + $0x1ac] sm:$0x3] }
 0x1b2   :  { %v1730_v46 = vrot.slane %v1729_v38, 2  ;;  %v1736_v36 = vmax.f32 %v1734_v24, %v1735_v2  ;;  %v1748_v43 = vsel %vm284_vm0, %v237_v11, -inf  ;;  %v1755_v14 = vsel %vm284_vm0, %v238_v52, -inf }
 0x1b3   :  { %v8162_v39 = vmax.f32 %v1710_v40, %v1711_v25  ;;  %v1718_v30 = vrot.slane %v1717_v48, 1  ;;  %v1743_v61 = vmax.f32 %v1741_v10, %v1742_v54  ;;  %v1749_v6 = vrot.slane %v1748_v43, 4 }
 0x1b4   :  { %v1725_v22 = vrot.slane %v1724_v51, 1  ;;  %v1731_v50 = vmax.f32 %v1729_v38, %v1730_v46  ;;  %v1737_v27 = vrot.slane %v1736_v36, 2  ;;  %v1756_v59 = vrot.slane %v1755_v14, 4 }
 0x1b5   :  { %v8171_v9 = vmax.f32 %v1717_v48, %v1718_v30  ;;  %v1744_v16 = vrot.slane %v1743_v61, 2  ;;  %v1750_v37 = vmax.f32 %v1748_v43, %v1749_v6  ;;  %v1762_v11 = vsel %vm284_vm0, %v239_v49, -inf  ;;  %v243_v48 = vld [vmem:[%s11292_s0 + $0x1ae] sm:$0x3]  ;;  %v244_v6 = vld [vmem:[%s11292_s0 + $0x1b0] sm:$0x3] }
 0x1b6   :  { %v8173_v18 = vmax.f32 %v1724_v51, %v1725_v22  ;;  %v1732_v34 = vrot.slane %v1731_v50, 1  ;;  %v1738_v24 = vmax.f32 %v1736_v36, %v1737_v27  ;;  %v1757_v23 = vmax.f32 %v1755_v14, %v1756_v59  ;;  %v245_v59 = vld [vmem:[%s11292_s0 + $0x1b2] sm:$0x3] }
 0x1b7   :  { %v1745_v40 = vmax.f32 %v1743_v61, %v1744_v16  ;;  %v1751_v15 = vrot.slane %v1750_v37, 2  ;;  %v1763_v38 = vrot.slane %v1762_v11, 4  ;;  %v1769_v52 = vsel %vm284_vm0, %v240_v47, -inf }
 0x1b8   :  { %v8179_v2 = vmax.f32 %v1731_v50, %v1732_v34  ;;  %v1739_v10 = vrot.slane %v1738_v24, 1  ;;  %v1776_v25 = vsel %vm284_vm0, %v241_v8, -inf  ;;  %v1758_v46 = vrot.slane %v1757_v23, 2 }
 0x1b9   :  { %v1746_v54 = vrot.slane %v1745_v40, 1  ;;  %v1752_v51 = vmax.f32 %v1750_v37, %v1751_v15  ;;  %v1764_v36 = vmax.f32 %v1762_v11, %v1763_v38  ;;  %v1770_v49 = vrot.slane %v1769_v52, 4 }
 0x1ba   :  { %v8186_v43 = vmax.f32 %v1738_v24, %v1739_v10  ;;  %v1777_v30 = vrot.slane %v1776_v25, 4  ;;  %v1783_v61 = vsel %vm284_vm0, %v242_v31, -inf  ;;  %v1759_v27 = vmax.f32 %v1757_v23, %v1758_v46  ;;  %v246_v10 = vld [vmem:[%s11292_s0 + $0x1b4] sm:$0x3] }
 0x1bb   :  { %v8192_v22 = vmax.f32 %v1745_v40, %v1746_v54  ;;  %v1753_v50 = vrot.slane %v1752_v51, 1  ;;  %v1765_v14 = vrot.slane %v1764_v36, 2  ;;  %v1771_v47 = vmax.f32 %v1769_v52, %v1770_v49 }
 0x1bc   :  { %v1778_v8 = vmax.f32 %v1776_v25, %v1777_v30  ;;  %v1784_v16 = vrot.slane %v1783_v61, 4  ;;  %v1790_v37 = vsel %vm284_vm0, %v243_v48, -inf  ;;  %v1760_v24 = vrot.slane %v1759_v27, 1  ;;  %v247_v30 = vld [vmem:[%s11292_s0 + $0x1b6] sm:$0x3] }
 0x1bd   :  { %v8198_v34 = vmax.f32 %v1752_v51, %v1753_v50  ;;  %v1766_v11 = vmax.f32 %v1764_v36, %v1765_v14  ;;  %v1791_v31 = vrot.slane %v1790_v37, 4  ;;  %v1772_v15 = vrot.slane %v1771_v47, 2 }
 0x1be   :  { %v1779_v40 = vrot.slane %v1778_v8, 2  ;;  %v1785_v38 = vmax.f32 %v1783_v61, %v1784_v16  ;;  %v1797_v23 = vsel %vm284_vm0, %v244_v6, -inf  ;;  %v8204_v52 = vmax.f32 %v1759_v27, %v1760_v24 }
 0x1bf   :  { %v1767_v25 = vrot.slane %v1766_v11, 1  ;;  %v1792_v48 = vmax.f32 %v1790_v37, %v1791_v31  ;;  %v1798_v54 = vrot.slane %v1797_v23, 4  ;;  %v1773_v46 = vmax.f32 %v1771_v47, %v1772_v15  ;;  %v248_v47 = vld [vmem:[%s11292_s0 + $0x1b8] sm:$0x3] }
 0x1c0   :  { %v1780_v51 = vmax.f32 %v1778_v8, %v1779_v40  ;;  %v1786_v49 = vrot.slane %v1785_v38, 2  ;;  %v1804_v36 = vsel %vm284_vm0, %v245_v59, -inf  ;;  %v1811_v37 = vsel %vm284_vm0, %v246_v10, -inf  ;;  %v249_v8 = vld [vmem:[%s11292_s0 + $0x1ba] sm:$0x3] }
 0x1c1   :  { %v8210_v61 = vmax.f32 %v1766_v11, %v1767_v25  ;;  %v1793_v6 = vrot.slane %v1792_v48, 2  ;;  %v1799_v50 = vmax.f32 %v1797_v23, %v1798_v54  ;;  %v1805_v14 = vrot.slane %v1804_v36, 4  ;;  %v250_v10 = vld [vmem:[%s11292_s0 + $0x1bc] sm:$0x3] }
 0x1c2   :  { %v1774_v16 = vrot.slane %v1773_v46, 1  ;;  %v1781_v27 = vrot.slane %v1780_v51, 1  ;;  %v1787_v24 = vmax.f32 %v1785_v38, %v1786_v49  ;;  %v1812_v15 = vrot.slane %v1811_v37, 4 }
 0x1c3   :  { %v1794_v59 = vmax.f32 %v1792_v48, %v1793_v6  ;;  %v1800_v31 = vrot.slane %v1799_v50, 2  ;;  %v1806_v11 = vmax.f32 %v1804_v36, %v1805_v14  ;;  %v1818_v38 = vsel %vm284_vm0, %v247_v30, -inf }
 0x1c4   :  { %v8219_v40 = vmax.f32 %v1773_v46, %v1774_v16  ;;  %v8221_v23 = vmax.f32 %v1780_v51, %v1781_v27  ;;  %v1788_v25 = vrot.slane %v1787_v24, 1  ;;  %v1813_v32 = vmax.f32 %v1811_v37, %v1812_v15  ;;  %v251_v51 = vld [vmem:[%s11292_s0 + $0x1be] sm:$0x3] }
 0x1c5   :  { %v1795_v54 = vrot.slane %v1794_v59, 1  ;;  %v1801_v49 = vmax.f32 %v1799_v50, %v1800_v31  ;;  %v1807_v0 = vrot.slane %v1806_v11, 2  ;;  %v1819_v48 = vrot.slane %v1818_v38, 4 }
 0x1c6   :  { %v8227_v26 = vmax.f32 %v1787_v24, %v1788_v25  ;;  %v1825_v36 = vsel %vm284_vm0, %v248_v47, -inf  ;;  %v1832_v46 = vsel %vm284_vm0, %v249_v8, -inf  ;;  %v1814_v16 = vrot.slane %v1813_v32, 2 }
 0x1c7   :  { %v8234_v30 = vmax.f32 %v1794_v59, %v1795_v54  ;;  %v1802_v6 = vrot.slane %v1801_v49, 1  ;;  %v1808_v14 = vmax.f32 %v1806_v11, %v1807_v0  ;;  %v1820_v27 = vmax.f32 %v1818_v38, %v1819_v48 }
 0x1c8   :  { %v1826_v50 = vrot.slane %v1825_v36, 4  ;;  %v1833_v31 = vrot.slane %v1832_v46, 4  ;;  %v1839_v24 = vsel %vm284_vm0, %v250_v10, -inf  ;;  %v1815_v25 = vmax.f32 %v1813_v32, %v1814_v16 }
 0x1c9   :  { %v1803_v37 = vmax.f32 %v1801_v49, %v1802_v6  ;;  %v1809_v15 = vrot.slane %v1808_v14, 1  ;;  %v1840_v47 = vrot.slane %v1839_v24, 4  ;;  %v1821_v56 = vrot.slane %v1820_v27, 2 }
 0x1ca   :  { %v1827_v8 = vmax.f32 %v1825_v36, %v1826_v50  ;;  %v1834_v17 = vmax.f32 %v1832_v46, %v1833_v31  ;;  %v1846_v12 = vsel %vm284_vm0, %v251_v51, -inf  ;;  %v1816_v59 = vrot.slane %v1815_v25, 1 }
 0x1cb   :  { %v1810_v4 = vmax.f32 %v1808_v14, %v1809_v15  ;;  %v1841_v54 = vmax.f32 %v1839_v24, %v1840_v47  ;;  %v1847_v13 = vrot.slane %v1846_v12, 4  ;;  %v1822_v0 = vmax.f32 %v1820_v27, %v1821_v56 }
 0x1cc   :  { %v1828_v11 = vrot.slane %v1827_v8, 2  ;;  %v1835_v38 = vrot.slane %v1834_v17, 2  ;;  %v2366_v48 = vsel %vm11499_vm1, %v8096_v1, -inf  ;;  %v1817_v10 = vmax.f32 %v1815_v25, %v1816_v59 }
 0x1cd   :  { %v1842_v49 = vrot.slane %v1841_v54, 2  ;;  %v1848_v6 = vmax.f32 %v1846_v12, %v1847_v13  ;;  %v2367_v32 = vsel %vm11499_vm1, %v8144_v28, -inf  ;;  %v1823_v36 = vrot.slane %v1822_v0, 1 }
 0x1ce   :  { %v1829_v46 = vmax.f32 %v1827_v8, %v1828_v11  ;;  %v1836_v16 = vmax.f32 %v1834_v17, %v1835_v38  ;;  %v8242_v51 = vmax.f32 %v2366_v48, %v2367_v32  ;;  %v2369_v56 = vsel %vm11499_vm1, %v8102_v53, -inf }
 0x1cf   :  { %v1843_v14 = vmax.f32 %v1841_v54, %v1842_v49  ;;  %v1849_v50 = vrot.slane %v1848_v6, 2  ;;  %v2370_v27 = vsel %vm11499_vm1, %v8150_v19, -inf  ;;  %v1824_v1 = vmax.f32 %v1822_v0, %v1823_v36 }
 0x1d0   :  { %v1830_v31 = vrot.slane %v1829_v46, 1  ;;  %v1837_v24 = vrot.slane %v1836_v16, 1  ;;  %v8248_v13 = vmax.f32 %v2369_v56, %v2370_v27  ;;  %v2372_v17 = vsel %vm11499_vm1, %v8108_v55, -inf }
 0x1d1   :  { %v1844_v12 = vrot.slane %v1843_v14, 1  ;;  %v1850_v28 = vmax.f32 %v1848_v6, %v1849_v50  ;;  %v2373_v15 = vsel %vm11499_vm1, %v8156_v41, -inf  ;;  %v2375_v53 = vsel %vm11499_vm1, %v8114_v63, -inf }
 0x1d2   :  { %v1831_v25 = vmax.f32 %v1829_v46, %v1830_v31  ;;  %v1838_v47 = vmax.f32 %v1836_v16, %v1837_v24  ;;  %v8254_v8 = vmax.f32 %v2372_v17, %v2373_v15  ;;  %v2376_v54 = vsel %vm11499_vm1, %v8162_v39, -inf }
 0x1d3   :  { %v1845_v19 = vmax.f32 %v1843_v14, %v1844_v12  ;;  %v1851_v59 = vrot.slane %v1850_v28, 1  ;;  %v2378_v0 = vsel %vm11499_vm1, %v8123_v35, -inf  ;;  %v8262_v11 = vmax.f32 %v2375_v53, %v2376_v54 }
 0x1d4   :  { %v2379_v55 = vsel %vm11499_vm1, %v8171_v9, -inf  ;;  %v2381_v41 = vsel %vm11499_vm1, %v8125_v3, -inf  ;;  %v2382_v38 = vsel %vm11499_vm1, %v8173_v18, -inf  ;;  %v2384_v39 = vsel %vm11499_vm1, %v8131_v58, -inf }
 0x1d5   :  { %v1852_v63 = vmax.f32 %v1850_v28, %v1851_v59  ;;  %v8270_v48 = vmax.f32 %v2378_v0, %v2379_v55  ;;  %v8272_v49 = vmax.f32 %v2381_v41, %v2382_v38  ;;  %v2385_v35 = vsel %vm11499_vm1, %v8179_v2, -inf }
 0x1d6   :  { %v2387_v9 = vsel %vm11499_vm1, %v8138_v44, -inf  ;;  %v2388_v3 = vsel %vm11499_vm1, %v8186_v43, -inf  ;;  %v2390_v18 = vsel %vm11499_vm1, %v8192_v22, -inf  ;;  %v8284_v6 = vmax.f32 %v2384_v39, %v2385_v35 }
 0x1d7   :  { %v8286_v32 = vmax.f32 %v2387_v9, %v2388_v3  ;;  %v2391_v36 = vsel %vm11499_vm1, %v1803_v37, -inf  ;;  %v2393_v58 = vsel %vm11499_vm1, %v8198_v34, -inf  ;;  %v2394_v2 = vsel %vm11499_vm1, %v1810_v4, -inf }
 0x1d8   :  { %v8291_v46 = vmax.f32 %v2390_v18, %v2391_v36  ;;  %v2396_v44 = vsel %vm11499_vm1, %v8204_v52, -inf  ;;  %v2397_v43 = vsel %vm11499_vm1, %v1817_v10, -inf  ;;  %v8297_v16 = vmax.f32 %v2393_v58, %v2394_v2 }
 0x1d9   :  { %v8299_v22 = vmax.f32 %v2396_v44, %v2397_v43  ;;  %v2399_v14 = vsel %vm11499_vm1, %v8210_v61, -inf  ;;  %v2400_v37 = vsel %vm11499_vm1, %v1824_v1, -inf  ;;  %v2402_v34 = vsel %vm11499_vm1, %v8219_v40, -inf }
 0x1da   :  { %v8304_v50 = vmax.f32 %v2399_v14, %v2400_v37  ;;  %v2403_v4 = vsel %vm11499_vm1, %v1831_v25, -inf  ;;  %v2405_v52 = vsel %vm11499_vm1, %v8221_v23, -inf  ;;  %v2406_v56 = vsel %vm11499_vm1, %v1838_v47, -inf }
 0x1db   :  { %v8311_v10 = vmax.f32 %v2402_v34, %v2403_v4  ;;  %v2408_v27 = vsel %vm11499_vm1, %v8227_v26, -inf  ;;  %v2409_v61 = vsel %vm11499_vm1, %v1845_v19, -inf  ;;  %v8317_v1 = vmax.f32 %v2405_v52, %v2406_v56 }
 0x1dc   :  { %v8319_v31 = vmax.f32 %v2408_v27, %v2409_v61  ;;  %v2411_v40 = vsel %vm11499_vm1, %v8234_v30, -inf  ;;  %v2412_v24 = vsel %vm11499_vm1, %v1852_v63, -inf  ;;  %v2658_v23 = vsel %vm2574_vm2, %v8248_v13, %v8242_v51  ;;  %v11590_v27 = vld [vmem:[#allocation81_spill] sm:$0xff] }
 0x1dd   :  { %11585 = vst [vmem:[#allocation87_spill] sm:$0xff] %v8317_v1  ;;  %v8324_v12 = vmax.f32 %v2411_v40, %v2412_v24  ;;  %v2665_v26 = vsel %vm2574_vm2, %v8297_v16, %v8291_v46  ;;  %v3044_v28 = vrot.slane %v7887_v29, 7  ;;  %v2659_v17 = vsel %vm2576_vm3, %v8254_v8, %v2658_v23  ;;  %v11591_v40 = vld [vmem:[#allocation82_spill] sm:$0xff] }
 0x1de   :  { %11586 = vst [vmem:[#allocation88_spill] sm:$0xff] %v8319_v31  ;;  %v2666_v30 = vsel %vm2576_vm3, %v8299_v22, %v2665_v26  ;;  %v3045_v15 = vrot.slane %v7889_v57, 6  ;;  %v3047_v25 = vrot.slane %v7895_v42, 5  ;;  %v2660_v47 = vsel %vm2578_vm4, %v8262_v11, %v2659_v17  ;;  %v11592_v26 = vld [vmem:[#allocation83_spill] sm:$0xff] }
 0x1df   :  { %11587 = vst [vmem:[#allocation89_spill] sm:$0xff] %v8324_v12  ;;  %v2667_v53 = vsel %vm2578_vm4, %v8304_v50, %v2666_v30  ;;  %v3049_v19 = vrot.slane %v7905_v7, 4  ;;  %v3051_v59 = vrot.slane %v7907_v21, 3  ;;  %v2661_v54 = vsel %vm2580_vm5, %v8270_v48, %v2660_v47  ;;  %v11593_v30 = vld [vmem:[#allocation42_spill] sm:$0xff] }
 0x1e0   :  { %v2668_v0 = vsel %vm2580_vm5, %v8311_v10, %v2667_v53  ;;  %v3046_v55 = vsel %vm2576_vm3, %v3045_v15, %v3044_v28  ;;  %v3053_v41 = vrot.slane %v7917_v20, 2  ;;  %v2662_v38 = vsel %vm2582_vm6, %v8272_v49, %v2661_v54  ;;  %v11594_v15 = vld [vmem:[#allocation85_spill] sm:$0xff] }
 0x1e1   :  { %v2669_v63 = vsel %vm2582_vm6, %v8317_v1, %v2668_v0  ;;  %v3048_v39 = vsel %vm2578_vm4, %v3047_v25, %v3046_v55  ;;  %v3055_v35 = vrot.slane %v7919_v60, 1  ;;  %v2663_v9 = vsel %vm2584_vm7, %v8284_v6, %v2662_v38  ;;  %v11596_v55 = vld [vmem:[#allocation86_spill] sm:$0xff] }
 0x1e2   :  { %v2670_v3 = vsel %vm2584_vm7, %v8319_v31, %v2669_v63  ;;  %v3050_v18 = vsel %vm2580_vm5, %v3049_v19, %v3048_v39  ;;  %v3057_v36 = vrot.slane %v7930_v45, 7  ;;  %v8365_v58 = vsel %vm2586_vm8, %v8286_v32, %v2663_v9 }
 0x1e3   :  { %11588 = vst [vmem:[#allocation90_spill] sm:$0xff] %v8365_v58  ;;  %v8369_v2 = vsel %vm2586_vm8, %v8324_v12, %v2670_v3  ;;  %v3052_v44 = vsel %vm2582_vm6, %v3051_v59, %v3050_v18  ;;  %v3058_v43 = vrot.slane %v7937_v33, 6  ;;  %v3060_v34 = vrot.slane %v7943_v5, 5 }
 0x1e4   :  { %11589 = vst [vmem:[#allocation91_spill] sm:$0xff] %v8369_v2  ;;  %v8375_v14 = vpack.i.bf16 %v8369_v2, %v8365_v58  ;;  %v3054_v37 = vsel %vm2584_vm7, %v3053_v41, %v3052_v44  ;;  %v3062_v4 = vrot.slane %v7945_v62, 4  ;;  %v3064_v61 = vrot.slane %v11590_v27, 3 }
 0x1e5   :  { %v3056_v52 = vsel %vm2586_vm8, %v3055_v35, %v3054_v37  ;;  %v3059_v56 = vsel %vm2576_vm3, %v3058_v43, %v3057_v36  ;;  %v3066_v24 = vrot.slane %v11591_v40, 2  ;;  %v3068_v28 = vrot.slane %v11592_v26, 1 }
 0x1e6   :  { %5671 = vrot.lane.b32.xlu0 %v8375_v14, %s6271_s12  ;;  %v3061_v23 = vsel %vm2578_vm4, %v3060_v34, %v3059_v56  ;;  %v3252_v17 = vsel %vm2710_vm10, 0.0, %v3056_v52  ;;  %v5680_v25 = vpack.i.bf16 %v11594_v15, %v11593_v30  ;;  %v11595_v53 = vmov 0.0  }
 0x1e7   :  { %v3063_v47 = vsel %vm2580_vm5, %v3062_v4, %v3061_v23  ;;  %v8393_v19 = vrot.slane %v11595_v53, 1  ;;  %v2727_v59 = vrot.slane %v11593_v30, 1  ;;  %v2728_v54 = vrot.slane %v11594_v15, 1  ;;  %v11632_v15 = vld [vmem:[#allocation75_spill] sm:$0xff] }
 0x1e8   :  { %v3065_v0 = vsel %vm2582_vm6, %v3064_v61, %v3063_v47  ;;  %v2729_v41 = vrot.slane %v11596_v55, 1  ;;  %v3826_v38 = vrot.slane %v7889_v57, 7  ;;  %v3828_v63 = vrot.slane %v7895_v42, 6  ;;  %v11648_v30 = vld [vmem:[#allocation59_spill] sm:$0xff] }
 0x1e9   :  { %v3067_v39 = vsel %vm2584_vm7, %v3066_v24, %v3065_v0  ;;  %v8404_v35 = vsel %vm2756_vm9, %v8393_v19, 0.0  ;;  %v2758_v9 = vsel %vm2756_vm9, %v2727_v59, 0.0  ;;  %v2759_v3 = vsel %vm2756_vm9, %v2728_v54, 0.0 }
 0x1ea   :  { %11597 = vst [vmem:[#allocation81_spill] sm:$0xff] %v8404_v35  ;;  %v3069_v18 = vsel %vm2586_vm8, %v3068_v28, %v3067_v39  ;;  %v5700_v36 = vpack.i.bf16 %v2758_v9, %v8404_v35  ;;  %v2760_v44 = vsel %vm2756_vm9, %v2729_v41, 0.0  ;;  %v3827_v43 = vsel %vm2574_vm2, %v3826_v38, %v7887_v29  ;;  %v11598_v29 = vld [vmem:[#allocation80_spill] sm:$0xff] }
 0x1eb   :  { %v3253_v37 = vsel %vm2710_vm10, 0.0, %v3069_v18  ;;  %v5710_v34 = vpack.i.bf16 %v2760_v44, %v2759_v3  ;;  %v3829_v4 = vsel %vm2576_vm3, %v3828_v63, %v3827_v43  ;;  %v3830_v52 = vrot.slane %v7905_v7, 5  ;;  %v11599_v3 = vld [vmem:[#allocation84_spill] sm:$0xff] }
 0x1ec   :  { %v5690_v56 = vpack.i.bf16 %v3253_v37, %v3252_v17  ;;  %5701 = vrot.lane.b32.xlu1 %v5700_v36, %s6275_s25  ;;  %v3832_v61 = vrot.slane %v7907_v21, 4  ;;  %v3834_v24 = vrot.slane %v7917_v20, 3  ;;  %v3836_v23 = vrot.slane %v7919_v60, 2 }
 0x1ed   :  { %v3831_v28 = vsel %vm2578_vm4, %v3830_v52, %v3829_v4  ;;  %v3838_v47 = vrot.slane %v11598_v29, 1  ;;  %v3840_v59 = vrot.slane %v7937_v33, 7  ;;  %v3842_v54 = vrot.slane %v7943_v5, 6 }
 0x1ee   :  { %5691 = vrot.lane.b32.xlu2 %v5690_v56, %s6276_s26  ;;  %5681 = vrot.lane.b32.xlu0 %v5680_v25, %s6277_s27  ;;  %v3833_v17 = vsel %vm2580_vm5, %v3832_v61, %v3831_v28  ;;  %v3844_v0 = vrot.slane %v7945_v62, 5  ;;  %v3846_v41 = vrot.slane %v11590_v27, 4  ;;  %v3848_v38 = vrot.slane %v11591_v40, 3 }
 0x1ef   :  { %v3835_v63 = vsel %vm2582_vm6, %v3834_v24, %v3833_v17  ;;  %v3841_v39 = vsel %vm2574_vm2, %v3840_v59, %v7930_v45  ;;  %v3850_v9 = vrot.slane %v11592_v26, 2  ;;  %v3852_v18 = vrot.slane %v11599_v3, 1 }
 0x1f0   :  { %v3837_v36 = vsel %vm2584_vm7, %v3836_v23, %v3835_v63  ;;  %v3843_v25 = vsel %vm2576_vm3, %v3842_v54, %v3841_v39  ;;  %v3267_v44 = vrot.slane %v7895_v42, 7  ;;  %v3269_v43 = vrot.slane %v7905_v7, 6 }
 0x1f1   :  { %v3839_v37 = vsel %vm2586_vm8, %v3838_v47, %v3837_v36  ;;  %v3845_v4 = vsel %vm2578_vm4, %v3844_v0, %v3843_v25  ;;  %v3271_v52 = vrot.slane %v7907_v21, 5  ;;  %v3273_v56 = vrot.slane %v7917_v20, 4  ;;  %v11600_v25 = vld [vmem:[#allocation25_spill] sm:$0xff] }
 0x1f2   :  { %v3847_v61 = vsel %vm2580_vm5, %v3846_v41, %v3845_v4  ;;  %v3268_v24 = vsel %vm2574_vm2, %v3267_v44, %v7889_v57  ;;  %v3275_v23 = vrot.slane %v7919_v60, 3  ;;  %v3277_v28 = vrot.slane %v11598_v29, 2  ;;  %v11601_v44 = vld [vmem:[#allocation26_spill] sm:$0xff] }
 0x1f3   :  { %v3849_v42 = vsel %vm2582_vm6, %v3848_v38, %v3847_v61  ;;  %v3270_v7 = vsel %vm2576_vm3, %v3269_v43, %v3268_v24  ;;  %v3279_v47 = vrot.slane %v7943_v5, 7  ;;  %v3281_v59 = vrot.slane %v7945_v62, 6 }
 0x1f4   :  { %v3851_v21 = vsel %vm2584_vm7, %v3850_v9, %v3849_v42  ;;  %v3272_v20 = vsel %vm2578_vm4, %v3271_v52, %v3270_v7  ;;  %v3283_v54 = vrot.slane %v11590_v27, 5  ;;  %v3285_v57 = vrot.slane %v11591_v40, 4  ;;  %v11602_v52 = vld [vmem:[#allocation27_spill] sm:$0xff] }
 0x1f5   :  { %v3853_v60 = vsel %vm2586_vm8, %v3852_v18, %v3851_v21  ;;  %v3274_v29 = vsel %vm2580_vm5, %v3273_v56, %v3272_v20  ;;  %v3280_v17 = vsel %vm2574_vm2, %v3279_v47, %v7937_v33  ;;  %v3287_v0 = vrot.slane %v11592_v26, 3 }
 0x1f6   :  { %5711 = vrot.lane.b32.xlu2 %v5710_v34, %s6275_s25  ;;  %v5695_v41 = vpack.i.bf16 %v3853_v60, %v3839_v37  ;;  %v3276_v38 = vsel %vm2582_vm6, %v3275_v23, %v3274_v29  ;;  %v3282_v63 = vsel %vm2576_vm3, %v3281_v59, %v3280_v17  ;;  %v3289_v39 = vrot.slane %v11599_v3, 2  ;;  %v11603_v23 = vld [vmem:[#allocation28_spill] sm:$0xff]  ;;  %v11604_v59 = vld [vmem:[#allocation29_spill] sm:$0xff]  ;;  %v11605_v60 = vld [vmem:[#allocation30_spill] sm:$0xff] }
 0x1f7   :  { %v3278_v9 = vsel %vm2584_vm7, %v3277_v28, %v3276_v38  ;;  %v3284_v18 = vsel %vm2578_vm4, %v3283_v54, %v3282_v63  ;;  %v2928_v36 = vsel %vm2574_vm2, %v7943_v5, %v7937_v33  ;;  %v2934_v43 = vsel %vm2574_vm2, %v11601_v44, %v11600_v25 }
 0x1f8   :  { %5696 = vrot.lane.b32.xlu0 %v5695_v41, %s6278_s28  ;;  %v3286_v34 = vsel %vm2580_vm5, %v3285_v57, %v3284_v18  ;;  %v3456_v37 = vsel %vm2756_vm9, %v3278_v9, 0.0  ;;  %v2929_v4 = vsel %vm2576_vm3, %v7945_v62, %v2928_v36  ;;  %v2935_v56 = vsel %vm2576_vm3, %v11602_v52, %v2934_v43  ;;  %v11607_v9 = vld [vmem:[#allocation24_spill] sm:$0xff] }
 0x1f9   :  { %v3288_v61 = vsel %vm2582_vm6, %v3287_v0, %v3286_v34  ;;  %v2930_v24 = vsel %vm2578_vm4, %v11590_v27, %v2929_v4  ;;  %v2936_v28 = vsel %vm2578_vm4, %v11603_v23, %v2935_v56  ;;  %v2798_v42 = vsel %vm2576_vm3, %v7937_v33, %v7930_v45  ;;  %v11606_v0 = vld [vmem:[#allocation31_spill] sm:$0xff]  ;;  %v11608_v36 = vld [vmem:[#allocation40_spill] sm:$0xff] }
 0x1fa   :  { %v3290_v7 = vsel %vm2584_vm7, %v3289_v39, %v3288_v61  ;;  %v2931_v47 = vsel %vm2580_vm5, %v11591_v40, %v2930_v24  ;;  %v2937_v21 = vsel %vm2580_vm5, %v11604_v59, %v2936_v28  ;;  %v2799_v20 = vsel %vm2578_vm4, %v7943_v5, %v2798_v42 }
 0x1fb   :  { %v3457_v54 = vsel %vm2756_vm9, %v3290_v7, 0.0  ;;  %v2932_v57 = vsel %vm2582_vm6, %v11592_v26, %v2931_v47  ;;  %v2938_v29 = vsel %vm2582_vm6, %v11605_v60, %v2937_v21  ;;  %v2800_v45 = vsel %vm2580_vm5, %v7945_v62, %v2799_v20  ;;  %v11609_v47 = vld [vmem:[#allocation34_spill] sm:$0xff] }
 0x1fc   :  { %v5705_v33 = vpack.i.bf16 %v3457_v54, %v3456_v37  ;;  %v2933_v17 = vsel %vm2584_vm7, %v11599_v3, %v2932_v57  ;;  %v2939_v41 = vsel %vm2584_vm7, %v11606_v0, %v2938_v29  ;;  %v2801_v5 = vsel %vm2582_vm6, %v11590_v27, %v2800_v45  ;;  %v11610_v57 = vld [vmem:[#allocation35_spill] sm:$0xff]  ;;  %v11611_v45 = vld [vmem:[#allocation36_spill] sm:$0xff] }
 0x1fd   :  { %v3030_v38 = vsel %vm2756_vm9, %v2933_v17, 0.0  ;;  %v3031_v63 = vsel %vm2756_vm9, %v2939_v41, 0.0  ;;  %v2802_v39 = vsel %vm2584_vm7, %v11591_v40, %v2801_v5  ;;  %v2804_v62 = vsel %vm2576_vm3, %v11600_v25, %v11607_v9  ;;  %v11612_v5 = vld [vmem:[#allocation33_spill] sm:$0xff] }
 0x1fe   :  { %5706 = vrot.lane.b32.xlu1 %v5705_v33, %s6279_s30  ;;  %v5725_v3 = vpack.i.bf16 %v3031_v63, %v3030_v38  ;;  %v2803_v18 = vsel %vm2586_vm8, %v11592_v26, %v2802_v39  ;;  %v2805_v27 = vsel %vm2578_vm4, %v11601_v44, %v2804_v62  ;;  %v5720_v43 = vpack.i.bf16 %v11608_v36, %v11596_v55  ;;  %v11613_v63 = vld [vmem:[#allocation37_spill] sm:$0xff]  ;;  %v11633_v55 = vld [vmem:[#allocation76_spill] sm:$0xff] }
 0x1ff   :  { %v2806_v40 = vsel %vm2580_vm5, %v11602_v52, %v2805_v27  ;;  %v2900_v34 = vsel %vm2710_vm10, 0.0, %v2803_v18  ;;  %v3291_v37 = vrot.slane %v11601_v44, 7  ;;  %v3293_v4 = vrot.slane %v11602_v52, 6  ;;  %v11614_v27 = vld [vmem:[#allocation38_spill] sm:$0xff] }
 0x200   :  { %5726 = vrot.lane.b32.xlu2 %v5725_v3, %s6273_s29  ;;  %v2807_v26 = vsel %vm2582_vm6, %v11603_v23, %v2806_v40  ;;  %v3295_v56 = vrot.slane %v11603_v23, 5  ;;  %v3297_v61 = vrot.slane %v11604_v59, 4  ;;  %v3299_v24 = vrot.slane %v11605_v60, 3 }
 0x201   :  { %v2808_v28 = vsel %vm2584_vm7, %v11604_v59, %v2807_v26  ;;  %v3292_v42 = vsel %vm2574_vm2, %v3291_v37, %v11600_v25  ;;  %v3301_v7 = vrot.slane %v11606_v0, 2  ;;  %v3303_v21 = vrot.slane %v11609_v47, 7  ;;  %v11615_v26 = vld [vmem:[#allocation39_spill] sm:$0xff] }
 0x202   :  { %v2809_v20 = vsel %vm2586_vm8, %v11605_v60, %v2808_v28  ;;  %v3294_v54 = vsel %vm2576_vm3, %v3293_v4, %v3292_v42  ;;  %v3305_v29 = vrot.slane %v11610_v57, 6  ;;  %v3307_v33 = vrot.slane %v11611_v45, 5 }
 0x203   :  { %v2901_v17 = vsel %vm2710_vm10, 0.0, %v2809_v20  ;;  %v3296_v41 = vsel %vm2578_vm4, %v3295_v56, %v3294_v54  ;;  %v3304_v38 = vsel %vm2574_vm2, %v3303_v21, %v11612_v5  ;;  %v3309_v39 = vrot.slane %v11613_v63, 4 }
 0x204   :  { %v5715_v62 = vpack.i.bf16 %v2901_v17, %v2900_v34  ;;  %v3298_v3 = vsel %vm2580_vm5, %v3297_v61, %v3296_v41  ;;  %v3306_v18 = vsel %vm2576_vm3, %v3305_v29, %v3304_v38  ;;  %v3311_v40 = vrot.slane %v11614_v27, 3 }
 0x205   :  { %v3300_v37 = vsel %vm2582_vm6, %v3299_v24, %v3298_v3  ;;  %v3308_v4 = vsel %vm2578_vm4, %v3307_v33, %v3306_v18  ;;  %v3313_v28 = vrot.slane %v11615_v26, 2  ;;  %v3070_v56 = vrot.slane %v11607_v9, 7 }
 0x206   :  { %5716 = vrot.lane.b32.xlu0 %v5715_v62, %s6274_s16  ;;  %5721 = vrot.lane.b32.xlu1 %v5720_v43, %s6277_s27  ;;  %v3302_v34 = vsel %vm2584_vm7, %v3301_v7, %v3300_v37  ;;  %v3310_v61 = vsel %vm2580_vm5, %v3309_v39, %v3308_v4  ;;  %v3071_v42 = vrot.slane %v11600_v25, 6  ;;  %v3073_v21 = vrot.slane %v11601_v44, 5  ;;  %v11616_v39 = vld [vmem:[#allocation32_spill] sm:$0xff] }
 0x207   :  { %v3312_v24 = vsel %vm2582_vm6, %v3311_v40, %v3310_v61  ;;  %v3458_v20 = vsel %vm2756_vm9, %v3302_v34, 0.0  ;;  %v3075_v54 = vrot.slane %v11602_v52, 4  ;;  %v3077_v29 = vrot.slane %v11603_v23, 3 }
 0x208   :  { %v3314_v33 = vsel %vm2584_vm7, %v3313_v28, %v3312_v24  ;;  %v3072_v43 = vsel %vm2576_vm3, %v3071_v42, %v3070_v56  ;;  %v3079_v7 = vrot.slane %v11604_v59, 2  ;;  %v3081_v17 = vrot.slane %v11605_v60, 1 }
 0x209   :  { %v3459_v41 = vsel %vm2756_vm9, %v3314_v33, 0.0  ;;  %v3074_v38 = vsel %vm2578_vm4, %v3073_v21, %v3072_v43  ;;  %v3083_v62 = vrot.slane %v11616_v39, 7  ;;  %v3084_v3 = vrot.slane %v11612_v5, 6 }
 0x20a   :  { %v5740_v18 = vpack.i.bf16 %v3459_v41, %v3458_v20  ;;  %v3076_v40 = vsel %vm2580_vm5, %v3075_v54, %v3074_v38  ;;  %v3086_v37 = vrot.slane %v11609_v47, 5  ;;  %v3088_v4 = vrot.slane %v11610_v57, 4 }
 0x20b   :  { %v3078_v28 = vsel %vm2582_vm6, %v3077_v29, %v3076_v40  ;;  %v3085_v56 = vsel %vm2576_vm3, %v3084_v3, %v3083_v62  ;;  %v3090_v34 = vrot.slane %v11611_v45, 3  ;;  %v3092_v61 = vrot.slane %v11613_v63, 2 }
 0x20c   :  { %5741 = vrot.lane.b32.xlu2 %v5740_v18, %s6279_s30  ;;  %v3080_v42 = vsel %vm2584_vm7, %v3079_v7, %v3078_v28  ;;  %v3087_v21 = vsel %vm2578_vm4, %v3086_v37, %v3085_v56  ;;  %v3094_v24 = vrot.slane %v11614_v27, 1  ;;  %v3854_v20 = vrot.slane %v11600_v25, 7 }
 0x20d   :  { %v3082_v54 = vsel %vm2586_vm8, %v3081_v17, %v3080_v42  ;;  %v3089_v29 = vsel %vm2580_vm5, %v3088_v4, %v3087_v21  ;;  %v3856_v33 = vrot.slane %v11601_v44, 6  ;;  %v3858_v43 = vrot.slane %v11602_v52, 5 }
 0x20e   :  { %v3091_v41 = vsel %vm2582_vm6, %v3090_v34, %v3089_v29  ;;  %v3254_v38 = vsel %vm2710_vm10, 0.0, %v3082_v54  ;;  %v3855_v7 = vsel %vm2574_vm2, %v3854_v20, %v11607_v9  ;;  %v3860_v62 = vrot.slane %v11603_v23, 4  ;;  %v11617_v29 = vld [vmem:[#allocation41_spill] sm:$0xff] }
 0x20f   :  { %v3093_v3 = vsel %vm2584_vm7, %v3092_v61, %v3091_v41  ;;  %v3857_v25 = vsel %vm2576_vm3, %v3856_v33, %v3855_v7  ;;  %v3862_v17 = vrot.slane %v11604_v59, 3  ;;  %v3864_v18 = vrot.slane %v11605_v60, 2  ;;  %v11618_v33 = vld [vmem:[#allocation78_spill] sm:$0xff] }
 0x210   :  { %v3095_v44 = vsel %vm2586_vm8, %v3094_v24, %v3093_v3  ;;  %v3859_v52 = vsel %vm2578_vm4, %v3858_v43, %v3857_v25  ;;  %v3866_v40 = vrot.slane %v11606_v0, 1  ;;  %v3868_v37 = vrot.slane %v11612_v5, 7 }
 0x211   :  { %v3255_v9 = vsel %vm2710_vm10, 0.0, %v3095_v44  ;;  %v3861_v23 = vsel %vm2580_vm5, %v3860_v62, %v3859_v52  ;;  %v3870_v4 = vrot.slane %v11609_v47, 6  ;;  %v3872_v28 = vrot.slane %v11610_v57, 5 }
 0x212   :  { %v5730_v56 = vpack.i.bf16 %v3255_v9, %v3254_v38  ;;  %v3863_v59 = vsel %vm2582_vm6, %v3862_v17, %v3861_v23  ;;  %v3869_v60 = vsel %vm2574_vm2, %v3868_v37, %v11616_v39  ;;  %v3874_v34 = vrot.slane %v11611_v45, 4  ;;  %v11619_v17 = vld [vmem:[#allocation62_spill] sm:$0xff] }
 0x213   :  { %v3865_v0 = vsel %vm2584_vm7, %v3864_v18, %v3863_v59  ;;  %v3871_v61 = vsel %vm2576_vm3, %v3870_v4, %v3869_v60  ;;  %v3876_v42 = vrot.slane %v11613_v63, 3  ;;  %v3878_v21 = vrot.slane %v11614_v27, 2  ;;  %v11620_v18 = vld [vmem:[#allocation63_spill] sm:$0xff] }
 0x214   :  { %5731 = vrot.lane.b32.xlu0 %v5730_v56, %s6276_s26  ;;  %v3867_v24 = vsel %vm2586_vm8, %v3866_v40, %v3865_v0  ;;  %v3873_v20 = vsel %vm2578_vm4, %v3872_v28, %v3871_v61  ;;  %v3880_v54 = vrot.slane %v11615_v26, 1  ;;  %v5755_v43 = vpack.i.bf16 %v11618_v33, %v11617_v29  ;;  %v11621_v56 = vld [vmem:[#allocation64_spill] sm:$0xff]  ;;  %v11622_v0 = vld [vmem:[#allocation65_spill] sm:$0xff] }
 0x215   :  { %v3875_v41 = vsel %vm2580_vm5, %v3874_v34, %v3873_v20  ;;  %v2730_v38 = vrot.slane %v11608_v36, 1  ;;  %v2731_v7 = vrot.slane %v11617_v29, 1  ;;  %v2810_v62 = vsel %vm2576_vm3, %v11612_v5, %v11616_v39  ;;  %v11623_v20 = vld [vmem:[#allocation66_spill] sm:$0xff]  ;;  %v11650_v36 = vld [vmem:[#allocation57_spill] sm:$0xff] }
 0x216   :  { %v3877_v3 = vsel %vm2582_vm6, %v3876_v42, %v3875_v41  ;;  %5756 = vrot.lane.b32.xlu2 %v5755_v43, %s6277_s27  ;;  %v2811_v25 = vsel %vm2578_vm4, %v11609_v47, %v2810_v62  ;;  %v2816_v44 = vsel %vm2576_vm3, %v11620_v18, %v11619_v17  ;;  %v3882_v52 = vrot.slane %v11620_v18, 7 }
 0x217   :  { %v3879_v40 = vsel %vm2584_vm7, %v3878_v21, %v3877_v3  ;;  %v2761_v37 = vsel %vm2756_vm9, %v2730_v38, 0.0  ;;  %v2762_v9 = vsel %vm2756_vm9, %v2731_v7, 0.0  ;;  %v2812_v39 = vsel %vm2580_vm5, %v11610_v57, %v2811_v25  ;;  %v11625_v25 = vld [vmem:[#allocation68_spill] sm:$0xff] }
 0x218   :  { %v3881_v23 = vsel %vm2586_vm8, %v3880_v54, %v3879_v40  ;;  %v5745_v4 = vpack.i.bf16 %v2762_v9, %v2761_v37  ;;  %v2813_v28 = vsel %vm2582_vm6, %v11611_v45, %v2812_v39  ;;  %v2817_v59 = vsel %vm2578_vm4, %v11621_v56, %v2816_v44  ;;  %v11626_v37 = vld [vmem:[#allocation69_spill] sm:$0xff] }
 0x219   :  { %v5735_v60 = vpack.i.bf16 %v3881_v23, %v3867_v24  ;;  %v2814_v34 = vsel %vm2584_vm7, %v11613_v63, %v2813_v28  ;;  %v2818_v61 = vsel %vm2580_vm5, %v11622_v0, %v2817_v59  ;;  %v3883_v42 = vsel %vm2574_vm2, %v3882_v52, %v11619_v17  ;;  %v11624_v24 = vld [vmem:[#allocation67_spill] sm:$0xff] }
 0x21a   :  { %v2815_v21 = vsel %vm2586_vm8, %v11614_v27, %v2814_v34  ;;  %v2819_v54 = vsel %vm2582_vm6, %v11623_v20, %v2818_v61  ;;  %v3884_v43 = vrot.slane %v11621_v56, 6  ;;  %v3886_v41 = vrot.slane %v11622_v0, 5  ;;  %v11627_v28 = vld [vmem:[#allocation71_spill] sm:$0xff] }
 0x21b   :  { %5736 = vrot.lane.b32.xlu1 %v5735_v60, %s6278_s28  ;;  %v2820_v38 = vsel %vm2584_vm7, %v11624_v24, %v2819_v54  ;;  %v2902_v7 = vsel %vm2710_vm10, 0.0, %v2815_v21  ;;  %v3888_v62 = vrot.slane %v11623_v20, 4  ;;  %v3890_v3 = vrot.slane %v11624_v24, 3  ;;  %v11628_v60 = vld [vmem:[#allocation72_spill] sm:$0xff]  ;;  %v11629_v21 = vld [vmem:[#allocation73_spill] sm:$0xff] }
 0x21c   :  { %5746 = vrot.lane.b32.xlu0 %v5745_v4, %s6275_s25  ;;  %v2821_v44 = vsel %vm2586_vm8, %v11625_v25, %v2820_v38  ;;  %v3885_v52 = vsel %vm2576_vm3, %v3884_v43, %v3883_v42  ;;  %v3892_v40 = vrot.slane %v11625_v25, 2  ;;  %v3894_v9 = vrot.slane %v11626_v37, 1  ;;  %v11630_v38 = vld [vmem:[#allocation74_spill] sm:$0xff] }
 0x21d   :  { %v2903_v39 = vsel %vm2710_vm10, 0.0, %v2821_v44  ;;  %v3887_v23 = vsel %vm2578_vm4, %v3886_v41, %v3885_v52  ;;  %v3896_v59 = vrot.slane %v11627_v28, 7  ;;  %v3898_v34 = vrot.slane %v11628_v60, 6  ;;  %v11631_v43 = vld [vmem:[#allocation70_spill] sm:$0xff] }
 0x21e   :  { %v5750_v61 = vpack.i.bf16 %v2903_v39, %v2902_v7  ;;  %v3889_v4 = vsel %vm2580_vm5, %v3888_v62, %v3887_v23  ;;  %v3900_v54 = vrot.slane %v11629_v21, 5  ;;  %v3902_v35 = vrot.slane %v11630_v38, 4  ;;  %v11634_v7 = vld [vmem:[#allocation77_spill] sm:$0xff] }
 0x21f   :  { %v3891_v42 = vsel %vm2582_vm6, %v3890_v3, %v3889_v4  ;;  %v3897_v2 = vsel %vm2574_vm2, %v3896_v59, %v11631_v43  ;;  %v3904_v44 = vrot.slane %v11632_v15, 3  ;;  %v3906_v41 = vrot.slane %v11633_v55, 2 }
 0x220   :  { %v3893_v52 = vsel %vm2584_vm7, %v3892_v40, %v3891_v42  ;;  %v3899_v12 = vsel %vm2576_vm3, %v3898_v34, %v3897_v2  ;;  %v3908_v39 = vrot.slane %v11634_v7, 1  ;;  %v2940_v62 = vsel %vm2574_vm2, %v11609_v47, %v11612_v5 }
 0x221   :  { %v3895_v23 = vsel %vm2586_vm8, %v3894_v9, %v3893_v52  ;;  %v3901_v3 = vsel %vm2578_vm4, %v3900_v54, %v3899_v12  ;;  %v2941_v59 = vsel %vm2576_vm3, %v11610_v57, %v2940_v62  ;;  %v2946_v4 = vsel %vm2574_vm2, %v11621_v56, %v11620_v18 }
 0x222   :  { %v3903_v40 = vsel %vm2580_vm5, %v3902_v35, %v3901_v3  ;;  %v2942_v2 = vsel %vm2578_vm4, %v11611_v45, %v2941_v59  ;;  %v2947_v34 = vsel %vm2576_vm3, %v11622_v0, %v2946_v4  ;;  %v3096_v47 = vrot.slane %v11619_v17, 7 }
 0x223   :  { %5751 = vrot.lane.b32.xlu1 %v5750_v61, %s6274_s16  ;;  %v3905_v12 = vsel %vm2582_vm6, %v3904_v44, %v3903_v40  ;;  %v2943_v57 = vsel %vm2580_vm5, %v11613_v63, %v2942_v2  ;;  %v2948_v5 = vsel %vm2578_vm4, %v11623_v20, %v2947_v34  ;;  %v3097_v35 = vrot.slane %v11620_v18, 6 }
 0x224   :  { %v3907_v9 = vsel %vm2584_vm7, %v3906_v41, %v3905_v12  ;;  %v2944_v45 = vsel %vm2582_vm6, %v11614_v27, %v2943_v57  ;;  %v2949_v17 = vsel %vm2580_vm5, %v11624_v24, %v2948_v5  ;;  %v3099_v61 = vrot.slane %v11621_v56, 5 }
 0x225   :  { %v3909_v54 = vsel %vm2586_vm8, %v3908_v39, %v3907_v9  ;;  %v2945_v63 = vsel %vm2584_vm7, %v11615_v26, %v2944_v45  ;;  %v2950_v42 = vsel %vm2582_vm6, %v11625_v25, %v2949_v17  ;;  %v3098_v44 = vsel %vm2576_vm3, %v3097_v35, %v3096_v47 }
 0x226   :  { %v5770_v52 = vpack.i.bf16 %v3909_v54, %v3895_v23  ;;  %v2951_v41 = vsel %vm2584_vm7, %v11626_v37, %v2950_v42  ;;  %v3032_v27 = vsel %vm2756_vm9, %v2945_v63, 0.0  ;;  %v3100_v62 = vsel %vm2578_vm4, %v3099_v61, %v3098_v44  ;;  %v11635_v54 = vld [vmem:[#allocation43_spill] sm:$0xff]  ;;  %v11636_v63 = vld [vmem:[#allocation44_spill] sm:$0xff] }
 0x227   :  { %v3033_v3 = vsel %vm2756_vm9, %v2951_v41, 0.0  ;;  %v3101_v39 = vrot.slane %v11622_v0, 4  ;;  %v3103_v59 = vrot.slane %v11623_v20, 3  ;;  %v3105_v26 = vrot.slane %v11624_v24, 2  ;;  %v11637_v44 = vld [vmem:[#allocation51_spill] sm:$0xff] }
 0x228   :  { %5771 = vrot.lane.b32.xlu2 %v5770_v52, %s6278_s28  ;;  %v5760_v4 = vpack.i.bf16 %v3033_v3, %v3032_v27  ;;  %v3107_v23 = vrot.slane %v11625_v25, 1  ;;  %v3109_v40 = vrot.slane %v11631_v43, 7  ;;  %v3110_v2 = vrot.slane %v11627_v28, 6  ;;  %v11638_v52 = vld [vmem:[#allocation52_spill] sm:$0xff]  ;;  %v11639_v3 = vld [vmem:[#allocation45_spill] sm:$0xff] }
 0x229   :  { %v3102_v34 = vsel %vm2580_vm5, %v3101_v39, %v3100_v62  ;;  %v3112_v47 = vrot.slane %v11628_v60, 5  ;;  %v3114_v12 = vrot.slane %v11629_v21, 4  ;;  %v3116_v57 = vrot.slane %v11630_v38, 3 }
 0x22a   :  { %5761 = vrot.lane.b32.xlu0 %v5760_v4, %s6273_s29  ;;  %v3104_v5 = vsel %vm2582_vm6, %v3103_v59, %v3102_v34  ;;  %v3111_v35 = vsel %vm2576_vm3, %v3110_v2, %v3109_v40  ;;  %v3118_v9 = vrot.slane %v11632_v15, 2  ;;  %v3120_v45 = vrot.slane %v11633_v55, 1  ;;  %v11640_v59 = vld [vmem:[#allocation53_spill] sm:$0xff]  ;;  %v11641_v2 = vld [vmem:[#allocation46_spill] sm:$0xff] }
 0x22b   :  { %v3106_v17 = vsel %vm2584_vm7, %v3105_v26, %v3104_v5  ;;  %v3113_v61 = vsel %vm2578_vm4, %v3112_v47, %v3111_v35  ;;  %v2846_v42 = vsel %vm2576_vm3, %v11636_v63, %v11635_v54  ;;  %v2852_v41 = vsel %vm2576_vm3, %v11638_v52, %v11637_v44  ;;  %v11642_v47 = vld [vmem:[#allocation54_spill] sm:$0xff]  ;;  %v11643_v35 = vld [vmem:[#allocation47_spill] sm:$0xff]  ;;  %v11647_v54 = vld [vmem:[#allocation56_spill] sm:$0xff] }
 0x22c   :  { %v3108_v27 = vsel %vm2586_vm8, %v3107_v23, %v3106_v17  ;;  %v3115_v62 = vsel %vm2580_vm5, %v3114_v12, %v3113_v61  ;;  %v2847_v39 = vsel %vm2578_vm4, %v11639_v3, %v2846_v42  ;;  %v2853_v26 = vsel %vm2578_vm4, %v11640_v59, %v2852_v41  ;;  %v11644_v17 = vld [vmem:[#allocation55_spill] sm:$0xff]  ;;  %v11645_v42 = vld [vmem:[#allocation22_spill] sm:$0xff] }
 0x22d   :  { %v3117_v4 = vsel %vm2582_vm6, %v3116_v57, %v3115_v62  ;;  %v3256_v40 = vsel %vm2710_vm10, 0.0, %v3108_v27  ;;  %v2848_v34 = vsel %vm2580_vm5, %v11641_v2, %v2847_v39  ;;  %v2854_v5 = vsel %vm2580_vm5, %v11642_v47, %v2853_v26  ;;  %v11646_v62 = vld [vmem:[#allocation48_spill] sm:$0xff] }
 0x22e   :  { %v3119_v23 = vsel %vm2584_vm7, %v3118_v9, %v3117_v4  ;;  %v2849_v12 = vsel %vm2582_vm6, %v11643_v35, %v2848_v34  ;;  %v2855_v61 = vsel %vm2582_vm6, %v11644_v17, %v2854_v5  ;;  %v2735_v41 = vrot.slane %v11645_v42, 1  ;;  %v11649_v4 = vld [vmem:[#allocation49_spill] sm:$0xff] }
 0x22f   :  { %v3121_v57 = vsel %vm2586_vm8, %v3120_v45, %v3119_v23  ;;  %v2850_v27 = vsel %vm2584_vm7, %v11646_v62, %v2849_v12  ;;  %v2856_v39 = vsel %vm2584_vm7, %v11647_v54, %v2855_v61  ;;  %v2736_v26 = vrot.slane %v11648_v30, 1 }
 0x230   :  { %v3257_v9 = vsel %vm2710_vm10, 0.0, %v3121_v57  ;;  %v2851_v34 = vsel %vm2586_vm8, %v11649_v4, %v2850_v27  ;;  %v2857_v5 = vsel %vm2586_vm8, %v11650_v36, %v2856_v39  ;;  %v2766_v29 = vsel %vm2756_vm9, %v2735_v41, 0.0 }
 0x231   :  { %v5765_v31 = vpack.i.bf16 %v3257_v9, %v3256_v40  ;;  %v2908_v45 = vsel %vm2710_vm10, 0.0, %v2851_v34  ;;  %v2909_v23 = vsel %vm2710_vm10, 0.0, %v2857_v5  ;;  %v2767_v12 = vsel %vm2756_vm9, %v2736_v26, 0.0 }
 0x232   :  { %v5785_v61 = vpack.i.bf16 %v2909_v23, %v2908_v45  ;;  %v5775_v1 = vpack.i.bf16 %v2767_v12, %v2766_v29  ;;  %v3315_v30 = vrot.slane %v11621_v56, 7  ;;  %v3317_v57 = vrot.slane %v11622_v0, 6 }
 0x233   :  { %5766 = vrot.lane.b32.xlu1 %v5765_v31, %s6276_s26  ;;  %v3319_v27 = vrot.slane %v11623_v20, 5  ;;  %v3321_v39 = vrot.slane %v11624_v24, 4  ;;  %v3323_v40 = vrot.slane %v11625_v25, 3  ;;  %v3325_v41 = vrot.slane %v11626_v37, 2 }
 0x234   :  { %5786 = vrot.lane.b32.xlu2 %v5785_v61, %s6274_s16  ;;  %5776 = vrot.lane.b32.xlu0 %v5775_v1, %s6275_s25  ;;  %v3316_v29 = vsel %vm2574_vm2, %v3315_v30, %v11620_v18  ;;  %v3327_v56 = vrot.slane %v11628_v60, 7  ;;  %v3329_v0 = vrot.slane %v11629_v21, 6  ;;  %v3331_v31 = vrot.slane %v11630_v38, 5 }
 0x235   :  { %v3318_v20 = vsel %vm2576_vm3, %v3317_v57, %v3316_v29  ;;  %v3333_v24 = vrot.slane %v11632_v15, 4  ;;  %v3335_v25 = vrot.slane %v11633_v55, 3  ;;  %v3337_v37 = vrot.slane %v11634_v7, 2 }
 0x236   :  { %v3320_v26 = vsel %vm2578_vm4, %v3319_v27, %v3318_v20  ;;  %v3328_v1 = vsel %vm2574_vm2, %v3327_v56, %v11627_v28  ;;  %v3172_v30 = vrot.slane %v11637_v44, 7  ;;  %v3173_v18 = vrot.slane %v11638_v52, 6 }
 0x237   :  { %v3322_v9 = vsel %vm2580_vm5, %v3321_v39, %v3320_v26  ;;  %v3330_v34 = vsel %vm2576_vm3, %v3329_v0, %v3328_v1  ;;  %v3175_v5 = vrot.slane %v11640_v59, 5  ;;  %v3177_v45 = vrot.slane %v11642_v47, 4 }
 0x238   :  { %v3324_v23 = vsel %vm2582_vm6, %v3323_v40, %v3322_v9  ;;  %v3332_v12 = vsel %vm2578_vm4, %v3331_v31, %v3330_v34  ;;  %v3174_v61 = vsel %vm2576_vm3, %v3173_v18, %v3172_v30  ;;  %v3179_v57 = vrot.slane %v11644_v17, 3 }
 0x239   :  { %v3326_v27 = vsel %vm2584_vm7, %v3325_v41, %v3324_v23  ;;  %v3334_v29 = vsel %vm2580_vm5, %v3333_v24, %v3332_v12  ;;  %v3176_v39 = vsel %vm2578_vm4, %v3175_v5, %v3174_v61  ;;  %v3181_v56 = vrot.slane %v11647_v54, 2 }
 0x23a   :  { %v3336_v0 = vsel %vm2582_vm6, %v3335_v25, %v3334_v29  ;;  %v3460_v20 = vsel %vm2756_vm9, %v3326_v27, 0.0  ;;  %v3178_v40 = vsel %vm2580_vm5, %v3177_v45, %v3176_v39  ;;  %v3183_v31 = vrot.slane %v11650_v36, 1 }
 0x23b   :  { %v3338_v26 = vsel %vm2584_vm7, %v3337_v37, %v3336_v0  ;;  %v3180_v1 = vsel %vm2582_vm6, %v3179_v57, %v3178_v40  ;;  %v3185_v41 = vrot.slane %v8242_v51, 7  ;;  %v3186_v24 = vrot.slane %v8248_v13, 6 }
 0x23c   :  { %v3461_v30 = vsel %vm2756_vm9, %v3338_v26, 0.0  ;;  %v3182_v18 = vsel %vm2584_vm7, %v3181_v56, %v3180_v1  ;;  %v3188_v25 = vrot.slane %v8254_v8, 5  ;;  %v3190_v9 = vrot.slane %v8262_v11, 4  ;;  %v11651_v26 = vld [vmem:[#allocation61_spill] sm:$0xff] }
 0x23d   :  { %v5780_v34 = vpack.i.bf16 %v3461_v30, %v3460_v20  ;;  %v3184_v5 = vsel %vm2586_vm8, %v3183_v31, %v3182_v18  ;;  %v3187_v45 = vsel %vm2576_vm3, %v3186_v24, %v3185_v41  ;;  %v3192_v37 = vrot.slane %v8270_v48, 3  ;;  %5791 = vrot.lane.b32.xlu0 %v11651_v26, %s6277_s27  ;;  %v11652_v24 = vld [vmem:[#allocation79_spill] sm:$0xff] }
 0x23e   :  { %v3189_v23 = vsel %vm2578_vm4, %v3188_v25, %v3187_v45  ;;  %v3194_v12 = vrot.slane %v8272_v49, 2  ;;  %v3196_v61 = vrot.slane %v8284_v6, 1  ;;  %v3262_v57 = vsel %vm2710_vm10, 0.0, %v3184_v5 }
 0x23f   :  { %5781 = vrot.lane.b32.xlu1 %v5780_v34, %s6279_s30  ;;  %v3191_v27 = vsel %vm2580_vm5, %v3190_v9, %v3189_v23  ;;  %v2976_v29 = vsel %vm2574_vm2, %v11639_v3, %v11636_v63  ;;  %v2982_v39 = vsel %vm2574_vm2, %v11640_v59, %v11638_v52  ;;  %v2732_v40 = vrot.slane %v11618_v33, 1 }
 0x240   :  { %v3193_v56 = vsel %vm2582_vm6, %v3192_v37, %v3191_v27  ;;  %v2977_v0 = vsel %vm2576_vm3, %v11641_v2, %v2976_v29  ;;  %v2983_v20 = vsel %vm2576_vm3, %v11642_v47, %v2982_v39  ;;  %v2733_v30 = vrot.slane %v11652_v24, 1  ;;  %v11654_v29 = vld [vmem:[#allocation58_spill] sm:$0xff] }
 0x241   :  { %v3195_v31 = vsel %vm2584_vm7, %v3194_v12, %v3193_v56  ;;  %v2978_v1 = vsel %vm2578_vm4, %v11643_v35, %v2977_v0  ;;  %v2984_v41 = vsel %vm2578_vm4, %v11644_v17, %v2983_v20  ;;  %v2763_v34 = vsel %vm2756_vm9, %v2732_v40, 0.0 }
 0x242   :  { %v3197_v18 = vsel %vm2586_vm8, %v3196_v61, %v3195_v31  ;;  %v2979_v25 = vsel %vm2580_vm5, %v11646_v62, %v2978_v1  ;;  %v2985_v9 = vsel %vm2580_vm5, %v11647_v54, %v2984_v41  ;;  %v2764_v23 = vsel %vm2756_vm9, %v2733_v30, 0.0  ;;  %v11653_v61 = vld [vmem:[#allocation50_spill] sm:$0xff] }
 0x243   :  { %v3263_v5 = vsel %vm2710_vm10, 0.0, %v3197_v18  ;;  %v2980_v45 = vsel %vm2582_vm6, %v11649_v4, %v2979_v25  ;;  %v2986_v37 = vsel %vm2582_vm6, %v11650_v36, %v2985_v9  ;;  %v5815_v56 = vpack.i.bf16 %v2764_v23, %v2763_v34 }
 0x244   :  { %v5800_v12 = vpack.i.bf16 %v3263_v5, %v3262_v57  ;;  %v2981_v27 = vsel %vm2584_vm7, %v11653_v61, %v2980_v45  ;;  %v2987_v39 = vsel %vm2584_vm7, %v11654_v29, %v2986_v37  ;;  %v3953_v40 = vrot.slane %v11638_v52, 7 }
 0x245   :  { %v3038_v0 = vsel %vm2756_vm9, %v2981_v27, 0.0  ;;  %v3039_v20 = vsel %vm2756_vm9, %v2987_v39, 0.0  ;;  %v3955_v31 = vrot.slane %v11640_v59, 6  ;;  %v3957_v57 = vrot.slane %v11642_v47, 5 }
 0x246   :  { %5801 = vrot.lane.b32.xlu2 %v5800_v12, %s6276_s26  ;;  %v5795_v26 = vpack.i.bf16 %v3039_v20, %v3038_v0  ;;  %v3959_v1 = vrot.slane %v11644_v17, 4  ;;  %v3961_v41 = vrot.slane %v11647_v54, 3  ;;  %v3954_v30 = vsel %vm2574_vm2, %v3953_v40, %v11637_v44 }
 0x247   :  { %v3963_v18 = vrot.slane %v11650_v36, 2  ;;  %v3965_v25 = vrot.slane %v11654_v29, 1  ;;  %v3967_v9 = vrot.slane %v8248_v13, 7  ;;  %v3956_v34 = vsel %vm2576_vm3, %v3955_v31, %v3954_v30 }
 0x248   :  { %5796 = vrot.lane.b32.xlu1 %v5795_v26, %s6273_s29  ;;  %v3969_v5 = vrot.slane %v8254_v8, 6  ;;  %v3971_v45 = vrot.slane %v8262_v11, 5  ;;  %v3973_v37 = vrot.slane %v8270_v48, 4  ;;  %v3958_v23 = vsel %vm2578_vm4, %v3957_v57, %v3956_v34 }
 0x249   :  { %v3968_v44 = vsel %vm2574_vm2, %v3967_v9, %v8242_v51  ;;  %v3975_v12 = vrot.slane %v8272_v49, 3  ;;  %v3977_v27 = vrot.slane %v8284_v6, 2  ;;  %v3960_v39 = vsel %vm2580_vm5, %v3959_v1, %v3958_v23 }
 0x24a   :  { %v3970_v0 = vsel %vm2576_vm3, %v3969_v5, %v3968_v44  ;;  %v3979_v20 = vrot.slane %v8286_v32, 1  ;;  %v3381_v40 = vrot.slane %v11640_v59, 7  ;;  %v3962_v31 = vsel %vm2582_vm6, %v3961_v41, %v3960_v39 }
 0x24b   :  { %v3972_v26 = vsel %vm2578_vm4, %v3971_v45, %v3970_v0  ;;  %v3383_v57 = vrot.slane %v11642_v47, 6  ;;  %v3385_v30 = vrot.slane %v11644_v17, 5  ;;  %v3964_v9 = vsel %vm2584_vm7, %v3963_v18, %v3962_v31  ;;  %v142_v31 = vld [vmem:[%s11292_s0 + $0xe4] sm:$0x3] }
 0x24c   :  { %v3974_v34 = vsel %vm2580_vm5, %v3973_v37, %v3972_v26  ;;  %v3382_v1 = vsel %vm2574_vm2, %v3381_v40, %v11638_v52  ;;  %v3387_v5 = vrot.slane %v11647_v54, 4  ;;  %v3966_v23 = vsel %vm2586_vm8, %v3965_v25, %v3964_v9  ;;  %v144_v9 = vld [vmem:[%s11292_s0 + $0xe8] sm:$0x3] }
 0x24d   :  { %v3976_v59 = vsel %vm2582_vm6, %v3975_v12, %v3974_v34  ;;  %v3384_v41 = vsel %vm2576_vm3, %v3383_v57, %v3382_v1  ;;  %v3389_v45 = vrot.slane %v11650_v36, 3  ;;  %v3391_v18 = vrot.slane %v11654_v29, 2  ;;  %v141_v29 = vld [vmem:[%s11292_s0 + $0xe2] sm:$0x3]  ;;  %v143_v57 = vld [vmem:[%s11292_s0 + $0xe6] sm:$0x3] }
 0x24e   :  { %5816 = vrot.lane.b32.xlu2 %v5815_v56, %s6275_s25  ;;  %v3978_v47 = vsel %vm2584_vm7, %v3977_v27, %v3976_v59  ;;  %v3386_v17 = vsel %vm2578_vm4, %v3385_v30, %v3384_v41  ;;  %v3393_v52 = vrot.slane %v8254_v8, 7  ;;  %v3395_v37 = vrot.slane %v8262_v11, 6 }
 0x24f   :  { %v3980_v54 = vsel %vm2586_vm8, %v3979_v20, %v3978_v47  ;;  %v3388_v25 = vsel %vm2580_vm5, %v3387_v5, %v3386_v17  ;;  %v3397_v44 = vrot.slane %v8270_v48, 5  ;;  %v3399_v27 = vrot.slane %v8272_v49, 4  ;;  %v146_v47 = vld [vmem:[%s11292_s0 + $0xec] sm:$0x3] }
 0x250   :  { %v5805_v12 = vpack.i.bf16 %v3980_v54, %v3966_v23  ;;  %v3390_v36 = vsel %vm2582_vm6, %v3389_v45, %v3388_v25  ;;  %v3394_v56 = vsel %vm2574_vm2, %v3393_v52, %v8248_v13  ;;  %v3401_v20 = vrot.slane %v8284_v6, 3  ;;  %v145_v23 = vld [vmem:[%s11292_s0 + $0xea] sm:$0x3]  ;;  %v147_v54 = vld [vmem:[%s11292_s0 + $0xee] sm:$0x3] }
 0x251   :  { %v3392_v39 = vsel %vm2584_vm7, %v3391_v18, %v3390_v36  ;;  %v3396_v0 = vsel %vm2576_vm3, %v3395_v37, %v3394_v56  ;;  %v3403_v40 = vrot.slane %v8286_v32, 2  ;;  %v1076_v34 = vsel %vm284_vm0, %v141_v29, -inf  ;;  %v149_v29 = vld [vmem:[%s11292_s0 + $0xf2] sm:$0x3] }
 0x252   :  { %5806 = vrot.lane.b32.xlu0 %v5805_v12, %s6278_s28  ;;  %v3398_v26 = vsel %vm2578_vm4, %v3397_v44, %v3396_v0  ;;  %v3466_v5 = vsel %vm2756_vm9, %v3392_v39, 0.0  ;;  %v1077_v59 = vrot.slane %v1076_v34, 4  ;;  %v1083_v41 = vsel %vm284_vm0, %v142_v31, -inf }
 0x253   :  { %v3400_v30 = vsel %vm2580_vm5, %v3399_v27, %v3398_v26  ;;  %v1084_v17 = vrot.slane %v1083_v41, 4  ;;  %v1090_v18 = vsel %vm284_vm0, %v143_v57, -inf  ;;  %v1097_v44 = vsel %vm284_vm0, %v144_v9, -inf }
 0x254   :  { %v3402_v1 = vsel %vm2582_vm6, %v3401_v20, %v3400_v30  ;;  %v1078_v25 = vmax.f32 %v1076_v34, %v1077_v59  ;;  %v1091_v37 = vrot.slane %v1090_v18, 4  ;;  %v1098_v56 = vrot.slane %v1097_v44, 4 }
 0x255   :  { %v3404_v45 = vsel %vm2584_vm7, %v3403_v40, %v3402_v1  ;;  %v1085_v36 = vmax.f32 %v1083_v41, %v1084_v17  ;;  %v1104_v27 = vsel %vm284_vm0, %v145_v23, -inf  ;;  %v1111_v40 = vsel %vm284_vm0, %v146_v47, -inf }
 0x256   :  { %v3467_v52 = vsel %vm2756_vm9, %v3404_v45, 0.0  ;;  %v1079_v39 = vrot.slane %v1078_v25, 2  ;;  %v1092_v0 = vmax.f32 %v1090_v18, %v1091_v37  ;;  %v1105_v20 = vrot.slane %v1104_v27, 4  ;;  %v150_v37 = vld [vmem:[%s11292_s0 + $0xf4] sm:$0x3] }
 0x257   :  { %v5810_v12 = vpack.i.bf16 %v3467_v52, %v3466_v5  ;;  %v1086_v31 = vrot.slane %v1085_v36, 2  ;;  %v1099_v26 = vmax.f32 %v1097_v44, %v1098_v56  ;;  %v1112_v57 = vrot.slane %v1111_v40, 4 }
 0x258   :  { %v1118_v30 = vsel %vm284_vm0, %v147_v54, -inf  ;;  %v1080_v9 = vmax.f32 %v1078_v25, %v1079_v39  ;;  %v1093_v34 = vrot.slane %v1092_v0, 2  ;;  %v1106_v1 = vmax.f32 %v1104_v27, %v1105_v20 }
 0x259   :  { %5811 = vrot.lane.b32.xlu1 %v5810_v12, %s6279_s30  ;;  %v1119_v5 = vrot.slane %v1118_v30, 4  ;;  %v1087_v23 = vmax.f32 %v1085_v36, %v1086_v31  ;;  %v1100_v59 = vrot.slane %v1099_v26, 2  ;;  %v1113_v41 = vmax.f32 %v1111_v40, %v1112_v57 }
 0x25a   :  { %v1132_v45 = vsel %vm284_vm0, %v149_v29, -inf  ;;  %v1081_v17 = vrot.slane %v1080_v9, 1  ;;  %v1094_v18 = vmax.f32 %v1092_v0, %v1093_v34  ;;  %v1107_v52 = vrot.slane %v1106_v1, 2  ;;  %v151_v29 = vld [vmem:[%s11292_s0 + $0xf6] sm:$0x3] }
 0x25b   :  { %v1120_v47 = vmax.f32 %v1118_v30, %v1119_v5  ;;  %v1088_v44 = vrot.slane %v1087_v23, 1  ;;  %v1101_v12 = vmax.f32 %v1099_v26, %v1100_v59  ;;  %v1114_v54 = vrot.slane %v1113_v41, 2  ;;  %v152_v0 = vld [vmem:[%s11292_s0 + $0xf8] sm:$0x3]  ;;  %v153_v26 = vld [vmem:[%s11292_s0 + $0xfa] sm:$0x3] }
 0x25c   :  { %v1133_v25 = vrot.slane %v1132_v45, 4  ;;  %v1082_v56 = vmax.f32 %v1080_v9, %v1081_v17  ;;  %v1095_v27 = vrot.slane %v1094_v18, 1  ;;  %v1108_v39 = vmax.f32 %v1106_v1, %v1107_v52  ;;  %v154_v5 = vld [vmem:[%s11292_s0 + $0xfc] sm:$0x3] }
 0x25d   :  { %v1121_v36 = vrot.slane %v1120_v47, 2  ;;  %v1089_v20 = vmax.f32 %v1087_v23, %v1088_v44  ;;  %v1102_v40 = vrot.slane %v1101_v12, 1  ;;  %v1115_v31 = vmax.f32 %v1113_v41, %v1114_v54 }
 0x25e   :  { %v1134_v57 = vmax.f32 %v1132_v45, %v1133_v25  ;;  %v1096_v30 = vmax.f32 %v1094_v18, %v1095_v27  ;;  %v1109_v9 = vrot.slane %v1108_v39, 1  ;;  %v1139_v1 = vsel %vm284_vm0, %v150_v37, -inf  ;;  %v155_v18 = vld [vmem:[%s11292_s0 + $0xfe] sm:$0x3] }
 0x25f   :  { %v1122_v34 = vmax.f32 %v1120_v47, %v1121_v36  ;;  %v1103_v59 = vmax.f32 %v1101_v12, %v1102_v40  ;;  %v1116_v17 = vrot.slane %v1115_v31, 1  ;;  %v1140_v23 = vrot.slane %v1139_v1, 4 }
 0x260   :  { %v1135_v52 = vrot.slane %v1134_v57, 2  ;;  %v1110_v44 = vmax.f32 %v1108_v39, %v1109_v9  ;;  %v1146_v45 = vsel %vm284_vm0, %v151_v29, -inf  ;;  %v1153_v54 = vsel %vm284_vm0, %v152_v0, -inf }
 0x261   :  { %v1123_v41 = vrot.slane %v1122_v34, 1  ;;  %v1117_v47 = vmax.f32 %v1115_v31, %v1116_v17  ;;  %v1141_v25 = vmax.f32 %v1139_v1, %v1140_v23  ;;  %v1147_v27 = vrot.slane %v1146_v45, 4 }
 0x262   :  { %v1136_v37 = vmax.f32 %v1134_v57, %v1135_v52  ;;  %v1154_v61 = vrot.slane %v1153_v54, 4  ;;  %v1160_v12 = vsel %vm284_vm0, %v153_v26, -inf  ;;  %v1167_v40 = vsel %vm284_vm0, %v154_v5, -inf }
 0x263   :  { %v1124_v36 = vmax.f32 %v1122_v34, %v1123_v41  ;;  %v1142_v9 = vrot.slane %v1141_v25, 2  ;;  %v1148_v4 = vmax.f32 %v1146_v45, %v1147_v27  ;;  %v1161_v29 = vrot.slane %v1160_v12, 4 }
 0x264   :  { %v1137_v39 = vrot.slane %v1136_v37, 1  ;;  %v1155_v62 = vmax.f32 %v1153_v54, %v1154_v61  ;;  %v1168_v0 = vrot.slane %v1167_v40, 4  ;;  %v1174_v35 = vsel %vm284_vm0, %v155_v18, -inf }
 0x265   :  { %v2249_v2 = vsel %vm11499_vm1, %v1082_v56, -inf  ;;  %v1143_v57 = vmax.f32 %v1141_v25, %v1142_v9  ;;  %v1149_v1 = vrot.slane %v1148_v4, 2  ;;  %v1162_v17 = vmax.f32 %v1160_v12, %v1161_v29 }
 0x266   :  { %v1138_v31 = vmax.f32 %v1136_v37, %v1137_v39  ;;  %v1156_v34 = vrot.slane %v1155_v62, 2  ;;  %v1169_v52 = vmax.f32 %v1167_v40, %v1168_v0  ;;  %v1175_v23 = vrot.slane %v1174_v35, 4 }
 0x267   :  { %v2252_v26 = vsel %vm11499_vm1, %v1089_v20, -inf  ;;  %v1144_v5 = vrot.slane %v1143_v57, 1  ;;  %v1150_v41 = vmax.f32 %v1148_v4, %v1149_v1  ;;  %v1163_v3 = vrot.slane %v1162_v17, 2 }
 0x268   :  { %v2250_v45 = vsel %vm11499_vm1, %v1138_v31, -inf  ;;  %v1157_v61 = vmax.f32 %v1155_v62, %v1156_v34  ;;  %v1170_v54 = vrot.slane %v1169_v52, 2  ;;  %v1176_v27 = vmax.f32 %v1174_v35, %v1175_v23 }
 0x269   :  { %v8997_v18 = vmax.f32 %v2249_v2, %v2250_v45  ;;  %v1145_v56 = vmax.f32 %v1143_v57, %v1144_v5  ;;  %v1151_v37 = vrot.slane %v1150_v41, 1  ;;  %v1164_v25 = vmax.f32 %v1162_v17, %v1163_v3 }
 0x26a   :  { %v2255_v12 = vsel %vm11499_vm1, %v1096_v30, -inf  ;;  %v1158_v39 = vrot.slane %v1157_v61, 1  ;;  %v1171_v40 = vmax.f32 %v1169_v52, %v1170_v54  ;;  %v1177_v9 = vrot.slane %v1176_v27, 2 }
 0x26b   :  { %v2258_v20 = vsel %vm11499_vm1, %v1103_v59, -inf  ;;  %v1152_v29 = vmax.f32 %v1150_v41, %v1151_v37  ;;  %v1165_v4 = vrot.slane %v1164_v25, 1  ;;  %v2253_v0 = vsel %vm11499_vm1, %v1145_v56, -inf }
 0x26c   :  { %v2261_v62 = vsel %vm11499_vm1, %v1110_v44, -inf  ;;  %v1159_v31 = vmax.f32 %v1157_v61, %v1158_v39  ;;  %v1172_v35 = vrot.slane %v1171_v40, 1  ;;  %v1178_v2 = vmax.f32 %v1176_v27, %v1177_v9  ;;  %v140_v44 = vld [vmem:[%s11292_s0 + $0xe0] sm:$0x3]  ;;  %v148_v27 = vld [vmem:[%s11292_s0 + $0xf0] sm:$0x3] }
 0x26d   :  { %v9003_v1 = vmax.f32 %v2252_v26, %v2253_v0  ;;  %v1166_v57 = vmax.f32 %v1164_v25, %v1165_v4  ;;  %v2256_v3 = vsel %vm11499_vm1, %v1152_v29, -inf  ;;  %v2264_v30 = vsel %vm11499_vm1, %v1117_v47, -inf }
 0x26e   :  { %v2267_v17 = vsel %vm11499_vm1, %v1124_v36, -inf  ;;  %v1173_v34 = vmax.f32 %v1171_v40, %v1172_v35  ;;  %v1179_v59 = vrot.slane %v1178_v2, 1  ;;  %v9008_v52 = vmax.f32 %v2255_v12, %v2256_v3 }
 0x26f   :  { %v2259_v23 = vsel %vm11499_vm1, %v1159_v31, -inf  ;;  %v2262_v26 = vsel %vm11499_vm1, %v1166_v57, -inf  ;;  %v2952_v47 = vsel %vm2574_vm2, %v11628_v60, %v11627_v28  ;;  %v2958_v36 = vsel %vm2574_vm2, %v9003_v1, %v8997_v18 }
 0x270   :  { %v9014_v5 = vmax.f32 %v2258_v20, %v2259_v23  ;;  %v1180_v41 = vmax.f32 %v1178_v2, %v1179_v59  ;;  %v9023_v45 = vmax.f32 %v2261_v62, %v2262_v26  ;;  %v2265_v61 = vsel %vm11499_vm1, %v1173_v34, -inf }
 0x271   :  { %v2953_v54 = vsel %vm2576_vm3, %v11629_v21, %v2952_v47  ;;  %v9031_v56 = vmax.f32 %v2264_v30, %v2265_v61  ;;  %v2959_v25 = vsel %vm2576_vm3, %v9008_v52, %v2958_v36  ;;  %v1069_v12 = vsel %vm284_vm0, %v140_v44, -inf }
 0x272   :  { %v2954_v37 = vsel %vm2578_vm4, %v11630_v38, %v2953_v54  ;;  %v2268_v39 = vsel %vm11499_vm1, %v1180_v41, -inf  ;;  %v2960_v9 = vsel %vm2578_vm4, %v9014_v5, %v2959_v25  ;;  %v1070_v20 = vrot.slane %v1069_v12, 4 }
 0x273   :  { %v2955_v40 = vsel %vm2580_vm5, %v11632_v15, %v2954_v37  ;;  %v9043_v29 = vmax.f32 %v2267_v17, %v2268_v39  ;;  %v2961_v0 = vsel %vm2580_vm5, %v9023_v45, %v2960_v9  ;;  %v1125_v62 = vsel %vm284_vm0, %v148_v27, -inf }
 0x274   :  { %v2956_v4 = vsel %vm2582_vm6, %v11633_v55, %v2955_v40  ;;  %v2962_v35 = vsel %vm2582_vm6, %v9031_v56, %v2961_v0  ;;  %v1071_v2 = vmax.f32 %v1069_v12, %v1070_v20  ;;  %v1126_v57 = vrot.slane %v1125_v62, 4 }
 0x275   :  { %v2957_v31 = vsel %vm2584_vm7, %v11634_v7, %v2956_v4  ;;  %v2963_v3 = vsel %vm2584_vm7, %v9043_v29, %v2962_v35  ;;  %v2822_v17 = vsel %vm2576_vm3, %v11627_v28, %v11631_v43  ;;  %v11655_v43 = vld [vmem:[#allocation60_spill] sm:$0xff]  ;;  %v2738_v37 = vrot.slane %v8365_v58, 1 }
 0x276   :  { %v3034_v30 = vsel %vm2756_vm9, %v2957_v31, 0.0  ;;  %v3035_v34 = vsel %vm2756_vm9, %v2963_v3, 0.0  ;;  %v1072_v59 = vrot.slane %v1071_v2, 2  ;;  %v1127_v23 = vmax.f32 %v1125_v62, %v1126_v57 }
 0x277   :  { %v2823_v7 = vsel %vm2578_vm4, %v11628_v60, %v2822_v17  ;;  %v5830_v44 = vpack.i.bf16 %v3035_v34, %v3034_v30  ;;  %v2737_v61 = vrot.slane %v11655_v43, 1  ;;  %v9079_v39 = vrot.slane %v11595_v53, 7 }
 0x278   :  { %v2824_v26 = vsel %vm2580_vm5, %v11629_v21, %v2823_v7  ;;  %v1073_v47 = vmax.f32 %v1071_v2, %v1072_v59  ;;  %v1128_v36 = vrot.slane %v1127_v23, 2  ;;  %v3123_v40 = vrot.slane %v8997_v18, 6 }
 0x279   :  { %v2825_v41 = vsel %vm2582_vm6, %v11630_v38, %v2824_v26  ;;  %5831 = vrot.lane.b32.xlu2 %v5830_v44, %s6273_s29  ;;  %v2768_v21 = vsel %vm2756_vm9, %v2737_v61, 0.0  ;;  %v3125_v9 = vrot.slane %v9003_v1, 5  ;;  %v3129_v62 = vrot.slane %v9014_v5, 3 }
 0x27a   :  { %v2826_v28 = vsel %vm2584_vm7, %v11632_v15, %v2825_v41  ;;  %v1074_v54 = vrot.slane %v1073_v47, 1  ;;  %v1129_v27 = vmax.f32 %v1127_v23, %v1128_v36  ;;  %v2769_v15 = vsel %vm2756_vm9, %v2738_v37, 0.0 }
 0x27b   :  { %v2827_v60 = vsel %vm2586_vm8, %v11633_v55, %v2826_v28  ;;  %v3127_v55 = vrot.slane %v9008_v52, 4  ;;  %v5845_v0 = vpack.i.bf16 %v2769_v15, %v2768_v21  ;;  %v3131_v31 = vrot.slane %v9023_v45, 2 }
 0x27c   :  { %v1075_v25 = vmax.f32 %v1073_v47, %v1074_v54  ;;  %v1130_v12 = vrot.slane %v1129_v27, 1  ;;  %v9076_v38 = vsel %vm2710_vm10, 0.0, %v2827_v60  ;;  %v3135_v35 = vrot.slane %v11595_v53, 6 }
 0x27d   :  { %v3137_v2 = vrot.slane %v11595_v53, 5  ;;  %v3139_v57 = vrot.slane %v11595_v53, 4  ;;  %v3133_v30 = vrot.slane %v9031_v56, 1  ;;  %v3141_v17 = vrot.slane %v11595_v53, 3 }
 0x27e   :  { %v1131_v20 = vmax.f32 %v1129_v27, %v1130_v12  ;;  %v2246_v4 = vsel %vm11499_vm1, %v1075_v25, -inf  ;;  %v3351_v34 = vsel %vm2574_vm2, %v9079_v39, 0.0  ;;  %v3136_v23 = vsel %vm2576_vm3, %v3135_v35, %v9079_v39 }
 0x27f   :  { %v3143_v7 = vrot.slane %v11595_v53, 2  ;;  %v3352_v44 = vsel %vm2576_vm3, %v3135_v35, %v3351_v34  ;;  %v3138_v26 = vsel %vm2578_vm4, %v3137_v2, %v3136_v23  ;;  %v3910_v36 = vrot.slane %v8997_v18, 7 }
 0x280   :  { %v2247_v3 = vsel %vm11499_vm1, %v1131_v20, -inf  ;;  %v3353_v47 = vsel %vm2578_vm4, %v3137_v2, %v3352_v44  ;;  %v3912_v41 = vrot.slane %v9003_v1, 6  ;;  %v3140_v27 = vsel %vm2580_vm5, %v3139_v57, %v3138_v26 }
 0x281   :  { %v2248_v59 = vmax.f32 %v2246_v4, %v2247_v3  ;;  %5846 = vrot.lane.b32.xlu2 %v5845_v0, %s6275_s25  ;;  %v3142_v37 = vsel %vm2582_vm6, %v3141_v17, %v3140_v27  ;;  %v3354_v21 = vsel %vm2580_vm5, %v3139_v57, %v3353_v47  ;;  %v3914_v2 = vrot.slane %v9008_v52, 5 }
 0x282   :  { %v3144_v20 = vsel %vm2584_vm7, %v3143_v7, %v3142_v37  ;;  %v3355_v26 = vsel %vm2582_vm6, %v3141_v17, %v3354_v21  ;;  %v3916_v37 = vrot.slane %v9014_v5, 4  ;;  %v3918_v21 = vrot.slane %v9023_v45, 3 }
 0x283   :  { %v2828_v28 = vsel %vm2576_vm3, %v8997_v18, %v2248_v59  ;;  %v3640_v61 = vsel %vm2574_vm2, %v8997_v18, %v2248_v59  ;;  %v3122_v54 = vrot.slane %v2248_v59, 7  ;;  %v3145_v34 = vsel %vm2586_vm8, %v8393_v19, %v3144_v20 }
 0x284   :  { %v2829_v53 = vsel %vm2578_vm4, %v9003_v1, %v2828_v28  ;;  %v3641_v60 = vsel %vm2576_vm3, %v9003_v1, %v3640_v61  ;;  %v3356_v61 = vsel %vm2584_vm7, %v3143_v7, %v3355_v26  ;;  %vm4143_vm11 = vcmask 64512  }
 0x285   :  { %v2830_v25 = vsel %vm2580_vm5, %v9008_v52, %v2829_v53  ;;  %v3642_v12 = vsel %vm2578_vm4, %v9008_v52, %v3641_v60  ;;  %v3124_v15 = vsel %vm2576_vm3, %v3123_v40, %v3122_v54  ;;  %v3911_v60 = vsel %vm2574_vm2, %v3910_v36, %v2248_v59 }
 0x286   :  { %v2831_v4 = vsel %vm2582_vm6, %v9014_v5, %v2830_v25  ;;  %v3643_v0 = vsel %vm2580_vm5, %v9014_v5, %v3642_v12  ;;  %v3126_v35 = vsel %vm2578_vm4, %v3125_v9, %v3124_v15  ;;  %v3913_v17 = vsel %vm2576_vm3, %v3912_v41, %v3911_v60  ;;  %v11658_v60 = vld [vmem:[#allocation88_spill] sm:$0xff] }
 0x287   :  { %v2832_v57 = vsel %vm2584_vm7, %v9023_v45, %v2831_v4  ;;  %v3644_v3 = vsel %vm2582_vm6, %v9023_v45, %v3643_v0  ;;  %v3128_v40 = vsel %vm2580_vm5, %v3127_v55, %v3126_v35  ;;  %v3922_v59 = vrot.slane %v9043_v29, 1  ;;  %v9169_v35 = vpop.permute.xlu2 %5661 }
 0x288   :  { %v2833_v23 = vsel %vm2586_vm8, %v9031_v56, %v2832_v57  ;;  %v3645_v44 = vsel %vm2584_vm7, %v9031_v56, %v3644_v3  ;;  %v3130_v9 = vsel %vm2582_vm6, %v3129_v62, %v3128_v40  ;;  %v3259_v62 = vsel %vm2710_vm10, 0.0, %v3145_v34  ;;  %11656 = vst [vmem:[#allocation82_spill] sm:$0xff] %v9169_v35 }
 0x289   :  { %v2905_v47 = vsel %vm2710_vm10, 0.0, %v2833_v23  ;;  %v3646_v28 = vsel %vm2586_vm8, %v9043_v29, %v3645_v44  ;;  %v3132_v55 = vsel %vm2584_vm7, %v3131_v31, %v3130_v9  ;;  %v3915_v31 = vsel %vm2578_vm4, %v3914_v2, %v3913_v17  ;;  %5861 = vrot.lane.b32.xlu2 %v8375_v14, %s6277_s27  ;;  %v254_v17 = vld [vmem:[%s11292_s0 + $0x1c4] sm:$0x3] }
 0x28a   :  { %v5820_v54 = vpack.i.bf16 %v2905_v47, %v9076_v38  ;;  %v5825_v27 = vpack.i.bf16 %v3646_v28, %v11652_v24  ;;  %v3134_v53 = vsel %vm2586_vm8, %v3133_v30, %v3132_v55  ;;  %v3920_v30 = vrot.slane %v9031_v56, 2 }
 0x28b   :  { %v3258_v38 = vsel %vm2710_vm10, 0.0, %v3134_v53  ;;  %v3917_v7 = vsel %vm2580_vm5, %v3916_v37, %v3915_v31  ;;  %v3924_v36 = vsel %vm2586_vm8, %v8393_v19, %v3356_v61  ;;  %v3339_v25 = vrot.slane %v9003_v1, 7  ;;  %v11659_v37 = vld [vmem:[#allocation41_spill] sm:$0xff] }
 0x28c   :  { %5821 = vrot.lane.b32.xlu0 %v5820_v54, %s6274_s16  ;;  %5826 = vrot.lane.b32.xlu1 %v5825_v27, %s6277_s27  ;;  %v3919_v41 = vsel %vm2582_vm6, %v3918_v21, %v3917_v7  ;;  %v3341_v12 = vrot.slane %v9008_v52, 6  ;;  %v5835_v15 = vpack.i.bf16 %v3259_v62, %v3258_v38  ;;  %v3343_v4 = vrot.slane %v9014_v5, 5  ;;  %v252_v54 = vld [vmem:[%s11292_s0 + $0x1c0] sm:$0x3]  ;;  %v11660_v38 = vld [vmem:[#allocation59_spill] sm:$0xff] }
 0x28d   :  { %v3921_v20 = vsel %vm2584_vm7, %v3920_v30, %v3919_v41  ;;  %v3345_v0 = vrot.slane %v9023_v45, 4  ;;  %v3340_v19 = vsel %vm2574_vm2, %v3339_v25, %v8997_v18  ;;  %v3347_v1 = vrot.slane %v9031_v56, 3  ;;  %v255_v7 = vld [vmem:[%s11292_s0 + $0x1c6] sm:$0x3]  ;;  %v11662_v25 = vld [vmem:[#allocation42_spill] sm:$0xff] }
 0x28e   :  { %v3923_v2 = vsel %vm2586_vm8, %v3922_v59, %v3921_v20  ;;  %v3349_v52 = vrot.slane %v9043_v29, 2  ;;  %v3342_v3 = vsel %vm2576_vm3, %v3341_v12, %v3340_v19  ;;  %v2858_v5 = vsel %vm2576_vm3, %v8248_v13, %v8242_v51  ;;  %v257_v19 = vld [vmem:[%s11292_s0 + $0x1ca] sm:$0x3] }
 0x28f   :  { %v5840_v57 = vpack.i.bf16 %v3924_v36, %v3923_v2  ;;  %v2864_v45 = vsel %vm2576_vm3, %v8297_v16, %v8291_v46  ;;  %v3344_v14 = vsel %vm2578_vm4, %v3343_v4, %v3342_v3  ;;  %v2859_v18 = vsel %vm2578_vm4, %v8254_v8, %v2858_v5  ;;  %v11661_v36 = vld [vmem:[#allocation40_spill] sm:$0xff]  ;;  %v256_v2 = vld [vmem:[%s11292_s0 + $0x1c8] sm:$0x3] }
 0x290   :  { %v2865_v56 = vsel %vm2578_vm4, %v8299_v22, %v2864_v45  ;;  %v3346_v29 = vsel %vm2580_vm5, %v3345_v0, %v3344_v14  ;;  %v2860_v40 = vsel %vm2580_vm5, %v8262_v11, %v2859_v18  ;;  %v2689_v34 = vrot.slane %v11645_v42, 7  ;;  %v11657_v42 = vld [vmem:[#allocation87_spill] sm:$0xff] }
 0x291   :  { %v2866_v51 = vsel %vm2580_vm5, %v8304_v50, %v2865_v56  ;;  %v3348_v23 = vsel %vm2582_vm6, %v3347_v1, %v3346_v29  ;;  %v2861_v44 = vsel %vm2582_vm6, %v8270_v48, %v2860_v40  ;;  %v3463_v47 = vsel %vm2756_vm9, %v3356_v61, 0.0  ;;  %v253_v61 = vld [vmem:[%s11292_s0 + $0x1c2] sm:$0x3]  ;;  %v259_v29 = vld [vmem:[%s11292_s0 + $0x1ce] sm:$0x3] }
 0x292   :  { %v2867_v9 = vsel %vm2582_vm6, %v8311_v10, %v2866_v51  ;;  %v3350_v26 = vsel %vm2584_vm7, %v3349_v52, %v3348_v23  ;;  %v2862_v28 = vsel %vm2584_vm7, %v8272_v49, %v2861_v44  ;;  %v2690_v31 = vrot.slane %v11660_v38, 7  ;;  %v9243_v52 = vpop.permute.xlu2 %5666 }
 0x293   :  { %v2868_v55 = vsel %vm2584_vm7, %v11657_v42, %v2867_v9  ;;  %v3462_v27 = vsel %vm2756_vm9, %v3350_v26, 0.0  ;;  %v2863_v53 = vsel %vm2586_vm8, %v8284_v6, %v2862_v28  ;;  %v9233_v4 = vsel %vm2710_vm10, 0.0, %v2689_v34  ;;  %11663 = vst [vmem:[#allocation83_spill] sm:$0xff] %v9243_v52 }
 0x294   :  { %5836 = vrot.lane.b32.xlu0 %v5835_v15, %s6276_s26  ;;  %5841 = vrot.lane.b32.xlu1 %v5840_v57, %s6278_s28  ;;  %v2869_v62 = vsel %vm2586_vm8, %v11658_v60, %v2868_v55  ;;  %v2910_v30 = vsel %vm2710_vm10, 0.0, %v2863_v53  ;;  %v5850_v15 = vpack.i.bf16 %v3463_v47, %v3462_v27  ;;  %v1853_v1 = vsel %vm284_vm0, %v252_v54, -inf  ;;  %v258_v57 = vld [vmem:[%s11292_s0 + $0x1cc] sm:$0x3] }
 0x295   :  { %v2911_v59 = vsel %vm2710_vm10, 0.0, %v2869_v62  ;;  %v1854_v3 = vrot.slane %v1853_v1, 4  ;;  %v1860_v5 = vsel %vm284_vm0, %v253_v61, -inf  ;;  %v1867_v45 = vsel %vm284_vm0, %v254_v17, -inf }
 0x296   :  { %v5855_v20 = vpack.i.bf16 %v2911_v59, %v2910_v30  ;;  %v1874_v14 = vsel %vm284_vm0, %v255_v7, -inf  ;;  %v9252_v18 = vsel %vm2710_vm10, 0.0, %v2690_v31  ;;  %v1861_v40 = vrot.slane %v1860_v5, 4 }
 0x297   :  { %v1868_v51 = vrot.slane %v1867_v45, 4  ;;  %v1855_v34 = vmax.f32 %v1853_v1, %v1854_v3  ;;  %v1875_v23 = vrot.slane %v1874_v14, 4  ;;  %v1881_v44 = vsel %vm284_vm0, %v256_v2, -inf }
 0x298   :  { %v1888_v9 = vsel %vm284_vm0, %v257_v19, -inf  ;;  %v1862_v26 = vmax.f32 %v1860_v5, %v1861_v40  ;;  %v1882_v28 = vrot.slane %v1881_v44, 4  ;;  %v1895_v53 = vsel %vm284_vm0, %v258_v57, -inf  ;;  %v260_v57 = vld [vmem:[%s11292_s0 + $0x1d0] sm:$0x3] }
 0x299   :  { %v1869_v47 = vmax.f32 %v1867_v45, %v1868_v51  ;;  %v1889_v55 = vrot.slane %v1888_v9, 4  ;;  %v1856_v54 = vrot.slane %v1855_v34, 2  ;;  %v1876_v27 = vmax.f32 %v1874_v14, %v1875_v23 }
 0x29a   :  { %v1902_v62 = vsel %vm284_vm0, %v259_v29, -inf  ;;  %v1863_v61 = vrot.slane %v1862_v26, 2  ;;  %v1883_v38 = vmax.f32 %v1881_v44, %v1882_v28  ;;  %v1896_v7 = vrot.slane %v1895_v53, 4  ;;  %v262_v28 = vld [vmem:[%s11292_s0 + $0x1d4] sm:$0x3] }
 0x29b   :  { %v1870_v17 = vrot.slane %v1869_v47, 2  ;;  %v1890_v31 = vmax.f32 %v1888_v9, %v1889_v55  ;;  %v1857_v30 = vmax.f32 %v1855_v34, %v1856_v54  ;;  %v1877_v59 = vrot.slane %v1876_v27, 2  ;;  %v261_v34 = vld [vmem:[%s11292_s0 + $0x1d2] sm:$0x3] }
 0x29c   :  { %5851 = vrot.lane.b32.xlu0 %v5850_v15, %s6279_s30  ;;  %5856 = vrot.lane.b32.xlu1 %v5855_v20, %s6274_s16  ;;  %v1903_v15 = vrot.slane %v1902_v62, 4  ;;  %v1864_v20 = vmax.f32 %v1862_v26, %v1863_v61  ;;  %v1884_v19 = vrot.slane %v1883_v38, 2  ;;  %v1897_v45 = vmax.f32 %v1895_v53, %v1896_v7  ;;  %v264_v61 = vld [vmem:[%s11292_s0 + $0x1d8] sm:$0x3] }
 0x29d   :  { %v1871_v2 = vmax.f32 %v1869_v47, %v1870_v17  ;;  %v1891_v1 = vrot.slane %v1890_v31, 2  ;;  %v1858_v3 = vrot.slane %v1857_v30, 1  ;;  %v1878_v5 = vmax.f32 %v1876_v27, %v1877_v59 }
 0x29e   :  { %v1904_v14 = vmax.f32 %v1902_v62, %v1903_v15  ;;  %v1865_v29 = vrot.slane %v1864_v20, 1  ;;  %v1885_v51 = vmax.f32 %v1883_v38, %v1884_v19  ;;  %v1898_v26 = vrot.slane %v1897_v45, 2  ;;  %v263_v62 = vld [vmem:[%s11292_s0 + $0x1d6] sm:$0x3] }
 0x29f   :  { %v1872_v40 = vrot.slane %v1871_v2, 1  ;;  %v1892_v23 = vmax.f32 %v1890_v31, %v1891_v1  ;;  %v9270_v44 = vmax.f32 %v1857_v30, %v1858_v3  ;;  %v1879_v9 = vrot.slane %v1878_v5, 1 }
 0x2a0   :  { %v1905_v47 = vrot.slane %v1904_v14, 2  ;;  %v9275_v55 = vmax.f32 %v1864_v20, %v1865_v29  ;;  %v1886_v27 = vrot.slane %v1885_v51, 1  ;;  %v1899_v38 = vmax.f32 %v1897_v45, %v1898_v26  ;;  %v266_v45 = vld [vmem:[%s11292_s0 + $0x1dc] sm:$0x3]  ;;  %v267_v26 = vld [vmem:[%s11292_s0 + $0x1de] sm:$0x3] }
 0x2a1   :  { %v9277_v54 = vmax.f32 %v1871_v2, %v1872_v40  ;;  %v1893_v53 = vrot.slane %v1892_v23, 1  ;;  %v9285_v17 = vmax.f32 %v1878_v5, %v1879_v9  ;;  %v1909_v30 = vsel %vm284_vm0, %v260_v57, -inf  ;;  %v265_v2 = vld [vmem:[%s11292_s0 + $0x1da] sm:$0x3] }
 0x2a2   :  { %v1906_v31 = vmax.f32 %v1904_v14, %v1905_v47  ;;  %v9288_v59 = vmax.f32 %v1885_v51, %v1886_v27  ;;  %v1910_v15 = vrot.slane %v1909_v30, 4  ;;  %v1916_v20 = vsel %vm284_vm0, %v261_v34, -inf }
 0x2a3   :  { %v9290_v7 = vmax.f32 %v1892_v23, %v1893_v53  ;;  %v1900_v19 = vrot.slane %v1899_v38, 1  ;;  %v1917_v3 = vrot.slane %v1916_v20, 4  ;;  %v1923_v5 = vsel %vm284_vm0, %v262_v28, -inf }
 0x2a4   :  { %v1907_v1 = vrot.slane %v1906_v31, 1  ;;  %v1911_v14 = vmax.f32 %v1909_v30, %v1910_v15  ;;  %v1924_v57 = vrot.slane %v1923_v5, 4  ;;  %v1930_v29 = vsel %vm284_vm0, %v263_v62, -inf }
 0x2a5   :  { %v1937_v40 = vsel %vm284_vm0, %v264_v61, -inf  ;;  %v9302_v51 = vmax.f32 %v1899_v38, %v1900_v19  ;;  %v1918_v34 = vmax.f32 %v1916_v20, %v1917_v3  ;;  %v1931_v9 = vrot.slane %v1930_v29, 4 }
 0x2a6   :  { %v9304_v23 = vmax.f32 %v1906_v31, %v1907_v1  ;;  %v1912_v47 = vrot.slane %v1911_v14, 2  ;;  %v1925_v28 = vmax.f32 %v1923_v5, %v1924_v57  ;;  %v1938_v27 = vrot.slane %v1937_v40, 4 }
 0x2a7   :  { %v1944_v53 = vsel %vm284_vm0, %v265_v2, -inf  ;;  %v1919_v30 = vrot.slane %v1918_v34, 2  ;;  %v1932_v15 = vmax.f32 %v1930_v29, %v1931_v9  ;;  %v1951_v61 = vsel %vm284_vm0, %v266_v45, -inf }
 0x2a8   :  { %v1945_v62 = vrot.slane %v1944_v53, 4  ;;  %v1913_v38 = vmax.f32 %v1911_v14, %v1912_v47  ;;  %v1926_v19 = vrot.slane %v1925_v28, 2  ;;  %v1939_v31 = vmax.f32 %v1937_v40, %v1938_v27 }
 0x2a9   :  { %v1952_v1 = vrot.slane %v1951_v61, 4  ;;  %v1920_v20 = vmax.f32 %v1918_v34, %v1919_v30  ;;  %v1933_v3 = vrot.slane %v1932_v15, 2  ;;  %v1958_v56 = vsel %vm284_vm0, %v267_v26, -inf }
 0x2aa   :  { %v1946_v12 = vmax.f32 %v1944_v53, %v1945_v62  ;;  %v1914_v0 = vrot.slane %v1913_v38, 1  ;;  %v1927_v41 = vmax.f32 %v1925_v28, %v1926_v19  ;;  %v1940_v5 = vrot.slane %v1939_v31, 2 }
 0x2ab   :  { %v1953_v57 = vmax.f32 %v1951_v61, %v1952_v1  ;;  %v1921_v21 = vrot.slane %v1920_v20, 1  ;;  %v1934_v2 = vmax.f32 %v1932_v15, %v1933_v3  ;;  %v1959_v29 = vrot.slane %v1958_v56, 4 }
 0x2ac   :  { %v1947_v58 = vrot.slane %v1946_v12, 2  ;;  %v1915_v9 = vmax.f32 %v1913_v38, %v1914_v0  ;;  %v1928_v43 = vrot.slane %v1927_v41, 1  ;;  %v1941_v45 = vmax.f32 %v1939_v31, %v1940_v5 }
 0x2ad   :  { %v1954_v14 = vrot.slane %v1953_v57, 2  ;;  %v1922_v47 = vmax.f32 %v1920_v20, %v1921_v21  ;;  %v1935_v40 = vrot.slane %v1934_v2, 1  ;;  %v1960_v34 = vmax.f32 %v1958_v56, %v1959_v29 }
 0x2ae   :  { %v1948_v27 = vmax.f32 %v1946_v12, %v1947_v58  ;;  %v1929_v30 = vmax.f32 %v1927_v41, %v1928_v43  ;;  %v1942_v53 = vrot.slane %v1941_v45, 1  ;;  %v2414_v26 = vsel %vm11499_vm1, %v9270_v44, -inf }
 0x2af   :  { %v1955_v62 = vmax.f32 %v1953_v57, %v1954_v14  ;;  %v1936_v28 = vmax.f32 %v1934_v2, %v1935_v40  ;;  %v1961_v19 = vrot.slane %v1960_v34, 2  ;;  %v2415_v15 = vsel %vm11499_vm1, %v1915_v9, -inf }
 0x2b0   :  { %v1949_v61 = vrot.slane %v1948_v27, 1  ;;  %v1943_v1 = vmax.f32 %v1941_v45, %v1942_v53  ;;  %v9315_v38 = vmax.f32 %v2414_v26, %v2415_v15  ;;  %v2417_v21 = vsel %vm11499_vm1, %v9275_v55, -inf }
 0x2b1   :  { %v1956_v0 = vrot.slane %v1955_v62, 1  ;;  %v1962_v12 = vmax.f32 %v1960_v34, %v1961_v19  ;;  %v2418_v43 = vsel %vm11499_vm1, %v1922_v47, -inf  ;;  %v2420_v41 = vsel %vm11499_vm1, %v9277_v54, -inf  ;;  %v11665_v19 = vld [vmem:[#allocation89_spill] sm:$0xff] }
 0x2b2   :  { %v1950_v58 = vmax.f32 %v1948_v27, %v1949_v61  ;;  %v9322_v44 = vmax.f32 %v2417_v21, %v2418_v43  ;;  %v2421_v31 = vsel %vm11499_vm1, %v1929_v30, -inf  ;;  %v2423_v20 = vsel %vm11499_vm1, %v9285_v17, -inf }
 0x2b3   :  { %v1957_v56 = vmax.f32 %v1955_v62, %v1956_v0  ;;  %v1963_v3 = vrot.slane %v1962_v12, 1  ;;  %v9327_v5 = vmax.f32 %v2420_v41, %v2421_v31  ;;  %v2424_v55 = vsel %vm11499_vm1, %v1936_v28, -inf }
 0x2b4   :  { %v2426_v57 = vsel %vm11499_vm1, %v9288_v59, -inf  ;;  %v9332_v2 = vmax.f32 %v2423_v20, %v2424_v55  ;;  %v2427_v54 = vsel %vm11499_vm1, %v1943_v1, -inf  ;;  %v2429_v29 = vsel %vm11499_vm1, %v9290_v7, -inf }
 0x2b5   :  { %v2430_v9 = vsel %vm11499_vm1, %v1950_v58, -inf  ;;  %v1964_v45 = vmax.f32 %v1962_v12, %v1963_v3  ;;  %v9338_v14 = vmax.f32 %v2426_v57, %v2427_v54  ;;  %v2432_v47 = vsel %vm11499_vm1, %v9302_v51, -inf }
 0x2b6   :  { %v9340_v17 = vmax.f32 %v2429_v29, %v2430_v9  ;;  %v2433_v40 = vsel %vm11499_vm1, %v1957_v56, -inf  ;;  %v2435_v59 = vsel %vm11499_vm1, %v9304_v23, -inf  ;;  %v3981_v27 = vrot.slane %v8297_v16, 7 }
 0x2b7   :  { %v3983_v34 = vrot.slane %v8299_v22, 6  ;;  %v9349_v7 = vmax.f32 %v2432_v47, %v2433_v40  ;;  %v2436_v30 = vsel %vm11499_vm1, %v1964_v45, -inf  ;;  %v3985_v53 = vrot.slane %v8304_v50, 5 }
 0x2b8   :  { %v3987_v62 = vrot.slane %v8311_v10, 4  ;;  %v9354_v26 = vmax.f32 %v2435_v59, %v2436_v30  ;;  %v3982_v51 = vsel %vm2574_vm2, %v3981_v27, %v8291_v46  ;;  %v3989_v28 = vrot.slane %v11657_v42, 3  ;;  %v9393_v27 = vpop.permute.xlu0 %5641 }
 0x2b9   :  { %v3991_v23 = vrot.slane %v11658_v60, 2  ;;  %v3984_v61 = vsel %vm2576_vm3, %v3983_v34, %v3982_v51  ;;  %v3993_v15 = vrot.slane %v11665_v19, 1  ;;  %v3995_v1 = vrot.slane %v9322_v44, 7 }
 0x2ba   :  { %11664 = vst [vmem:[#allocation80_spill] sm:$0xff] %v9354_v26  ;;  %v3997_v0 = vrot.slane %v9327_v5, 6  ;;  %v3986_v21 = vsel %vm2578_vm4, %v3985_v53, %v3984_v61  ;;  %v3999_v58 = vrot.slane %v9332_v2, 5  ;;  %v4001_v12 = vrot.slane %v9338_v14, 4  ;;  %v9407_v61 = vpop.permute.xlu2 %5676 }
 0x2bb   :  { %v4003_v43 = vrot.slane %v9340_v17, 3  ;;  %v3988_v41 = vsel %vm2580_vm5, %v3987_v62, %v3986_v21  ;;  %v3996_v56 = vsel %vm2574_vm2, %v3995_v1, %v9315_v38  ;;  %v4005_v31 = vrot.slane %v9349_v7, 2  ;;  %v5652_v62 = vpop.permute.xlu1 %5651 }
 0x2bc   :  { %v4007_v20 = vrot.slane %v9354_v26, 1  ;;  %v3990_v3 = vsel %vm2582_vm6, %v3989_v28, %v3988_v41  ;;  %v3998_v55 = vsel %vm2576_vm3, %v3997_v0, %v3996_v56  ;;  %v2988_v57 = vsel %vm2574_vm2, %v8254_v8, %v8248_v13 }
 0x2bd   :  { %v2994_v54 = vsel %vm2574_vm2, %v8299_v22, %v8297_v16  ;;  %v3992_v29 = vsel %vm2584_vm7, %v3991_v23, %v3990_v3  ;;  %v4000_v9 = vsel %vm2578_vm4, %v3999_v58, %v3998_v55  ;;  %v2989_v45 = vsel %vm2576_vm3, %v8262_v11, %v2988_v57 }
 0x2be   :  { %v2995_v47 = vsel %vm2576_vm3, %v8304_v50, %v2994_v54  ;;  %v3994_v40 = vsel %vm2586_vm8, %v3993_v15, %v3992_v29  ;;  %v4002_v59 = vsel %vm2580_vm5, %v4001_v12, %v4000_v9  ;;  %v2990_v13 = vsel %vm2578_vm4, %v8270_v48, %v2989_v45 }
 0x2bf   :  { %v2996_v8 = vsel %vm2578_vm4, %v8311_v10, %v2995_v47  ;;  %v4004_v34 = vsel %vm2582_vm6, %v4003_v43, %v4002_v59  ;;  %v2991_v11 = vsel %vm2580_vm5, %v8272_v49, %v2990_v13  ;;  %v3198_v53 = vrot.slane %v8291_v46, 7 }
 0x2c0   :  { %v2997_v30 = vsel %vm2580_vm5, %v11657_v42, %v2996_v8  ;;  %v4006_v51 = vsel %vm2584_vm7, %v4005_v31, %v4004_v34  ;;  %v2992_v48 = vsel %vm2582_vm6, %v8284_v6, %v2991_v11  ;;  %v3199_v23 = vrot.slane %v8297_v16, 6 }
 0x2c1   :  { %v2998_v28 = vsel %vm2582_vm6, %v11658_v60, %v2997_v30  ;;  %v4008_v49 = vsel %vm2586_vm8, %v4007_v20, %v4006_v51  ;;  %v2993_v15 = vsel %vm2584_vm7, %v8286_v32, %v2992_v48  ;;  %v3201_v1 = vrot.slane %v8299_v22, 5 }
 0x2c2   :  { %v2999_v46 = vsel %vm2584_vm7, %v11665_v19, %v2998_v28  ;;  %v5875_v0 = vpack.i.bf16 %v4008_v49, %v3994_v40  ;;  %v3040_v6 = vsel %vm2756_vm9, %v2993_v15, 0.0  ;;  %v3200_v58 = vsel %vm2576_vm3, %v3199_v23, %v3198_v53 }
 0x2c3   :  { %v3041_v21 = vsel %vm2756_vm9, %v2999_v46, 0.0  ;;  %v3202_v43 = vsel %vm2578_vm4, %v3201_v1, %v3200_v58  ;;  %v3203_v41 = vrot.slane %v8304_v50, 4  ;;  %v3205_v56 = vrot.slane %v8311_v10, 3  ;;  %v9459_v46 = vpop.permute.xlu0 %5646 }
 0x2c4   :  { %v5865_v12 = vpack.i.bf16 %v3041_v21, %v3040_v6  ;;  %5876 = vrot.lane.b32.xlu2 %v5875_v0, %s6278_s28  ;;  %v3207_v32 = vrot.slane %v11657_v42, 2  ;;  %v3209_v31 = vrot.slane %v11658_v60, 1  ;;  %v3211_v20 = vrot.slane %v9315_v38, 7  ;;  %v9465_v21 = vpop.permute.xlu1 %5656 }
 0x2c5   :  { %v3212_v3 = vrot.slane %v9322_v44, 6  ;;  %v3204_v55 = vsel %vm2580_vm5, %v3203_v41, %v3202_v43  ;;  %v3214_v57 = vrot.slane %v9327_v5, 5  ;;  %v3216_v54 = vrot.slane %v9332_v2, 4  ;;  %11672 = vst [vmem:[#allocation26_spill] sm:$0xff] %v9465_v21 }
 0x2c6   :  { %5866 = vrot.lane.b32.xlu0 %v5865_v12, %s6273_s29  ;;  %v3218_v29 = vrot.slane %v9338_v14, 3  ;;  %v5654_v9 = vunpack.i.h.bf16 %v5652_v62  ;;  %v3206_v45 = vsel %vm2582_vm6, %v3205_v56, %v3204_v55  ;;  %v3220_v40 = vrot.slane %v9340_v17, 2  ;;  %v9473_v12 = vpop.permute.xlu2 %5691  ;;  %v11694_v56 = vld [vmem:[#allocation85_spill] sm:$0xff] }
 0x2c7   :  { %v3213_v47 = vsel %vm2576_vm3, %v3212_v3, %v3211_v20  ;;  %v5653_v59 = vunpack.i.l.bf16 %v5652_v62  ;;  %v3208_v13 = vsel %vm2584_vm7, %v3207_v32, %v3206_v45  ;;  %v3222_v34 = vrot.slane %v9349_v7, 1  ;;  %v11676_v20 = vld [vmem:[#allocation5_spill] sm:$0xff]  ;;  %v11677_v3 = vld [vmem:[#allocation6_spill] sm:$0xff] }
 0x2c8   :  { %v3215_v8 = vsel %vm2578_vm4, %v3214_v57, %v3213_v47  ;;  %v11666_v11 = vrot.slane %v11659_v37, 7  ;;  %v11667_v53 = vrot.slane %v11661_v36, 7  ;;  %v3210_v48 = vsel %vm2586_vm8, %v3209_v31, %v3208_v13  ;;  %v11681_v13 = vld [vmem:[#allocation8_spill] sm:$0xff] }
 0x2c9   :  { %v3217_v28 = vsel %vm2580_vm5, %v3216_v54, %v3215_v8  ;;  %v11668_v62 = vunpack.i.h.bf16 %v9169_v35  ;;  %v11670_v49 = vunpack.i.l.bf16 %v9243_v52  ;;  %v5679_v36 = vunpack.i.h.bf16 %v9407_v61 }
 0x2ca   :  { %v2716_v30 = vsel %vm2710_vm10, 0.0, %v11666_v11  ;;  %v2715_v51 = vsel %vm2710_vm10, 0.0, %v11667_v53  ;;  %v3219_v15 = vsel %vm2582_vm6, %v3218_v29, %v3217_v28  ;;  %v5678_v1 = vunpack.i.l.bf16 %v9407_v61  ;;  %v11683_v11 = vld [vmem:[#allocation14_spill] sm:$0xff]  ;;  %v11685_v53 = vld [vmem:[#allocation15_spill] sm:$0xff] }
 0x2cb   :  { %v9449_v23 = vsel %vm11499_vm1, %v9233_v4, %v11668_v62  ;;  %v9455_v37 = vsel %vm11499_vm1, %v9252_v18, %v11670_v49  ;;  %v5643_v0 = vunpack.i.l.bf16 %v9393_v27  ;;  %v3221_v6 = vsel %vm2584_vm7, %v3220_v40, %v3219_v15  ;;  %v11680_v40 = vld [vmem:[#allocation86_spill] sm:$0xff]  ;;  %v11687_v15 = vld [vmem:[#allocation16_spill] sm:$0xff] }
 0x2cc   :  { %11669 = vst [vmem:[#allocation84_spill] sm:$0xff] %v9449_v23  ;;  %v3264_v4 = vsel %vm2710_vm10, 0.0, %v3210_v48  ;;  %v9468_v58 = vsel %vm11499_vm1, %v2716_v30, %v5654_v9  ;;  %v9471_v18 = vsel %vm11499_vm1, %v2715_v51, %v5653_v59  ;;  %v9477_v43 = vsel %vm2710_vm10, 0.0, %v9079_v39  ;;  %v11679_v9 = vld [vmem:[#allocation7_spill] sm:$0xff]  ;;  %v11686_v62 = vld [vmem:[#allocation10_spill] sm:$0xff] }
 0x2cd   :  { %11671 = vst [vmem:[#allocation25_spill] sm:$0xff] %v9455_v37  ;;  %v3223_v41 = vsel %vm2586_vm8, %v3222_v34, %v3221_v6  ;;  %v2834_v55 = vsel %vm2576_vm3, %v11677_v3, %v11676_v20  ;;  %v5644_v57 = vunpack.i.h.bf16 %v9393_v27  ;;  %v11678_v54 = vrot.slane %v11662_v25, 7  ;;  %v11682_v34 = vld [vmem:[#allocation13_spill] sm:$0xff] }
 0x2ce   :  { %11673 = vst [vmem:[#allocation27_spill] sm:$0xff] %v9468_v58  ;;  %v3265_v31 = vsel %vm2710_vm10, 0.0, %v3223_v41  ;;  %v2835_v45 = vsel %vm2578_vm4, %v11679_v9, %v2834_v55  ;;  %v9494_v47 = vsel %vm11499_vm1, %v9477_v43, %v5643_v0  ;;  %v2683_v59 = vrot.slane %v11680_v40, 7  ;;  %v11684_v25 = vld [vmem:[#allocation9_spill] sm:$0xff]  ;;  %v11688_v41 = vld [vmem:[#allocation11_spill] sm:$0xff] }
 0x2cf   :  { %11674 = vst [vmem:[#allocation28_spill] sm:$0xff] %v9471_v18  ;;  %v2712_v29 = vsel %vm2710_vm10, 0.0, %v11678_v54  ;;  %v5870_v39 = vpack.i.bf16 %v3265_v31, %v3264_v4  ;;  %v2836_v8 = vsel %vm2580_vm5, %v11681_v13, %v2835_v45  ;;  %v2840_v27 = vsel %vm2576_vm3, %v11683_v11, %v11682_v34  ;;  %v11689_v20 = vld [vmem:[#allocation17_spill] sm:$0xff]  ;;  %v11690_v54 = vld [vmem:[#allocation18_spill] sm:$0xff]  ;;  %v11691_v40 = vld [vmem:[#allocation19_spill] sm:$0xff] }
 0x2d0   :  { %11675 = vst [vmem:[#allocation29_spill] sm:$0xff] %v9477_v43  ;;  %v2837_v30 = vsel %vm2582_vm6, %v11684_v25, %v2836_v8  ;;  %v2841_v51 = vsel %vm2578_vm4, %v11685_v53, %v2840_v27  ;;  %v3405_v48 = vrot.slane %v8299_v22, 7  ;;  %v3407_v28 = vrot.slane %v8304_v50, 6 }
 0x2d1   :  { %5871 = vrot.lane.b32.xlu1 %v5870_v39, %s6276_s26  ;;  %v2838_v49 = vsel %vm2584_vm7, %v11686_v62, %v2837_v30  ;;  %v2842_v0 = vsel %vm2580_vm5, %v11687_v15, %v2841_v51  ;;  %v3409_v6 = vrot.slane %v8311_v10, 5  ;;  %v3411_v4 = vrot.slane %v11657_v42, 4  ;;  %v9532_v51 = vpop.permute.xlu0 %5671 }
 0x2d2   :  { %v2839_v31 = vsel %vm2586_vm8, %v11688_v41, %v2838_v49  ;;  %v2843_v55 = vsel %vm2582_vm6, %v11689_v20, %v2842_v0  ;;  %v3406_v22 = vsel %vm2574_vm2, %v3405_v48, %v8297_v16  ;;  %v3413_v50 = vrot.slane %v11658_v60, 3  ;;  %11692 = vst [vmem:[#allocation30_spill] sm:$0xff] %v9532_v51 }
 0x2d3   :  { %v2844_v39 = vsel %vm2584_vm7, %v11690_v54, %v2843_v55  ;;  %v2906_v45 = vsel %vm2710_vm10, 0.0, %v2839_v31  ;;  %v3408_v10 = vsel %vm2576_vm3, %v3407_v28, %v3406_v22  ;;  %v3415_v42 = vrot.slane %v11665_v19, 2  ;;  %v9538_v19 = vpop.permute.xlu1 %5686 }
 0x2d4   :  { %v2845_v8 = vsel %vm2586_vm8, %v11691_v40, %v2844_v39  ;;  %v3410_v27 = vsel %vm2578_vm4, %v3409_v6, %v3408_v10  ;;  %v3417_v30 = vrot.slane %v9327_v5, 7  ;;  %v3419_v16 = vrot.slane %v9332_v2, 6  ;;  %v11693_v10 = vld [vmem:[#allocation21_spill] sm:$0xff] }
 0x2d5   :  { %v2907_v60 = vsel %vm2710_vm10, 0.0, %v2845_v8  ;;  %v3412_v48 = vsel %vm2580_vm5, %v3411_v4, %v3410_v27  ;;  %v3421_v49 = vrot.slane %v9338_v14, 5  ;;  %v3423_v28 = vrot.slane %v9340_v17, 4 }
 0x2d6   :  { %v5890_v0 = vpack.i.bf16 %v2907_v60, %v2906_v45  ;;  %v3414_v31 = vsel %vm2582_vm6, %v3413_v50, %v3412_v48  ;;  %v3418_v6 = vsel %vm2574_vm2, %v3417_v30, %v9322_v44  ;;  %v3425_v55 = vrot.slane %v9349_v7, 3  ;;  %v11695_v45 = vld [vmem:[#allocation91_spill] sm:$0xff] }
 0x2d7   :  { %v3416_v22 = vsel %vm2584_vm7, %v3415_v42, %v3414_v31  ;;  %v3420_v39 = vsel %vm2576_vm3, %v3419_v16, %v3418_v6  ;;  %v3427_v4 = vrot.slane %v9354_v26, 2  ;;  %v2734_v8 = vrot.slane %v11693_v10, 1  ;;  %v9557_v31 = vpop.permute.xlu2 %5711 }
 0x2d8   :  { %v4129_v27 = vsel %vm11499_vm1, %v2712_v29, %v5644_v57  ;;  %v2682_v32 = vrot.slane %v11694_v56, 7  ;;  %5891 = vrot.lane.b32.xlu2 %v5890_v0, %s6274_s16  ;;  %v3422_v50 = vsel %vm2578_vm4, %v3421_v49, %v3420_v39  ;;  %v2739_v30 = vrot.slane %v11695_v45, 1 }
 0x2d9   :  { %v3424_v16 = vsel %vm2580_vm5, %v3423_v28, %v3422_v50  ;;  %v2765_v48 = vsel %vm2756_vm9, %v2734_v8, 0.0  ;;  %v5649_v57 = vunpack.i.h.bf16 %v9459_v46  ;;  %v3468_v29 = vsel %vm2756_vm9, %v3416_v22, 0.0  ;;  %v11702_v8 = vld [vmem:[#allocation47_spill] sm:$0xff] }
 0x2da   :  { %v3426_v56 = vsel %vm2582_vm6, %v3425_v55, %v3424_v16  ;;  %v2770_v49 = vsel %vm2756_vm9, %v2739_v30, 0.0  ;;  %v2714_v0 = vsel %vm2710_vm10, 0.0, %v2683_v59  ;;  %v5648_v6 = vunpack.i.l.bf16 %v9459_v46 }
 0x2db   :  { %v3428_v39 = vsel %vm2584_vm7, %v3427_v4, %v3426_v56  ;;  %v5885_v42 = vpack.i.bf16 %v2770_v49, %v2765_v48  ;;  %v2713_v50 = vsel %vm2710_vm10, 0.0, %v2682_v32  ;;  %v2964_v46 = vsel %vm2574_vm2, %v11679_v9, %v11677_v3  ;;  %v4273_v49 = vld [vmem:[%s11293_s1 + $0x10] sm:$0x3]  ;;  %v11706_v3 = vld [vmem:[#allocation49_spill] sm:$0xff] }
 0x2dc   :  { %v3469_v60 = vsel %vm2756_vm9, %v3428_v39, 0.0  ;;  %v2970_v59 = vsel %vm2574_vm2, %v11685_v53, %v11683_v11  ;;  %v9580_v30 = vsel %vm11499_vm1, %v2714_v0, %v5649_v57  ;;  %v2965_v32 = vsel %vm2576_vm3, %v11681_v13, %v2964_v46  ;;  %v5702_v57 = vpop.permute.xlu1 %5701  ;;  %v11696_v39 = vld [vmem:[#allocation12_spill] sm:$0xff]  ;;  %v11707_v13 = vld [vmem:[#allocation50_spill] sm:$0xff] }
 0x2dd   :  { %v5880_v22 = vpack.i.bf16 %v3469_v60, %v3468_v29  ;;  %5886 = vrot.lane.b32.xlu1 %v5885_v42, %s6275_s25  ;;  %v2971_v60 = vsel %vm2576_vm3, %v11687_v15, %v2970_v59  ;;  %v9586_v42 = vpop.permute.xlu0 %5681  ;;  %v9589_v16 = vsel %vm11499_vm1, %v2713_v50, %v5648_v6  ;;  %v2966_v9 = vsel %vm2578_vm4, %v11684_v25, %v2965_v32 }
 0x2de   :  { %v2972_v48 = vsel %vm2578_vm4, %v11689_v20, %v2971_v60  ;;  %v2967_v56 = vsel %vm2580_vm5, %v11686_v62, %v2966_v9  ;;  %v5684_v6 = vunpack.i.h.bf16 %v9586_v42  ;;  %v11697_v62 = vld [vmem:[#allocation20_spill] sm:$0xff]  ;;  %vm11502_vm12 = vcmask 97280  }
 0x2df   :  { %5881 = vrot.lane.b32.xlu0 %v5880_v22, %s6279_s30  ;;  %v2973_v29 = vsel %vm2580_vm5, %v11690_v54, %v2972_v48  ;;  %v2968_v0 = vsel %vm2582_vm6, %v11688_v41, %v2967_v56  ;;  %v5704_v46 = vunpack.i.h.bf16 %v5702_v57  ;;  %v5703_v60 = vunpack.i.l.bf16 %v5702_v57 }
 0x2e0   :  { %v2974_v25 = vsel %vm2582_vm6, %v11691_v40, %v2973_v29  ;;  %v2969_v50 = vsel %vm2584_vm7, %v11696_v39, %v2968_v0  ;;  %v4283_v41 = vunpack.c.l.b16 %v4273_v49  ;;  %vm4314_vm13 = vcmask 1041408   ;;  %v11699_v49 = vld [vmem:[#allocation23_spill] sm:$0xff] }
 0x2e1   :  { %v2975_v22 = vsel %vm2584_vm7, %v11697_v62, %v2974_v25  ;;  %v3036_v59 = vsel %vm2756_vm9, %v2969_v50, 0.0  ;;  %v4145_v48 = vsel %vm4143_vm11, %v4129_v27, %v5704_v46  ;;  %v2672_v56 = vsel %vm2574_vm2, %v9322_v44, %v9315_v38 }
 0x2e2   :  { %v3037_v32 = vsel %vm2756_vm9, %v2975_v22, 0.0  ;;  %v5683_v29 = vunpack.i.l.bf16 %v9586_v42  ;;  %v9623_v0 = vsel %vm4143_vm11, %v9494_v47, %v5703_v60  ;;  %v4286_v25 = vpack.c.b16 %v4283_v41, %v4283_v41 }
 0x2e3   :  { %v5900_v9 = vpack.i.bf16 %v3037_v32, %v3036_v59  ;;  %11698 = vst [vmem:[#allocation31_spill] sm:$0xff] %v9623_v0  ;;  %v2673_v39 = vsel %vm2576_vm3, %v9327_v5, %v2672_v56  ;;  %vm11485_vm14 = vcmask 130048   ;;  %v4161_v27 = vsel %vm11502_vm12, %v4145_v48, %v5679_v36 }
 0x2e4   :  { %v2674_v57 = vsel %vm2578_vm4, %v9332_v2, %v2673_v39  ;;  %v3925_v42 = vrot.slane %v11683_v11, 7  ;;  %v4160_v47 = vsel %vm11502_vm12, %v9623_v0, %v5678_v1  ;;  %v4316_v50 = vsel %vm4314_vm13, %v4286_v25, 0  ;;  %v5612_v1 = vld [vmem:[%s11293_s1 + $0x8] sm:$0xff]  ;;  %v9683_v45 = vpop.permute.xlu1 %5706 }
 0x2e5   :  { %5901 = vrot.lane.b32.xlu1 %v5900_v9, %s6273_s29  ;;  %v2675_v22 = vsel %vm2580_vm5, %v9338_v14, %v2674_v57  ;;  %v3927_v46 = vrot.slane %v11685_v53, 6  ;;  %4323 = vmatpush.bf16.msra.mxu0 %v4316_v50  ;;  %v3929_v32 = vrot.slane %v11687_v15, 5  ;;  %v3931_v61 = vrot.slane %v11689_v20, 4  ;;  %v5697_v4 = vpop.permute.xlu0 %5696 }
 0x2e6   :  { %v2676_v36 = vsel %vm2582_vm6, %v9340_v17, %v2675_v22  ;;  %v3926_v59 = vsel %vm2574_vm2, %v3925_v42, %v11682_v34  ;;  %5617 = vmatpush.bf16.msra.mxu3 %v4316_v50  ;;  %v3933_v9 = vrot.slane %v11690_v54, 3  ;;  %v3935_v48 = vrot.slane %v11691_v40, 2  ;;  %v11701_v22 = vld [vmem:[#allocation46_spill] sm:$0xff] }
 0x2e7   :  { %5896 = vrot.lane.b32.xlu0 %v11699_v49, %s6277_s27  ;;  %v2677_v60 = vsel %vm2584_vm7, %v9349_v7, %v2676_v36  ;;  %v3928_v41 = vsel %vm2576_vm3, %v3927_v46, %v3926_v59  ;;  %v4178_v56 = vsel %vm11485_vm14, %v4161_v27, %v5684_v6  ;;  %v3937_v39 = vrot.slane %v11697_v62, 1  ;;  %v11700_v49 = vld [vmem:[#allocation45_spill] sm:$0xff]  ;;  %v11704_v27 = vld [vmem:[#allocation43_spill] sm:$0xff] }
 0x2e8   :  { %v3930_v25 = vsel %vm2578_vm4, %v3929_v32, %v3928_v41  ;;  %v3939_v57 = vrot.slane %v11636_v63, 7  ;;  %v3941_v50 = vrot.slane %v11700_v49, 6  ;;  %v3943_v36 = vrot.slane %v11701_v22, 5  ;;  %v11705_v41 = vld [vmem:[#allocation48_spill] sm:$0xff] }
 0x2e9   :  { %v3932_v42 = vsel %vm2580_vm5, %v3931_v61, %v3930_v25  ;;  %v3945_v46 = vrot.slane %v11702_v8, 4  ;;  %v9667_v59 = vsel %vm2586_vm8, %v9354_v26, %v2677_v60  ;;  %v3947_v28 = vrot.slane %v11705_v41, 3  ;;  %4324 = vmatpush.bf16.msra.mxu0 %v5612_v1  ;;  %v5611_v61 = vld [vmem:[%s11293_s1] sm:$0xff] }
 0x2ea   :  { %11703 = vst [vmem:[#allocation24_spill] sm:$0xff] %v9667_v59  ;;  %v3934_v6 = vsel %vm2582_vm6, %v3933_v9, %v3932_v42  ;;  %v3940_v32 = vsel %vm2574_vm2, %v3939_v57, %v11704_v27  ;;  %5618 = vmatpush.bf16.msra.mxu3 %v5612_v1  ;;  %v4177_v25 = vsel %vm11485_vm14, %v4160_v47, %v5683_v29  ;;  %v3949_v9 = vrot.slane %v11706_v3, 2 }
 0x2eb   :  { %v3936_v55 = vsel %vm2584_vm7, %v3935_v48, %v3934_v6  ;;  %v3942_v60 = vsel %vm2576_vm3, %v3941_v50, %v3940_v32  ;;  %v3951_v43 = vrot.slane %v11707_v13, 1  ;;  %vm11501_vm15 = vcmask 162816  }
 0x2ec   :  { %v3938_v42 = vsel %vm2586_vm8, %v3937_v39, %v3936_v55  ;;  %v3944_v57 = vsel %vm2578_vm4, %v3943_v36, %v3942_v60  ;;  %vm4210_vm13 = vcmask 195584   ;;  %vm11498_vm14 = vcmask 228352  }
 0x2ed   :  { %v3946_v29 = vsel %vm2580_vm5, %v3945_v46, %v3944_v57  ;;  %v5699_v47 = vunpack.i.h.bf16 %v5697_v4  ;;  %v5698_v48 = vunpack.i.l.bf16 %v5697_v4  ;;  %v11708_v55 = vunpack.i.l.bf16 %v9538_v19  ;;  %4325 = vmatpush.bf16.msra.mxu0 %v5611_v61 }
 0x2ee   :  { %v3948_v1 = vsel %vm2582_vm6, %v3947_v28, %v3946_v29  ;;  %v11709_v50 = vunpack.i.h.bf16 %v9538_v19  ;;  %5619 = vmatpush.bf16.msra.mxu3 %v5611_v61  ;;  %v11710_v46 = vunpack.i.l.bf16 %v9473_v12  ;;  %v11711_v60 = vunpack.i.h.bf16 %v9473_v12 }
 0x2ef   :  { %3499 = vrot.lane.b32.xlu0 %v9667_v59, %s6271_s12  ;;  %v4194_v39 = vsel %vm11501_vm15, %v4177_v25, %v11708_v55  ;;  %v3950_v6 = vsel %vm2584_vm7, %v3949_v9, %v3948_v1  ;;  %v3357_v57 = vrot.slane %v11685_v53, 7  ;;  %v3359_v29 = vrot.slane %v11687_v15, 6  ;;  %v268_v1 = vld [vmem:[%s11292_s0 + $0x1e0] sm:$0x3] }
 0x2f0   :  { %v4195_v36 = vsel %vm11501_vm15, %v4178_v56, %v11709_v50  ;;  %v4211_v32 = vsel %vm4210_vm13, %v4194_v39, %v11710_v46  ;;  %v3952_v25 = vsel %vm2586_vm8, %v3951_v43, %v3950_v6  ;;  %v3361_v12 = vrot.slane %v11689_v20, 5 }
 0x2f1   :  { %v4212_v28 = vsel %vm4210_vm13, %v4195_v36, %v11711_v60  ;;  %v9705_v19 = vsel %vm11498_vm14, %v4211_v32, %v5698_v48  ;;  %v5910_v9 = vpack.i.bf16 %v3952_v25, %v3938_v42  ;;  %v3363_v43 = vrot.slane %v11690_v54, 4  ;;  %v269_v42 = vld [vmem:[%s11292_s0 + $0x1e2] sm:$0x3]  ;;  %v271_v25 = vld [vmem:[%s11292_s0 + $0x1e6] sm:$0x3] }
 0x2f2   :  { %v9708_v56 = vsel %vm11498_vm14, %v4212_v28, %v5699_v47  ;;  %v3365_v48 = vrot.slane %v11691_v40, 3  ;;  %v3367_v47 = vrot.slane %v11697_v62, 2  ;;  %v3369_v55 = vrot.slane %v11700_v49, 7  ;;  %v270_v28 = vld [vmem:[%s11292_s0 + $0x1e4] sm:$0x3] }
 0x2f3   :  { %5911 = vrot.lane.b32.xlu1 %v5910_v9, %s6278_s28  ;;  %v3358_v39 = vsel %vm2574_vm2, %v3357_v57, %v11683_v11  ;;  %v3371_v50 = vrot.slane %v11701_v22, 6  ;;  %v3373_v36 = vrot.slane %v11702_v8, 5  ;;  %v3375_v6 = vrot.slane %v11705_v41, 4 }
 0x2f4   :  { %v3360_v46 = vsel %vm2576_vm3, %v3359_v29, %v3358_v39  ;;  %v3370_v62 = vsel %vm2574_vm2, %v3369_v55, %v11636_v63  ;;  %v3377_v32 = vrot.slane %v11706_v3, 3  ;;  %v3379_v60 = vrot.slane %v11707_v13, 2  ;;  %v9805_v3 = vpop.permute.xlu0 %5716 }
 0x2f5   :  { %v3362_v9 = vsel %vm2578_vm4, %v3361_v12, %v3360_v46  ;;  %v3372_v57 = vsel %vm2576_vm3, %v3371_v50, %v3370_v62  ;;  %v1965_v29 = vsel %vm284_vm0, %v268_v1, -inf  ;;  %v1972_v55 = vsel %vm284_vm0, %v269_v42, -inf  ;;  %v272_v12 = vld [vmem:[%s11292_s0 + $0x1e8] sm:$0x3] }
 0x2f6   :  { %v3364_v39 = vsel %vm2580_vm5, %v3363_v43, %v3362_v9  ;;  %v3374_v13 = vsel %vm2578_vm4, %v3373_v36, %v3372_v57  ;;  %v1966_v4 = vrot.slane %v1965_v29, 4  ;;  %v1973_v61 = vrot.slane %v1972_v55, 4  ;;  %v273_v36 = vld [vmem:[%s11292_s0 + $0x1ea] sm:$0x3] }
 0x2f7   :  { %v3366_v0 = vsel %vm2582_vm6, %v3365_v48, %v3364_v39  ;;  %v3376_v35 = vsel %vm2580_vm5, %v3375_v6, %v3374_v13  ;;  %v1979_v50 = vsel %vm284_vm0, %v270_v28, -inf  ;;  %v1986_v1 = vsel %vm284_vm0, %v271_v25, -inf  ;;  %v274_v28 = vld [vmem:[%s11292_s0 + $0x1ec] sm:$0x3] }
 0x2f8   :  { %v3368_v42 = vsel %vm2584_vm7, %v3367_v47, %v3366_v0  ;;  %v3378_v43 = vsel %vm2582_vm6, %v3377_v32, %v3376_v35  ;;  %v1967_v46 = vmax.f32 %v1965_v29, %v1966_v4  ;;  %v1974_v48 = vmax.f32 %v1972_v55, %v1973_v61  ;;  %v276_v4 = vld [vmem:[%s11292_s0 + $0x1f0] sm:$0x3] }
 0x2f9   :  { %v3380_v6 = vsel %vm2584_vm7, %v3379_v60, %v3378_v43  ;;  %v3464_v62 = vsel %vm2756_vm9, %v3368_v42, 0.0  ;;  %v1980_v9 = vrot.slane %v1979_v50, 4  ;;  %v1987_v25 = vrot.slane %v1986_v1, 4 }
 0x2fa   :  { %v3465_v0 = vsel %vm2756_vm9, %v3380_v6, 0.0  ;;  %v1968_v47 = vrot.slane %v1967_v46, 2  ;;  %v1975_v35 = vrot.slane %v1974_v48, 2  ;;  %v1993_v32 = vsel %vm284_vm0, %v272_v12, -inf }
 0x2fb   :  { %v5920_v57 = vpack.i.bf16 %v3465_v0, %v3464_v62  ;;  %v1981_v61 = vmax.f32 %v1979_v50, %v1980_v9  ;;  %v1988_v60 = vmax.f32 %v1986_v1, %v1987_v25  ;;  %v1994_v29 = vrot.slane %v1993_v32, 4  ;;  %v9773_v50 = vpop.permute.xlu2 %5726  ;;  %v277_v1 = vld [vmem:[%s11292_s0 + $0x1f2] sm:$0x3] }
 0x2fc   :  { %v1969_v55 = vmax.f32 %v1967_v46, %v1968_v47  ;;  %v1976_v39 = vmax.f32 %v1974_v48, %v1975_v35  ;;  %v2000_v13 = vsel %vm284_vm0, %v273_v36, -inf  ;;  %v2007_v42 = vsel %vm284_vm0, %v274_v28, -inf  ;;  %v278_v36 = vld [vmem:[%s11292_s0 + $0x1f4] sm:$0x3] }
 0x2fd   :  { %5921 = vrot.lane.b32.xlu0 %v5920_v57, %s6279_s30  ;;  %v1982_v43 = vrot.slane %v1981_v61, 2  ;;  %v1989_v6 = vrot.slane %v1988_v60, 2  ;;  %v1995_v10 = vmax.f32 %v1993_v32, %v1994_v29  ;;  %v2001_v12 = vrot.slane %v2000_v13, 4  ;;  %v279_v57 = vld [vmem:[%s11292_s0 + $0x1f6] sm:$0x3] }
 0x2fe   :  { %v1970_v62 = vrot.slane %v1969_v55, 1  ;;  %v1977_v0 = vrot.slane %v1976_v39, 1  ;;  %v2008_v51 = vrot.slane %v2007_v42, 4  ;;  %v2021_v52 = vsel %vm284_vm0, %v276_v4, -inf }
 0x2ff   :  { %v1983_v46 = vmax.f32 %v1981_v61, %v1982_v43  ;;  %v1990_v48 = vmax.f32 %v1988_v60, %v1989_v6  ;;  %v1996_v28 = vrot.slane %v1995_v10, 2  ;;  %v2002_v9 = vmax.f32 %v2000_v13, %v2001_v12  ;;  %v280_v61 = vld [vmem:[%s11292_s0 + $0x1f8] sm:$0x3]  ;;  %v281_v12 = vld [vmem:[%s11292_s0 + $0x1fa] sm:$0x3] }
 0x300   :  { %v1971_v25 = vmax.f32 %v1969_v55, %v1970_v62  ;;  %v9781_v47 = vmax.f32 %v1976_v39, %v1977_v0  ;;  %v2009_v35 = vmax.f32 %v2007_v42, %v2008_v51  ;;  %v2022_v32 = vrot.slane %v2021_v52, 4 }
 0x301   :  { %v1984_v4 = vrot.slane %v1983_v46, 1  ;;  %v1991_v29 = vrot.slane %v1990_v48, 1  ;;  %v1997_v21 = vmax.f32 %v1995_v10, %v1996_v28  ;;  %v2003_v23 = vrot.slane %v2002_v9, 2 }
 0x302   :  { %v2010_v60 = vrot.slane %v2009_v35, 2  ;;  %v2023_v43 = vmax.f32 %v2021_v52, %v2022_v32  ;;  %v2028_v55 = vsel %vm284_vm0, %v277_v1, -inf  ;;  %v2035_v39 = vsel %vm284_vm0, %v278_v36, -inf  ;;  %v282_v36 = vld [vmem:[%s11292_s0 + $0x1fc] sm:$0x3] }
 0x303   :  { %v1985_v51 = vmax.f32 %v1983_v46, %v1984_v4  ;;  %v1992_v13 = vmax.f32 %v1990_v48, %v1991_v29  ;;  %v1998_v42 = vrot.slane %v1997_v21, 1  ;;  %v2004_v6 = vmax.f32 %v2002_v9, %v2003_v23 }
 0x304   :  { %v2011_v10 = vmax.f32 %v2009_v35, %v2010_v60  ;;  %v2024_v62 = vrot.slane %v2023_v43, 2  ;;  %v2029_v0 = vrot.slane %v2028_v55, 4  ;;  %v2036_v28 = vrot.slane %v2035_v39, 4 }
 0x305   :  { %v1999_v37 = vmax.f32 %v1997_v21, %v1998_v42  ;;  %v2005_v24 = vrot.slane %v2004_v6, 1  ;;  %v2042_v52 = vsel %vm284_vm0, %v279_v57, -inf  ;;  %v2049_v1 = vsel %vm284_vm0, %v280_v61, -inf  ;;  %v9800_v57 = vpop.permute.xlu2 %5741 }
 0x306   :  { %v2012_v46 = vrot.slane %v2011_v10, 1  ;;  %v2025_v23 = vmax.f32 %v2023_v43, %v2024_v62  ;;  %v2030_v48 = vmax.f32 %v2028_v55, %v2029_v0  ;;  %v2037_v9 = vmax.f32 %v2035_v39, %v2036_v28 }
 0x307   :  { %v2006_v32 = vmax.f32 %v2004_v6, %v2005_v24  ;;  %v2043_v4 = vrot.slane %v2042_v52, 4  ;;  %v2050_v35 = vrot.slane %v2049_v1, 4  ;;  %v2056_v29 = vsel %vm284_vm0, %v281_v12, -inf }
 0x308   :  { %v2013_v60 = vmax.f32 %v2011_v10, %v2012_v46  ;;  %v2026_v21 = vrot.slane %v2025_v23, 1  ;;  %v2031_v42 = vrot.slane %v2030_v48, 2  ;;  %v2038_v33 = vrot.slane %v2037_v9, 2 }
 0x309   :  { %v2044_v61 = vmax.f32 %v2042_v52, %v2043_v4  ;;  %v2051_v18 = vmax.f32 %v2049_v1, %v2050_v35  ;;  %v2057_v58 = vrot.slane %v2056_v29, 4  ;;  %v2063_v59 = vsel %vm284_vm0, %v282_v36, -inf }
 0x30a   :  { %v2027_v26 = vmax.f32 %v2025_v23, %v2026_v21  ;;  %v2032_v43 = vmax.f32 %v2030_v48, %v2031_v42  ;;  %v2039_v55 = vmax.f32 %v2037_v9, %v2038_v33  ;;  %v2064_v39 = vrot.slane %v2063_v59, 4  ;;  %v9809_v23 = vpop.permute.xlu1 %5721 }
 0x30b   :  { %v2045_v24 = vrot.slane %v2044_v61, 2  ;;  %v2052_v6 = vrot.slane %v2051_v18, 2  ;;  %v2058_v62 = vmax.f32 %v2056_v29, %v2057_v58  ;;  %v2438_v12 = vsel %vm11499_vm1, %v1971_v25, -inf }
 0x30c   :  { %v2033_v10 = vrot.slane %v2032_v43, 1  ;;  %v2040_v0 = vrot.slane %v2039_v55, 1  ;;  %v2065_v28 = vmax.f32 %v2063_v59, %v2064_v39  ;;  %v2439_v46 = vsel %vm11499_vm1, %v2027_v26, -inf }
 0x30d   :  { %v2046_v52 = vmax.f32 %v2044_v61, %v2045_v24  ;;  %v2053_v1 = vmax.f32 %v2051_v18, %v2052_v6  ;;  %v2059_v4 = vrot.slane %v2058_v62, 2  ;;  %v9807_v36 = vmax.f32 %v2438_v12, %v2439_v46 }
 0x30e   :  { %v2034_v33 = vmax.f32 %v2032_v43, %v2033_v10  ;;  %v2041_v48 = vmax.f32 %v2039_v55, %v2040_v0  ;;  %v2066_v9 = vrot.slane %v2065_v28, 2  ;;  %v2441_v58 = vsel %vm11499_vm1, %v9781_v47, -inf }
 0x30f   :  { %v2047_v25 = vrot.slane %v2046_v52, 1  ;;  %v2054_v35 = vrot.slane %v2053_v1, 1  ;;  %v2060_v59 = vmax.f32 %v2058_v62, %v2059_v4  ;;  %v2444_v26 = vsel %vm11499_vm1, %v1985_v51, -inf  ;;  %v9823_v51 = vpop.permute.xlu2 %5756 }
 0x310   :  { %v2067_v29 = vmax.f32 %v2065_v28, %v2066_v9  ;;  %v2442_v21 = vsel %vm11499_vm1, %v2034_v33, -inf  ;;  %v2445_v18 = vsel %vm11499_vm1, %v2041_v48, -inf  ;;  %v2447_v42 = vsel %vm11499_vm1, %v1992_v13, -inf  ;;  %v9848_v9 = vpop.permute.xlu0 %5731 }
 0x311   :  { %v2048_v61 = vmax.f32 %v2046_v52, %v2047_v25  ;;  %v2055_v39 = vmax.f32 %v2053_v1, %v2054_v35  ;;  %v2061_v43 = vrot.slane %v2060_v59, 1  ;;  %v9817_v55 = vmax.f32 %v2441_v58, %v2442_v21 }
 0x312   :  { %v2068_v24 = vrot.slane %v2067_v29, 1  ;;  %v9819_v6 = vmax.f32 %v2444_v26, %v2445_v18  ;;  %v2450_v47 = vsel %vm11499_vm1, %v1999_v37, -inf  ;;  %v2453_v62 = vsel %vm11499_vm1, %v2006_v32, -inf }
 0x313   :  { %v2062_v12 = vmax.f32 %v2060_v59, %v2061_v43  ;;  %v2448_v10 = vsel %vm11499_vm1, %v2048_v61, -inf  ;;  %v2451_v0 = vsel %vm11499_vm1, %v2055_v39, -inf  ;;  %v2456_v13 = vsel %vm11499_vm1, %v2013_v60, -inf }
 0x314   :  { %v2069_v28 = vmax.f32 %v2067_v29, %v2068_v24  ;;  %v9828_v46 = vmax.f32 %v2447_v42, %v2448_v10  ;;  %v9830_v52 = vmax.f32 %v2450_v47, %v2451_v0  ;;  %v2870_v37 = vsel %vm2576_vm3, %v9322_v44, %v9315_v38  ;;  %v9860_v29 = vpop.permute.xlu1 %5736 }
 0x315   :  { %v2454_v32 = vsel %vm11499_vm1, %v2062_v12, -inf  ;;  %v2871_v1 = vsel %vm2578_vm4, %v9327_v5, %v2870_v37  ;;  %v2876_v4 = vsel %vm2576_vm3, %v9817_v55, %v9807_v36  ;;  %vm4244_vm14 = vcmask 261120  }
 0x316   :  { %v9841_v60 = vmax.f32 %v2453_v62, %v2454_v32  ;;  %v2457_v33 = vsel %vm11499_vm1, %v2069_v28, -inf  ;;  %v2872_v48 = vsel %vm2580_vm5, %v9332_v2, %v2871_v1  ;;  %v2877_v38 = vsel %vm2578_vm4, %v9819_v6, %v2876_v4 }
 0x317   :  { %v9850_v58 = vmax.f32 %v2456_v13, %v2457_v33  ;;  %v2873_v25 = vsel %vm2582_vm6, %v9338_v14, %v2872_v48  ;;  %v2878_v35 = vsel %vm2580_vm5, %v9828_v46, %v2877_v38  ;;  %v11712_v59 = vunpack.i.l.bf16 %v9683_v45  ;;  %v9894_v48 = vpop.permute.xlu2 %5771 }
 0x318   :  { %v2874_v21 = vsel %vm2584_vm7, %v9340_v17, %v2873_v25  ;;  %v2879_v18 = vsel %vm2582_vm6, %v9830_v52, %v2878_v35  ;;  %v11713_v42 = vunpack.i.h.bf16 %v9683_v45  ;;  %vm11500_vm1 = vcmask 293888  }
 0x319   :  { %v4245_v26 = vsel %vm4244_vm14, %v9705_v19, %v11712_v59  ;;  %v5729_v39 = vunpack.i.h.bf16 %v9773_v50  ;;  %v2875_v43 = vsel %vm2586_vm8, %v9349_v7, %v2874_v21  ;;  %v2880_v19 = vsel %vm2584_vm7, %v9841_v60, %v2879_v18  ;;  %v9908_v21 = vpop.permute.xlu0 %5746 }
 0x31a   :  { %v4246_v61 = vsel %vm4244_vm14, %v9708_v56, %v11713_v42  ;;  %v5728_v47 = vunpack.i.l.bf16 %v9773_v50  ;;  %v2881_v62 = vsel %vm2586_vm8, %v9850_v58, %v2880_v19  ;;  %v2912_v45 = vsel %vm2710_vm10, 0.0, %v2875_v43  ;;  %v11716_v19 = vld [vmem:[#allocation49_spill] sm:$0xff] }
 0x31b   :  { %v4261_v24 = vpack.c.bf16 %v4246_v61, %v4245_v26  ;;  %v5719_v12 = vunpack.i.h.bf16 %v9805_v3  ;;  %v5744_v56 = vunpack.i.h.bf16 %v9800_v57  ;;  %v2913_v10 = vsel %vm2710_vm10, 0.0, %v2881_v62  ;;  %v275_v26 = vld [vmem:[%s11292_s0 + $0x1ee] sm:$0x3] }
 0x31c   :  { %v5718_v0 = vunpack.i.l.bf16 %v9805_v3  ;;  %v11714_v13 = vunpack.i.h.bf16 %v9557_v31  ;;  %v5743_v37 = vunpack.i.l.bf16 %v9800_v57  ;;  %v5925_v32 = vpack.i.bf16 %v2913_v10, %v2912_v45 }
 0x31d   :  { %5579 = vmatmul.msk.bf16.vlgmr.msra.gmra.mxu0 %vm11500_vm1, %v4261_v24  ;;  %v11715_v1 = vunpack.i.l.bf16 %v9557_v31  ;;  %v5724_v38 = vunpack.i.h.bf16 %v9809_v23  ;;  %v3146_v3 = vrot.slane %v11682_v34, 7  ;;  %v3147_v25 = vrot.slane %v11683_v11, 6 }
 0x31e   :  { %v4147_v28 = vsel %vm4143_vm11, %v9580_v30, %v11714_v13  ;;  %v3149_v30 = vrot.slane %v11685_v53, 5  ;;  %5926 = vrot.lane.b32.xlu1 %v5925_v32, %s6274_s16  ;;  %v5723_v31 = vunpack.i.l.bf16 %v9809_v23  ;;  %v3153_v59 = vrot.slane %v11689_v20, 3  ;;  %v9917_v23 = vpop.permute.xlu1 %5751 }
 0x31f   :  { %v4146_v4 = vsel %vm4143_vm11, %v9589_v16, %v11715_v1  ;;  %v4163_v33 = vsel %vm11502_vm12, %v4147_v28, %v5719_v12  ;;  %v3151_v16 = vrot.slane %v11687_v15, 4  ;;  %v3148_v34 = vsel %vm2576_vm3, %v3147_v25, %v3146_v3  ;;  %v283_v15 = vld [vmem:[%s11292_s0 + $0x1fe] sm:$0x3] }
 0x320   :  { %v4162_v35 = vsel %vm11502_vm12, %v4146_v4, %v5718_v0  ;;  %v3155_v11 = vrot.slane %v11690_v54, 2  ;;  %v3157_v53 = vrot.slane %v11691_v40, 1  ;;  %v3159_v18 = vrot.slane %v11704_v27, 7 }
 0x321   :  { %v3150_v20 = vsel %vm2578_vm4, %v3149_v30, %v3148_v34  ;;  %v3160_v42 = vrot.slane %v11636_v63, 6  ;;  %v3162_v61 = vrot.slane %v11700_v49, 5  ;;  %v3164_v43 = vrot.slane %v11701_v22, 4  ;;  %v9954_v34 = vpop.permute.xlu2 %5786 }
 0x322   :  { %v3152_v54 = vsel %vm2580_vm5, %v3151_v16, %v3150_v20  ;;  %v3166_v40 = vrot.slane %v11702_v8, 3  ;;  %v3168_v27 = vrot.slane %v11705_v41, 2  ;;  %v3170_v24 = vrot.slane %v11716_v19, 1 }
 0x323   :  { %v3154_v62 = vsel %vm2582_vm6, %v3153_v59, %v3152_v54  ;;  %v3161_v45 = vsel %vm2576_vm3, %v3160_v42, %v3159_v18  ;;  %v2014_v12 = vsel %vm284_vm0, %v275_v26, -inf  ;;  %v2070_v63 = vsel %vm284_vm0, %v283_v15, -inf }
 0x324   :  { %v3156_v49 = vsel %vm2584_vm7, %v3155_v11, %v3154_v62  ;;  %v3163_v22 = vsel %vm2578_vm4, %v3162_v61, %v3161_v45  ;;  %v2015_v10 = vrot.slane %v2014_v12, 4  ;;  %v2071_v0 = vrot.slane %v2070_v63, 4 }
 0x325   :  { %v3158_v8 = vsel %vm2586_vm8, %v3157_v53, %v3156_v49  ;;  %v3165_v41 = vsel %vm2580_vm5, %v3164_v43, %v3163_v22  ;;  %v3000_v13 = vsel %vm2574_vm2, %v9327_v5, %v9322_v44  ;;  %v3006_v28 = vsel %vm2574_vm2, %v9819_v6, %v9817_v55  ;;  %v9949_v5 = vpop.permute.xlu0 %5761  ;;  %v11719_v43 = vld [vmem:[#allocation80_spill] sm:$0xff] }
 0x326   :  { %vm11717_vm1 = vcmask 130048   ;;  %v3167_v1 = vsel %vm2582_vm6, %v3166_v40, %v3165_v41  ;;  %v2016_v4 = vmax.f32 %v2014_v12, %v2015_v10  ;;  %v2072_v3 = vmax.f32 %v2070_v63, %v2071_v0  ;;  %v9956_v11 = vpop.permute.xlu1 %5766 }
 0x327   :  { %v4180_v32 = vsel %vm11717_vm1, %v4163_v33, %v5724_v38  ;;  %v3169_v25 = vsel %vm2584_vm7, %v3168_v27, %v3167_v1  ;;  %v3260_v30 = vsel %vm2710_vm10, 0.0, %v3158_v8  ;;  %v3001_v16 = vsel %vm2576_vm3, %v9332_v2, %v3000_v13  ;;  %vm11718_vm0 = vmmov %vm11717_vm1 }
 0x328   :  { %v3007_v44 = vsel %vm2576_vm3, %v9828_v46, %v3006_v28  ;;  %v3171_v59 = vsel %vm2586_vm8, %v3170_v24, %v3169_v25  ;;  %v2017_v26 = vrot.slane %v2016_v4, 2  ;;  %v2073_v33 = vrot.slane %v2072_v3, 2 }
 0x329   :  { %v3002_v38 = vsel %vm2578_vm4, %v9338_v14, %v3001_v16  ;;  %v4179_v53 = vsel %vm11718_vm0, %v4162_v35, %v5723_v31  ;;  %v3261_v2 = vsel %vm2710_vm10, 0.0, %v3171_v59  ;;  %v3008_v15 = vsel %vm2578_vm4, %v9830_v52, %v3007_v44  ;;  %v11724_v16 = vld [vmem:[#allocation24_spill] sm:$0xff] }
 0x32a   :  { %v3003_v18 = vsel %vm2580_vm5, %v9340_v17, %v3002_v38  ;;  %v5905_v20 = vpack.i.bf16 %v3261_v2, %v3260_v30  ;;  %v2018_v42 = vmax.f32 %v2016_v4, %v2017_v26  ;;  %v2074_v61 = vmax.f32 %v2072_v3, %v2073_v33  ;;  %v10007_v26 = vpop.permute.xlu2 %5801 }
 0x32b   :  { %v3004_v14 = vsel %vm2582_vm6, %v9349_v7, %v3003_v18  ;;  %v3009_v35 = vsel %vm2580_vm5, %v9841_v60, %v3008_v15  ;;  %v5734_v31 = vunpack.i.h.bf16 %v9848_v9  ;;  %v5733_v40 = vunpack.i.l.bf16 %v9848_v9 }
 0x32c   :  { %v3005_v54 = vsel %vm2584_vm7, %v11719_v43, %v3004_v14  ;;  %5906 = vrot.lane.b32.xlu2 %v5905_v20, %s6276_s26  ;;  %v2019_v17 = vrot.slane %v2018_v42, 1  ;;  %v2075_v27 = vrot.slane %v2074_v61, 1  ;;  %v3010_v19 = vsel %vm2582_vm6, %v9850_v58, %v3009_v35 }
 0x32d   :  { %v3042_v24 = vsel %vm2756_vm9, %v3005_v54, 0.0  ;;  %v4196_v7 = vsel %vm11501_vm15, %v4179_v53, %v5728_v47  ;;  %v4197_v62 = vsel %vm11501_vm15, %v4180_v32, %v5729_v39  ;;  %v5739_v45 = vunpack.i.h.bf16 %v9860_v29  ;;  %v9990_v8 = vpop.permute.xlu0 %5776 }
 0x32e   :  { %v5738_v9 = vunpack.i.l.bf16 %v9860_v29  ;;  %v2020_v12 = vmax.f32 %v2018_v42, %v2019_v17  ;;  %v2076_v63 = vmax.f32 %v2074_v61, %v2075_v27  ;;  %v4213_v49 = vsel %vm4210_vm13, %v4196_v7, %v5733_v40  ;;  %v9996_v28 = vpop.permute.xlu1 %5781 }
 0x32f   :  { %v4214_v22 = vsel %vm4210_vm13, %v4197_v62, %v5734_v31  ;;  %vm11720_vm1 = vcmask 228352   ;;  %v3224_v47 = vrot.slane %v9807_v36, 7  ;;  %v3225_v50 = vrot.slane %v9817_v55, 6 }
 0x330   :  { %v4230_v10 = vsel %vm11720_vm1, %v4213_v49, %v5738_v9  ;;  %vm11721_vm0 = vmmov %vm11720_vm1  ;;  %vm11722_vm15 = vcmask 31744   ;;  %v3227_v41 = vrot.slane %v9819_v6, 5  ;;  %v3229_v13 = vrot.slane %v9828_v46, 4 }
 0x331   :  { %v4231_v0 = vsel %vm11721_vm0, %v4214_v22, %v5739_v45  ;;  %v2459_v39 = vsel %vm11722_vm15, %v2020_v12, -inf  ;;  %vm11723_vm12 = vmmov %vm11722_vm15  ;;  %v3226_v1 = vsel %vm2576_vm3, %v3225_v50, %v3224_v47  ;;  %v3231_v4 = vrot.slane %v9830_v52, 3 }
 0x332   :  { %v2460_v29 = vsel %vm11723_vm12, %v2076_v63, -inf  ;;  %v3233_v3 = vrot.slane %v9841_v60, 2  ;;  %v3228_v25 = vsel %vm2578_vm4, %v3227_v41, %v3226_v1  ;;  %v3235_v30 = vrot.slane %v9850_v58, 1  ;;  %v11726_v41 = vld [vmem:[#allocation28_spill] sm:$0xff] }
 0x333   :  { %v9998_v32 = vmax.f32 %v2459_v39, %v2460_v29  ;;  %v2740_v44 = vrot.slane %v11724_v16, 1  ;;  %v3429_v59 = vrot.slane %v9819_v6, 7  ;;  %v3230_v38 = vsel %vm2580_vm5, %v3229_v13, %v3228_v25  ;;  %v11725_v29 = vld [vmem:[#allocation27_spill] sm:$0xff] }
 0x334   :  { %v3431_v53 = vrot.slane %v9828_v46, 6  ;;  %v3433_v2 = vrot.slane %v9830_v52, 5  ;;  %v3232_v15 = vsel %vm2582_vm6, %v3231_v4, %v3230_v38  ;;  %v3435_v40 = vrot.slane %v9841_v60, 4  ;;  %v11727_v4 = vld [vmem:[#allocation78_spill] sm:$0xff] }
 0x335   :  { %v3011_v33 = vsel %vm2584_vm7, %v9998_v32, %v3010_v19  ;;  %v2771_v20 = vsel %vm2756_vm9, %v2740_v44, 0.0  ;;  %v3430_v42 = vsel %vm2574_vm2, %v3429_v59, %v9817_v55  ;;  %v3234_v14 = vsel %vm2584_vm7, %v3233_v3, %v3232_v15  ;;  %v10031_v62 = vpop.permute.xlu0 %5791  ;;  %v10072_v59 = vpop.permute.xlu2 %5816 }
 0x336   :  { %v3043_v18 = vsel %vm2756_vm9, %v3011_v33, 0.0  ;;  %v5915_v43 = vpack.i.bf16 0.0, %v2771_v20  ;;  %v3432_v54 = vsel %vm2576_vm3, %v3431_v53, %v3430_v42  ;;  %v3236_v35 = vsel %vm2586_vm8, %v3235_v30, %v3234_v14  ;;  %v10038_v63 = vpop.permute.xlu1 %5796 }
 0x337   :  { %v5935_v61 = vpack.i.bf16 %v3043_v18, %v3042_v24  ;;  %v3434_v31 = vsel %vm2578_vm4, %v3433_v2, %v3432_v54  ;;  %v3437_v17 = vrot.slane %v9850_v58, 3  ;;  %v5759_v27 = vunpack.i.h.bf16 %v9823_v51 }
 0x338   :  { %v5758_v19 = vunpack.i.l.bf16 %v9823_v51  ;;  %v3266_v24 = vsel %vm2710_vm10, 0.0, %v3236_v35  ;;  %5916 = vrot.lane.b32.xlu2 %v5915_v43, %s6275_s25  ;;  %v3439_v7 = vrot.slane %v9998_v32, 2  ;;  %v3436_v45 = vsel %vm2580_vm5, %v3435_v40, %v3434_v31 }
 0x339   :  { %5936 = vrot.lane.b32.xlu0 %v5935_v61, %s6273_s29  ;;  %3809 = vrot.lane.b32.xlu1 %v3266_v24, %s6276_s26  ;;  %v5749_v9 = vunpack.i.h.bf16 %v9908_v21  ;;  %v5748_v12 = vunpack.i.l.bf16 %v9908_v21  ;;  %v5754_v51 = vunpack.i.h.bf16 %v9917_v23  ;;  %v3438_v49 = vsel %vm2582_vm6, %v3437_v17, %v3436_v45 }
 0x33a   :  { %v5753_v22 = vunpack.i.l.bf16 %v9917_v23  ;;  %v4247_v47 = vsel %vm4244_vm14, %v4230_v10, %v5743_v37  ;;  %v4248_v50 = vsel %vm4244_vm14, %v4231_v0, %v5744_v56  ;;  %v3440_v39 = vsel %vm2584_vm7, %v3439_v7, %v3438_v49  ;;  %v11731_v10 = vld [vmem:[#allocation79_spill] sm:$0xff] }
 0x33b   :  { %v4149_v21 = vsel %vm4143_vm11, %v11725_v29, %v5749_v9  ;;  %v4148_v13 = vsel %vm4143_vm11, %v11726_v41, %v5748_v12  ;;  %v4262_v1 = vpack.c.bf16 %v4248_v50, %v4247_v47  ;;  %v11728_v3 = vrot.slane %v11727_v4, 7  ;;  %v11738_v50 = vld [vmem:[#allocation25_spill] sm:$0xff]  ;;  %v11739_v29 = vld [vmem:[#allocation84_spill] sm:$0xff] }
 0x33c   :  { %vm11729_vm12 = vcmask 97280   ;;  %v3647_v56 = vsel %vm2574_vm2, %v9817_v55, %v9807_v36  ;;  %v11732_v0 = vrot.slane %v11731_v10, 7  ;;  %v3470_v30 = vsel %vm2756_vm9, %v3440_v39, 0.0 }
 0x33d   :  { %v10056_v23 = vsel %vm2710_vm10, 0.0, %v11728_v3  ;;  %v4165_v37 = vsel %vm11729_vm12, %v4149_v21, %v5754_v51  ;;  %vm11730_vm15 = vmmov %vm11729_vm12  ;;  %vm11733_vm1 = vcmask 293888   ;;  %v3648_v44 = vsel %vm2576_vm3, %v9819_v6, %v3647_v56  ;;  %v10091_v35 = vpop.permute.xlu0 %5806  ;;  %v10125_v41 = vpop.permute.xlu2 %5831 }
 0x33e   :  { %v4164_v57 = vsel %vm11730_vm15, %v4148_v13, %v5753_v22  ;;  %v10066_v25 = vsel %vm2710_vm10, 0.0, %v11732_v0  ;;  %5580 = vmatmul.msk.bf16.gmra.mxu0 %vm11733_vm1, %v4262_v1  ;;  %v5764_v33 = vunpack.i.h.bf16 %v9949_v5  ;;  %v5774_v38 = vunpack.i.h.bf16 %v9894_v48 }
 0x33f   :  { %v3649_v53 = vsel %vm2578_vm4, %v9828_v46, %v3648_v44  ;;  %v5763_v2 = vunpack.i.l.bf16 %v9949_v5  ;;  %vm11734_vm0 = vcmask 130048   ;;  %v5773_v15 = vunpack.i.l.bf16 %v9894_v48 }
 0x340   :  { %v4182_v18 = vsel %vm11734_vm0, %v4165_v37, %v5759_v27  ;;  %v3650_v20 = vsel %vm2580_vm5, %v9830_v52, %v3649_v53  ;;  %vm11735_vm12 = vmmov %vm11734_vm0  ;;  %vm11736_vm15 = vcmask 162816   ;;  %v5769_v5 = vunpack.i.h.bf16 %v9956_v11  ;;  %v10098_v27 = vpop.permute.xlu1 %5811 }
 0x341   :  { %v4181_v42 = vsel %vm11735_vm12, %v4164_v57, %v5758_v19  ;;  %v4199_v61 = vsel %vm11736_vm15, %v4182_v18, %v5764_v33  ;;  %4111 = vrot.lane.b32.xlu0 %v3470_v30, %s6279_s30  ;;  %v3651_v14 = vsel %vm2582_vm6, %v9841_v60, %v3650_v20  ;;  %vm11737_vm1 = vmmov %vm11736_vm15  ;;  %v5768_v54 = vunpack.i.l.bf16 %v9956_v11 }
 0x342   :  { %v4198_v43 = vsel %vm11737_vm1, %v4181_v42, %v5763_v2  ;;  %v5789_v48 = vunpack.i.h.bf16 %v9954_v34  ;;  %v5788_v31 = vunpack.i.l.bf16 %v9954_v34  ;;  %v3652_v40 = vsel %vm2584_vm7, %v9850_v58, %v3651_v14 }
 0x343   :  { %v5779_v17 = vunpack.i.h.bf16 %v9990_v8  ;;  %v5804_v19 = vunpack.i.h.bf16 %v10007_v26  ;;  %v3653_v24 = vsel %vm2586_vm8, %v9998_v32, %v3652_v40  ;;  %v4215_v11 = vsel %vm4210_vm13, %v4198_v43, %v5768_v54 }
 0x344   :  { %v5778_v7 = vunpack.i.l.bf16 %v9990_v8  ;;  %v5930_v45 = vpack.i.bf16 %v3653_v24, %v11724_v16  ;;  %v4216_v34 = vsel %vm4210_vm13, %v4199_v61, %v5769_v5  ;;  %v5784_v9 = vunpack.i.h.bf16 %v9996_v28 }
 0x345   :  { %v5783_v12 = vunpack.i.l.bf16 %v9996_v28  ;;  %v5803_v51 = vunpack.i.l.bf16 %v10007_v26  ;;  %v4009_v49 = vrot.slane %v9817_v55, 7  ;;  %v4011_v22 = vrot.slane %v9819_v6, 6  ;;  %v5822_v57 = vpop.permute.xlu0 %5821 }
 0x346   :  { %v4013_v47 = vrot.slane %v9828_v46, 5  ;;  %5931 = vrot.lane.b32.xlu2 %v5930_v45, %s6277_s27  ;;  %v5819_v8 = vunpack.i.h.bf16 %v10072_v59  ;;  %v4154_v39 = vsel %vm4143_vm11, %v11738_v50, %v5779_v17  ;;  %v4153_v21 = vsel %vm4143_vm11, %v11739_v29, %v5778_v7 }
 0x347   :  { %v4015_v28 = vrot.slane %v9830_v52, 4  ;;  %v4010_v26 = vsel %vm2574_vm2, %v4009_v49, %v9807_v36  ;;  %v4017_v55 = vrot.slane %v9841_v60, 3  ;;  %vm11740_vm0 = vcmask 228352  }
 0x348   :  { %v4232_v6 = vsel %vm11740_vm0, %v4215_v11, %v5773_v15  ;;  %vm11741_vm12 = vmmov %vm11740_vm0  ;;  %v4012_v13 = vsel %vm2576_vm3, %v4011_v22, %v4010_v26  ;;  %v4019_v1 = vrot.slane %v9850_v58, 2  ;;  %v5818_v52 = vunpack.i.l.bf16 %v10072_v59  ;;  %v5827_v30 = vpop.permute.xlu1 %5826 }
 0x349   :  { %v4233_v46 = vsel %vm11741_vm12, %v4216_v34, %v5774_v38  ;;  %v4249_v4 = vsel %vm4244_vm14, %v4232_v6, %v5783_v12  ;;  %v4014_v36 = vsel %vm2578_vm4, %v4013_v47, %v4012_v13  ;;  %v4021_v60 = vrot.slane %v9998_v32, 1  ;;  %v11744_v32 = vld [vmem:[#allocation26_spill] sm:$0xff]  ;;  %vm11751_vm0 = vmmov %vm11737_vm1 }
 0x34a   :  { %v4250_v3 = vsel %vm4244_vm14, %v4233_v46, %v5784_v9  ;;  %v5794_v37 = vunpack.i.h.bf16 %v10031_v62  ;;  %v4016_v56 = vsel %vm2580_vm5, %v4015_v28, %v4014_v36  ;;  %v5793_v0 = vunpack.i.l.bf16 %v10031_v62  ;;  %v11758_v28 = vld [vmem:[#allocation60_spill] sm:$0xff] }
 0x34b   :  { %v4263_v10 = vpack.c.bf16 %v4250_v3, %v4249_v4  ;;  %vm11742_vm2 = vcmask 97280   ;;  %v4018_v44 = vsel %vm2582_vm6, %v4017_v55, %v4016_v56  ;;  %v5799_v59 = vunpack.i.h.bf16 %v10038_v63  ;;  %v11759_v55 = vld [vmem:[#allocation90_spill] sm:$0xff] }
 0x34c   :  { %v4170_v58 = vsel %vm11742_vm2, %v4153_v21, %v5788_v31  ;;  %vm11743_vm3 = vmmov %vm11742_vm2  ;;  %v5798_v38 = vunpack.i.l.bf16 %v10038_v63  ;;  %v11745_v53 = vunpack.i.h.bf16 %v11744_v32  ;;  %vm11746_vm4 = vcmask 31744  }
 0x34d   :  { %v4171_v33 = vsel %vm11743_vm3, %v4154_v39, %v5789_v48  ;;  %v4020_v18 = vsel %vm2584_vm7, %v4019_v1, %v4018_v44  ;;  %vm11747_vm5 = vcmask 130048   ;;  %v11749_v20 = vunpack.i.l.bf16 %v11744_v32  ;;  %vm11750_vm6 = vmmov %vm11746_vm4  ;;  %v10170_v12 = vpop.permute.xlu0 %5836 }
 0x34e   :  { %v4135_v2 = vsel %vm11746_vm4, %v10066_v25, %v11745_v53  ;;  %v4187_v62 = vsel %vm11747_vm5, %v4170_v58, %v5793_v0  ;;  %vm11748_vm15 = vmmov %vm11747_vm5  ;;  %v4022_v61 = vsel %vm2586_vm8, %v4021_v60, %v4020_v18  ;;  %vm11752_vm7 = vcmask 293888   ;;  %v11762_v60 = vld [vmem:[#allocation83_spill] sm:$0xff]  ;;  %v11763_v58 = vld [vmem:[#allocation30_spill] sm:$0xff] }
 0x34f   :  { %v4188_v15 = vsel %vm11748_vm15, %v4171_v33, %v5794_v37  ;;  %v4134_v42 = vsel %vm11750_vm6, %v10056_v23, %v11749_v20  ;;  %v4204_v14 = vsel %vm11751_vm0, %v4187_v62, %v5798_v38  ;;  %v4151_v43 = vsel %vm4143_vm11, %v4135_v2, %v5819_v8  ;;  %4051 = vrot.lane.b32.xlu2 %v4022_v61, %s6278_s28  ;;  %vm11753_vm8 = vmmov %vm11741_vm12 }
 0x350   :  { %v4205_v63 = vsel %vm11737_vm1, %v4188_v15, %v5799_v59  ;;  %v4150_v25 = vsel %vm4143_vm11, %v4134_v42, %v5818_v52  ;;  %5581 = vmatmul.msk.bf16.gmra.mxu0 %vm11752_vm7, %v4263_v10  ;;  %v5809_v5 = vunpack.i.h.bf16 %v10091_v35  ;;  %v5808_v54 = vunpack.i.l.bf16 %v10091_v35  ;;  %vm11754_vm12 = vmmov %vm11753_vm8  ;;  %v10174_v22 = vpop.permute.xlu1 %5841 }
 0x351   :  { %v4221_v23 = vsel %vm4210_vm13, %v4204_v14, %v5803_v51  ;;  %v4222_v48 = vsel %vm4210_vm13, %v4205_v63, %v5804_v19  ;;  %v5814_v31 = vunpack.i.h.bf16 %v10098_v27  ;;  %v5813_v40 = vunpack.i.l.bf16 %v10098_v27  ;;  %v5847_v51 = vpop.permute.xlu2 %5846  ;;  %vm11755_vm3 = vmmov %vm11742_vm2 }
 0x352   :  { %v4238_v17 = vsel %vm11753_vm8, %v4221_v23, %v5808_v54  ;;  %v4239_v24 = vsel %vm11754_vm12, %v4222_v48, %v5809_v5  ;;  %v5824_v11 = vunpack.i.h.bf16 %v5822_v57  ;;  %v5823_v7 = vunpack.i.l.bf16 %v5822_v57  ;;  %vm11756_vm4 = vmmov %vm11752_vm7 }
 0x353   :  { %v4255_v45 = vsel %vm4244_vm14, %v4238_v17, %v5813_v40  ;;  %v4256_v34 = vsel %vm4244_vm14, %v4239_v24, %v5814_v31  ;;  %v5829_v9 = vunpack.i.h.bf16 %v5827_v30  ;;  %v5828_v35 = vunpack.i.l.bf16 %v5827_v30  ;;  %vm11757_vm15 = vmmov %vm11747_vm5 }
 0x354   :  { %v4266_v19 = vpack.c.bf16 %v4256_v34, %v4255_v45  ;;  %v4167_v49 = vsel %vm11742_vm2, %v4151_v43, %v5824_v11  ;;  %v4166_v27 = vsel %vm11755_vm3, %v4150_v25, %v5823_v7  ;;  %v5834_v47 = vunpack.i.h.bf16 %v10125_v41  ;;  %vm11760_vm6 = vmmov %vm11751_vm0 }
 0x355   :  { %v5833_v8 = vunpack.i.l.bf16 %v10125_v41  ;;  %v4184_v50 = vsel %vm11747_vm5, %v4167_v49, %v5829_v9  ;;  %v4183_v39 = vsel %vm11757_vm15, %v4166_v27, %v5828_v35  ;;  %v5839_v29 = vunpack.i.h.bf16 %v10170_v12  ;;  %vm11761_vm1 = vmmov %vm11751_vm0  ;;  %v10193_v52 = vpop.permute.xlu0 %5851 }
 0x356   :  { %5584 = vmatmul.msk.bf16.vlgmr.msra.gmra.mxu3 %vm11756_vm4, %v4266_v19  ;;  %v5838_v21 = vunpack.i.l.bf16 %v10170_v12  ;;  %v2691_v26 = vrot.slane %v11758_v28, 7  ;;  %v2692_v6 = vrot.slane %v11759_v55, 7  ;;  %v4201_v13 = vsel %vm11761_vm1, %v4184_v50, %v5834_v47  ;;  %vm11764_vm0 = vmmov %vm11753_vm8 }
 0x357   :  { %v4200_v46 = vsel %vm11760_vm6, %v4183_v39, %v5833_v8  ;;  %v5844_v41 = vunpack.i.h.bf16 %v10174_v22  ;;  %v5843_v1 = vunpack.i.l.bf16 %v10174_v22  ;;  %v4218_v3 = vsel %vm4210_vm13, %v4201_v13, %v5839_v29  ;;  %vm11765_vm7 = vmmov %vm11764_vm0 }
 0x358   :  { %v4217_v4 = vsel %vm4210_vm13, %v4200_v46, %v5838_v21  ;;  %v2722_v36 = vsel %vm2710_vm10, 0.0, %v2691_v26  ;;  %v5669_v37 = vunpack.i.h.bf16 %v11762_v60  ;;  %v5854_v57 = vunpack.i.h.bf16 %v10193_v52  ;;  %v5857_v10 = vpop.permute.xlu1 %5856  ;;  %vm11768_vm2 = vmmov %vm11756_vm4 }
 0x359   :  { %v5853_v56 = vunpack.i.l.bf16 %v10193_v52  ;;  %v2723_v0 = vsel %vm2710_vm10, 0.0, %v2692_v6  ;;  %v5673_v30 = vunpack.i.l.bf16 %v11763_v58  ;;  %v4234_v44 = vsel %vm11764_vm0, %v4217_v4, %v5843_v1  ;;  %v5862_v32 = vpop.permute.xlu2 %5861  ;;  %vm11769_vm4 = vmmov %vm11755_vm3  ;;  %v11774_v6 = vld [vmem:[#allocation21_spill] sm:$0xff]  ;;  %v11775_v1 = vld [vmem:[#allocation82_spill] sm:$0xff] }
 0x35a   :  { %v4235_v33 = vsel %vm11765_vm7, %v4218_v3, %v5844_v41  ;;  %v5849_v59 = vunpack.i.h.bf16 %v5847_v51  ;;  %v5848_v38 = vunpack.i.l.bf16 %v5847_v51  ;;  %v5859_v18 = vunpack.i.h.bf16 %v5857_v10  ;;  %vm11770_vm15 = vmmov %vm11747_vm5 }
 0x35b   :  { %v4251_v53 = vsel %vm4244_vm14, %v4234_v44, %v5853_v56  ;;  %v4252_v2 = vsel %vm4244_vm14, %v4235_v33, %v5854_v57  ;;  %v5858_v62 = vunpack.i.l.bf16 %v5857_v10  ;;  %vm11766_vm8 = vcmask 31744   ;;  %vm11771_vm6 = vmmov %vm11761_vm1 }
 0x35c   :  { %v4264_v15 = vpack.c.bf16 %v4252_v2, %v4251_v53  ;;  %v4139_v20 = vsel %vm11766_vm8, %v2722_v36, %v5669_v37  ;;  %vm11767_vm12 = vmmov %vm11766_vm8  ;;  %v5864_v14 = vunpack.i.h.bf16 %v5862_v32  ;;  %v5863_v43 = vunpack.i.l.bf16 %v5862_v32 }
 0x35d   :  { %v4140_v42 = vsel %vm11767_vm12, %v2723_v0, %v5673_v30  ;;  %v4155_v61 = vsel %vm4143_vm11, %v4139_v20, %v5848_v38  ;;  %v5867_v54 = vpop.permute.xlu0 %5866  ;;  %vm11772_vm7 = vmmov %vm11764_vm0  ;;  %v2688_v46 = vrot.slane %v11774_v6, 7  ;;  %v5663_v4 = vunpack.i.l.bf16 %v11775_v1 }
 0x35e   :  { %v4156_v63 = vsel %vm4143_vm11, %v4140_v42, %v5849_v59  ;;  %v4172_v5 = vsel %vm11769_vm4, %v4155_v61, %v5858_v62  ;;  %v5869_v23 = vunpack.i.h.bf16 %v5867_v54  ;;  %v5868_v48 = vunpack.i.l.bf16 %v5867_v54  ;;  %vm11773_vm8 = vmmov %vm11768_vm2  ;;  %v11776_v59 = vld [vmem:[#allocation31_spill] sm:$0xff] }
 0x35f   :  { %v4173_v25 = vsel %vm11755_vm3, %v4156_v63, %v5859_v18  ;;  %v4189_v40 = vsel %vm11747_vm5, %v4172_v5, %v5863_v43  ;;  %v2719_v36 = vsel %vm2710_vm10, 0.0, %v2688_v46  ;;  %vm11779_vm4 = vmmov %vm11747_vm5 }
 0x360   :  { %5582 = vmatmul.msk.bf16.gmra.mxu0 %vm11768_vm2, %v4264_v15  ;;  %v5872_v31 = vpop.permute.xlu1 %5871  ;;  %v4190_v17 = vsel %vm11770_vm15, %v4173_v25, %v5864_v14  ;;  %v4206_v7 = vsel %vm11771_vm6, %v4189_v40, %v5868_v48  ;;  %v4136_v56 = vsel %vm11767_vm12, %v2719_v36, %v5663_v4  ;;  %vm11777_vm2 = vmmov %vm11755_vm3 }
 0x361   :  { %v5874_v24 = vunpack.i.h.bf16 %v5872_v31  ;;  %v5873_v11 = vunpack.i.l.bf16 %v5872_v31  ;;  %v4207_v45 = vsel %vm11761_vm1, %v4190_v17, %v5869_v23  ;;  %v5877_v34 = vpop.permute.xlu2 %5876  ;;  %vm11778_vm3 = vmmov %vm11777_vm2 }
 0x362   :  { %v5879_v9 = vunpack.i.h.bf16 %v5877_v34  ;;  %v5878_v35 = vunpack.i.l.bf16 %v5877_v34  ;;  %vm11780_vm5 = vmmov %vm11779_vm4  ;;  %v2694_v34 = vrot.slane %v11724_v16, 7 }
 0x363   :  { %v4223_v51 = vsel %vm4210_vm13, %v4206_v7, %v5873_v11  ;;  %v4224_v19 = vsel %vm4210_vm13, %v4207_v45, %v5874_v24  ;;  %vm11781_vm15 = vmmov %vm11761_vm1 }
 0x364   :  { %v4240_v8 = vsel %vm11764_vm0, %v4223_v51, %v5878_v35  ;;  %v4241_v50 = vsel %vm11772_vm7, %v4224_v19, %v5879_v9  ;;  %vm11782_vm6 = vmmov %vm11761_vm1  ;;  %v11785_v9 = vld [vmem:[#allocation91_spill] sm:$0xff]  ;;  %v2725_v51 = vsel %vm2710_vm10, 0.0, %v2694_v34 }
 0x365   :  { %v5882_v49 = vpop.permute.xlu0 %5881  ;;  %vm11783_vm1 = vmmov %vm11764_vm0  ;;  %v2693_v35 = vrot.slane %v11785_v9, 7 }
 0x366   :  { %v5884_v27 = vunpack.i.h.bf16 %v5882_v49  ;;  %v5883_v47 = vunpack.i.l.bf16 %v5882_v49  ;;  %vm11784_vm7 = vmmov %vm11773_vm8  ;;  %v5674_v49 = vunpack.i.h.bf16 %v11763_v58 }
 0x368   :  { %v4257_v39 = vsel %vm4244_vm14, %v4240_v8, %v5883_v47  ;;  %v4258_v21 = vsel %vm4244_vm14, %v4241_v50, %v5884_v27  ;;  %v5887_v26 = vpop.permute.xlu1 %5886  ;;  %v2724_v27 = vsel %vm2710_vm10, 0.0, %v2693_v35 }
 0x369   :  { %v4267_v28 = vpack.c.bf16 %v4258_v21, %v4257_v39  ;;  %v5892_v60 = vpop.permute.xlu2 %5891  ;;  %v5888_v37 = vunpack.i.l.bf16 %v5887_v26  ;;  %v5889_v47 = vunpack.i.h.bf16 %v5887_v26 }
 0x36a   :  { %v5894_v10 = vunpack.i.h.bf16 %v5892_v60  ;;  %v5893_v0 = vunpack.i.l.bf16 %v5892_v60 }
 0x36b   :  { %5585 = vmatmul.msk.bf16.gmra.mxu3 %vm11773_vm8, %v4267_v28  ;;  %v4152_v30 = vsel %vm4143_vm11, %v4136_v56, %v5888_v37  ;;  %vm11786_vm8 = vmmov %vm11767_vm12 }
 0x36c   :  { %v4168_v38 = vsel %vm11777_vm2, %v11776_v59, %v5893_v0  ;;  %v4169_v32 = vsel %vm11778_vm3, %v4152_v30, %v5894_v10  ;;  %vm11787_vm12 = vmmov %vm11786_vm8 }
 0x36d   :  { %v5897_v55 = vpop.permute.xlu0 %5896  ;;  %vm11788_vm3 = vmmov %vm11777_vm2 }
 0x36e   :  { %v5899_v44 = vunpack.i.h.bf16 %v5897_v55  ;;  %v5898_v33 = vunpack.i.l.bf16 %v5897_v55  ;;  %v4141_v55 = vsel %vm11787_vm12, %v2724_v27, %v5674_v49 }
 0x36f   :  { %v4157_v16 = vsel %vm4143_vm11, %v4141_v55, %v5889_v47 }
 0x370   :  { %v5902_v13 = vpop.permute.xlu1 %5901  ;;  %v4185_v18 = vsel %vm11779_vm4, %v4168_v38, %v5898_v33  ;;  %v4186_v62 = vsel %vm11780_vm5, %v4169_v32, %v5899_v44  ;;  %vm11789_vm5 = vmmov %vm11779_vm4 }
 0x371   :  { %v5904_v53 = vunpack.i.h.bf16 %v5902_v13  ;;  %v5903_v2 = vunpack.i.l.bf16 %v5902_v13 }
 0x373   :  { %v4202_v61 = vsel %vm11781_vm15, %v4185_v18, %v5903_v2  ;;  %v4203_v63 = vsel %vm11782_vm6, %v4186_v62, %v5904_v53  ;;  %vm11790_vm15 = vmmov %vm11782_vm6 }
 0x375   :  { %v3500_v3 = vpop.permute.xlu0 %3499 }
 0x376   :  { %v4142_v50 = vsel %vm11786_vm8, %v2725_v51, %v3500_v3 }
 0x378   :  { %v5912_v15 = vpop.permute.xlu1 %5911 }
 0x379   :  { %v5914_v14 = vunpack.i.h.bf16 %v5912_v15  ;;  %v5913_v43 = vunpack.i.l.bf16 %v5912_v15 }
 0x37d   :  { %v5922_v20 = vpop.permute.xlu0 %5921 }
 0x37e   :  { %v5924_v54 = vunpack.i.h.bf16 %v5922_v20  ;;  %v5923_v23 = vunpack.i.l.bf16 %v5922_v20 }
 0x386   :  { %v5907_v42 = vpop.permute.xlu2 %5906 }
 0x387   :  { %v5909_v25 = vunpack.i.h.bf16 %v5907_v42  ;;  %v5908_v5 = vunpack.i.l.bf16 %v5907_v42 }
 0x389   :  { %v4219_v48 = vsel %vm4210_vm13, %v4202_v61, %v5908_v5  ;;  %v4220_v31 = vsel %vm4210_vm13, %v4203_v63, %v5909_v25 }
 0x38a   :  { %v4236_v40 = vsel %vm11783_vm1, %v4219_v48, %v5913_v43  ;;  %v4237_v17 = vsel %vm11764_vm0, %v4220_v31, %v5914_v14  ;;  %vm11791_vm1 = vmmov %vm11764_vm0 }
 0x38b   :  { %v4253_v24 = vsel %vm4244_vm14, %v4236_v40, %v5923_v23  ;;  %v4254_v11 = vsel %vm4244_vm14, %v4237_v17, %v5924_v54 }
 0x38c   :  { %v4265_v7 = vpack.c.bf16 %v4254_v11, %v4253_v24 }
 0x38e   :  { %5583 = vmatmul.msk.bf16.gmra.mxu0 %vm11784_vm7, %v4265_v7 }
 0x390   :  { %v5927_v19 = vpop.permute.xlu1 %5926 }
 0x391   :  { %v5929_v39 = vunpack.i.h.bf16 %v5927_v19  ;;  %v5928_v21 = vunpack.i.l.bf16 %v5927_v19 }
 0x392   :  { %v10246_v45 = vpop.permute.xlu2 %5916 }
 0x393   :  { %v5918_v8 = vunpack.i.l.bf16 %v10246_v45  ;;  %v4174_v1 = vsel %vm11788_vm3, %v4157_v16, %v5928_v21 }
 0x395   :  { %v4158_v6 = vsel %vm4143_vm11, %v4142_v50, %v5918_v8  ;;  %v6280_v50 = vmov 128.0  }
 0x396   :  { %v4175_v58 = vsel %vm11777_vm2, %v4158_v6, %v5929_v39  ;;  %6239 = vrcp.f32 %v6280_v50 }
 0x39a   :  { %v10277_v12 = vpop.f32.mrf.mxu0 }
 0x39b   :  { %v4367_v42 = vsel %vm4143_vm11, %v10277_v12, 0.0 }
 0x39c   :  { %v6240_v16 = vpop.eup %6239 }
 0x39d   :  { %vm4409_vm8 = vweird.f32 %v6240_v16 }
 0x3a0   :  { %v5932_v28 = vpop.permute.xlu2 %5931 }
 0x3a1   :  { %v5934_v46 = vunpack.i.h.bf16 %v5932_v28  ;;  %v5933_v13 = vunpack.i.l.bf16 %v5932_v28 }
 0x3a3   :  { %v4192_v3 = vsel %vm11779_vm4, %v4175_v58, %v5934_v46  ;;  %v4191_v37 = vsel %vm11789_vm5, %v4174_v1, %v5933_v13  ;;  %v4405_v58 = vmul.f32 128.0, %v6240_v16  ;;  %vm5141_vm5 = vcmask 326656  }
 0x3a9   :  { %v4052_v44 = vpop.permute.xlu2 %4051 }
 0x3ab   :  { %v5937_v26 = vpop.permute.xlu0 %5936  ;;  %v3810_v60 = vpop.permute.xlu1 %3809 }
 0x3ac   :  { %v5939_v4 = vunpack.i.h.bf16 %v5937_v26  ;;  %v5938_v36 = vunpack.i.l.bf16 %v5937_v26 }
 0x3ae   :  { %v4209_v56 = vsel %vm11790_vm15, %v4192_v3, %v5939_v4  ;;  %v4208_v10 = vsel %vm11782_vm6, %v4191_v37, %v5938_v36  ;;  %v4406_v3 = vsub.f32 1.0, %v4405_v58  ;;  %vm5158_vm15 = vcmask 392192  }
 0x3af   :  { %v4226_v0 = vsel %vm4210_vm13, %v4209_v56, %v5839_v29  ;;  %v4225_v30 = vsel %vm4210_vm13, %v4208_v10, %v3810_v60  ;;  %v10279_v29 = vpop.f32.mrf.mxu0  ;;  %vm5175_vm6 = vcmask 457728  }
 0x3b0   :  { %v4243_v33 = vsel %vm11791_vm1, %v4226_v0, %v5844_v41  ;;  %v4242_v59 = vsel %vm11764_vm0, %v4225_v30, %v4052_v44  ;;  %v4368_v20 = vsel %vm4143_vm11, %v10279_v29, 0.0  ;;  %v4407_v56 = vmul.f32 %v6240_v16, %v4406_v3  ;;  %vm11795_vm0 = vmmov %vm11779_vm4 }
 0x3b1   :  { %v4260_v53 = vsel %vm4244_vm14, %v4243_v33, %v5854_v57  ;;  %v4369_v63 = vadd.f32 %v4368_v20, %v4367_v42  ;;  %vm5192_vm1 = vcmask 523264  }
 0x3b2   :  { %v4408_v30 = vadd.f32 %v6240_v16, %v4407_v56 }
 0x3b3   :  { %v4112_v38 = vpop.permute.xlu0 %4111 }
 0x3b4   :  { %v4259_v32 = vsel %vm4244_vm14, %v4242_v59, %v4112_v38  ;;  %v10338_v59 = vsel %vm4409_vm8, %v6240_v16, %v4408_v30  ;;  %vm11796_vm8 = vmmov %vm11795_vm0 }
 0x3b5   :  { %v4268_v2 = vpack.c.bf16 %v4260_v53, %v4259_v32 }
 0x3b7   :  { %5586 = vmatmul.msk.bf16.gmra.mxu3 %vm11784_vm7, %v4268_v2  ;;  %vm5253_vm7 = vcmask 588800  }
 0x3bb   :  { %v10281_v18 = vpop.f32.mrf.mxu0 }
 0x3bc   :  { %v4370_v61 = vsel %vm4143_vm11, %v10281_v18, 0.0 }
 0x3bd   :  { %v4371_v5 = vadd.f32 %v4370_v61, %v4369_v63 }
 0x3c3   :  { %v10283_v22 = vpop.f32.mrf.mxu0 }
 0x3c4   :  { %v4372_v25 = vsel %vm4143_vm11, %v10283_v22, 0.0 }
 0x3c5   :  { %v4373_v23 = vadd.f32 %v4372_v25, %v4371_v5 }
 0x3cd   :  { %v10285_v41 = vpop.f32.mrf.mxu0 }
 0x3ce   :  { %v4374_v54 = vsel %vm4143_vm11, %v10285_v41, 0.0 }
 0x3cf   :  { %v4375_v31 = vadd.f32 %v4374_v54, %v4373_v23 }
 0x3d5   :  { %v10287_v62 = vpop.f32.mrf.mxu0 }
 0x3d6   :  { %v4376_v48 = vsel %vm4143_vm11, %v10287_v62, 0.0 }
 0x3d7   :  { %v4377_v17 = vadd.f32 %v4376_v48, %v4375_v31 }
 0x3d9   :  { %v10291_v52 = vpop.f32.mrf.mxu3 }
 0x3da   :  { %v4386_v47 = vsel %vm4143_vm11, %v10291_v52, 0.0 }
 0x3dd   :  { %v10289_v15 = vpop.f32.mrf.mxu0 }
 0x3de   :  { %v4378_v40 = vsel %vm4143_vm11, %v10289_v15, 0.0 }
 0x3df   :  { %v4379_v7 = vadd.f32 %v4378_v40, %v4377_v17 }
 0x3e1   :  { %v10301_v14 = vpop.f32.mrf.mxu3 }
 0x3e2   :  { %v4388_v39 = vsel %vm4143_vm11, %v10301_v14, 0.0 }
 0x3e5   :  { %v10293_v57 = vpop.f32.mrf.mxu0 }
 0x3e6   :  { %v4380_v11 = vsel %vm4143_vm11, %v10293_v57, 0.0 }
 0x3e7   :  { %v4381_v35 = vadd.f32 %v4380_v11, %v4379_v7 }
 0x3ee   :  { %v10313_v24 = vpop.f32.mrf.mxu3 }
 0x3ef   :  { %v4390_v55 = vsel %vm4143_vm11, %v10313_v24, 0.0 }
 0x3f6   :  { %v10320_v27 = vpop.f32.mrf.mxu3 }
 0x3f7   :  { %v4392_v46 = vsel %vm4143_vm11, %v10320_v27, 0.0 }
 0x40b   :  { %v10303_v43 = vpop.f32.mrf.mxu0 }
 0x40c   :  { %v4382_v9 = vsel %vm4143_vm11, %v10303_v43, 0.0 }
 0x40d   :  { %v4383_v19 = vadd.f32 %v4382_v9, %v4381_v35 }
 0x413   :  { %v4349_v34 = vpop.f32.mrf.mxu0 }
 0x414   :  { %v4384_v51 = vsel %vm4143_vm11, %v4349_v34, 0.0 }
 0x415   :  { %v4385_v49 = vadd.f32 %v4384_v51, %v4383_v19 }
 0x417   :  { %v4387_v8 = vadd.f32 %v4386_v47, %v4385_v49 }
 0x419   :  { %v4389_v21 = vadd.f32 %v4388_v39, %v4387_v8 }
 0x41b   :  { %v4391_v6 = vadd.f32 %v4390_v55, %v4389_v21 }
 0x41d   :  { %v4393_v1 = vadd.f32 %v4392_v46, %v4391_v6 }
 0x43a   :  { %v10326_v28 = vpop.f32.mrf.mxu3 }
 0x43b   :  { %v4394_v13 = vsel %vm4143_vm11, %v10326_v28, 0.0 }
 0x43c   :  { %v4395_v26 = vadd.f32 %v4394_v13, %v4393_v1 }
 0x442   :  { %v10334_v4 = vpop.f32.mrf.mxu3 }
 0x443   :  { %v4396_v36 = vsel %vm4143_vm11, %v10334_v4, 0.0 }
 0x444   :  { %v4397_v60 = vadd.f32 %v4396_v36, %v4395_v26 }
 0x446   :  { %v4398_v37 = vrot.slane %v4397_v60, 4 }
 0x448   :  { %v4399_v10 = vadd.f32 %v4398_v37, %v4397_v60 }
 0x44a   :  { %v4400_v0 = vrot.slane %v4399_v10, 2 }
 0x44c   :  { %v4401_v44 = vadd.f32 %v4400_v0, %v4399_v10 }
 0x44e   :  { %v4402_v33 = vrot.slane %v4401_v44, 1 }
 0x450   :  { %v4403_v38 = vadd.f32 %v4402_v33, %v4401_v44 }
 0x452   :  { %v4411_v32 = vmul.f32 %v10338_v59, %v4403_v38 }
 0x454   :  { %v10342_v53 = vsub.f32 %v10277_v12, %v4411_v32  ;;  %v10345_v2 = vsub.f32 %v10279_v29, %v4411_v32  ;;  %v10348_v20 = vsub.f32 %v10281_v18, %v4411_v32  ;;  %v10351_v42 = vsub.f32 %v10283_v22, %v4411_v32 }
 0x455   :  { %v10358_v25 = vsub.f32 %v10285_v41, %v4411_v32  ;;  %v10363_v29 = vsub.f32 %v10287_v62, %v4411_v32  ;;  %v10370_v23 = vsub.f32 %v10289_v15, %v4411_v32  ;;  %v10376_v62 = vsub.f32 %v10293_v57, %v4411_v32 }
 0x456   :  { %v4428_v61 = vmul.f32 %v10342_v53, %v10342_v53  ;;  %v4429_v63 = vmul.f32 %v10345_v2, %v10345_v2  ;;  %v4430_v12 = vmul.f32 %v10348_v20, %v10348_v20  ;;  %v4431_v18 = vmul.f32 %v10351_v42, %v10351_v42 }
 0x457   :  { %v4432_v41 = vmul.f32 %v10358_v25, %v10358_v25  ;;  %v4433_v40 = vmul.f32 %v10363_v29, %v10363_v29  ;;  %v10382_v7 = vsub.f32 %v10303_v43, %v4411_v32  ;;  %v4434_v15 = vmul.f32 %v10370_v23, %v10370_v23 }
 0x458   :  { %v4444_v22 = vsel %vm4143_vm11, %v4428_v61, 0.0  ;;  %v4445_v5 = vsel %vm4143_vm11, %v4429_v63, 0.0  ;;  %v4447_v48 = vsel %vm4143_vm11, %v4430_v12, 0.0  ;;  %v4449_v17 = vsel %vm4143_vm11, %v4431_v18, 0.0 }
 0x459   :  { %v4446_v54 = vadd.f32 %v4445_v5, %v4444_v22  ;;  %v4451_v9 = vsel %vm4143_vm11, %v4432_v41, 0.0  ;;  %v10387_v51 = vsub.f32 %v4349_v34, %v4411_v32  ;;  %v4435_v57 = vmul.f32 %v10376_v62, %v10376_v62 }
 0x45a   :  { %v4453_v19 = vsel %vm4143_vm11, %v4433_v40, 0.0  ;;  %v10393_v47 = vsub.f32 %v10291_v52, %v4411_v32  ;;  %v4436_v43 = vmul.f32 %v10382_v7, %v10382_v7  ;;  %v4455_v8 = vsel %vm4143_vm11, %v4434_v15, 0.0 }
 0x45b   :  { %v4448_v31 = vadd.f32 %v4447_v48, %v4446_v54  ;;  %v10399_v39 = vsub.f32 %v10301_v14, %v4411_v32  ;;  %v4437_v34 = vmul.f32 %v10387_v51, %v10387_v51  ;;  %v4457_v21 = vsel %vm4143_vm11, %v4435_v57, 0.0 }
 0x45c   :  { %v10405_v16 = vsub.f32 %v10313_v24, %v4411_v32  ;;  %v4438_v52 = vmul.f32 %v10393_v47, %v10393_v47  ;;  %v4459_v6 = vsel %vm4143_vm11, %v4436_v43, 0.0  ;;  %v10411_v13 = vsub.f32 %v10320_v27, %v4411_v32  ;;  %v10441_v43 = vld [vmem:[%s11295_s3] ss:$0 sm:$0xff]  ;;  %s6282_s3 = smov 48  }
 0x45d   :  { %v4450_v11 = vadd.f32 %v4449_v17, %v4448_v31  ;;  %v4439_v14 = vmul.f32 %v10399_v39, %v10399_v39  ;;  %v4461_v58 = vsel %vm4143_vm11, %v4437_v34, 0.0  ;;  %v4426_v26 = vsub.f32 %v10326_v28, %v4411_v32 }
 0x45e   :  { %v4440_v24 = vmul.f32 %v10405_v16, %v10405_v16  ;;  %v4463_v36 = vsel %vm4143_vm11, %v4438_v52, 0.0  ;;  %v4427_v60 = vsub.f32 %v10334_v4, %v4411_v32  ;;  %v4441_v27 = vmul.f32 %v10411_v13, %v10411_v13 }
 0x45f   :  { %v4452_v35 = vadd.f32 %v4451_v9, %v4450_v11  ;;  %v4465_v37 = vsel %vm4143_vm11, %v4439_v14, 0.0  ;;  %v4442_v10 = vmul.f32 %v4426_v26, %v4426_v26 }
 0x460   :  { %v4467_v0 = vsel %vm4143_vm11, %v4440_v24, 0.0  ;;  %v4443_v44 = vmul.f32 %v4427_v60, %v4427_v60  ;;  %v4469_v28 = vsel %vm4143_vm11, %v4441_v27, 0.0 }
 0x461   :  { %v4454_v49 = vadd.f32 %v4453_v19, %v4452_v35  ;;  %v4471_v38 = vsel %vm4143_vm11, %v4442_v10, 0.0  ;;  %v10432_v35 = vld [vmem:[%s11294_s2] ss:$0 sm:$0xff]  ;;  %s6281_s2 = smov 56  }
 0x462   :  { %v4473_v63 = vsel %vm4143_vm11, %v4443_v44, 0.0 }
 0x463   :  { %v4456_v50 = vadd.f32 %v4455_v8, %v4454_v49 }
 0x465   :  { %v4458_v55 = vadd.f32 %v4457_v21, %v4456_v50 }
 0x467   :  { %v4460_v46 = vadd.f32 %v4459_v6, %v4458_v55 }
 0x469   :  { %v4462_v1 = vadd.f32 %v4461_v58, %v4460_v46 }
 0x46b   :  { %v4464_v3 = vadd.f32 %v4463_v36, %v4462_v1 }
 0x46d   :  { %v4466_v56 = vadd.f32 %v4465_v37, %v4464_v3 }
 0x46f   :  { %v4468_v30 = vadd.f32 %v4467_v0, %v4466_v56 }
 0x471   :  { %v4470_v33 = vadd.f32 %v4469_v28, %v4468_v30 }
 0x473   :  { %v4472_v61 = vadd.f32 %v4471_v38, %v4470_v33 }
 0x475   :  { %v4474_v4 = vadd.f32 %v4473_v63, %v4472_v61 }
 0x477   :  { %v4475_v32 = vrot.slane %v4474_v4, 4 }
 0x479   :  { %v4476_v12 = vadd.f32 %v4475_v32, %v4474_v4 }
 0x47b   :  { %v4477_v18 = vrot.slane %v4476_v12, 2 }
 0x47d   :  { %v4478_v22 = vadd.f32 %v4477_v18, %v4476_v12 }
 0x47f   :  { %v4479_v5 = vrot.slane %v4478_v22, 1 }
 0x481   :  { %v4480_v54 = vadd.f32 %v4479_v5, %v4478_v22 }
 0x483   :  { %v4481_v41 = vmul.f32 %v4480_v54, %v10338_v59 }
 0x485   :  { %v4482_v48 = vadd.f32 1e-05, %v4481_v41 }
 0x487   :  { %6241 = vrsqrt.f32 %v4482_v48  ;;  %vm4489_vm2 = vweird.f32 %v4482_v48 }
 0x48d   :  { %v6242_v31 = vpop.eup %6241 }
 0x48e   :  { %v4484_v40 = vmul.f32 %v6242_v31, %v4482_v48  ;;  %vm4490_vm12 = vweird.f32 %v6242_v31 }
 0x48f   :  { %vm4491_vm3 = vmor %vm4489_vm2, %vm4490_vm12 }
 0x490   :  { %v4485_v17 = vmul.f32 %v6242_v31, %v4484_v40  ;;  %vm11797_vm12 = vmmov %vm11795_vm0 }
 0x491   :  { %vm11798_vm2 = vmmov %vm11795_vm0 }
 0x492   :  { %v4486_v11 = vmul.f32 0.5, %v4485_v17 }
 0x494   :  { %v4487_v15 = vsub.f32 1.5, %v4486_v11 }
 0x496   :  { %v4488_v9 = vmul.f32 %v6242_v31, %v4487_v15 }
 0x498   :  { %v10434_v57 = vsel %vm4491_vm3, %v6242_v31, %v4488_v9  ;;  %vm11799_vm3 = vmmov %vm11795_vm0 }
 0x499   :  { %v4507_v19 = vmul.f32 %v10434_v57, %v4426_v26  ;;  %v4508_v49 = vmul.f32 %v10434_v57, %v4427_v60  ;;  %v4497_v8 = vmul.f32 %v10434_v57, %v10358_v25  ;;  %v4498_v50 = vmul.f32 %v10434_v57, %v10363_v29 }
 0x49a   :  { %v4495_v34 = vmul.f32 %v10434_v57, %v10348_v20  ;;  %v4496_v55 = vmul.f32 %v10434_v57, %v10351_v42  ;;  %v4493_v52 = vmul.f32 %v10434_v57, %v10342_v53  ;;  %v4494_v20 = vmul.f32 %v10434_v57, %v10345_v2 }
 0x49b   :  { %v10450_v21 = vmul.f32 %v10432_v35, %v4507_v19  ;;  %v4528_v6 = vmul.f32 %v10432_v35, %v4508_v49  ;;  %v4517_v46 = vmul.f32 %v10432_v35, %v4497_v8  ;;  %v4518_v25 = vmul.f32 %v10432_v35, %v4498_v50 }
 0x49c   :  { %v4515_v29 = vmul.f32 %v10432_v35, %v4495_v34  ;;  %v4516_v14 = vmul.f32 %v10432_v35, %v4496_v55  ;;  %v4513_v58 = vmul.f32 %v10432_v35, %v4493_v52  ;;  %v4501_v42 = vmul.f32 %v10434_v57, %v10382_v7 }
 0x49d   :  { %v10467_v53 = vadd.f32 %v10441_v43, %v4528_v6  ;;  %v4537_v1 = vadd.f32 %v10441_v43, %v4517_v46  ;;  %v4538_v26 = vadd.f32 %v10441_v43, %v4518_v25  ;;  %v4514_v3 = vmul.f32 %v10432_v35, %v4494_v20 }
 0x49e   :  { %v4535_v24 = vadd.f32 %v10441_v43, %v4515_v29  ;;  %v4536_v36 = vadd.f32 %v10441_v43, %v4516_v14  ;;  %v4533_v2 = vadd.f32 %v10441_v43, %v4513_v58  ;;  %v4502_v60 = vmul.f32 %v10434_v57, %v10387_v51 }
 0x49f   :  { %v10477_v27 = vmax.f32 %v4537_v1, 0.0  ;;  %v10479_v7 = vmax.f32 %v4538_v26, 0.0  ;;  %v4534_v10 = vadd.f32 %v10441_v43, %v4514_v3  ;;  %v4521_v30 = vmul.f32 %v10432_v35, %v4501_v42 }
 0x4a0   :  { %v10481_v37 = vmax.f32 %v4535_v24, 0.0  ;;  %v10483_v56 = vmax.f32 %v4536_v36, 0.0  ;;  %v10486_v0 = vmax.f32 %v4533_v2, 0.0  ;;  %v4522_v51 = vmul.f32 %v10432_v35, %v4502_v60 }
 0x4a1   :  { %v10491_v44 = vpack.i.bf16 %v10479_v7, %v10477_v27  ;;  %v4499_v28 = vmul.f32 %v10434_v57, %v10370_v23  ;;  %v4503_v33 = vmul.f32 %v10434_v57, %v10393_v47  ;;  %v10500_v61 = vmax.f32 %v4534_v10, 0.0 }
 0x4a2   :  { %v5945_v38 = vpack.i.bf16 %v10483_v56, %v10481_v37  ;;  %v4541_v63 = vadd.f32 %v10441_v43, %v4521_v30  ;;  %v4542_v4 = vadd.f32 %v10441_v43, %v4522_v51  ;;  %v5985_v23 = vpack.i.bf16 %v10477_v27, %v10483_v56 }
 0x4a3   :  { %5951 = vrot.lane.b32.xlu0 %v10491_v44, %s6275_s25  ;;  %v4519_v32 = vmul.f32 %v10432_v35, %v4499_v28  ;;  %v5940_v47 = vpack.i.bf16 %v10500_v61, %v10486_v0  ;;  %v4506_v12 = vmul.f32 %v10434_v57, %v10411_v13  ;;  %v4523_v22 = vmul.f32 %v10432_v35, %v4503_v33 }
 0x4a4   :  { %5946 = vrot.lane.b32.xlu2 %v5945_v38, %s6275_s25  ;;  %v4504_v5 = vmul.f32 %v10434_v57, %v10399_v39  ;;  %v10519_v54 = vmax.f32 %v4541_v63, 0.0  ;;  %v10521_v41 = vmax.f32 %v4542_v4, 0.0  ;;  %v4505_v48 = vmul.f32 %v10434_v57, %v10405_v16 }
 0x4a5   :  { %v4539_v18 = vadd.f32 %v10441_v43, %v4519_v32  ;;  %5941 = vrot.lane.b32.xlu1 %v5940_v47, %s6275_s25  ;;  %v4526_v13 = vmul.f32 %v10432_v35, %v4506_v12  ;;  %v4543_v40 = vadd.f32 %v10441_v43, %v4523_v22  ;;  %v4623_v49 = vrot.slane %v10481_v37, 1 }
 0x4a6   :  { %v5970_v17 = vpack.i.bf16 %v10521_v41, %v10519_v54  ;;  %v4524_v39 = vmul.f32 %v10432_v35, %v4504_v5  ;;  %v4525_v16 = vmul.f32 %v10432_v35, %v4505_v48  ;;  %v4624_v8 = vrot.slane %v10483_v56, 1 }
 0x4a7   :  { %v10525_v31 = vmax.f32 %v4539_v18, 0.0  ;;  %v10537_v15 = vmax.f32 %v4543_v40, 0.0  ;;  %v4546_v9 = vadd.f32 %v10441_v43, %v4526_v13  ;;  %v4547_v55 = vadd.f32 %v10441_v43, %v10450_v21 }
 0x4a8   :  { %v4544_v19 = vadd.f32 %v10441_v43, %v4524_v39  ;;  %v4545_v50 = vadd.f32 %v10441_v43, %v4525_v16  ;;  %v4625_v52 = vrot.slane %v10477_v27, 1  ;;  %v4500_v46 = vmul.f32 %v10434_v57, %v10376_v62 }
 0x4a9   :  { %v5955_v11 = vpack.i.bf16 %v10519_v54, %v10525_v31  ;;  %v10545_v34 = vmax.f32 %v4546_v9, 0.0  ;;  %v5975_v6 = vpack.i.bf16 %v10537_v15, %v10521_v41  ;;  %v10555_v25 = vsel %vm2756_vm9, %v4623_v49, 0.0 }
 0x4aa   :  { %v10558_v29 = vsel %vm2756_vm9, %v4624_v8, 0.0  ;;  %v10560_v14 = vmax.f32 %v4544_v19, 0.0  ;;  %v10564_v21 = vmax.f32 %v4547_v55, 0.0  ;;  %v10567_v58 = vsel %vm2756_vm9, %v4625_v52, 0.0 }
 0x4ab   :  { %5981 = vrot.lane.b32.xlu0 %v5945_v38, %s6279_s30  ;;  %v6105_v20 = vpack.i.bf16 %v10558_v29, %v10555_v25  ;;  %v4630_v62 = vrot.slane %v10537_v15, 1  ;;  %v6115_v57 = vpack.i.bf16 %v10567_v58, %v10558_v29  ;;  %v10574_v42 = vmax.f32 %v4545_v50, 0.0 }
 0x4ac   :  { %5971 = vrot.lane.b32.xlu2 %v5970_v17, %s6279_s30  ;;  %v10578_v1 = vpack.i.bf16 %v10564_v21, %v10545_v34  ;;  %v4622_v26 = vrot.slane %v10500_v61, 1  ;;  %v4520_v24 = vmul.f32 %v10432_v35, %v4500_v46  ;;  %v4628_v36 = vrot.slane %v10519_v54, 1 }
 0x4ad   :  { %5956 = vrot.lane.b32.xlu1 %v5955_v11, %s6275_s25  ;;  %v4621_v3 = vrot.slane %v10486_v0, 1  ;;  %v4631_v60 = vrot.slane %v10560_v14, 1  ;;  %v10590_v10 = vsel %vm2756_vm9, %v4630_v62, 0.0  ;;  %v4632_v28 = vrot.slane %v10574_v42, 1 }
 0x4ae   :  { %v10586_v2 = vsel %vm2756_vm9, %v4622_v26, 0.0  ;;  %v10593_v30 = vsel %vm2756_vm9, %v4628_v36, 0.0  ;;  %v4540_v33 = vadd.f32 %v10441_v43, %v4520_v24  ;;  %v4626_v4 = vrot.slane %v10479_v7, 1 }
 0x4af   :  { %v10596_v51 = vsel %vm2756_vm9, %v4621_v3, 0.0  ;;  %v6070_v35 = vpack.i.bf16 %v10586_v2, %v10593_v30  ;;  %v10603_v38 = vsel %vm2756_vm9, %v4631_v60, 0.0  ;;  %v6065_v32 = vpack.i.bf16 %v10555_v25, %v10586_v2 }
 0x4b0   :  { %v6055_v63 = vpack.i.bf16 %v10586_v2, %v10596_v51  ;;  %v5965_v43 = vpack.i.bf16 %v10481_v37, %v10500_v61  ;;  %v4586_v12 = vrot.slane %v10519_v54, 7  ;;  %v10620_v18 = vsel %vm2756_vm9, %v4632_v28, 0.0 }
 0x4b1   :  { %v10623_v22 = vsel %vm2756_vm9, %v4626_v4, 0.0  ;;  %v6140_v5 = vpack.i.bf16 %v10603_v38, %v10567_v58  ;;  %v10628_v48 = vmax.f32 %v4540_v33, 0.0  ;;  %v10641_v39 = vmax.f32 %v10467_v53, 0.0 }
 0x4b2   :  { %v6155_v13 = vpack.i.bf16 %v10623_v22, %v10567_v58  ;;  %v6170_v17 = vpack.i.bf16 %v10623_v22, %v10620_v18  ;;  %v4633_v11 = vrot.slane %v10545_v34, 1  ;;  %v4634_v16 = vrot.slane %v10564_v21, 1 }
 0x4b3   :  { %5986 = vrot.lane.b32.xlu0 %v5985_v23, %s6281_s2  ;;  %v6120_v23 = vpack.i.bf16 %v10558_v29, %v10590_v10  ;;  %v6010_v9 = vpack.i.bf16 %v10525_v31, %v10479_v7  ;;  %v10648_v19 = vsel %vm2710_vm10, 0.0, %v4586_v12  ;;  %v4671_v8 = vrot.slane %v10628_v48, 1 }
 0x4b4   :  { %5976 = vrot.lane.b32.xlu2 %v5975_v6, %s6281_s2  ;;  %v5995_v50 = vpack.i.bf16 %v10560_v14, %v10537_v15  ;;  %v10657_v53 = vsel %vm2756_vm9, %v4633_v11, 0.0  ;;  %v10660_v55 = vsel %vm2756_vm9, %v4634_v16, 0.0  ;;  %v4588_v36 = vrot.slane %v10537_v15, 7 }
 0x4b5   :  { %5961 = vrot.lane.b32.xlu1 %v5940_v47, %s6279_s30  ;;  %v4627_v47 = vrot.slane %v10525_v31, 1  ;;  %v6195_v52 = vpack.i.bf16 %v10660_v55, %v10657_v53  ;;  %v10668_v46 = vsel %vm2756_vm9, %v4671_v8, 0.0  ;;  %v6215_v3 = vpack.i.bf16 %v10641_v39, %v10564_v21 }
 0x4b6   :  { %v4672_v60 = vrot.slane %v10641_v39, 1  ;;  %v6030_v4 = vpack.i.bf16 %v10628_v48, %v10525_v31  ;;  %v6000_v15 = vpack.i.bf16 %v10574_v42, %v10560_v14  ;;  %v4629_v12 = vrot.slane %v10521_v41, 1 }
 0x4b7   :  { %v10633_v40 = vsel %vm2756_vm9, %v4627_v47, 0.0  ;;  %v4579_v16 = vrot.slane %v10486_v0, 7  ;;  %v4591_v2 = vrot.slane %v10545_v34, 7 }
 0x4b8   :  { %v6165_v54 = vpack.i.bf16 %v10633_v40, %v10623_v22  ;;  %v6205_v26 = vpack.i.bf16 %v10668_v46, %v10633_v40  ;;  %v6190_v24 = vpack.i.bf16 %v10657_v53, %v10633_v40  ;;  %v10683_v28 = vsel %vm2756_vm9, %v4672_v60, 0.0 }
 0x4b9   :  { %v6230_v33 = vpack.i.bf16 %v10683_v28, %v10660_v55  ;;  %v4657_v11 = vsel %vm2756_vm9, %v4629_v12, 0.0  ;;  %vm5278_vm9 = vcmask 1043456  }
 0x4ba   :  { %v6095_v8 = vpack.i.bf16 %v10590_v10, %v4657_v11 }
 0x4bb   :  { %6006 = vrot.lane.b32.xlu0 %v10491_v44, %s6279_s30  ;;  %v4587_v44 = vrot.slane %v10521_v41, 7  ;;  %v10709_v41 = vsel %vm2710_vm10, 0.0, %v4579_v16 }
 0x4bc   :  { %5991 = vrot.lane.b32.xlu2 %v5975_v6, %s6275_s25  ;;  %v6180_v6 = vpack.i.bf16 %v10657_v53, %v10620_v18  ;;  %v5225_v53 = vld [vmem:[%s11296_s4 + $0x20] sm:$0xf] }
 0x4bd   :  { %5966 = vrot.lane.b32.xlu1 %v5965_v43, %s6281_s2  ;;  %v10651_v49 = vsel %vm2710_vm10, 0.0, %v4587_v44  ;;  %v10690_v43 = vsel %vm2710_vm10, 0.0, %v4588_v36  ;;  %v6035_v44 = vpack.i.bf16 0.0, %v10628_v48 }
 0x4be   :  { %v6075_v62 = vpack.i.bf16 %v10651_v49, %v10648_v19  ;;  %v6085_v47 = vpack.i.bf16 %v10690_v43, %v10651_v49 }
 0x4c3   :  { %6011 = vrot.lane.b32.xlu0 %v6010_v9, %s6281_s2  ;;  %v4580_v9 = vrot.slane %v10500_v61, 7  ;;  %v6020_v61 = vpack.i.bf16 %v10545_v34, %v10574_v42  ;;  %v4584_v34 = vrot.slane %v10479_v7, 7 }
 0x4c4   :  { %5996 = vrot.lane.b32.xlu2 %v5995_v50, %s6279_s30 }
 0x4c5   :  { %6076 = vrot.lane.b32.xlu1 %v6075_v62, %s6276_s26  ;;  %v10712_v50 = vsel %vm2710_vm10, 0.0, %v4580_v9  ;;  %v4581_v62 = vrot.slane %v10481_v37, 7  ;;  %v4589_v37 = vrot.slane %v10560_v14, 7  ;;  %v4590_v14 = vrot.slane %v10574_v42, 7 }
 0x4c6   :  { %v6050_v0 = vpack.i.bf16 %v10712_v50, %v10709_v41  ;;  %v6090_v42 = vpack.i.bf16 %v4657_v11, %v10555_v25  ;;  %v4583_v25 = vrot.slane %v10477_v27, 7  ;;  %v10828_v9 = vsel %vm2710_vm10, 0.0, %v4584_v34 }
 0x4c7   :  { %v10726_v36 = vsel %vm2710_vm10, 0.0, %v4581_v62 }
 0x4c8   :  { %v6060_v60 = vpack.i.bf16 %v10726_v36, %v10712_v50 }
 0x4cb   :  { %6031 = vrot.lane.b32.xlu0 %v6030_v4, %s6279_s30 }
 0x4cc   :  { %6001 = vrot.lane.b32.xlu2 %v6000_v15, %s6281_s2 }
 0x4cd   :  { %6086 = vrot.lane.b32.xlu1 %v6085_v47, %s6282_s3  ;;  %v11792_v47 = vld [vmem:[#allocation81_spill] sm:$0xff] }
 0x4ce   :  { %v6045_v12 = vpack.i.bf16 %v10596_v51, %v11792_v47 }
 0x4d3   :  { %6036 = vrot.lane.b32.xlu0 %v6035_v44, %s6281_s2  ;;  %v4582_v44 = vrot.slane %v10483_v56, 7  ;;  %v6130_v56 = vpack.i.bf16 %v10603_v38, %v10590_v10  ;;  %v10806_v10 = vsel %vm2710_vm10, 0.0, %v4583_v25  ;;  %v5615_v25 = vld [vmem:[%s11296_s4 + $0x10] sm:$0xff] }
 0x4d4   :  { %6016 = vrot.lane.b32.xlu2 %v6000_v15, %s6275_s25  ;;  %v6080_v15 = vpack.i.bf16 %v4657_v11, %v10593_v30  ;;  %v4592_v11 = vrot.slane %v10564_v21, 7  ;;  %v5614_v21 = vld [vmem:[%s11296_s4 + $0x8] sm:$0xff] }
 0x4d5   :  { %6096 = vrot.lane.b32.xlu1 %v6095_v8, %s6283_s18 }
 0x4d6   :  { %v10833_v7 = vsel %vm2710_vm10, 0.0, %v4592_v11 }
 0x4db   :  { %6051 = vrot.lane.b32.xlu0 %v6050_v0, %s6276_s26 }
 0x4dc   :  { %6021 = vrot.lane.b32.xlu2 %v6020_v61, %s6279_s30 }
 0x4dd   :  { %6106 = vrot.lane.b32.xlu1 %v6105_v20, %s6284_s19  ;;  %v10739_v20 = vsel %vm2710_vm10, 0.0, %v4589_v37 }
 0x4de   :  { %v6125_v4 = vpack.i.bf16 %v10739_v20, %v10690_v43 }
 0x4e3   :  { %6061 = vrot.lane.b32.xlu0 %v6060_v60, %s6282_s3 }
 0x4e4   :  { %6026 = vrot.lane.b32.xlu2 %v10578_v1, %s6281_s2 }
 0x4e5   :  { %6116 = vrot.lane.b32.xlu1 %v6115_v57, %s6283_s18  ;;  %v10752_v57 = vsel %vm2710_vm10, 0.0, %v4590_v14 }
 0x4eb   :  { %6071 = vrot.lane.b32.xlu0 %v6070_v35, %s6277_s27  ;;  %v6145_v35 = vpack.i.bf16 %v10620_v18, %v10603_v38  ;;  %v6150_v38 = vpack.i.bf16 %v10828_v9, %v10806_v10 }
 0x4ec   :  { %6041 = vrot.lane.b32.xlu2 %v10578_v1, %s6275_s25  ;;  %v6135_v1 = vpack.i.bf16 %v10752_v57, %v10739_v20 }
 0x4ed   :  { %6126 = vrot.lane.b32.xlu1 %v6125_v4, %s6276_s26 }
 0x4f3   :  { %6081 = vrot.lane.b32.xlu0 %v6080_v15, %s6284_s19  ;;  %v11793_v15 = vld [vmem:[#allocation29_spill] sm:$0xff] }
 0x4f4   :  { %6046 = vrot.lane.b32.xlu2 %v6045_v12, %s6277_s27 }
 0x4f5   :  { %6136 = vrot.lane.b32.xlu1 %v6135_v1, %s6282_s3  ;;  %v6220_v1 = vpack.i.bf16 %v11792_v47, %v10668_v46  ;;  %v5616_v46 = vld [vmem:[%s11296_s4 + $0x18] sm:$0xff] }
 0x4fb   :  { %6091 = vrot.lane.b32.xlu0 %v6090_v42, %s6277_s27 }
 0x4fc   :  { %6056 = vrot.lane.b32.xlu2 %v6055_v63, %s6284_s19  ;;  %v10789_v63 = vsel %vm2710_vm10, 0.0, %v4582_v44 }
 0x4fd   :  { %6146 = vrot.lane.b32.xlu1 %v6145_v35, %s6283_s18  ;;  %v6100_v29 = vpack.i.bf16 %v10789_v63, %v10726_v36  ;;  %v6110_v27 = vpack.i.bf16 %v10806_v10, %v10789_v63 }
 0x4fe   :  { %v10771_v30 = vpop.permute.xlu2 %5946 }
 0x503   :  { %6121 = vrot.lane.b32.xlu0 %v6120_v23, %s6277_s27  ;;  %v10809_v23 = vsel %vm2710_vm10, 0.0, %v4591_v2 }
 0x504   :  { %6066 = vrot.lane.b32.xlu2 %v6065_v32, %s6283_s18  ;;  %v6185_v8 = vpack.i.bf16 %v10833_v7, %v10809_v23 }
 0x505   :  { %6156 = vrot.lane.b32.xlu1 %v6155_v13, %s6284_s19  ;;  %v6175_v13 = vpack.i.bf16 %v10809_v23, %v10752_v57 }
 0x506   :  { %v10786_v51 = vpop.permute.xlu2 %5971 }
 0x50b   :  { %6131 = vrot.lane.b32.xlu0 %v6130_v56, %s6284_s19 }
 0x50c   :  { %6101 = vrot.lane.b32.xlu2 %v6100_v29, %s6276_s26 }
 0x50d   :  { %6166 = vrot.lane.b32.xlu1 %v6165_v54, %s6283_s18 }
 0x50e   :  { %v10803_v32 = vpop.permute.xlu2 %5976 }
 0x513   :  { %6141 = vrot.lane.b32.xlu0 %v6140_v5, %s6277_s27  ;;  %v4585_v5 = vrot.slane %v10525_v31, 7  ;;  %v4665_v31 = vrot.slane %v10628_v48, 7 }
 0x514   :  { %6111 = vrot.lane.b32.xlu2 %v6110_v27, %s6282_s3 }
 0x515   :  { %v10821_v54 = vpop.permute.xlu0 %5951  ;;  %6176 = vrot.lane.b32.xlu1 %v6175_v13, %s6276_s26  ;;  %v10851_v62 = vsel %vm2710_vm10, 0.0, %v4585_v5  ;;  %v4669_v4 = vsel %vm2710_vm10, 0.0, %v4665_v31 }
 0x516   :  { %v10825_v16 = vpop.permute.xlu2 %5991  ;;  %v6160_v22 = vpack.i.bf16 %v10851_v62, %v10828_v9  ;;  %v6200_v18 = vpack.i.bf16 %v4669_v4, %v10851_v62  ;;  %v6210_v12 = vpack.i.bf16 %v11793_v15, %v4669_v4 }
 0x517   :  { %v10830_v58 = vpop.permute.xlu1 %5941 }
 0x51b   :  { %6171 = vrot.lane.b32.xlu0 %v6170_v17, %s6277_s27 }
 0x51c   :  { %6151 = vrot.lane.b32.xlu2 %v6150_v38, %s6276_s26  ;;  %v5943_v38 = vunpack.i.l.bf16 %v10830_v58 }
 0x51d   :  { %v10845_v0 = vpop.permute.xlu0 %5981  ;;  %6186 = vrot.lane.b32.xlu1 %v6185_v8, %s6282_s3 }
 0x51e   :  { %v10848_v61 = vpop.permute.xlu2 %5996 }
 0x51f   :  { %v10853_v60 = vpop.permute.xlu1 %5956 }
 0x523   :  { %6181 = vrot.lane.b32.xlu0 %v6180_v6, %s6284_s19 }
 0x524   :  { %6161 = vrot.lane.b32.xlu2 %v6160_v22, %s6282_s3 }
 0x525   :  { %v10863_v17 = vpop.permute.xlu0 %5986  ;;  %6196 = vrot.lane.b32.xlu1 %v6195_v52, %s6283_s18 }
 0x526   :  { %v10869_v37 = vpop.permute.xlu2 %6001 }
 0x527   :  { %v10872_v14 = vpop.permute.xlu1 %5961 }
 0x52b   :  { %6191 = vrot.lane.b32.xlu0 %v6190_v24, %s6277_s27  ;;  %v5243_v24 = vunpack.c.l.b16 %v5225_v53 }
 0x52c   :  { %6201 = vrot.lane.b32.xlu2 %v6200_v18, %s6276_s26  ;;  %v5973_v18 = vunpack.i.l.bf16 %v10786_v51 }
 0x52d   :  { %v10880_v48 = vpop.permute.xlu0 %6006  ;;  %6206 = vrot.lane.b32.xlu1 %v6205_v26, %s6284_s19  ;;  %v4666_v26 = vrot.slane %v10641_v39, 7  ;;  %v5248_v42 = vpack.c.b16 %v5243_v24, %v5243_v24  ;;  %v5080_v24 = vsel %vm4143_vm11, %v10709_v41, %v5943_v38  ;;  %v5959_v41 = vunpack.i.h.bf16 %v10853_v60 }
 0x52e   :  { %v10886_v52 = vpop.permute.xlu2 %6016 }
 0x52f   :  { %v10888_v6 = vpop.permute.xlu1 %5966  ;;  %v5280_v44 = vsel %vm5278_vm9, %v5248_v42, 0  ;;  %v4670_v47 = vsel %vm2710_vm10, 0.0, %v4666_v26  ;;  %vm11794_vm10 = vmmov %vm11779_vm4 }
 0x530   :  { %5285 = vmatpush.bf16.msra.mxu1 %v5280_v44  ;;  %5620 = vmatpush.bf16.msra.mxu2 %v5280_v44  ;;  %v6225_v29 = vpack.i.bf16 %v4670_v47, %v10833_v7  ;;  %v5963_v44 = vunpack.i.l.bf16 %v10872_v14  ;;  %vm11800_vm9 = vmmov %vm11795_vm0 }
 0x533   :  { %4764 = vrot.lane.b32.xlu0 %v10660_v55, %s6277_s27 }
 0x534   :  { %6211 = vrot.lane.b32.xlu2 %v6210_v12, %s6282_s3  ;;  %5286 = vmatpush.bf16.msra.mxu1 %v5616_v46 }
 0x535   :  { %v10899_v40 = vpop.permute.xlu0 %6011  ;;  %6221 = vrot.lane.b32.xlu1 %v6220_v1, %s6283_s18  ;;  %5621 = vmatpush.bf16.msra.mxu2 %v5616_v46 }
 0x536   :  { %v10903_v35 = vpop.permute.xlu2 %6021 }
 0x537   :  { %v10905_v56 = vpop.permute.xlu1 %6076 }
 0x538   :  { %5287 = vmatpush.bf16.msra.mxu1 %v5615_v25  ;;  %v6078_v22 = vunpack.i.l.bf16 %v10905_v56 }
 0x539   :  { %5622 = vmatpush.bf16.msra.mxu2 %v5615_v25 }
 0x53b   :  { %6231 = vrot.lane.b32.xlu0 %v6230_v33, %s6284_s19 }
 0x53c   :  { %6216 = vrot.lane.b32.xlu2 %v6215_v3, %s6279_s30  ;;  %5288 = vmatpush.bf16.msra.mxu1 %v5614_v21  ;;  %v5613_v3 = vld [vmem:[%s11296_s4] sm:$0xff] }
 0x53d   :  { %v10923_v2 = vpop.permute.xlu0 %6031  ;;  %6226 = vrot.lane.b32.xlu1 %v6225_v29, %s6276_s26  ;;  %5623 = vmatpush.bf16.msra.mxu2 %v5614_v21 }
 0x53e   :  { %v10926_v27 = vpop.permute.xlu2 %6026 }
 0x53f   :  { %v10928_v55 = vpop.permute.xlu1 %6086 }
 0x540   :  { %5289 = vmatpush.bf16.msra.mxu1 %v5613_v3 }
 0x541   :  { %5624 = vmatpush.bf16.msra.mxu2 %v5613_v3  ;;  %v5964_v3 = vunpack.i.h.bf16 %v10872_v14 }
 0x543   :  { %5062 = vrot.lane.b32.xlu0 %v10683_v28, %s6283_s18  ;;  %v5919_v28 = vunpack.i.h.bf16 %v10246_v45 }
 0x544   :  { %5017 = vrot.lane.b32.xlu2 %v10641_v39, %s6281_s2 }
 0x545   :  { %v10940_v33 = vpop.permute.xlu0 %6036  ;;  %4972 = vrot.lane.b32.xlu1 %v4670_v47, %s6282_s3  ;;  %v5079_v8 = vsel %vm4143_vm11, %v11793_v15, %v5919_v28 }
 0x546   :  { %v10943_v34 = vpop.permute.xlu2 %6041 }
 0x547   :  { %v10945_v13 = vpop.permute.xlu1 %6096 }
 0x54d   :  { %v6052_v11 = vpop.permute.xlu0 %6051 }
 0x54e   :  { %v6047_v39 = vpop.permute.xlu2 %6046  ;;  %v6053_v45 = vunpack.i.l.bf16 %v6052_v11  ;;  %v6054_v1 = vunpack.i.h.bf16 %v6052_v11 }
 0x54f   :  { %v6048_v5 = vunpack.i.l.bf16 %v6047_v39  ;;  %v10952_v31 = vpop.permute.xlu1 %6106  ;;  %v6049_v4 = vunpack.i.h.bf16 %v6047_v39 }
 0x551   :  { %v5094_v12 = vsel %vm11794_vm10, %v5079_v8, %v6048_v5  ;;  %v5095_v15 = vsel %vm11779_vm4, %v5080_v24, %v6049_v4  ;;  %v5087_v4 = vsel %vm4143_vm11, %v10648_v19, %v5959_v41  ;;  %v5944_v41 = vunpack.i.h.bf16 %v10830_v58  ;;  %vm11801_vm10 = vmmov %vm11795_vm0 }
 0x552   :  { %v5117_v53 = vsel %vm4210_vm13, %v5094_v12, %v6078_v22  ;;  %v5109_v46 = vsel %vm4210_vm13, %v5094_v12, %v6053_v45  ;;  %v5110_v29 = vsel %vm4210_vm13, %v5095_v15, %v6054_v1  ;;  %v5968_v12 = vunpack.i.l.bf16 %v10888_v6  ;;  %vm11802_vm4 = vmmov %vm11795_vm0 }
 0x553   :  { %v5133_v26 = vsel %vm4244_vm14, %v5117_v53, %v5973_v18  ;;  %v5125_v11 = vsel %vm4244_vm14, %v5109_v46, %v5963_v44  ;;  %v5126_v38 = vsel %vm4244_vm14, %v5110_v29, %v5964_v3  ;;  %v5969_v1 = vunpack.i.h.bf16 %v10888_v6 }
 0x554   :  { %v6079_v15 = vunpack.i.h.bf16 %v10905_v56  ;;  %v5974_v46 = vunpack.i.h.bf16 %v10786_v51  ;;  %v6088_v58 = vunpack.i.l.bf16 %v10928_v55 }
 0x555   :  { %v6062_v42 = vpop.permute.xlu0 %6061 }
 0x556   :  { %v6057_v47 = vpop.permute.xlu2 %6056  ;;  %v6063_v39 = vunpack.i.l.bf16 %v6062_v42  ;;  %v6064_v8 = vunpack.i.h.bf16 %v6062_v42 }
 0x557   :  { %v6059_v25 = vunpack.i.h.bf16 %v6057_v47  ;;  %v6058_v21 = vunpack.i.l.bf16 %v6057_v47  ;;  %v10965_v28 = vpop.permute.xlu1 %6116 }
 0x559   :  { %v5142_v5 = vsel %vm5141_vm5, %v5125_v11, %v6058_v21  ;;  %v5143_v22 = vsel %vm5141_vm5, %v5126_v38, %v6059_v25 }
 0x55a   :  { %v5159_v14 = vsel %vm5158_vm15, %v5142_v5, %v6063_v39  ;;  %v5160_v53 = vsel %vm5158_vm15, %v5143_v22, %v6064_v8  ;;  %v5948_v39 = vunpack.i.l.bf16 %v10771_v30  ;;  %v5979_v5 = vunpack.i.h.bf16 %v10803_v32 }
 0x55b   :  { %v5176_v29 = vsel %vm5175_vm6, %v5159_v14, %v5968_v12  ;;  %v5177_v21 = vsel %vm5175_vm6, %v5160_v53, %v5969_v1  ;;  %v5978_v8 = vunpack.i.l.bf16 %v10803_v32  ;;  %v5081_v12 = vsel %vm4143_vm11, %v10712_v50, %v5944_v41 }
 0x55c   :  { %v5983_v53 = vunpack.i.l.bf16 %v10845_v0 }
 0x55d   :  { %v6072_v18 = vpop.permute.xlu0 %6071 }
 0x55e   :  { %v6067_v45 = vpop.permute.xlu2 %6066  ;;  %v6073_v24 = vunpack.i.l.bf16 %v6072_v18  ;;  %v6074_v11 = vunpack.i.h.bf16 %v6072_v18 }
 0x55f   :  { %v6069_v42 = vunpack.i.h.bf16 %v6067_v45  ;;  %v6068_v44 = vunpack.i.l.bf16 %v6067_v45  ;;  %v10980_v19 = vpop.permute.xlu1 %6126  ;;  %v6089_v45 = vunpack.i.h.bf16 %v10928_v55 }
 0x560   :  { %v5102_v47 = vsel %vm11795_vm0, %v5087_v4, %v6073_v24  ;;  %v5096_v24 = vsel %vm11796_vm8, %v5081_v12, %v6074_v11  ;;  %v6108_v11 = vunpack.i.l.bf16 %v10952_v31  ;;  %v6128_v12 = vunpack.i.l.bf16 %v10980_v19  ;;  %vm11803_vm8 = vmmov %vm11795_vm0 }
 0x561   :  { %v5118_v25 = vsel %vm4210_vm13, %v5102_v47, %v6079_v15  ;;  %v5193_v3 = vsel %vm5192_vm1, %v5176_v29, %v6068_v44  ;;  %v5194_v6 = vsel %vm5192_vm1, %v5177_v21, %v6069_v42  ;;  %v5993_v42 = vunpack.i.l.bf16 %v10825_v16 }
 0x562   :  { %v5134_v56 = vsel %vm4244_vm14, %v5118_v25, %v5974_v46  ;;  %v5209_v51 = vpack.c.bf16 %v5194_v6, %v5193_v3  ;;  %v6098_v44 = vunpack.i.l.bf16 %v10945_v13  ;;  %v6099_v47 = vunpack.i.h.bf16 %v10945_v13 }
 0x563   :  { %v5949_v6 = vunpack.i.h.bf16 %v10771_v30  ;;  %v5088_v13 = vsel %vm4143_vm11, %v10651_v49, %v5993_v42 }
 0x564   :  { %5603 = vmatmul.msk.bf16.vlgmr.msra.gmra.mxu1 %vm5253_vm7, %v5209_v51 }
 0x565   :  { %v6082_v38 = vpop.permute.xlu0 %6081 }
 0x566   :  { %v6102_v22 = vpop.permute.xlu2 %6101  ;;  %v6084_v4 = vunpack.i.h.bf16 %v6082_v38  ;;  %v6083_v14 = vunpack.i.l.bf16 %v6082_v38 }
 0x567   :  { %v6103_v18 = vunpack.i.l.bf16 %v6102_v22  ;;  %v11000_v1 = vpop.permute.xlu1 %6136 }
 0x568   :  { %v5150_v15 = vsel %vm5141_vm5, %v5133_v26, %v6083_v14  ;;  %v5151_v32 = vsel %vm5141_vm5, %v5134_v56, %v6084_v4  ;;  %v5082_v56 = vsel %vm4143_vm11, %v10726_v36, %v5948_v39  ;;  %v5988_v14 = vunpack.i.l.bf16 %v10863_v17 }
 0x569   :  { %v5111_v50 = vsel %vm4210_vm13, %v5096_v24, %v6103_v18  ;;  %v5167_v46 = vsel %vm5158_vm15, %v5150_v15, %v6088_v58  ;;  %v5168_v29 = vsel %vm5158_vm15, %v5151_v32, %v6089_v45  ;;  %v6104_v36 = vunpack.i.h.bf16 %v6102_v22 }
 0x56a   :  { %v5127_v55 = vsel %vm4244_vm14, %v5111_v50, %v5983_v53  ;;  %v5184_v25 = vsel %vm5175_vm6, %v5167_v46, %v5978_v8  ;;  %v5185_v26 = vsel %vm5175_vm6, %v5168_v29, %v5979_v5  ;;  %v5998_v5 = vunpack.i.l.bf16 %v10848_v61 }
 0x56b   :  { %v5201_v21 = vsel %vm5192_vm1, %v5184_v25, %v6098_v44  ;;  %v5202_v3 = vsel %vm5192_vm1, %v5185_v26, %v6099_v47  ;;  %v5144_v53 = vsel %vm5141_vm5, %v5127_v55, %v6108_v11  ;;  %v5994_v18 = vunpack.i.h.bf16 %v10825_v16 }
 0x56c   :  { %v5213_v51 = vpack.c.bf16 %v5202_v3, %v5201_v21  ;;  %v5984_v45 = vunpack.i.h.bf16 %v10845_v0  ;;  %v6109_v32 = vunpack.i.h.bf16 %v10952_v31  ;;  %v5083_v16 = vsel %vm4143_vm11, %v10789_v63, %v5949_v6 }
 0x56d   :  { %v6092_v41 = vpop.permute.xlu0 %6091  ;;  %v5989_v0 = vunpack.i.h.bf16 %v10863_v17  ;;  %v5089_v55 = vsel %vm4143_vm11, %v10690_v43, %v5994_v18  ;;  %v6119_v31 = vunpack.i.h.bf16 %v10965_v28  ;;  %v6118_v29 = vunpack.i.l.bf16 %v10965_v28 }
 0x56e   :  { %v6112_v38 = vpop.permute.xlu2 %6111  ;;  %v6094_v8 = vunpack.i.h.bf16 %v6092_v41  ;;  %v6093_v4 = vunpack.i.l.bf16 %v6092_v41  ;;  %5607 = vmatmul.msk.bf16.vlgmr.msra.gmra.mxu2 %vm5253_vm7, %v5213_v51  ;;  %v5999_v21 = vunpack.i.h.bf16 %v10848_v61  ;;  %v6129_v17 = vunpack.i.h.bf16 %v10980_v19 }
 0x56f   :  { %v6113_v30 = vunpack.i.l.bf16 %v6112_v38  ;;  %v11025_v39 = vpop.permute.xlu1 %6146  ;;  %v6114_v50 = vunpack.i.h.bf16 %v6112_v38  ;;  %v6138_v18 = vunpack.i.l.bf16 %v11000_v1 }
 0x570   :  { %v5103_v49 = vsel %vm11797_vm12, %v5088_v13, %v6094_v8  ;;  %v5097_v58 = vsel %vm11798_vm2, %v5082_v56, %v6093_v4  ;;  %v6008_v13 = vunpack.i.l.bf16 %v10880_v48  ;;  %vm11804_vm12 = vmmov %vm11795_vm0 }
 0x571   :  { %v5161_v24 = vsel %vm5158_vm15, %v5144_v53, %v6113_v30  ;;  %v5119_v15 = vsel %vm4210_vm13, %v5103_v49, %v6128_v12  ;;  %v5112_v22 = vsel %vm4210_vm13, %v5097_v58, %v6104_v36  ;;  %v6003_v49 = vunpack.i.l.bf16 %v10869_v37  ;;  %vm11805_vm2 = vmmov %vm11795_vm0 }
 0x572   :  { %v5178_v42 = vsel %vm5175_vm6, %v5161_v24, %v5988_v14  ;;  %v5135_v44 = vsel %vm4244_vm14, %v5119_v15, %v5998_v5  ;;  %v5128_v46 = vsel %vm4244_vm14, %v5112_v22, %v5984_v45  ;;  %v6013_v58 = vunpack.i.l.bf16 %v10899_v40 }
 0x573   :  { %v5145_v47 = vsel %vm5141_vm5, %v5128_v46, %v6109_v32  ;;  %v5195_v51 = vsel %vm5192_vm1, %v5178_v42, %v6118_v29  ;;  %v6139_v24 = vunpack.i.h.bf16 %v11000_v1  ;;  %v6148_v46 = vunpack.i.l.bf16 %v11025_v39 }
 0x574   :  { %v5162_v26 = vsel %vm5158_vm15, %v5145_v47, %v6114_v50  ;;  %v6004_v50 = vunpack.i.h.bf16 %v10869_v37  ;;  %v6149_v47 = vunpack.i.h.bf16 %v11025_v39  ;;  %v6018_v29 = vunpack.i.l.bf16 %v10886_v52 }
 0x575   :  { %v6122_v25 = vpop.permute.xlu0 %6121  ;;  %v5179_v63 = vsel %vm5175_vm6, %v5162_v26, %v5989_v0 }
 0x576   :  { %v6152_v3 = vpop.permute.xlu2 %6151  ;;  %v6124_v56 = vunpack.i.h.bf16 %v6122_v25  ;;  %v6123_v41 = vunpack.i.l.bf16 %v6122_v25  ;;  %v5196_v43 = vsel %vm5192_vm1, %v5179_v63, %v6119_v31 }
 0x577   :  { %v6153_v6 = vunpack.i.l.bf16 %v6152_v3  ;;  %v6157_v28 = vpop.permute.xlu1 %6156  ;;  %v5210_v61 = vpack.c.bf16 %v5196_v43, %v5195_v51  ;;  %v6009_v51 = vunpack.i.h.bf16 %v10880_v48  ;;  %v6014_v48 = vunpack.i.h.bf16 %v10899_v40 }
 0x578   :  { %v5098_v11 = vsel %vm11799_vm3, %v5083_v16, %v6124_v56  ;;  %v5104_v38 = vsel %vm11800_vm9, %v5089_v55, %v6123_v41  ;;  %v6158_v12 = vunpack.i.l.bf16 %v6157_v28  ;;  %vm11806_vm3 = vmmov %vm11795_vm0 }
 0x579   :  { %v5113_v8 = vsel %vm4210_vm13, %v5098_v11, %v6153_v6  ;;  %v5120_v4 = vsel %vm4210_vm13, %v5104_v38, %v6129_v17  ;;  %5604 = vmatmul.msk.bf16.gmra.mxu1 %vm5253_vm7, %v5210_v61  ;;  %v5090_v17 = vsel %vm4143_vm11, %v10739_v20, %v6018_v29  ;;  %v6154_v6 = vunpack.i.h.bf16 %v6152_v3 }
 0x57a   :  { %v5129_v19 = vsel %vm4244_vm14, %v5113_v8, %v6008_v13  ;;  %v5136_v5 = vsel %vm4244_vm14, %v5120_v4, %v5999_v21  ;;  %v5954_v38 = vunpack.i.h.bf16 %v10821_v54  ;;  %v6159_v61 = vunpack.i.h.bf16 %v6157_v28 }
 0x57b   :  { %v5146_v32 = vsel %vm5141_vm5, %v5129_v19, %v6158_v12  ;;  %v6019_v3 = vunpack.i.h.bf16 %v10886_v52 }
 0x57d   :  { %v6132_v14 = vpop.permute.xlu0 %6131 }
 0x57e   :  { %v6162_v30 = vpop.permute.xlu2 %6161  ;;  %v6134_v36 = vunpack.i.h.bf16 %v6132_v14  ;;  %v6133_v53 = vunpack.i.l.bf16 %v6132_v14 }
 0x57f   :  { %v6163_v45 = vunpack.i.l.bf16 %v6162_v30  ;;  %v6167_v15 = vpop.permute.xlu1 %6166  ;;  %v6164_v19 = vunpack.i.h.bf16 %v6162_v30  ;;  %v5085_v30 = vsel %vm4143_vm11, %v10828_v9, %v5954_v38 }
 0x580   :  { %v5152_v22 = vsel %vm5141_vm5, %v5135_v44, %v6133_v53  ;;  %v5153_v42 = vsel %vm5141_vm5, %v5136_v5, %v6134_v36  ;;  %v5953_v44 = vunpack.i.l.bf16 %v10821_v54  ;;  %v6169_v12 = vunpack.i.h.bf16 %v6167_v15 }
 0x581   :  { %v5163_v16 = vsel %vm5158_vm15, %v5146_v32, %v6163_v45  ;;  %v5169_v0 = vsel %vm5158_vm15, %v5152_v22, %v6138_v18  ;;  %v5170_v55 = vsel %vm5158_vm15, %v5153_v42, %v6139_v24  ;;  %v6168_v36 = vunpack.i.l.bf16 %v6167_v15 }
 0x582   :  { %v5186_v1 = vsel %vm5175_vm6, %v5169_v0, %v6003_v49  ;;  %v5180_v31 = vsel %vm5175_vm6, %v5163_v16, %v6013_v58  ;;  %v5187_v37 = vsel %vm5175_vm6, %v5170_v55, %v6004_v50  ;;  %v5084_v63 = vsel %vm4143_vm11, %v10806_v10, %v5953_v44 }
 0x583   :  { %v5203_v25 = vsel %vm5192_vm1, %v5186_v1, %v6148_v46  ;;  %v5204_v26 = vsel %vm5192_vm1, %v5187_v37, %v6149_v47  ;;  %v6023_v10 = vunpack.i.l.bf16 %v10903_v35  ;;  %v5197_v40 = vsel %vm5192_vm1, %v5180_v31, %v6168_v36 }
 0x584   :  { %v5214_v56 = vpack.c.bf16 %v5204_v26, %v5203_v25  ;;  %v5091_v24 = vsel %vm4143_vm11, %v10752_v57, %v6019_v3  ;;  %v6024_v42 = vunpack.i.h.bf16 %v10903_v35  ;;  %v6033_v50 = vunpack.i.l.bf16 %v10923_v2 }
 0x585   :  { %v6142_v21 = vpop.permute.xlu0 %6141  ;;  %v6029_v37 = vunpack.i.h.bf16 %v10926_v27  ;;  %v6028_v25 = vunpack.i.l.bf16 %v10926_v27 }
 0x586   :  { %v6144_v41 = vunpack.i.h.bf16 %v6142_v21  ;;  %v6143_v39 = vunpack.i.l.bf16 %v6142_v21  ;;  %5608 = vmatmul.msk.bf16.gmra.mxu2 %vm5253_vm7, %v5214_v56  ;;  %v6202_v54 = vpop.permute.xlu2 %6201 }
 0x587   :  { %v6177_v43 = vpop.permute.xlu1 %6176  ;;  %v6203_v32 = vunpack.i.l.bf16 %v6202_v54 }
 0x588   :  { %v5105_v13 = vsel %vm11801_vm10, %v5090_v17, %v6144_v41  ;;  %v5099_v11 = vsel %vm11802_vm4, %v5084_v63, %v6143_v39  ;;  %v6178_v8 = vunpack.i.l.bf16 %v6177_v43  ;;  %v6179_v15 = vunpack.i.h.bf16 %v6177_v43 }
 0x589   :  { %v5114_v4 = vsel %vm4210_vm13, %v5099_v11, %v6154_v6  ;;  %v5958_v43 = vunpack.i.l.bf16 %v10853_v60 }
 0x58a   :  { %v5130_v20 = vsel %vm4244_vm14, %v5114_v4, %v6009_v51  ;;  %v5121_v5 = vsel %vm4210_vm13, %v5105_v13, %v6178_v8  ;;  %v6204_v4 = vunpack.i.h.bf16 %v6202_v54 }
 0x58b   :  { %v5147_v14 = vsel %vm5141_vm5, %v5130_v20, %v6159_v61  ;;  %v5137_v53 = vsel %vm4244_vm14, %v5121_v5, %v6023_v10  ;;  %v5086_v8 = vsel %vm4143_vm11, %v10851_v62, %v5958_v43 }
 0x58c   :  { %v5164_v28 = vsel %vm5158_vm15, %v5147_v14, %v6164_v19  ;;  %v6034_v19 = vunpack.i.h.bf16 %v10923_v2 }
 0x58d   :  { %v6172_v49 = vpop.permute.xlu0 %6171  ;;  %v5181_v58 = vsel %vm5175_vm6, %v5164_v28, %v6014_v48  ;;  %v6039_v28 = vunpack.i.h.bf16 %v10940_v33 }
 0x58e   :  { %v6174_v52 = vunpack.i.h.bf16 %v6172_v49  ;;  %v6173_v18 = vunpack.i.l.bf16 %v6172_v49  ;;  %v5198_v45 = vsel %vm5192_vm1, %v5181_v58, %v6169_v12  ;;  %v6212_v10 = vpop.permute.xlu2 %6211 }
 0x58f   :  { %v5211_v22 = vpack.c.bf16 %v5198_v45, %v5197_v40  ;;  %v6187_v9 = vpop.permute.xlu1 %6186  ;;  %v6214_v14 = vunpack.i.h.bf16 %v6212_v10  ;;  %v6213_v12 = vunpack.i.l.bf16 %v6212_v10 }
 0x590   :  { %v5100_v46 = vsel %vm11795_vm0, %v5085_v30, %v6174_v52  ;;  %v5106_v16 = vsel %vm11803_vm8, %v5091_v24, %v6173_v18  ;;  %v6189_v44 = vunpack.i.h.bf16 %v6187_v9  ;;  %v6188_v29 = vunpack.i.l.bf16 %v6187_v9 }
 0x591   :  { %v5115_v0 = vsel %vm4210_vm13, %v5100_v46, %v6203_v32  ;;  %v5122_v47 = vsel %vm4210_vm13, %v5106_v16, %v6179_v15  ;;  %5605 = vmatmul.msk.bf16.gmra.mxu1 %vm5253_vm7, %v5211_v22  ;;  %v6044_v32 = vunpack.i.h.bf16 %v10943_v34  ;;  %v6043_v22 = vunpack.i.l.bf16 %v10943_v34 }
 0x592   :  { %v5138_v57 = vsel %vm4244_vm14, %v5122_v47, %v6024_v42  ;;  %v5131_v55 = vsel %vm4244_vm14, %v5115_v0, %v6033_v50 }
 0x593   :  { %v5092_v16 = vsel %vm4143_vm11, %v10809_v23, %v6043_v22  ;;  %v5093_v0 = vsel %vm4143_vm11, %v10833_v7, %v6044_v32 }
 0x595   :  { %v6182_v1 = vpop.permute.xlu0 %6181 }
 0x596   :  { %v6184_v31 = vunpack.i.h.bf16 %v6182_v1  ;;  %v6183_v35 = vunpack.i.l.bf16 %v6182_v1  ;;  %v6217_v50 = vpop.permute.xlu2 %6216 }
 0x597   :  { %v6197_v26 = vpop.permute.xlu1 %6196  ;;  %v6218_v34 = vunpack.i.l.bf16 %v6217_v50 }
 0x598   :  { %v5154_v21 = vsel %vm5141_vm5, %v5137_v53, %v6183_v35  ;;  %v5155_v56 = vsel %vm5141_vm5, %v5138_v57, %v6184_v31  ;;  %v6199_v41 = vunpack.i.h.bf16 %v6197_v26  ;;  %v6198_v39 = vunpack.i.l.bf16 %v6197_v26 }
 0x599   :  { %v5171_v63 = vsel %vm5158_vm15, %v5154_v21, %v6188_v29  ;;  %v5172_v17 = vsel %vm5158_vm15, %v5155_v56, %v6189_v44  ;;  %v6038_v53 = vunpack.i.l.bf16 %v10940_v33 }
 0x59a   :  { %v5188_v6 = vsel %vm5175_vm6, %v5171_v63, %v6028_v25  ;;  %v5189_v51 = vsel %vm5175_vm6, %v5172_v17, %v6029_v37 }
 0x59b   :  { %v5205_v13 = vsel %vm5192_vm1, %v5188_v6, %v6198_v39  ;;  %v5206_v27 = vsel %vm5192_vm1, %v5189_v51, %v6199_v41 }
 0x59c   :  { %v5215_v11 = vpack.c.bf16 %v5206_v27, %v5205_v13 }
 0x59d   :  { %v6192_v38 = vpop.permute.xlu0 %6191 }
 0x59e   :  { %v6193_v61 = vunpack.i.l.bf16 %v6192_v38  ;;  %5609 = vmatmul.msk.bf16.gmra.mxu2 %vm5253_vm7, %v5215_v11  ;;  %v6194_v42 = vunpack.i.h.bf16 %v6192_v38  ;;  %v5018_v39 = vpop.permute.xlu2 %5017 }
 0x59f   :  { %v6207_v20 = vpop.permute.xlu1 %6206 }
 0x5a0   :  { %v5101_v3 = vsel %vm11804_vm12, %v5086_v8, %v6193_v61  ;;  %v6209_v60 = vunpack.i.h.bf16 %v6207_v20  ;;  %v6208_v48 = vunpack.i.l.bf16 %v6207_v20  ;;  %v5107_v1 = vsel %vm11805_vm2, %v5092_v16, %v6194_v42 }
 0x5a1   :  { %v5116_v5 = vsel %vm4210_vm13, %v5101_v3, %v6204_v4 }
 0x5a2   :  { %v5132_v36 = vsel %vm4244_vm14, %v5116_v5, %v6034_v19  ;;  %v5148_v62 = vsel %vm5141_vm5, %v5131_v55, %v6208_v48  ;;  %v6219_v55 = vunpack.i.h.bf16 %v6217_v50 }
 0x5a3   :  { %v5149_v54 = vsel %vm5141_vm5, %v5132_v36, %v6209_v60  ;;  %v5165_v2 = vsel %vm5158_vm15, %v5148_v62, %v6213_v12 }
 0x5a4   :  { %v5166_v30 = vsel %vm5158_vm15, %v5149_v54, %v6214_v14  ;;  %v5182_v49 = vsel %vm5175_vm6, %v5165_v2, %v6038_v53 }
 0x5a5   :  { %v5183_v58 = vsel %vm5175_vm6, %v5166_v30, %v6039_v28  ;;  %v4765_v52 = vpop.permute.xlu0 %4764 }
 0x5a6   :  { %v5108_v31 = vsel %vm11806_vm3, %v5093_v0, %v4765_v52 }
 0x5a7   :  { %v6222_v18 = vpop.permute.xlu1 %6221 }
 0x5a8   :  { %v6224_v40 = vunpack.i.h.bf16 %v6222_v18  ;;  %v6223_v45 = vunpack.i.l.bf16 %v6222_v18 }
 0x5aa   :  { %v5199_v24 = vsel %vm5192_vm1, %v5182_v49, %v6223_v45  ;;  %v5200_v33 = vsel %vm5192_vm1, %v5183_v58, %v6224_v40 }
 0x5ab   :  { %v5212_v15 = vpack.c.bf16 %v5200_v33, %v5199_v24 }
 0x5ad   :  { %5606 = vmatmul.msk.bf16.gmra.mxu1 %vm5253_vm7, %v5212_v15  ;;  %v6232_v46 = vpop.permute.xlu0 %6231 }
 0x5ae   :  { %v6234_v29 = vunpack.i.h.bf16 %v6232_v46  ;;  %v6233_v7 = vunpack.i.l.bf16 %v6232_v46 }
 0x5af   :  { %v6227_v9 = vpop.permute.xlu1 %6226 }
 0x5b0   :  { %v6229_v47 = vunpack.i.h.bf16 %v6227_v9  ;;  %v6228_v57 = vunpack.i.l.bf16 %v6227_v9 }
 0x5b2   :  { %v5123_v35 = vsel %vm4210_vm13, %v5107_v1, %v6228_v57  ;;  %v5124_v44 = vsel %vm4210_vm13, %v5108_v31, %v6229_v47 }
 0x5b3   :  { %v5140_v37 = vsel %vm4244_vm14, %v5124_v44, %v6219_v55  ;;  %v5139_v25 = vsel %vm4244_vm14, %v5123_v35, %v6218_v34 }
 0x5b4   :  { %v5157_v23 = vsel %vm5141_vm5, %v5140_v37, %v6234_v29  ;;  %v5156_v41 = vsel %vm5141_vm5, %v5139_v25, %v6233_v7 }
 0x5b5   :  { %v5174_v26 = vsel %vm5158_vm15, %v5157_v23, %v6214_v14  ;;  %v5063_v17 = vpop.permute.xlu0 %5062 }
 0x5b6   :  { %v5191_v21 = vsel %vm5175_vm6, %v5174_v26, %v6039_v28 }
 0x5b7   :  { %v4973_v56 = vpop.permute.xlu1 %4972  ;;  %v5208_v43 = vsel %vm5192_vm1, %v5191_v21, %v6224_v40 }
 0x5b8   :  { %v5173_v63 = vsel %vm5158_vm15, %v5156_v41, %v4973_v56 }
 0x5b9   :  { %v5190_v6 = vsel %vm5175_vm6, %v5173_v63, %v5018_v39 }
 0x5ba   :  { %v5207_v51 = vsel %vm5192_vm1, %v5190_v6, %v5063_v17 }
 0x5bb   :  { %v5216_v13 = vpack.c.bf16 %v5208_v43, %v5207_v51 }
 0x5bd   :  { %5610 = vmatmul.msk.bf16.gmra.mxu2 %vm5253_vm7, %v5216_v13 }
 0x5e1   :  { %v5291_v27 = vpop.f32.mrf.mxu1 }
 0x5e2   :  { %v5331_v48 = vsel %vm4143_vm11, %v5291_v27, 0.0 }
 0x5e9   :  { %v5293_v11 = vpop.f32.mrf.mxu1 }
 0x5ea   :  { %v5332_v3 = vsel %vm4143_vm11, %v5293_v11, 0.0 }
 0x5eb   :  { %v5333_v14 = vadd.f32 %v5332_v3, %v5331_v48 }
 0x5f1   :  { %v11165_v61 = vpop.f32.mrf.mxu2 }
 0x5f2   :  { %v5346_v24 = vsel %vm4143_vm11, %v11165_v61, 0.0 }
 0x5f6   :  { %v5296_v38 = vpop.f32.mrf.mxu1 }
 0x5f7   :  { %v5334_v5 = vsel %vm4143_vm11, %v5296_v38, 0.0 }
 0x5f8   :  { %v5335_v36 = vadd.f32 %v5334_v5, %v5333_v14 }
 0x5f9   :  { %v11167_v4 = vpop.f32.mrf.mxu2 }
 0x5fa   :  { %v5348_v15 = vsel %vm4143_vm11, %v11167_v4, 0.0 }
 0x5fe   :  { %v5298_v8 = vpop.f32.mrf.mxu1 }
 0x5ff   :  { %v5336_v12 = vsel %vm4143_vm11, %v5298_v8, 0.0 }
 0x600   :  { %v5337_v62 = vadd.f32 %v5336_v12, %v5335_v36 }
 0x609   :  { %v11169_v19 = vpop.f32.mrf.mxu2 }
 0x60a   :  { %v5350_v42 = vsel %vm4143_vm11, %v11169_v19, 0.0 }
 0x60e   :  { %v5301_v10 = vpop.f32.mrf.mxu1 }
 0x60f   :  { %v5338_v53 = vsel %vm4143_vm11, %v5301_v10, 0.0 }
 0x610   :  { %v5339_v2 = vadd.f32 %v5338_v53, %v5337_v62 }
 0x611   :  { %v11172_v60 = vpop.f32.mrf.mxu2 }
 0x612   :  { %v5352_v9 = vsel %vm4143_vm11, %v11172_v60, 0.0 }
 0x616   :  { %v5303_v20 = vpop.f32.mrf.mxu1 }
 0x617   :  { %v5340_v54 = vsel %vm4143_vm11, %v5303_v20, 0.0 }
 0x618   :  { %v5341_v58 = vadd.f32 %v5340_v54, %v5339_v2 }
 0x621   :  { %v11179_v30 = vpop.f32.mrf.mxu2 }
 0x622   :  { %v5354_v16 = vsel %vm4143_vm11, %v11179_v30, 0.0 }
 0x629   :  { %v11187_v32 = vpop.f32.mrf.mxu2 }
 0x62a   :  { %v5306_v28 = vpop.f32.mrf.mxu1  ;;  %v5356_v57 = vsel %vm4143_vm11, %v11187_v32, 0.0 }
 0x62b   :  { %v5342_v49 = vsel %vm4143_vm11, %v5306_v28, 0.0 }
 0x62c   :  { %v5343_v52 = vadd.f32 %v5342_v49, %v5341_v58 }
 0x632   :  { %v5308_v18 = vpop.f32.mrf.mxu1 }
 0x633   :  { %v5344_v40 = vsel %vm4143_vm11, %v5308_v18, 0.0 }
 0x634   :  { %v5345_v45 = vadd.f32 %v5344_v40, %v5343_v52 }
 0x636   :  { %v5347_v33 = vadd.f32 %v5346_v24, %v5345_v45 }
 0x638   :  { %v5349_v22 = vadd.f32 %v5348_v15, %v5347_v33 }
 0x63a   :  { %v5351_v50 = vadd.f32 %v5350_v42, %v5349_v22 }
 0x63c   :  { %v5353_v46 = vadd.f32 %v5352_v9, %v5351_v50 }
 0x63e   :  { %v5355_v47 = vadd.f32 %v5354_v16, %v5353_v46 }
 0x640   :  { %v5326_v0 = vpop.f32.mrf.mxu2  ;;  %v5357_v55 = vadd.f32 %v5356_v57, %v5355_v47 }
 0x641   :  { %v5358_v1 = vsel %vm4143_vm11, %v5326_v0, 0.0 }
 0x642   :  { %v5359_v31 = vadd.f32 %v5358_v1, %v5357_v55 }
 0x648   :  { %v5328_v34 = vpop.f32.mrf.mxu2 }
 0x649   :  { %v5360_v35 = vsel %vm4143_vm11, %v5328_v34, 0.0 }
 0x64a   :  { %v5361_v44 = vadd.f32 %v5360_v35, %v5359_v31 }
 0x64c   :  { %v5362_v29 = vrot.slane %v5361_v44, 4 }
 0x64e   :  { %v5363_v37 = vadd.f32 %v5362_v29, %v5361_v44 }
 0x650   :  { %v5364_v23 = vrot.slane %v5363_v37, 2 }
 0x652   :  { %v5365_v25 = vadd.f32 %v5364_v23, %v5363_v37 }
 0x654   :  { %v5366_v7 = vrot.slane %v5365_v25, 1 }
 0x656   :  { %v5367_v26 = vadd.f32 %v5366_v7, %v5365_v25 }
 0x658   :  { %v5368_v21 = vmul.f32 %v5367_v26, %v10338_v59 }
 0x65a   :  { %v11200_v56 = vsub.f32 %v5291_v27, %v5368_v21  ;;  %v11202_v41 = vsub.f32 %v5293_v11, %v5368_v21  ;;  %v11204_v39 = vsub.f32 %v5296_v38, %v5368_v21  ;;  %v11206_v63 = vsub.f32 %v5298_v8, %v5368_v21 }
 0x65b   :  { %v11212_v51 = vsub.f32 %v5301_v10, %v5368_v21  ;;  %v11216_v13 = vsub.f32 %v5303_v20, %v5368_v21  ;;  %v11222_v3 = vsub.f32 %v5306_v28, %v5368_v21  ;;  %v11227_v14 = vsub.f32 %v5308_v18, %v5368_v21 }
 0x65c   :  { %v5385_v17 = vmul.f32 %v11200_v56, %v11200_v56  ;;  %v5386_v6 = vmul.f32 %v11202_v41, %v11202_v41  ;;  %v5387_v43 = vmul.f32 %v11204_v39, %v11204_v39  ;;  %v5388_v27 = vmul.f32 %v11206_v63, %v11206_v63 }
 0x65d   :  { %v5389_v48 = vmul.f32 %v11212_v51, %v11212_v51  ;;  %v5390_v20 = vmul.f32 %v11216_v13, %v11216_v13  ;;  %v11233_v53 = vsub.f32 %v11165_v61, %v5368_v21  ;;  %v5391_v28 = vmul.f32 %v11222_v3, %v11222_v3 }
 0x65e   :  { %v5401_v11 = vsel %vm4143_vm11, %v5385_v17, 0.0  ;;  %v5402_v38 = vsel %vm4143_vm11, %v5386_v6, 0.0  ;;  %v5404_v10 = vsel %vm4143_vm11, %v5387_v43, 0.0  ;;  %v5406_v12 = vsel %vm4143_vm11, %v5388_v27, 0.0 }
 0x65f   :  { %v5403_v8 = vadd.f32 %v5402_v38, %v5401_v11  ;;  %v5408_v62 = vsel %vm4143_vm11, %v5389_v48, 0.0  ;;  %v11239_v2 = vsub.f32 %v11167_v4, %v5368_v21  ;;  %v5392_v49 = vmul.f32 %v11227_v14, %v11227_v14 }
 0x660   :  { %v5410_v58 = vsel %vm4143_vm11, %v5390_v20, 0.0  ;;  %v11245_v18 = vsub.f32 %v11169_v19, %v5368_v21  ;;  %v5393_v61 = vmul.f32 %v11233_v53, %v11233_v53  ;;  %v5412_v40 = vsel %vm4143_vm11, %v5391_v28, 0.0 }
 0x661   :  { %v5405_v5 = vadd.f32 %v5404_v10, %v5403_v8  ;;  %v11251_v24 = vsub.f32 %v11172_v60, %v5368_v21  ;;  %v5394_v4 = vmul.f32 %v11239_v2, %v11239_v2  ;;  %v5414_v33 = vsel %vm4143_vm11, %v5392_v49, 0.0 }
 0x662   :  { %v5381_v22 = vsub.f32 %v11179_v30, %v5368_v21  ;;  %v5395_v19 = vmul.f32 %v11245_v18, %v11245_v18  ;;  %v5416_v42 = vsel %vm4143_vm11, %v5393_v61, 0.0  ;;  %v5382_v9 = vsub.f32 %v11187_v32, %v5368_v21 }
 0x663   :  { %v5407_v36 = vadd.f32 %v5406_v12, %v5405_v5  ;;  %v5396_v60 = vmul.f32 %v11251_v24, %v11251_v24  ;;  %v5418_v46 = vsel %vm4143_vm11, %v5394_v4, 0.0  ;;  %v5383_v47 = vsub.f32 %v5326_v0, %v5368_v21 }
 0x664   :  { %v5397_v57 = vmul.f32 %v5381_v22, %v5381_v22  ;;  %v5420_v55 = vsel %vm4143_vm11, %v5395_v19, 0.0  ;;  %v5384_v30 = vsub.f32 %v5328_v34, %v5368_v21  ;;  %v5398_v31 = vmul.f32 %v5382_v9, %v5382_v9 }
 0x665   :  { %v5409_v54 = vadd.f32 %v5408_v62, %v5407_v36  ;;  %v5422_v35 = vsel %vm4143_vm11, %v5396_v60, 0.0  ;;  %v5399_v29 = vmul.f32 %v5383_v47, %v5383_v47  ;;  %v6237_v62 = vld [vmem:[%s11297_s5] ss:$0 sm:$0xff]  ;;  %s6285_s5 = smov [#allocation2]  }
 0x666   :  { %v5424_v37 = vsel %vm4143_vm11, %v5397_v57, 0.0  ;;  %v5400_v23 = vmul.f32 %v5384_v30, %v5384_v30  ;;  %v5426_v25 = vsel %vm4143_vm11, %v5398_v31, 0.0 }
 0x667   :  { %v5411_v52 = vadd.f32 %v5410_v58, %v5409_v54  ;;  %v5428_v26 = vsel %vm4143_vm11, %v5399_v29, 0.0 }
 0x668   :  { %v5430_v17 = vsel %vm4143_vm11, %v5400_v23, 0.0 }
 0x669   :  { %v5413_v45 = vadd.f32 %v5412_v40, %v5411_v52 }
 0x66b   :  { %v5415_v15 = vadd.f32 %v5414_v33, %v5413_v45 }
 0x66d   :  { %v5417_v50 = vadd.f32 %v5416_v42, %v5415_v15 }
 0x66f   :  { %v5419_v16 = vadd.f32 %v5418_v46, %v5417_v50 }
 0x671   :  { %v5421_v1 = vadd.f32 %v5420_v55, %v5419_v16 }
 0x673   :  { %v5423_v44 = vadd.f32 %v5422_v35, %v5421_v1 }
 0x675   :  { %v5425_v32 = vadd.f32 %v5424_v37, %v5423_v44 }
 0x677   :  { %v5427_v7 = vadd.f32 %v5426_v25, %v5425_v32 }
 0x679   :  { %v5429_v0 = vadd.f32 %v5428_v26, %v5427_v7 }
 0x67b   :  { %v5431_v6 = vadd.f32 %v5430_v17, %v5429_v0 }
 0x67d   :  { %v5432_v43 = vrot.slane %v5431_v6, 4 }
 0x67f   :  { %v5433_v34 = vadd.f32 %v5432_v43, %v5431_v6 }
 0x681   :  { %v5434_v21 = vrot.slane %v5433_v34, 2 }
 0x683   :  { %v5435_v27 = vadd.f32 %v5434_v21, %v5433_v34 }
 0x685   :  { %v5436_v11 = vrot.slane %v5435_v27, 1 }
 0x687   :  { %v5437_v38 = vadd.f32 %v5436_v11, %v5435_v27 }
 0x689   :  { %v5438_v8 = vmul.f32 %v5437_v38, %v10338_v59  ;;  %v6238_v59 = vld [vmem:[%s11298_s6] ss:$0 sm:$0xff]  ;;  %s5560_s6 = sshll.u32 %s6285_s5, 4  ;;  %s5561_s6 = int_to_ptr.vmem [resolvable:$true] %s5560_s6 }
 0x68b   :  { %v5439_v48 = vadd.f32 1e-05, %v5438_v8 }
 0x68d   :  { %6243 = vrsqrt.f32 %v5439_v48  ;;  %vm5446_vm13 = vweird.f32 %v5439_v48 }
 0x693   :  { %v6244_v10 = vpop.eup %6243 }
 0x694   :  { %v5441_v5 = vmul.f32 %v6244_v10, %v5439_v48  ;;  %vm5447_vm14 = vweird.f32 %v6244_v10 }
 0x695   :  { %vm5448_vm11 = vmor %vm5446_vm13, %vm5447_vm14 }
 0x696   :  { %v5442_v20 = vmul.f32 %v6244_v10, %v5441_v5 }
 0x698   :  { %v5443_v12 = vmul.f32 0.5, %v5442_v20 }
 0x69a   :  { %v5444_v36 = vsub.f32 1.5, %v5443_v12 }
 0x69c   :  { %v5445_v28 = vmul.f32 %v6244_v10, %v5444_v36 }
 0x69e   :  { %v5449_v54 = vsel %vm5448_vm11, %v6244_v10, %v5445_v28 }
 0x69f   :  { %v5465_v49 = vmul.f32 %v5449_v54, %v5384_v30  ;;  %v5450_v58 = vmul.f32 %v5449_v54, %v11200_v56  ;;  %v5451_v40 = vmul.f32 %v5449_v54, %v11202_v41  ;;  %v5452_v15 = vmul.f32 %v5449_v54, %v11204_v39 }
 0x6a0   :  { %v5458_v19 = vmul.f32 %v5449_v54, %v11233_v53  ;;  %v5459_v42 = vmul.f32 %v5449_v54, %v11239_v2  ;;  %v5460_v56 = vmul.f32 %v5449_v54, %v11245_v18  ;;  %v5461_v50 = vmul.f32 %v5449_v54, %v11251_v24 }
 0x6a1   :  { %v5485_v52 = vmul.f32 %v6237_v62, %v5465_v49  ;;  %v5470_v61 = vmul.f32 %v6237_v62, %v5450_v58  ;;  %v5471_v33 = vmul.f32 %v6237_v62, %v5451_v40  ;;  %v5462_v60 = vmul.f32 %v5449_v54, %v5381_v22 }
 0x6a2   :  { %v5463_v46 = vmul.f32 %v5449_v54, %v5382_v9  ;;  %v5464_v16 = vmul.f32 %v5449_v54, %v5383_v47  ;;  %v5478_v55 = vmul.f32 %v6237_v62, %v5458_v19  ;;  %v5479_v41 = vmul.f32 %v6237_v62, %v5459_v42 }
 0x6a3   :  { %v5490_v45 = vadd.f32 %v6238_v59, %v5470_v61  ;;  %v5491_v57 = vadd.f32 %v6238_v59, %v5471_v33  ;;  %v5480_v1 = vmul.f32 %v6237_v62, %v5460_v56  ;;  %v5481_v30 = vmul.f32 %v6237_v62, %v5461_v50 }
 0x6a4   :  { %v5482_v31 = vmul.f32 %v6237_v62, %v5462_v60  ;;  %v5483_v35 = vmul.f32 %v6237_v62, %v5463_v46  ;;  %v5484_v44 = vmul.f32 %v6237_v62, %v5464_v16  ;;  %v5498_v39 = vadd.f32 %v6238_v59, %v5478_v55 }
 0x6a5   :  { %v5506_v4 = vmax.f32 %v5490_v45, 0.0  ;;  %v5499_v29 = vadd.f32 %v6238_v59, %v5479_v41  ;;  %v5500_v53 = vadd.f32 %v6238_v59, %v5480_v1  ;;  %v5505_v37 = vadd.f32 %v6238_v59, %v5485_v52 }
 0x6a6   :  { %v5501_v2 = vadd.f32 %v6238_v59, %v5481_v30  ;;  %v5502_v32 = vadd.f32 %v6238_v59, %v5482_v31  ;;  %v5503_v18 = vadd.f32 %v6238_v59, %v5483_v35  ;;  %v5504_v23 = vadd.f32 %v6238_v59, %v5484_v44 }
 0x6a7   :  { %5522 = vxpose.xlu1.b32.start [1/16] (narrow) %v5506_v4, 8  ;;  %v5507_v24 = vmax.f32 %v5491_v57, 0.0  ;;  %v5472_v22 = vmul.f32 %v6237_v62, %v5452_v15  ;;  %v5453_v47 = vmul.f32 %v5449_v54, %v11206_v63  ;;  %v5454_v0 = vmul.f32 %v5449_v54, %v11212_v51 }
 0x6a8   :  { %v5455_v34 = vmul.f32 %v5449_v54, %v11216_v13  ;;  %v5456_v38 = vmul.f32 %v5449_v54, %v11222_v3  ;;  %v5457_v10 = vmul.f32 %v5449_v54, %v11227_v14  ;;  %v5514_v36 = vmax.f32 %v5498_v39, 0.0 }
 0x6a9   :  { %v5492_v9 = vadd.f32 %v6238_v59, %v5472_v22  ;;  %v5473_v7 = vmul.f32 %v6237_v62, %v5453_v47  ;;  %v5474_v6 = vmul.f32 %v6237_v62, %v5454_v0  ;;  %v5515_v13 = vmax.f32 %v5499_v29, 0.0 }
 0x6aa   :  { %v5475_v27 = vmul.f32 %v6237_v62, %v5455_v34  ;;  %v5476_v63 = vmul.f32 %v6237_v62, %v5456_v38  ;;  %v5477_v51 = vmul.f32 %v6237_v62, %v5457_v10  ;;  %v5516_v28 = vmax.f32 %v5500_v53, 0.0 }
 0x6ab   :  { %v5508_v25 = vmax.f32 %v5492_v9, 0.0  ;;  %v5493_v26 = vadd.f32 %v6238_v59, %v5473_v7  ;;  %v5494_v43 = vadd.f32 %v6238_v59, %v5474_v6  ;;  %v5517_v49 = vmax.f32 %v5501_v2, 0.0 }
 0x6ac   :  { %v5495_v11 = vadd.f32 %v6238_v59, %v5475_v27  ;;  %v5496_v48 = vadd.f32 %v6238_v59, %v5476_v63  ;;  %v5497_v20 = vadd.f32 %v6238_v59, %v5477_v51  ;;  %v5518_v3 = vmax.f32 %v5502_v32, 0.0 }
 0x6ad   :  { %v5509_v17 = vmax.f32 %v5493_v26, 0.0  ;;  %v5510_v21 = vmax.f32 %v5494_v43, 0.0  ;;  %v5519_v58 = vmax.f32 %v5503_v18, 0.0  ;;  %v5520_v52 = vmax.f32 %v5504_v23, 0.0 }
 0x6ae   :  { %v5511_v8 = vmax.f32 %v5495_v11, 0.0  ;;  %v5512_v5 = vmax.f32 %v5496_v48, 0.0  ;;  %v5513_v12 = vmax.f32 %v5497_v20, 0.0  ;;  %v5521_v14 = vmax.f32 %v5505_v37, 0.0 }
 0x6af   :  { %5523 = vxpose.xlu1.b32.cont [2/16] (narrow) %v5507_v24, 8 }
 0x6b7   :  { %5524 = vxpose.xlu1.b32.cont [3/16] (narrow) %v5508_v25, 8 }
 0x6bf   :  { %5525 = vxpose.xlu1.b32.cont [4/16] (narrow) %v5509_v17, 8 }
 0x6c7   :  { %5526 = vxpose.xlu1.b32.cont [5/16] (narrow) %v5510_v21, 8 }
 0x6cf   :  { %5527 = vxpose.xlu1.b32.cont [6/16] (narrow) %v5511_v8, 8 }
 0x6d7   :  { %5528 = vxpose.xlu1.b32.cont [7/16] (narrow) %v5512_v5, 8 }
 0x6df   :  { %5529 = vxpose.xlu1.b32.cont [8/16] (narrow) %v5513_v12, 8 }
 0x6e7   :  { %5530 = vxpose.xlu1.b32.cont [9/16] (narrow) %v5514_v36, 8 }
 0x6ef   :  { %5531 = vxpose.xlu1.b32.cont [10/16] (narrow) %v5515_v13, 8 }
 0x6f7   :  { %5532 = vxpose.xlu1.b32.cont [11/16] (narrow) %v5516_v28, 8 }
 0x6ff   :  { %5533 = vxpose.xlu1.b32.cont [12/16] (narrow) %v5517_v49, 8 }
 0x707   :  { %5534 = vxpose.xlu1.b32.cont [13/16] (narrow) %v5518_v3, 8 }
 0x70f   :  { %5535 = vxpose.xlu1.b32.cont [14/16] (narrow) %v5519_v58, 8 }
 0x717   :  { %5536 = vxpose.xlu1.b32.cont [15/16] (narrow) %v5520_v52, 8 }
 0x71f   :  { %5537 = vxpose.xlu1.b32.end [16/16] (narrow) %v5521_v14, 8 }
 0x74b   :  { %v5538_v62 = vpop.trf.xlu1 }
 0x74c   :  { %5554 = vst [vmem:[#allocation2] sm:$0xff] %v5538_v62 }
 0x74d   :  { %5565 = dma.vmem_to_hbm [thread:$0]  %s5561_s6, 128, %s5563_s13, [#allocation3]  }
 0x74e   :  { %6269 = dma.done.wait [#allocation3], 128  }
 0x74f   :  { %6270 = vsyncadd [#allocation3], 4294967168 }
 0x750   :  { %5570 = vsyncpa [#allocation3], 1 }

</bundles_post_ra>
